<compile_context>
chip_gen: v7x
topology: tpu7x:2x2x1
jax: 0.10.0
libtpu: 0.0.40
codegen_flags: <defaults>
</compile_context>

<pallas_src>
import numpy as np
import jax
import jax.numpy as jnp
from jax.experimental import pallas as pl
from jax.experimental.pallas import tpu as pltpu

USE_BF16_MXU = True        # bf16 MXU operands (v6e/v7x native); accum in f32
CHUNK = 64                 # torch samples per grid step


# ----------------------------- fused Pallas kernel ---------------------------

def _fused_forward_kernel(x0_ref, x1_ref, w1_ref, b1_ref, w2_ref, b2_ref,
                          wf10_ref, wf11_ref, bf1_ref, wf2_ref, bf2_ref,
                          o_ref):
    w1 = w1_ref[...]        # (196, 4608)  cols = (pool-quadrant, py, px, c32)
    b1 = b1_ref[...]        # (1, 1152)    f32, tiled over (py, px)
    w2 = w2_ref[...]        # (1152, 1024) cols = (pool-quadrant, ph, pw, c64)
    b2 = b2_ref[...]        # (1, 256)     f32, tiled over (ph, pw)
    wf10 = wf10_ref[...]    # (256, H)  fc1 rows for branch 0 (host-permuted)
    wf11 = wf11_ref[...]    # (256, H)  fc1 rows for branch 1

    def branch(x_ref):
        xb = x_ref[...].astype(w1.dtype)                        # (C, 196)
        # conv1 as ONE matmul; 2x2/2 max-pool == max over the 4 contiguous
        # 1152-lane quadrant blocks (lane-aligned, full-vreg VPU maxes).
        c1 = jnp.dot(xb, w1, preferred_element_type=jnp.float32)  # (C, 4608)
        Q = 36 * 32
        p1 = jnp.maximum(jnp.maximum(c1[:, 0:Q], c1[:, Q:2 * Q]),
                         jnp.maximum(c1[:, 2 * Q:3 * Q], c1[:, 3 * Q:4 * Q]))
        h1 = jnp.maximum(p1 + b1, 0.0)                          # (C, 1152)
        # conv2 as ONE matmul on the pooled map (lanes already (py, px, c)).
        c2 = jnp.dot(h1.astype(w2.dtype), w2,
                     preferred_element_type=jnp.float32)        # (C, 1024)
        R = 4 * 64
        p2 = jnp.maximum(jnp.maximum(c2[:, 0:R], c2[:, R:2 * R]),
                         jnp.maximum(c2[:, 2 * R:3 * R], c2[:, 3 * R:4 * R]))
        # conv bias commutes with max-pool; apply after, then relu.
        return jnp.maximum(p2 + b2, 0.0)                        # (C, 256)

    f0 = branch(x0_ref)     # branch 0 features, kernel order (ph, pw, c)
    f1 = branch(x1_ref)     # branch 1 features
    # fc1: the torch cat+view(-1,512) is folded into two row-permuted matmuls.
    h = (jnp.dot(f0.astype(wf10.dtype), wf10,
                 preferred_element_type=jnp.float32)
         + jnp.dot(f1.astype(wf11.dtype), wf11,
                   preferred_element_type=jnp.float32)
         + bf1_ref[...])
    h = jnp.maximum(h, 0.0)                                     # (C, H)
    # fc2 on the VPU/XLU: a 1-lane-wide MXU result would waste 127/128 lanes.
    z = jnp.sum(h * wf2_ref[...], axis=-1, keepdims=True) + bf2_ref[...]
    o_ref[...] = 1.0 / (1.0 + jnp.exp(-z))                      # sigmoid


# ----------------------------- wrapper ---------------------------------------

def net_forward(x, kparams):
    """x: (N, 2, 14, 14) float32 NCHW.  One fused pallas_call."""
    (w1b, b1t, w2b, b2t, wf10, wf11, bf1r, wf2r, bf2r) = kparams
    N = x.shape[0]
    # lane-dense per-branch input slabs (N, 196); the only XLA glue left.
    x0 = x[:, 0, :, :].reshape(N, 14 * 14).astype(jnp.float32)
    x1 = x[:, 1, :, :].reshape(N, 14 * 14).astype(jnp.float32)

    if N <= CHUNK:
        chunk, n_pad = N, N
    else:
        chunk = CHUNK
        n_pad = pl.cdiv(N, chunk) * chunk
        if n_pad != N:
            pad = ((0, n_pad - N), (0, 0))
            x0 = jnp.pad(x0, pad)
            x1 = jnp.pad(x1, pad)
    grid = (n_pad // chunk,)

    def x_spec():
        return pl.BlockSpec((chunk, 14 * 14), lambda i: (i, 0))

    def const_spec(a):
        nd = a.ndim
        return pl.BlockSpec(a.shape, lambda i: (0,) * nd)

    out = pl.pallas_call(
        _fused_forward_kernel,
        out_shape=jax.ShapeDtypeStruct((n_pad, 1), jnp.float32),
        grid=grid,
        in_specs=[x_spec(), x_spec(),
                  const_spec(w1b), const_spec(b1t),
                  const_spec(w2b), const_spec(b2t),
                  const_spec(wf10), const_spec(wf11),
                  const_spec(bf1r), const_spec(wf2r), const_spec(bf2r)],
        out_specs=pl.BlockSpec((chunk, 1), lambda i: (i, 0)),
        compiler_params=pltpu.CompilerParams(
            # independent batch chunks: shard across v7x's 2 TensorCores and
            # let Pallas pipeline the per-chunk input DMA.
            dimension_semantics=("parallel",),
            # explicit budget, well inside v7x's 64 MiB physical VMEM
            # (weights ~4.3 MiB bf16 double-buffered + ~3 MiB per-chunk temps).
            vmem_limit_bytes=32 * 1024 * 1024,
        ),
    )(x0, x1, w1b, b1t, w2b, b2t, wf10, wf11, bf1r, wf2r, bf2r)
    return out[:N]


# ----------------------------- one-time param prep ---------------------------

def prepare_kernel_params(params, use_bf16=USE_BF16_MXU):
    """Host-side relayout of the PyTorch-convention params (hoisted out of the
    jitted forward).  Each conv becomes one zero-padded matmul whose output
    column order (pool-quadrant, spatial, channel) makes max-pool a max over
    contiguous lane blocks; fc1 is split per branch with rows permuted so
    torch's cat+view(-1, 512) ordering needs no in-kernel movement."""
    w1, b1, w2, b2, wf1, bf1, wf2, bf2 = [np.asarray(p) for p in params]
    nb_hidden = wf1.shape[1]

    # conv1: rows = flattened 14x14 image, cols = ((dy,dx) quadrant, py, px, c)
    w1big = np.zeros((14 * 14, 4 * 36 * 32), np.float32)
    for dy in range(2):
        for dx in range(2):
            q = 2 * dy + dx
            for py in range(6):
                for px in range(6):
                    col = (q * 36 + py * 6 + px) * 32
                    y, xx = 2 * py + dy, 2 * px + dx
                    for kh in range(3):
                        for kw in range(3):
                            row = (y + kh) * 14 + (xx + kw)
                            w1big[row, col:col + 32] = w1[:, 0, kh, kw]

    # conv2: rows = pooled map lanes (py*192 + px*32 + ci),
    #        cols = ((dy,dx) quadrant, ph, pw, co)
    w2big = np.zeros((36 * 32, 4 * 4 * 64), np.float32)
    for dy in range(2):
        for dx in range(2):
            q = 2 * dy + dx
            for ph in range(2):
                for pw in range(2):
                    col = (q * 4 + ph * 2 + pw) * 64
                    oh, ow = 2 * ph + dy, 2 * pw + dx
                    for kh in range(3):
                        for kw in range(3):
                            row = ((oh + kh) * 6 + (ow + kw)) * 32
                            w2big[row:row + 32, col:col + 64] = \
                                w2[:, :, kh, kw].T

    # per-channel biases tiled over pooled spatial positions (bias commutes
    # with max-pool), kept f32 for the VPU adds.
    b1t = np.tile(b1, 36).reshape(1, 36 * 32)
    b2t = np.tile(b2, 4).reshape(1, 4 * 64)

    # fc1 rows: kernel feature order (ph, pw, c) -> torch (c, ph, pw), split
    # into the two branch halves of the torch channel-cat.
    perm = np.empty(256, np.int32)
    for ph in range(2):
        for pw in range(2):
            for c in range(64):
                perm[ph * 128 + pw * 64 + c] = c * 4 + ph * 2 + pw
    wf1_0 = wf1[perm, :]
    wf1_1 = wf1[256 + perm, :]

    mxu = jnp.bfloat16 if use_bf16 else jnp.float32
    return (jnp.asarray(w1big, mxu), jnp.asarray(b1t, jnp.float32),
            jnp.asarray(w2big, mxu), jnp.asarray(b2t, jnp.float32),
            jnp.asarray(wf1_0, mxu), jnp.asarray(wf1_1, mxu),
            jnp.asarray(bf1.reshape(1, nb_hidden), jnp.float32),
            jnp.asarray(wf2.reshape(1, nb_hidden), jnp.float32),
            jnp.asarray(bf2.reshape(1, 1), jnp.float32))


# ----------------------------- pure-JAX reference ----------------------------

def net_forward_ref(x, params):
    w1, b1, w2, b2, wf1, bf1, wf2, bf2 = params
    n = x.shape[0]

    def conv(xi, w, b):
        y = jax.lax.conv_general_dilated(
            xi, w, (1, 1), 'VALID', dimension_numbers=('NCHW', 'OIHW', 'NCHW'))
        return y + b[None, :, None, None]

    def pool(xi):
        return jax.lax.reduce_window(
            xi, -jnp.inf, jax.lax.max, (1, 1, 2, 2), (1, 1, 2, 2), 'VALID')

    def branch(xi):
        h = jax.nn.relu(pool(conv(xi, w1, b1)))
        return jax.nn.relu(pool(conv(h, w2, b2)))

    x1 = branch(x[:, 0:1])
    x2 = branch(x[:, 1:2])
    h = jnp.concatenate([x1, x2], axis=1).reshape(n, -1)
    h = jax.nn.relu(h @ wf1 + bf1)
    return jax.nn.sigmoid(h @ wf2 + bf2)


# ----------------------------- params & main ---------------------------------

def init_params(key, nb_hidden):
    ks = jax.random.split(key, 8)
    w1 = jax.random.normal(ks[0], (32, 1, 3, 3), jnp.float32) * 0.20
    b1 = jax.random.normal(ks[1], (32,), jnp.float32) * 0.10
    w2 = jax.random.normal(ks[2], (64, 32, 3, 3), jnp.float32) * 0.05
    b2 = jax.random.normal(ks[3], (64,), jnp.float32) * 0.10
    wf1 = jax.random.normal(ks[4], (512, nb_hidden), jnp.float32) * 0.05
    bf1 = jax.random.normal(ks[5], (nb_hidden,), jnp.float32) * 0.10
    wf2 = jax.random.normal(ks[6], (nb_hidden, 1), jnp.float32) * 0.10
    bf2 = jax.random.normal(ks[7], (1,), jnp.float32) * 0.10
    return (w1, b1, w2, b2, wf1, bf1, wf2, bf2)


if __name__ == "__main__":
    key = jax.random.PRNGKey(0)
    pkey, xkey = jax.random.split(key)
    nb_hidden = 64
    params = init_params(pkey, nb_hidden)
    kparams = prepare_kernel_params(params)     # one-time host relayout
    # batch=2, 2 input channels, 14x14 spatial (so the flattened size == 512)
    x = jax.random.normal(xkey, (2, 2, 14, 14), jnp.float32)

    out = jax.block_until_ready(jax.jit(net_forward)(x, kparams))
    ref = jax.block_until_ready(net_forward_ref(x, params))

    assert out.shape == (2, 1)
    assert bool(jnp.all(jnp.isfinite(out)))
    # bf16 MXU operands need a looser tolerance than pure-f32 (per review).
    tol = 2e-2 if USE_BF16_MXU else 1e-5
    assert bool(jnp.allclose(out, ref, atol=tol, rtol=tol))
    print("KERNEL_OK")
</pallas_src>

<mosaic_0001>
module attributes {stable_mosaic.version = 11 : i64} {
  func.func @_fused_forward_kernel(%arg0: i32, %arg1: memref<2x196xf32, #tpu.memory_space<vmem>>, %arg2: memref<2x196xf32, #tpu.memory_space<vmem>>, %arg3: memref<196x4608xbf16, #tpu.memory_space<vmem>>, %arg4: memref<1x1152xf32, #tpu.memory_space<vmem>>, %arg5: memref<1152x1024xbf16, #tpu.memory_space<vmem>>, %arg6: memref<1x256xf32, #tpu.memory_space<vmem>>, %arg7: memref<256x64xbf16, #tpu.memory_space<vmem>>, %arg8: memref<256x64xbf16, #tpu.memory_space<vmem>>, %arg9: memref<1x64xf32, #tpu.memory_space<vmem>>, %arg10: memref<1x64xf32, #tpu.memory_space<vmem>>, %arg11: memref<1x1xf32, #tpu.memory_space<vmem>>, %arg12: memref<2x1xf32, #tpu.memory_space<vmem>>) attributes {dimension_semantics = [#tpu.dimension_semantics<parallel>], iteration_bounds = array<i64: 1>, scalar_prefetch = 0 : i64, scratch_operands = 0 : i64, tpu.core_type = #tpu.core_type<tc>, window_params = [{transform_indices = @transform_0, window_bounds = array<i64: 2, 196>}, {transform_indices = @transform_1, window_bounds = array<i64: 2, 196>}, {pipeline_mode = #tpu.pipeline_mode<synchronous>, transform_indices = @transform_2, window_bounds = array<i64: 196, 4608>}, {pipeline_mode = #tpu.pipeline_mode<synchronous>, transform_indices = @transform_3, window_bounds = array<i64: 1, 1152>}, {pipeline_mode = #tpu.pipeline_mode<synchronous>, transform_indices = @transform_4, window_bounds = array<i64: 1152, 1024>}, {pipeline_mode = #tpu.pipeline_mode<synchronous>, transform_indices = @transform_5, window_bounds = array<i64: 1, 256>}, {pipeline_mode = #tpu.pipeline_mode<synchronous>, transform_indices = @transform_6, window_bounds = array<i64: 256, 64>}, {pipeline_mode = #tpu.pipeline_mode<synchronous>, transform_indices = @transform_7, window_bounds = array<i64: 256, 64>}, {pipeline_mode = #tpu.pipeline_mode<synchronous>, transform_indices = @transform_8, window_bounds = array<i64: 1, 64>}, {pipeline_mode = #tpu.pipeline_mode<synchronous>, transform_indices = @transform_9, window_bounds = array<i64: 1, 64>}, {pipeline_mode = #tpu.pipeline_mode<synchronous>, transform_indices = @transform_10, window_bounds = array<i64: 1, 1>}, {transform_indices = @transform_11, window_bounds = array<i64: 2, 1>}]} {
    %c0 = arith.constant 0 : index
    %c0_0 = arith.constant 0 : index
    %0 = vector.load %arg3[%c0, %c0_0] : memref<196x4608xbf16, #tpu.memory_space<vmem>>, vector<196x4608xbf16>
    %c0_1 = arith.constant 0 : index
    %c0_2 = arith.constant 0 : index
    %1 = vector.load %arg4[%c0_1, %c0_2] : memref<1x1152xf32, #tpu.memory_space<vmem>>, vector<1x1152xf32>
    %c0_3 = arith.constant 0 : index
    %c0_4 = arith.constant 0 : index
    %2 = vector.load %arg5[%c0_3, %c0_4] : memref<1152x1024xbf16, #tpu.memory_space<vmem>>, vector<1152x1024xbf16>
    %c0_5 = arith.constant 0 : index
    %c0_6 = arith.constant 0 : index
    %3 = vector.load %arg6[%c0_5, %c0_6] : memref<1x256xf32, #tpu.memory_space<vmem>>, vector<1x256xf32>
    %c0_7 = arith.constant 0 : index
    %c0_8 = arith.constant 0 : index
    %4 = vector.load %arg7[%c0_7, %c0_8] : memref<256x64xbf16, #tpu.memory_space<vmem>>, vector<256x64xbf16>
    %c0_9 = arith.constant 0 : index
    %c0_10 = arith.constant 0 : index
    %5 = vector.load %arg8[%c0_9, %c0_10] : memref<256x64xbf16, #tpu.memory_space<vmem>>, vector<256x64xbf16>
    %c0_11 = arith.constant 0 : index
    %c0_12 = arith.constant 0 : index
    %6 = vector.load %arg1[%c0_11, %c0_12] : memref<2x196xf32, #tpu.memory_space<vmem>>, vector<2x196xf32>
    %7 = arith.truncf %6 : vector<2x196xf32> to vector<2x196xbf16>
    %cst = arith.constant dense<0.000000e+00> : vector<2x4608xf32>
    %8 = tpu.matmul %7, %0, %cst {dimension_numbers = #tpu.dot_dimension_numbers<[1], [0], [0], [1], [0, 0, 1, 1], [], []>} : vector<2x196xbf16>, vector<196x4608xbf16>, vector<2x4608xf32> -> vector<2x4608xf32>
    %9 = vector.extract_strided_slice %8 {offsets = [0, 0], sizes = [2, 1152], strides = [1, 1]} : vector<2x4608xf32> to vector<2x1152xf32>
    %10 = vector.extract_strided_slice %8 {offsets = [0, 1152], sizes = [2, 1152], strides = [1, 1]} : vector<2x4608xf32> to vector<2x1152xf32>
    %11 = arith.maximumf %9, %10 : vector<2x1152xf32>
    %12 = vector.extract_strided_slice %8 {offsets = [0, 2304], sizes = [2, 1152], strides = [1, 1]} : vector<2x4608xf32> to vector<2x1152xf32>
    %13 = vector.extract_strided_slice %8 {offsets = [0, 3456], sizes = [2, 1152], strides = [1, 1]} : vector<2x4608xf32> to vector<2x1152xf32>
    %14 = arith.maximumf %12, %13 : vector<2x1152xf32>
    %15 = arith.maximumf %11, %14 : vector<2x1152xf32>
    %16 = vector.broadcast %1 : vector<1x1152xf32> to vector<2x1152xf32>
    %17 = arith.addf %15, %16 : vector<2x1152xf32>
    %cst_13 = arith.constant 0.000000e+00 : f32
    %18 = vector.broadcast %cst_13 : f32 to vector<2x1152xf32>
    %19 = arith.maximumf %17, %18 : vector<2x1152xf32>
    %20 = arith.truncf %19 : vector<2x1152xf32> to vector<2x1152xbf16>
    %cst_14 = arith.constant dense<0.000000e+00> : vector<2x1024xf32>
    %21 = tpu.matmul %20, %2, %cst_14 {dimension_numbers = #tpu.dot_dimension_numbers<[1], [0], [0], [1], [0, 0, 1, 1], [], []>} : vector<2x1152xbf16>, vector<1152x1024xbf16>, vector<2x1024xf32> -> vector<2x1024xf32>
    %22 = vector.extract_strided_slice %21 {offsets = [0, 0], sizes = [2, 256], strides = [1, 1]} : vector<2x1024xf32> to vector<2x256xf32>
    %23 = vector.extract_strided_slice %21 {offsets = [0, 256], sizes = [2, 256], strides = [1, 1]} : vector<2x1024xf32> to vector<2x256xf32>
    %24 = arith.maximumf %22, %23 : vector<2x256xf32>
    %25 = vector.extract_strided_slice %21 {offsets = [0, 512], sizes = [2, 256], strides = [1, 1]} : vector<2x1024xf32> to vector<2x256xf32>
    %26 = vector.extract_strided_slice %21 {offsets = [0, 768], sizes = [2, 256], strides = [1, 1]} : vector<2x1024xf32> to vector<2x256xf32>
    %27 = arith.maximumf %25, %26 : vector<2x256xf32>
    %28 = arith.maximumf %24, %27 : vector<2x256xf32>
    %29 = vector.broadcast %3 : vector<1x256xf32> to vector<2x256xf32>
    %30 = arith.addf %28, %29 : vector<2x256xf32>
    %cst_15 = arith.constant 0.000000e+00 : f32
    %31 = vector.broadcast %cst_15 : f32 to vector<2x256xf32>
    %32 = arith.maximumf %30, %31 : vector<2x256xf32>
    %c0_16 = arith.constant 0 : index
    %c0_17 = arith.constant 0 : index
    %33 = vector.load %arg2[%c0_16, %c0_17] : memref<2x196xf32, #tpu.memory_space<vmem>>, vector<2x196xf32>
    %34 = arith.truncf %33 : vector<2x196xf32> to vector<2x196xbf16>
    %cst_18 = arith.constant dense<0.000000e+00> : vector<2x4608xf32>
    %35 = tpu.matmul %34, %0, %cst_18 {dimension_numbers = #tpu.dot_dimension_numbers<[1], [0], [0], [1], [0, 0, 1, 1], [], []>} : vector<2x196xbf16>, vector<196x4608xbf16>, vector<2x4608xf32> -> vector<2x4608xf32>
    %36 = vector.extract_strided_slice %35 {offsets = [0, 0], sizes = [2, 1152], strides = [1, 1]} : vector<2x4608xf32> to vector<2x1152xf32>
    %37 = vector.extract_strided_slice %35 {offsets = [0, 1152], sizes = [2, 1152], strides = [1, 1]} : vector<2x4608xf32> to vector<2x1152xf32>
    %38 = arith.maximumf %36, %37 : vector<2x1152xf32>
    %39 = vector.extract_strided_slice %35 {offsets = [0, 2304], sizes = [2, 1152], strides = [1, 1]} : vector<2x4608xf32> to vector<2x1152xf32>
    %40 = vector.extract_strided_slice %35 {offsets = [0, 3456], sizes = [2, 1152], strides = [1, 1]} : vector<2x4608xf32> to vector<2x1152xf32>
    %41 = arith.maximumf %39, %40 : vector<2x1152xf32>
    %42 = arith.maximumf %38, %41 : vector<2x1152xf32>
    %43 = vector.broadcast %1 : vector<1x1152xf32> to vector<2x1152xf32>
    %44 = arith.addf %42, %43 : vector<2x1152xf32>
    %cst_19 = arith.constant 0.000000e+00 : f32
    %45 = vector.broadcast %cst_19 : f32 to vector<2x1152xf32>
    %46 = arith.maximumf %44, %45 : vector<2x1152xf32>
    %47 = arith.truncf %46 : vector<2x1152xf32> to vector<2x1152xbf16>
    %cst_20 = arith.constant dense<0.000000e+00> : vector<2x1024xf32>
    %48 = tpu.matmul %47, %2, %cst_20 {dimension_numbers = #tpu.dot_dimension_numbers<[1], [0], [0], [1], [0, 0, 1, 1], [], []>} : vector<2x1152xbf16>, vector<1152x1024xbf16>, vector<2x1024xf32> -> vector<2x1024xf32>
    %49 = vector.extract_strided_slice %48 {offsets = [0, 0], sizes = [2, 256], strides = [1, 1]} : vector<2x1024xf32> to vector<2x256xf32>
    %50 = vector.extract_strided_slice %48 {offsets = [0, 256], sizes = [2, 256], strides = [1, 1]} : vector<2x1024xf32> to vector<2x256xf32>
    %51 = arith.maximumf %49, %50 : vector<2x256xf32>
    %52 = vector.extract_strided_slice %48 {offsets = [0, 512], sizes = [2, 256], strides = [1, 1]} : vector<2x1024xf32> to vector<2x256xf32>
    %53 = vector.extract_strided_slice %48 {offsets = [0, 768], sizes = [2, 256], strides = [1, 1]} : vector<2x1024xf32> to vector<2x256xf32>
    %54 = arith.maximumf %52, %53 : vector<2x256xf32>
    %55 = arith.maximumf %51, %54 : vector<2x256xf32>
    %56 = vector.broadcast %3 : vector<1x256xf32> to vector<2x256xf32>
    %57 = arith.addf %55, %56 : vector<2x256xf32>
    %cst_21 = arith.constant 0.000000e+00 : f32
    %58 = vector.broadcast %cst_21 : f32 to vector<2x256xf32>
    %59 = arith.maximumf %57, %58 : vector<2x256xf32>
    %60 = arith.truncf %32 : vector<2x256xf32> to vector<2x256xbf16>
    %cst_22 = arith.constant dense<0.000000e+00> : vector<2x64xf32>
    %61 = tpu.matmul %60, %4, %cst_22 {dimension_numbers = #tpu.dot_dimension_numbers<[1], [0], [0], [1], [0, 0, 1, 1], [], []>} : vector<2x256xbf16>, vector<256x64xbf16>, vector<2x64xf32> -> vector<2x64xf32>
    %62 = arith.truncf %59 : vector<2x256xf32> to vector<2x256xbf16>
    %cst_23 = arith.constant dense<0.000000e+00> : vector<2x64xf32>
    %63 = tpu.matmul %62, %5, %cst_23 {dimension_numbers = #tpu.dot_dimension_numbers<[1], [0], [0], [1], [0, 0, 1, 1], [], []>} : vector<2x256xbf16>, vector<256x64xbf16>, vector<2x64xf32> -> vector<2x64xf32>
    %64 = arith.addf %61, %63 : vector<2x64xf32>
    %c0_24 = arith.constant 0 : index
    %c0_25 = arith.constant 0 : index
    %65 = vector.load %arg9[%c0_24, %c0_25] : memref<1x64xf32, #tpu.memory_space<vmem>>, vector<1x64xf32>
    %66 = vector.broadcast %65 : vector<1x64xf32> to vector<2x64xf32>
    %67 = arith.addf %64, %66 : vector<2x64xf32>
    %cst_26 = arith.constant 0.000000e+00 : f32
    %68 = vector.broadcast %cst_26 : f32 to vector<2x64xf32>
    %69 = arith.maximumf %67, %68 : vector<2x64xf32>
    %c0_27 = arith.constant 0 : index
    %c0_28 = arith.constant 0 : index
    %70 = vector.load %arg10[%c0_27, %c0_28] : memref<1x64xf32, #tpu.memory_space<vmem>>, vector<1x64xf32>
    %71 = vector.broadcast %70 : vector<1x64xf32> to vector<2x64xf32>
    %72 = arith.mulf %69, %71 : vector<2x64xf32>
    %cst_29 = arith.constant dense<0.000000e+00> : vector<2xf32>
    %73 = vector.multi_reduction <add>, %72, %cst_29 [1] : vector<2x64xf32> to vector<2xf32>
    %74 = vector.shape_cast %73 : vector<2xf32> to vector<2x1xf32>
    %c0_30 = arith.constant 0 : index
    %c0_31 = arith.constant 0 : index
    %75 = vector.load %arg11[%c0_30, %c0_31] : memref<1x1xf32, #tpu.memory_space<vmem>>, vector<1x1xf32>
    %76 = vector.broadcast %75 : vector<1x1xf32> to vector<2x1xf32>
    %77 = arith.addf %74, %76 : vector<2x1xf32>
    %cst_32 = arith.constant 0.000000e+00 : f32
    %78 = vector.broadcast %cst_32 : f32 to vector<2x1xf32>
    %79 = arith.subf %78, %77 : vector<2x1xf32>
    %80 = math.exp %79 : vector<2x1xf32>
    %cst_33 = arith.constant 1.000000e+00 : f32
    %81 = vector.broadcast %cst_33 : f32 to vector<2x1xf32>
    %82 = arith.addf %81, %80 : vector<2x1xf32>
    %cst_34 = arith.constant 1.000000e+00 : f32
    %83 = vector.broadcast %cst_34 : f32 to vector<2x1xf32>
    %84 = arith.divf %83, %82 : vector<2x1xf32>
    %c0_35 = arith.constant 0 : index
    %c0_36 = arith.constant 0 : index
    %85 = vector.load %arg12[%c0_35, %c0_36] : memref<2x1xf32, #tpu.memory_space<vmem>>, vector<2x1xf32>
    tpu.vector_store %arg12[%c0_35, %c0_36], %84 {strides = array<i32>} : memref<2x1xf32, #tpu.memory_space<vmem>>, vector<2x1xf32>,
    return
  }
  func.func @transform_0(%arg0: i32) -> (i32, i32) {
    %c0_i32 = arith.constant 0 : i32
    %c0_i32_0 = arith.constant 0 : i32
    return %arg0, %c0_i32 : i32, i32
  }
  func.func @transform_1(%arg0: i32) -> (i32, i32) {
    %c0_i32 = arith.constant 0 : i32
    %c0_i32_0 = arith.constant 0 : i32
    return %arg0, %c0_i32 : i32, i32
  }
  func.func @transform_2(%arg0: i32) -> (i32, i32) {
    %c0_i32 = arith.constant 0 : i32
    %c0_i32_0 = arith.constant 0 : i32
    %c0_i32_1 = arith.constant 0 : i32
    return %c0_i32, %c0_i32_0 : i32, i32
  }
  func.func @transform_3(%arg0: i32) -> (i32, i32) {
    %c0_i32 = arith.constant 0 : i32
    %c0_i32_0 = arith.constant 0 : i32
    %c0_i32_1 = arith.constant 0 : i32
    return %c0_i32, %c0_i32_0 : i32, i32
  }
  func.func @transform_4(%arg0: i32) -> (i32, i32) {
    %c0_i32 = arith.constant 0 : i32
    %c0_i32_0 = arith.constant 0 : i32
    %c0_i32_1 = arith.constant 0 : i32
    return %c0_i32, %c0_i32_0 : i32, i32
  }
  func.func @transform_5(%arg0: i32) -> (i32, i32) {
    %c0_i32 = arith.constant 0 : i32
    %c0_i32_0 = arith.constant 0 : i32
    %c0_i32_1 = arith.constant 0 : i32
    return %c0_i32, %c0_i32_0 : i32, i32
  }
  func.func @transform_6(%arg0: i32) -> (i32, i32) {
    %c0_i32 = arith.constant 0 : i32
    %c0_i32_0 = arith.constant 0 : i32
    %c0_i32_1 = arith.constant 0 : i32
    return %c0_i32, %c0_i32_0 : i32, i32
  }
  func.func @transform_7(%arg0: i32) -> (i32, i32) {
    %c0_i32 = arith.constant 0 : i32
    %c0_i32_0 = arith.constant 0 : i32
    %c0_i32_1 = arith.constant 0 : i32
    return %c0_i32, %c0_i32_0 : i32, i32
  }
  func.func @transform_8(%arg0: i32) -> (i32, i32) {
    %c0_i32 = arith.constant 0 : i32
    %c0_i32_0 = arith.constant 0 : i32
    %c0_i32_1 = arith.constant 0 : i32
    return %c0_i32, %c0_i32_0 : i32, i32
  }
  func.func @transform_9(%arg0: i32) -> (i32, i32) {
    %c0_i32 = arith.constant 0 : i32
    %c0_i32_0 = arith.constant 0 : i32
    %c0_i32_1 = arith.constant 0 : i32
    return %c0_i32, %c0_i32_0 : i32, i32
  }
  func.func @transform_10(%arg0: i32) -> (i32, i32) {
    %c0_i32 = arith.constant 0 : i32
    %c0_i32_0 = arith.constant 0 : i32
    %c0_i32_1 = arith.constant 0 : i32
    return %c0_i32, %c0_i32_0 : i32, i32
  }
  func.func @transform_11(%arg0: i32) -> (i32, i32) {
    %c0_i32 = arith.constant 0 : i32
    %c0_i32_0 = arith.constant 0 : i32
    return %arg0, %c0_i32 : i32, i32
  }
}

</mosaic_0001>

<bundles_post_ra>
// kernel: squeeze.3
= control target key start
LH: loop header
LB: loop body
LE: loop exit
PB: predicated region body
PF: predicated region fallthrough
CT: control target
= control target key end

     0   :  { %s7_s6 = smov 3  ;;  %s10_s7 = smov 3  ;;  %vm12_vm0 = vcmask 15360   ;;  %vm4_vm1 = vcmask 113664   ;;  %vm16_vm2 = vcmask 97280   ;;  %vm19_vm3 = vcmask 1048560   ;;  %s222_s0 = inlined_call_operand.vmem [shape: f32[2,14,14], index: 0, kind: input, shape index: {}]   ;;  %s223_s1 = inlined_call_operand.vmem [shape: f32[2,196], index: 1, kind: output, shape index: {}]  }
   0x1   :  { %v120_v0 = vld [vmem:[%s222_s0 + $0x9] ss:$16 sm:%s7_s6]   ;;  %s29_s12 = smov 3  ;;  %s22_s15 = smov 3  ;;  %vm26_vm4 = vcmask 1032064   ;;  %vm33_vm5 = vcmask 917264  }
   0x2   :  { %v121_v1 = vld [vmem:[%s222_s0 + $0x9] ss:$16 sm:%s10_s7]   ;;  %v123_v3 = vld [vmem:[%s222_s0 + $0x7] ss:$16 sm:%s29_s12]   ;;  %s148_s16 = smov 126   ;;  %s149_s17 = smov 98  }
   0x3   :  { %v13_v2 = vsel %vm12_vm0, %v121_v1, %v120_v0  ;;  %31 = vrot.lane.b32.xlu1 %v123_v3, %s149_s17  ;;  %s36_s18 = smov 3  ;;  %v122_v4 = vld [vmem:[%s222_s0 + $0x8] ss:$16 sm:%s22_s15]   ;;  %s43_s23 = smov 3  ;;  %vm40_vm6 = vcmask 802464   ;;  %vm47_vm7 = vcmask 687664  }
   0x4   :  { %14 = vrot.lane.b32.xlu0 %v13_v2, %s148_s16  ;;  %v124_v5 = vld [vmem:[%s222_s0 + $0x6] ss:$16 sm:%s36_s18]   ;;  %s50_s24 = smov 3  ;;  %s150_s25 = smov 112   ;;  %vm54_vm8 = vcmask 572864   ;;  %vm61_vm9 = vcmask 556464  }
   0x5   :  { %s151_s26 = smov 84   ;;  %v125_v6 = vld [vmem:[%s222_s0 + $0x5] ss:$16 sm:%s43_s23]   ;;  %v126_v7 = vld [vmem:[%s222_s0 + $0x4] ss:$16 sm:%s50_s24]   ;;  %s57_s2 = smov 3 }
   0x6   :  { %s65_s3 = smov 3  ;;  %s152_s4 = smov 70   ;;  %v127_v8 = vld [vmem:[%s222_s0 + $0xd] ss:$16 sm:%s57_s2]   ;;  %vm69_vm10 = vcmask 458064   ;;  %vm76_vm11 = vcmask 441664  }
   0x7   :  { %38 = vrot.lane.b32.xlu1 %v124_v5, %s151_s26  ;;  %s153_s5 = smov 56   ;;  %v128_v9 = vld [vmem:[%s222_s0 + $0x3] ss:$16 sm:%s65_s3]   ;;  %s72_s10 = smov 3  ;;  %vm84_vm12 = vcmask 343264   ;;  %vm91_vm13 = vcmask 326864  }
   0x8   :  { %24 = vrot.lane.b32.xlu0 %v122_v4, %s150_s25  ;;  %s80_s11 = smov 3  ;;  %s2_s12 = smov 3  ;;  %v129_v11 = vld [vmem:[%s222_s0 + $0xc] ss:$16 sm:%s72_s10]   ;;  %vm99_vm14 = vcmask 228464   ;;  %vm106_vm15 = vcmask 212064  }
   0x9   :  { %v3_v10 = vld [vmem:[%s222_s0] ss:$16 sm:%s2_s12]   ;;  %s154_s15 = smov 54   ;;  %s155_s16 = smov 42   ;;  %v130_v12 = vld [vmem:[%s222_s0 + $0x2] ss:$16 sm:%s80_s11]  }
   0xa   :  { %5 = vst.msk [vmem:[#allocation0] sm:$0x3] %vm4_vm1, %v3_v10   ;;  %s87_s21 = smov 3  ;;  %s95_s22 = smov 3 }
   0xb   :  { %52 = vrot.lane.b32.xlu1 %v126_v7, %s153_s5  ;;  %s156_s23 = smov 40   ;;  %s157_s24 = smov 28   ;;  %v131_v13 = vld [vmem:[%s222_s0 + $0xb] ss:$16 sm:%s87_s21]  }
   0xc   :  { %45 = vrot.lane.b32.xlu0 %v125_v6, %s152_s4  ;;  %v132_v14 = vld [vmem:[%s222_s0 + $0x1] ss:$16 sm:%s95_s22]   ;;  %s102_s29 = smov 3  ;;  %s158_s30 = smov 26  }
   0xd   :  { %s159_s2 = smov 14   ;;  %v133_v15 = vld [vmem:[%s222_s0 + $0xa] ss:$16 sm:%s102_s29]   ;;  %s160_s0 = smov 12  }
   0xf   :  { %67 = vrot.lane.b32.xlu1 %v128_v9, %s155_s16 }
  0x10   :  { %59 = vrot.lane.b32.xlu0 %v127_v8, %s154_s15 }
  0x13   :  { %82 = vrot.lane.b32.xlu1 %v130_v12, %s157_s24 }
  0x14   :  { %74 = vrot.lane.b32.xlu0 %v129_v11, %s156_s23 }
  0x17   :  { %97 = vrot.lane.b32.xlu1 %v132_v14, %s159_s2 }
  0x18   :  { %89 = vrot.lane.b32.xlu0 %v131_v13, %s158_s30 }
  0x1c   :  { %104 = vrot.lane.b32.xlu0 %v133_v15, %s160_s0 }
  0x75   :  { %v32_v17 = vpop.permute.xlu1 %31  }
  0x76   :  { %v15_v16 = vpop.permute.xlu0 %14  }
  0x77   :  { %18 = vst.msk [vmem:[#allocation0 + $0x8] sm:$0x3] %vm16_vm2, %v15_v16  }
  0x78   :  { %20 = vst.msk [vmem:[#allocation0] sm:$0x3] %vm19_vm3, %v15_v16  }
  0x79   :  { %v39_v19 = vpop.permute.xlu1 %38  }
  0x7a   :  { %v25_v18 = vpop.permute.xlu0 %24  }
  0x7b   :  { %27 = vst.msk [vmem:[#allocation0] sm:$0x3] %vm26_vm4, %v25_v18  }
  0x7c   :  { %34 = vst.msk [vmem:[#allocation0] sm:$0x3] %vm33_vm5, %v32_v17  }
  0x7d   :  { %41 = vst.msk [vmem:[#allocation0] sm:$0x3] %vm40_vm6, %v39_v19   ;;  %v53_v21 = vpop.permute.xlu1 %52  }
  0x7e   :  { %v46_v20 = vpop.permute.xlu0 %45  }
  0x7f   :  { %48 = vst.msk [vmem:[#allocation0] sm:$0x3] %vm47_vm7, %v46_v20  }
  0x80   :  { %55 = vst.msk [vmem:[#allocation0] sm:$0x3] %vm54_vm8, %v53_v21  }
  0x81   :  { %v68_v23 = vpop.permute.xlu1 %67  }
  0x82   :  { %v60_v22 = vpop.permute.xlu0 %59   ;;  %70 = vst.msk [vmem:[#allocation0] sm:$0x3] %vm69_vm10, %v68_v23  }
  0x83   :  { %63 = vst.msk [vmem:[#allocation0 + $0x8] sm:$0x3] %vm61_vm9, %v60_v22  }
  0x85   :  { %v83_v25 = vpop.permute.xlu1 %82  }
  0x86   :  { %v75_v24 = vpop.permute.xlu0 %74   ;;  %85 = vst.msk [vmem:[#allocation0] sm:$0x3] %vm84_vm12, %v83_v25  }
  0x87   :  { %78 = vst.msk [vmem:[#allocation0 + $0x8] sm:$0x3] %vm76_vm11, %v75_v24  }
  0x89   :  { %v98_v27 = vpop.permute.xlu1 %97  }
  0x8a   :  { %v90_v26 = vpop.permute.xlu0 %89   ;;  %100 = vst.msk [vmem:[#allocation0] sm:$0x3] %vm99_vm14, %v98_v27  }
  0x8b   :  { %93 = vst.msk [vmem:[#allocation0 + $0x8] sm:$0x3] %vm91_vm13, %v90_v26  }
  0x8e   :  { %v105_v28 = vpop.permute.xlu0 %104  }
  0x8f   :  { %108 = vst.msk [vmem:[#allocation0 + $0x8] sm:$0x3] %vm106_vm15, %v105_v28  }
  0x91   :  { %v112_v29 = vld [vmem:[#allocation0] sm:$0x3] }
  0x92   :  { %114 = vst [vmem:[%s223_s1] sm:$0x3] %v112_v29 }
  0x96   :  { %v116_v30 = vld [vmem:[#allocation0 + $0x8] sm:$0x3] }
  0x97   :  { %134 = vst [vmem:[%s223_s1 + $0x2] sm:$0x3] %v116_v30 }

// kernel: net_forward.1
= control target key start
LH: loop header
LB: loop body
LE: loop exit
PB: predicated region body
PF: predicated region fallthrough
CT: control target
= control target key end

     0   :  { %s16076_s0 = inlined_call_operand.vmem [shape: f32[2,196], index: 0, kind: input, shape index: {}]   ;;  %s16077_s1 = inlined_call_operand.vmem [shape: f32[2,196], index: 1, kind: input, shape index: {}]   ;;  %s16078_s2 = inlined_call_operand.hbm [shape: bf16[196,4608], index: 2, kind: input, shape index: {}]   ;;  %s16079_s3 = inlined_call_operand.hbm [shape: f32[1,1152], index: 3, kind: input, shape index: {}]   ;;  %s16080_s4 = inlined_call_operand.hbm [shape: bf16[1152,1024], index: 4, kind: input, shape index: {}]   ;;  %s16081_s5 = inlined_call_operand.hbm [shape: f32[1,256], index: 5, kind: input, shape index: {}]   ;;  %s16082_s6 = inlined_call_operand.vmem [shape: bf16[256,64], index: 6, kind: input, shape index: {}]   ;;  %s16083_s7 = inlined_call_operand.vmem [shape: bf16[256,64], index: 7, kind: input, shape index: {}]   ;;  %s16084_s8 = inlined_call_operand.hbm [shape: f32[1,64], index: 8, kind: input, shape index: {}]   ;;  %s16085_s9 = inlined_call_operand.hbm [shape: f32[1,64], index: 9, kind: input, shape index: {}]   ;;  %s16086_s10 = inlined_call_operand.<no memory space> [shape: f32[1,1], index: 10, kind: input, shape index: {}]   ;;  %s16087_s11 = inlined_call_operand.vmem [shape: f32[2,1], index: 11, kind: output, shape index: {}]  }
   0x1   :  { %v16_v0 = vstv %s16086_s10 }
   0x2   :  { %17 = vst [vmem:[#allocation2] sm:$0x1] %v16_v0 }
   0x3   :  { %18 = vsyncpa [#allocation4], 0 }
   0x4   :  { %19 = vsyncpa [#allocation6], 0 }
   0x5   :  { %20 = vsyncpa [#allocation9], 0 }
   0x6   :  { %21 = vsyncpa [#allocation12], 0  ;;  %s12736_s19 = smov [#allocation5]   ;;  %s12737_s21 = smov [#allocation8]  }
   0x7   :  { %s44_s20 = sshll.u32 %s12736_s19, 4  ;;  %s66_s22 = sshll.u32 %s12737_s21, 4  ;;  %s45_s20 = int_to_ptr.vmem [resolvable:$true] %s44_s20  ;;  %s67_s22 = int_to_ptr.vmem [resolvable:$true] %s66_s22 }
   0x8   :  { %s12596_s25 = scalar_lea.hbm %s16079_s3, 144 }
   0x9   :  { %p12597_p0 = scmp.ne.s32.totalorder %s16079_s3, %s12596_s25  ;;  %p12600_p1 = scmp.lt.u32.totalorder %s12596_s25, %s16079_s3 }
   0xb   :  { %p12602_p2 = pnand %p12600_p1, %p12597_p0 }
   0xd   :  { %12605 = shalt.err (!%p12602_p2)
}
   0xe   :  { %s12606_s29 = scalar_lea.vmem %s45_s20, 144  ;;  %s12610_s30 = scalar_lea.vmem %s45_s20, 160 }
   0xf   :  { %p12607_p3 = scmp.ne.s32.totalorder %s45_s20, %s12606_s29  ;;  %p12611_p4 = scmp.lt.s32.totalorder %s45_s20, %s45_s20 }
  0x10   :  { %p12612_p5 = scmp.lt.s32.totalorder %s12610_s30, %s12606_s29 }
  0x12   :  { %p12613_p6 = por %p12612_p5, %p12611_p4 }
  0x14   :  { %p12614_p7 = pnand %p12613_p6, %p12607_p3 }
  0x16   :  { %12617 = shalt.err (!%p12614_p7)
}
  0x17   :  { %47 = dma.hbm_to_vmem [thread:$0]  %s16079_s3, 144, %s45_s20, [#allocation6]  }
  0x18   :  { %s12618_s16 = scalar_lea.hbm %s16081_s5, 32 }
  0x19   :  { %p12619_p8 = scmp.ne.s32.totalorder %s16081_s5, %s12618_s16  ;;  %p12622_p9 = scmp.lt.u32.totalorder %s12618_s16, %s16081_s5 }
  0x1b   :  { %p12624_p10 = pnand %p12622_p9, %p12619_p8 }
  0x1d   :  { %12627 = shalt.err (!%p12624_p10)
}
  0x1e   :  { %s12628_s23 = scalar_lea.vmem %s67_s22, 32  ;;  %p12633_p12 = scmp.lt.s32.totalorder %s67_s22, %s67_s22 }
  0x1f   :  { %p12629_p11 = scmp.ne.s32.totalorder %s67_s22, %s12628_s23  ;;  %p12634_p13 = scmp.lt.s32.totalorder %s12628_s23, %s12628_s23 }
  0x21   :  { %p12635_p0 = por %p12634_p13, %p12633_p12 }
  0x23   :  { %p12636_p1 = pnand %p12635_p0, %p12629_p11 }
  0x25   :  { %12639 = shalt.err (!%p12636_p1)
}
  0x26   :  { %69 = dma.hbm_to_vmem [thread:$0]  %s16081_s5, 32, %s67_s22, [#allocation9]  }
  0x27   :  { %s12738_s24 = smov [#allocation3]   ;;  %s12640_s10 = scalar_lea.hbm %s16078_s2, 57600 }
  0x28   :  { %s31_s25 = sshll.u32 %s12738_s24, 4  ;;  %p12641_p2 = scmp.ne.s32.totalorder %s16078_s2, %s12640_s10  ;;  %s32_s25 = int_to_ptr.vmem [resolvable:$true] %s31_s25 }
  0x29   :  { %p12644_p3 = scmp.lt.u32.totalorder %s12640_s10, %s16078_s2 }
  0x2b   :  { %p12646_p4 = pnand %p12644_p3, %p12641_p2 }
  0x2d   :  { %12649 = shalt.err (!%p12646_p4)
}
  0x2e   :  { %s12650_s13 = scalar_lea.vmem %s32_s25, 57600  ;;  %p12655_p6 = scmp.lt.s32.totalorder %s32_s25, %s32_s25 }
  0x2f   :  { %p12651_p5 = scmp.ne.s32.totalorder %s32_s25, %s12650_s13  ;;  %p12656_p7 = scmp.lt.s32.totalorder %s12650_s13, %s12650_s13 }
  0x31   :  { %p12657_p8 = por %p12656_p7, %p12655_p6 }
  0x33   :  { %p12658_p9 = pnand %p12657_p8, %p12651_p5 }
  0x35   :  { %12661 = shalt.err (!%p12658_p9)
}
  0x36   :  { %s12739_s5 = smov 2304   ;;  %s12740_s22 = smov 144  }
  0x37   :  { %37 = dma.hbm_to_vmem [thread:$0]  %s16078_s2, 57600, %s32_s25, [#allocation4], %s12739_s5, %s12739_s5, %s12740_s22  }
  0x38   :  { %s12741_s16 = smov [#allocation7]   ;;  %s12662_s21 = scalar_lea.hbm %s16080_s4, 73728 }
  0x39   :  { %s53_s17 = sshll.u32 %s12741_s16, 4  ;;  %p12663_p10 = scmp.ne.s32.totalorder %s16080_s4, %s12662_s21  ;;  %s54_s17 = int_to_ptr.vmem [resolvable:$true] %s53_s17 }
  0x3a   :  { %p12666_p11 = scmp.lt.u32.totalorder %s12662_s21, %s16080_s4 }
  0x3c   :  { %p12668_p12 = pnand %p12666_p11, %p12663_p10 }
  0x3e   :  { %12671 = shalt.err (!%p12668_p12)
}
  0x3f   :  { %s12672_s26 = scalar_lea.vmem %s54_s17, 73728  ;;  %p12677_p0 = scmp.lt.s32.totalorder %s54_s17, %s54_s17 }
  0x40   :  { %p12673_p13 = scmp.ne.s32.totalorder %s54_s17, %s12672_s26  ;;  %p12678_p1 = scmp.lt.s32.totalorder %s12672_s26, %s12672_s26 }
  0x42   :  { %p12679_p2 = por %p12678_p1, %p12677_p0 }
  0x44   :  { %p12680_p3 = pnand %p12679_p2, %p12673_p13 }
  0x46   :  { %12683 = shalt.err (!%p12680_p3)
}
  0x47   :  { %s12742_s2 = smov 512   ;;  %s12743_s25 = smov 32  }
  0x48   :  { %59 = dma.hbm_to_vmem [thread:$0]  %s16080_s4, 73728, %s54_s17, [#allocation6], %s12742_s2, %s12742_s2, %s12743_s25  }
  0x49   :  { %s12744_s28 = smov [#allocation10]   ;;  %s12745_s30 = smov [#allocation11]  }
  0x4a   :  { %s80_s29 = sshll.u32 %s12744_s28, 4  ;;  %s90_s12 = sshll.u32 %s12745_s30, 4  ;;  %s81_s29 = int_to_ptr.vmem [resolvable:$true] %s80_s29  ;;  %s91_s12 = int_to_ptr.vmem [resolvable:$true] %s90_s12 }
  0x4b   :  { %s12684_s22 = scalar_lea.hbm %s16084_s8, 16 }
  0x4c   :  { %p12685_p4 = scmp.ne.s32.totalorder %s16084_s8, %s12684_s22  ;;  %p12688_p5 = scmp.lt.u32.totalorder %s12684_s22, %s16084_s8 }
  0x4e   :  { %p12690_p6 = pnand %p12688_p5, %p12685_p4 }
  0x50   :  { %12693 = shalt.err (!%p12690_p6)
}
  0x51   :  { %s12694_s4 = scalar_lea.vmem %s81_s29, 16  ;;  %s12698_s17 = scalar_lea.vmem %s81_s29, 32 }
  0x52   :  { %p12695_p7 = scmp.ne.s32.totalorder %s81_s29, %s12694_s4  ;;  %p12699_p8 = scmp.lt.s32.totalorder %s81_s29, %s81_s29 }
  0x53   :  { %p12700_p9 = scmp.lt.s32.totalorder %s12698_s17, %s12694_s4 }
  0x55   :  { %p12701_p10 = por %p12700_p9, %p12699_p8 }
  0x57   :  { %p12702_p11 = pnand %p12701_p10, %p12695_p7 }
  0x59   :  { %12705 = shalt.err (!%p12702_p11)
}
  0x5a   :  { %83 = dma.hbm_to_vmem [thread:$0]  %s16084_s8, 16, %s81_s29, [#allocation9]  }
  0x5b   :  { %s12706_s20 = scalar_lea.hbm %s16085_s9, 16 }
  0x5c   :  { %p12707_p12 = scmp.ne.s32.totalorder %s16085_s9, %s12706_s20  ;;  %p12710_p13 = scmp.lt.u32.totalorder %s12706_s20, %s16085_s9 }
  0x5e   :  { %p12712_p0 = pnand %p12710_p13, %p12707_p12 }
  0x60   :  { %12715 = shalt.err (!%p12712_p0)
}
  0x61   :  { %s12716_s27 = scalar_lea.vmem %s91_s12, 16  ;;  %s12720_s10 = scalar_lea.vmem %s91_s12, 32 }
  0x62   :  { %p12717_p1 = scmp.ne.s32.totalorder %s91_s12, %s12716_s27  ;;  %p12721_p2 = scmp.lt.s32.totalorder %s91_s12, %s91_s12 }
  0x63   :  { %p12722_p3 = scmp.lt.s32.totalorder %s12720_s10, %s12716_s27 }
  0x65   :  { %p12723_p4 = por %p12722_p3, %p12721_p2 }
  0x67   :  { %p12724_p5 = pnand %p12723_p4, %p12717_p1 }
  0x69   :  { %12727 = shalt.err (!%p12724_p5)
}
  0x6a   :  { %93 = dma.hbm_to_vmem [thread:$0]  %s16085_s9, 16, %s91_s12, [#allocation12]  }
  0x6b   :  { %12728 = dma.done.wait [#allocation4], 57600  }
  0x6c   :  { %12729 = vsyncadd [#allocation4], 4294909696 }
  0x6d   :  { %12730 = dma.done.wait [#allocation6], 73872  }
  0x6e   :  { %12731 = vsyncadd [#allocation6], 4294893424 }
  0x6f   :  { %12732 = dma.done.wait [#allocation9], 48  }
  0x70   :  { %12733 = vsyncadd [#allocation9], 4294967248 }
  0x71   :  { %12734 = dma.done.wait [#allocation12], 16  }
  0x72   :  { %12735 = vsyncadd [#allocation12], 4294967280  ;;  %v11442_v1 = vld [vmem:[#allocation3 + $0x4] ss:$144 sps:$4 sm:$0xff]   ;;  %v11444_v2 = vld [vmem:[#allocation3 + $0xc] ss:$144 sps:$4 sm:$0xff]  }
  0x73   :  { %3585 = vmatprep.subr.bf16.mxu0 %v11442_v1  ;;  %v11446_v3 = vld [vmem:[#allocation3] ss:$144 sps:$4 sm:$0xff]   ;;  %v11447_v4 = vld [vmem:[#allocation3 + $0x8] ss:$144 sps:$4 sm:$0xff]   ;;  %3626 = vmatprep.subr.bf16.mxu1 %v11444_v2  ;;  %v11448_v5 = vld [vmem:[#allocation3 + $0x124] ss:$144 sps:$4 sm:$0xff]  }
  0x74   :  { %3586 = vmatpush1.bf16.msra.mxu0 %v11446_v3  ;;  %3627 = vmatpush1.bf16.msra.mxu1 %v11447_v4  ;;  %v11450_v6 = vld [vmem:[#allocation3 + $0x12c] ss:$144 sps:$4 sm:$0xff]   ;;  %v11452_v7 = vld [vmem:[#allocation3 + $0x120] ss:$144 sps:$4 sm:$0xff]   ;;  %v11453_v8 = vld [vmem:[#allocation3 + $0x128] ss:$144 sps:$4 sm:$0xff]  }
  0x75   :  { %3587 = vmatprep.subr.bf16.mxu0 %v11448_v5  ;;  %3628 = vmatprep.subr.bf16.mxu1 %v11450_v6  ;;  %v11454_v9 = vld [vmem:[#allocation3 + $0x244] ss:$144 sps:$4 sm:$0xff]   ;;  %v11456_v10 = vld [vmem:[#allocation3 + $0x24c] ss:$144 sps:$4 sm:$0xff]   ;;  %v11458_v11 = vld [vmem:[#allocation3 + $0x240] ss:$144 sps:$4 sm:$0xff]  }
  0x76   :  { %v11459_v12 = vld [vmem:[#allocation3 + $0x248] ss:$144 sps:$4 sm:$0xff]   ;;  %v11460_v13 = vld [vmem:[#allocation3 + $0x364] ss:$144 sps:$4 sm:$0xff]   ;;  %v11462_v14 = vld [vmem:[#allocation3 + $0x36c] ss:$144 sps:$4 sm:$0xff]  }
  0x77   :  { %v11464_v15 = vld [vmem:[#allocation3 + $0x360] ss:$144 sps:$4 sm:$0xff]   ;;  %v11465_v16 = vld [vmem:[#allocation3 + $0x368] ss:$144 sps:$4 sm:$0xff]   ;;  %v11466_v17 = vld [vmem:[#allocation3 + $0x484] ss:$144 sps:$4 sm:$0xff]  }
  0x78   :  { %3588 = vmatpush1.bf16.msra.mxu0 %v11452_v7  ;;  %3629 = vmatpush1.bf16.msra.mxu1 %v11453_v8  ;;  %v11468_v18 = vld [vmem:[#allocation3 + $0x48c] ss:$144 sps:$4 sm:$0xff]   ;;  %v11470_v19 = vld [vmem:[#allocation3 + $0x480] ss:$144 sps:$4 sm:$0xff]   ;;  %v11471_v20 = vld [vmem:[#allocation3 + $0x488] ss:$144 sps:$4 sm:$0xff]  }
  0x79   :  { %3589 = vmatprep.subr.bf16.mxu0 %v11454_v9  ;;  %3630 = vmatprep.subr.bf16.mxu1 %v11456_v10  ;;  %v11472_v21 = vld [vmem:[#allocation3 + $0x5a4] ss:$144 sps:$4 sm:$0xff]   ;;  %v11474_v22 = vld [vmem:[#allocation3 + $0x5ac] ss:$144 sps:$4 sm:$0xff]   ;;  %v11476_v23 = vld [vmem:[#allocation3 + $0x5a0] ss:$144 sps:$4 sm:$0xff]  }
  0x7a   :  { %v11477_v24 = vld [vmem:[#allocation3 + $0x5a8] ss:$144 sps:$4 sm:$0xff]   ;;  %v11478_v25 = vld [vmem:[#allocation3 + $0x6c4] ss:$144 sps:$4 sm:$0xff]   ;;  %v11480_v26 = vld [vmem:[#allocation3 + $0x6cc] ss:$144 sps:$4 sm:$0xff]  }
  0x7b   :  { %v11482_v27 = vld [vmem:[#allocation3 + $0x6c0] ss:$144 sps:$4 sm:$0xff]   ;;  %v11483_v28 = vld [vmem:[#allocation3 + $0x6c8] ss:$144 sps:$4 sm:$0xff]   ;;  %v11484_v29 = vld [vmem:[#allocation3 + $0x7e4] ss:$144 sps:$4 sm:$0xff]  }
  0x7c   :  { %3590 = vmatpush1.bf16.msra.mxu0 %v11458_v11  ;;  %3631 = vmatpush1.bf16.msra.mxu1 %v11459_v12  ;;  %v11486_v30 = vld [vmem:[#allocation3 + $0x7ec] ss:$144 sps:$4 sm:$0xff]   ;;  %v11488_v31 = vld [vmem:[#allocation3 + $0x7e0] ss:$144 sps:$4 sm:$0xff]   ;;  %v11489_v32 = vld [vmem:[#allocation3 + $0x7e8] ss:$144 sps:$4 sm:$0xff]  }
  0x7d   :  { %3591 = vmatprep.subr.bf16.mxu0 %v11460_v13  ;;  %3632 = vmatprep.subr.bf16.mxu1 %v11462_v14  ;;  %v11490_v33 = vld [vmem:[#allocation3 + $0x904] ss:$144 sps:$4 sm:$0xff]   ;;  %v11492_v34 = vld [vmem:[#allocation3 + $0x90c] ss:$144 sps:$4 sm:$0xff]   ;;  %v11494_v35 = vld [vmem:[#allocation3 + $0x900] ss:$144 sps:$4 sm:$0xff]  }
  0x7e   :  { %v11495_v36 = vld [vmem:[#allocation3 + $0x908] ss:$144 sps:$4 sm:$0xff]   ;;  %v11496_v37 = vld [vmem:[#allocation3 + $0xa24] ss:$144 sps:$4 sm:$0xff]   ;;  %v11498_v38 = vld [vmem:[#allocation3 + $0xa2c] ss:$144 sps:$4 sm:$0xff]  }
  0x7f   :  { %v10105_v39 = vld.sshfl [vmem:[%s16076_s0] sm:$0x33 pattern:$0x76325410]  ;;  %vm3472_vm0 = vcmask 556032   ;;  %vm3476_vm1 = vcmask 1041408  }
  0x80   :  { %3592 = vmatpush1.bf16.msra.mxu0 %v11464_v15  ;;  %3633 = vmatpush1.bf16.msra.mxu1 %v11465_v16  ;;  %v1217_v40 = vcombine.high %v10105_v39, %v10105_v39  ;;  %v11500_v41 = vld [vmem:[#allocation3 + $0xa20] ss:$144 sps:$4 sm:$0xff]   ;;  %v11501_v42 = vld [vmem:[#allocation3 + $0xa28] ss:$144 sps:$4 sm:$0xff]   ;;  %v11502_v43 = vld [vmem:[#allocation3 + $0xb44] ss:$144 sps:$4 sm:$0xff]   ;;  %v12905_v62 = vpack.c.bf16 %v10105_v39, %v10105_v39 }
  0x81   :  { %3593 = vmatprep.subr.bf16.mxu0 %v11466_v17  ;;  %3634 = vmatprep.subr.bf16.mxu1 %v11468_v18  ;;  %v11504_v45 = vld [vmem:[#allocation3 + $0xb4c] ss:$144 sps:$4 sm:$0xff]   ;;  %v11506_v46 = vld [vmem:[#allocation3 + $0xb40] ss:$144 sps:$4 sm:$0xff]   ;;  %v11507_v47 = vld [vmem:[#allocation3 + $0xb48] ss:$144 sps:$4 sm:$0xff]  }
  0x82   :  { %v12885_v44 = vpack.c.bf16 %v1217_v40, %v1217_v40  ;;  %v11508_v48 = vld [vmem:[#allocation3 + $0xc64] ss:$144 sps:$4 sm:$0xff]   ;;  %v11510_v49 = vld [vmem:[#allocation3 + $0xc6c] ss:$144 sps:$4 sm:$0xff]   ;;  %v11512_v52 = vld [vmem:[#allocation3 + $0xc60] ss:$144 sps:$4 sm:$0xff]  }
  0x83   :  { %v547_v50 = vld [vmem:[#allocation3 + $0xd80] sm:$0x33]  ;;  %v548_v51 = vld [vmem:[#allocation3 + $0xd88] sm:$0x33]  ;;  %vm10077_vm2 = vcmask 517120   ;;  %vm10095_vm3 = vcmask 1024  }
  0x84   :  { %3594 = vmatpush1.bf16.msra.mxu0 %v11470_v19  ;;  %3635 = vmatpush1.bf16.msra.mxu1 %v11471_v20  ;;  %v11513_v53 = vld [vmem:[#allocation3 + $0xc68] ss:$144 sps:$4 sm:$0xff]   ;;  %v12891_v54 = vcombine.high %v547_v50, %v547_v50  ;;  %v12893_v55 = vcombine.high %v548_v51, %v548_v51  ;;  %v10538_v56 = vcombine.low %v547_v50, %v547_v50  ;;  %v11520_v58 = vld [vmem:[#allocation3 + $0x14] ss:$144 sps:$4 sm:$0xff]   ;;  %v11523_v61 = vld [vmem:[#allocation3 + $0x1c] ss:$144 sps:$4 sm:$0xff]  }
  0x85   :  { %3595 = vmatprep.subr.bf16.mxu0 %v11472_v21  ;;  %3636 = vmatprep.subr.bf16.mxu1 %v11474_v22  ;;  %v10540_v57 = vcombine.low %v548_v51, %v548_v51  ;;  %v11518_v63 = vld [vmem:[#allocation3 + $0x10] ss:$144 sps:$4 sm:$0xff]   ;;  %v11521_v0 = vld [vmem:[#allocation3 + $0x18] ss:$144 sps:$4 sm:$0xff]   ;;  %v11526_v1 = vld [vmem:[#allocation3 + $0x134] ss:$144 sps:$4 sm:$0xff]  }
  0x86   :  { %10575 = vmatprep.mubr.msk.bf16.mxu0 %vm3472_vm0, %v12885_v44  ;;  %10577 = vmatprep.mubr.msk.bf16.mxu1 %vm3472_vm0, %v12885_v44  ;;  %v12900_v59 = vsel %vm3476_vm1, %v10538_v56, 0  ;;  %v11529_v2 = vld [vmem:[#allocation3 + $0x13c] ss:$144 sps:$4 sm:$0xff]   ;;  %v11524_v3 = vld [vmem:[#allocation3 + $0x130] ss:$144 sps:$4 sm:$0xff]  }
  0x87   :  { %v12903_v60 = vsel %vm3476_vm1, %v10540_v57, 0  ;;  %v11527_v4 = vld [vmem:[#allocation3 + $0x138] ss:$144 sps:$4 sm:$0xff]   ;;  %v11532_v5 = vld [vmem:[#allocation3 + $0x254] ss:$144 sps:$4 sm:$0xff]  }
  0x88   :  { %3596 = vmatpush1.bf16.msra.mxu0 %v11476_v23  ;;  %3637 = vmatpush1.bf16.msra.mxu1 %v11477_v24  ;;  %v11535_v6 = vld [vmem:[#allocation3 + $0x25c] ss:$144 sps:$4 sm:$0xff]   ;;  %v11530_v7 = vld [vmem:[#allocation3 + $0x250] ss:$144 sps:$4 sm:$0xff]   ;;  %v11533_v8 = vld [vmem:[#allocation3 + $0x258] ss:$144 sps:$4 sm:$0xff]  }
  0x89   :  { %3597 = vmatprep.subr.bf16.mxu0 %v11478_v25  ;;  %3638 = vmatprep.subr.bf16.mxu1 %v11480_v26  ;;  %v11538_v9 = vld [vmem:[#allocation3 + $0x374] ss:$144 sps:$4 sm:$0xff]   ;;  %v11541_v10 = vld [vmem:[#allocation3 + $0x37c] ss:$144 sps:$4 sm:$0xff]   ;;  %v11536_v11 = vld [vmem:[#allocation3 + $0x370] ss:$144 sps:$4 sm:$0xff]  }
  0x8a   :  { %v11539_v12 = vld [vmem:[#allocation3 + $0x378] ss:$144 sps:$4 sm:$0xff]   ;;  %v11544_v13 = vld [vmem:[#allocation3 + $0x494] ss:$144 sps:$4 sm:$0xff]   ;;  %v11547_v14 = vld [vmem:[#allocation3 + $0x49c] ss:$144 sps:$4 sm:$0xff]  }
  0x8b   :  { %v11542_v15 = vld [vmem:[#allocation3 + $0x490] ss:$144 sps:$4 sm:$0xff]   ;;  %v11545_v16 = vld [vmem:[#allocation3 + $0x498] ss:$144 sps:$4 sm:$0xff]   ;;  %v11550_v17 = vld [vmem:[#allocation3 + $0x5b4] ss:$144 sps:$4 sm:$0xff]  }
  0x8c   :  { %3598 = vmatpush1.bf16.msra.mxu0 %v11482_v27  ;;  %3639 = vmatpush1.bf16.msra.mxu1 %v11483_v28  ;;  %v11553_v18 = vld [vmem:[#allocation3 + $0x5bc] ss:$144 sps:$4 sm:$0xff]   ;;  %v11548_v19 = vld [vmem:[#allocation3 + $0x5b0] ss:$144 sps:$4 sm:$0xff]   ;;  %v11551_v20 = vld [vmem:[#allocation3 + $0x5b8] ss:$144 sps:$4 sm:$0xff]  }
  0x8d   :  { %3599 = vmatprep.subr.bf16.mxu0 %v11484_v29  ;;  %3640 = vmatprep.subr.bf16.mxu1 %v11486_v30  ;;  %v11556_v21 = vld [vmem:[#allocation3 + $0x6d4] ss:$144 sps:$4 sm:$0xff]   ;;  %v11559_v22 = vld [vmem:[#allocation3 + $0x6dc] ss:$144 sps:$4 sm:$0xff]   ;;  %v11554_v23 = vld [vmem:[#allocation3 + $0x6d0] ss:$144 sps:$4 sm:$0xff]  }
  0x8e   :  { %v11557_v24 = vld [vmem:[#allocation3 + $0x6d8] ss:$144 sps:$4 sm:$0xff]   ;;  %v11562_v25 = vld [vmem:[#allocation3 + $0x7f4] ss:$144 sps:$4 sm:$0xff]   ;;  %v11565_v26 = vld [vmem:[#allocation3 + $0x7fc] ss:$144 sps:$4 sm:$0xff]  }
  0x8f   :  { %v11560_v27 = vld [vmem:[#allocation3 + $0x7f0] ss:$144 sps:$4 sm:$0xff]   ;;  %v11563_v28 = vld [vmem:[#allocation3 + $0x7f8] ss:$144 sps:$4 sm:$0xff]   ;;  %v11568_v29 = vld [vmem:[#allocation3 + $0x914] ss:$144 sps:$4 sm:$0xff]  }
  0x90   :  { %3600 = vmatpush1.bf16.msra.mxu0 %v11488_v31  ;;  %3641 = vmatpush1.bf16.msra.mxu1 %v11489_v32  ;;  %v11571_v30 = vld [vmem:[#allocation3 + $0x91c] ss:$144 sps:$4 sm:$0xff]   ;;  %v11566_v31 = vld [vmem:[#allocation3 + $0x910] ss:$144 sps:$4 sm:$0xff]   ;;  %v11569_v32 = vld [vmem:[#allocation3 + $0x918] ss:$144 sps:$4 sm:$0xff]  }
  0x91   :  { %3601 = vmatprep.subr.bf16.mxu0 %v11490_v33  ;;  %3642 = vmatprep.subr.bf16.mxu1 %v11492_v34  ;;  %v11574_v33 = vld [vmem:[#allocation3 + $0xa34] ss:$144 sps:$4 sm:$0xff]   ;;  %v11577_v34 = vld [vmem:[#allocation3 + $0xa3c] ss:$144 sps:$4 sm:$0xff]   ;;  %v11578_v39 = vld [vmem:[#allocation3 + $0xb50] ss:$144 sps:$4 sm:$0xff]  }
  0x92   :  { %v11581_v40 = vld [vmem:[#allocation3 + $0xb58] ss:$144 sps:$4 sm:$0xff]   ;;  %v11599_v57 = vld [vmem:[#allocation3 + $0x2c] ss:$144 sps:$4 sm:$0xff]  }
  0x94   :  { %3602 = vmatpush1.bf16.msra.mxu0 %v11494_v35  ;;  %3643 = vmatpush1.bf16.msra.mxu1 %v11495_v36  ;;  %v11572_v35 = vld [vmem:[#allocation3 + $0xa30] ss:$144 sps:$4 sm:$0xff]   ;;  %v11575_v36 = vld [vmem:[#allocation3 + $0xa38] ss:$144 sps:$4 sm:$0xff]  }
  0x95   :  { %3603 = vmatprep.subr.bf16.mxu0 %v11496_v37  ;;  %3644 = vmatprep.subr.bf16.mxu1 %v11498_v38  ;;  %v11580_v37 = vld [vmem:[#allocation3 + $0xb54] ss:$144 sps:$4 sm:$0xff]   ;;  %v11583_v38 = vld [vmem:[#allocation3 + $0xb5c] ss:$144 sps:$4 sm:$0xff]  }
  0x98   :  { %3604 = vmatpush1.bf16.msra.mxu0 %v11500_v41  ;;  %3645 = vmatpush1.bf16.msra.mxu1 %v11501_v42  ;;  %v11586_v41 = vld [vmem:[#allocation3 + $0xc74] ss:$144 sps:$4 sm:$0xff]   ;;  %v11589_v42 = vld [vmem:[#allocation3 + $0xc7c] ss:$144 sps:$4 sm:$0xff]  }
  0x99   :  { %3605 = vmatprep.subr.bf16.mxu0 %v11502_v43  ;;  %3646 = vmatprep.subr.bf16.mxu1 %v11504_v45  ;;  %v549_v43 = vld [vmem:[#allocation3 + $0xd90] sm:$0x33]  ;;  %v550_v45 = vld [vmem:[#allocation3 + $0xd98] sm:$0x33] }
  0x9a   :  { %v10542_v50 = vcombine.low %v549_v43, %v549_v43  ;;  %v10544_v51 = vcombine.low %v550_v45, %v550_v45 }
  0x9c   :  { %3606 = vmatpush1.bf16.msra.mxu0 %v11506_v46  ;;  %3647 = vmatpush1.bf16.msra.mxu1 %v11507_v47  ;;  %v11584_v46 = vld [vmem:[#allocation3 + $0xc70] ss:$144 sps:$4 sm:$0xff]   ;;  %v11587_v47 = vld [vmem:[#allocation3 + $0xc78] ss:$144 sps:$4 sm:$0xff]   ;;  %v12927_v56 = vsel %vm3476_vm1, %v10544_v51, 0 }
  0x9d   :  { %3607 = vmatprep.subr.bf16.mxu0 %v11508_v48  ;;  %3648 = vmatprep.subr.bf16.mxu1 %v11510_v49  ;;  %v12915_v48 = vcombine.high %v549_v43, %v549_v43  ;;  %v12917_v49 = vcombine.high %v550_v45, %v550_v45  ;;  %v11660_v43 = vld [vmem:[#allocation3 + $0xc80] ss:$144 sps:$4 sm:$0xff]   ;;  %v11663_v45 = vld [vmem:[#allocation3 + $0xc88] ss:$144 sps:$4 sm:$0xff]  }
  0xa0   :  { %3608 = vmatpush1.bf16.msra.mxu0 %v11512_v52  ;;  %3649 = vmatpush1.bf16.msra.mxu1 %v11513_v53  ;;  %v11596_v52 = vld [vmem:[#allocation3 + $0x24] ss:$144 sps:$4 sm:$0xff]   ;;  %v12924_v53 = vsel %vm3476_vm1, %v10542_v50, 0 }
  0xa1   :  { %10574 = vmatprep.subr.msk.bf16.mxu0 %vm3476_vm1, %v12891_v54  ;;  %10576 = vmatprep.subr.msk.bf16.mxu1 %vm3476_vm1, %v12893_v55 }
  0xa4   :  { %3610 = vmatpush1.bf16.msra.mxu0 %v12900_v59  ;;  %3651 = vmatpush1.bf16.msra.mxu1 %v12903_v60 }
  0xa5   :  { %3667 = vmatprep.subr.bf16.mxu0 %v11520_v58  ;;  %3708 = vmatprep.subr.bf16.mxu1 %v11523_v61  ;;  %v11594_v58 = vld [vmem:[#allocation3 + $0x20] ss:$144 sps:$4 sm:$0xff]   ;;  %v11597_v61 = vld [vmem:[#allocation3 + $0x28] ss:$144 sps:$4 sm:$0xff]  }
  0xa7   :  { %3618 = vmatmul.mubr.bf16.vlgmr.msra.gmra.mrb[0].mxu0 %v12905_v62  ;;  %3659 = vmatmul.mubr.bf16.vlgmr.msra.gmra.mrb[0].mxu1 %v12905_v62 }
  0xa8   :  { %3668 = vmatpush1.bf16.msra.mxu0 %v11518_v63  ;;  %3709 = vmatpush1.bf16.msra.mxu1 %v11521_v0  ;;  %v11602_v63 = vld [vmem:[#allocation3 + $0x144] ss:$144 sps:$4 sm:$0xff]   ;;  %v11605_v0 = vld [vmem:[#allocation3 + $0x14c] ss:$144 sps:$4 sm:$0xff]  }
  0xa9   :  { %3669 = vmatprep.subr.bf16.mxu0 %v11526_v1  ;;  %3710 = vmatprep.subr.bf16.mxu1 %v11529_v2  ;;  %v11600_v1 = vld [vmem:[#allocation3 + $0x140] ss:$144 sps:$4 sm:$0xff]   ;;  %v11603_v2 = vld [vmem:[#allocation3 + $0x148] ss:$144 sps:$4 sm:$0xff]  }
  0xaa   :  { %10579 = vmatprep.mubr.msk.bf16.mxu0 %vm3472_vm0, %v12885_v44  ;;  %10581 = vmatprep.mubr.msk.bf16.mxu1 %vm3472_vm0, %v12885_v44 }
  0xac   :  { %3670 = vmatpush1.bf16.msra.mxu0 %v11524_v3  ;;  %3711 = vmatpush1.bf16.msra.mxu1 %v11527_v4  ;;  %v11608_v3 = vld [vmem:[#allocation3 + $0x264] ss:$144 sps:$4 sm:$0xff]   ;;  %v11611_v4 = vld [vmem:[#allocation3 + $0x26c] ss:$144 sps:$4 sm:$0xff]  }
  0xad   :  { %3671 = vmatprep.subr.bf16.mxu0 %v11532_v5  ;;  %3712 = vmatprep.subr.bf16.mxu1 %v11535_v6  ;;  %v11606_v5 = vld [vmem:[#allocation3 + $0x260] ss:$144 sps:$4 sm:$0xff]   ;;  %v11609_v6 = vld [vmem:[#allocation3 + $0x268] ss:$144 sps:$4 sm:$0xff]  }
  0xb0   :  { %3672 = vmatpush1.bf16.msra.mxu0 %v11530_v7  ;;  %3713 = vmatpush1.bf16.msra.mxu1 %v11533_v8  ;;  %v11614_v7 = vld [vmem:[#allocation3 + $0x384] ss:$144 sps:$4 sm:$0xff]   ;;  %v11617_v8 = vld [vmem:[#allocation3 + $0x38c] ss:$144 sps:$4 sm:$0xff]  }
  0xb1   :  { %3673 = vmatprep.subr.bf16.mxu0 %v11538_v9  ;;  %3714 = vmatprep.subr.bf16.mxu1 %v11541_v10  ;;  %v11612_v9 = vld [vmem:[#allocation3 + $0x380] ss:$144 sps:$4 sm:$0xff]   ;;  %v11615_v10 = vld [vmem:[#allocation3 + $0x388] ss:$144 sps:$4 sm:$0xff]  }
  0xb4   :  { %3674 = vmatpush1.bf16.msra.mxu0 %v11536_v11  ;;  %3715 = vmatpush1.bf16.msra.mxu1 %v11539_v12  ;;  %v11620_v11 = vld [vmem:[#allocation3 + $0x4a4] ss:$144 sps:$4 sm:$0xff]   ;;  %v11623_v12 = vld [vmem:[#allocation3 + $0x4ac] ss:$144 sps:$4 sm:$0xff]  }
  0xb5   :  { %3675 = vmatprep.subr.bf16.mxu0 %v11544_v13  ;;  %3716 = vmatprep.subr.bf16.mxu1 %v11547_v14  ;;  %v11618_v13 = vld [vmem:[#allocation3 + $0x4a0] ss:$144 sps:$4 sm:$0xff]   ;;  %v11621_v14 = vld [vmem:[#allocation3 + $0x4a8] ss:$144 sps:$4 sm:$0xff]  }
  0xb8   :  { %3676 = vmatpush1.bf16.msra.mxu0 %v11542_v15  ;;  %3717 = vmatpush1.bf16.msra.mxu1 %v11545_v16  ;;  %v11626_v15 = vld [vmem:[#allocation3 + $0x5c4] ss:$144 sps:$4 sm:$0xff]   ;;  %v11629_v16 = vld [vmem:[#allocation3 + $0x5cc] ss:$144 sps:$4 sm:$0xff]  }
  0xb9   :  { %3677 = vmatprep.subr.bf16.mxu0 %v11550_v17  ;;  %3718 = vmatprep.subr.bf16.mxu1 %v11553_v18  ;;  %v11624_v17 = vld [vmem:[#allocation3 + $0x5c0] ss:$144 sps:$4 sm:$0xff]   ;;  %v11627_v18 = vld [vmem:[#allocation3 + $0x5c8] ss:$144 sps:$4 sm:$0xff]  }
  0xbc   :  { %3678 = vmatpush1.bf16.msra.mxu0 %v11548_v19  ;;  %3719 = vmatpush1.bf16.msra.mxu1 %v11551_v20  ;;  %v11632_v19 = vld [vmem:[#allocation3 + $0x6e4] ss:$144 sps:$4 sm:$0xff]   ;;  %v11635_v20 = vld [vmem:[#allocation3 + $0x6ec] ss:$144 sps:$4 sm:$0xff]  }
  0xbd   :  { %3679 = vmatprep.subr.bf16.mxu0 %v11556_v21  ;;  %3720 = vmatprep.subr.bf16.mxu1 %v11559_v22  ;;  %v11630_v21 = vld [vmem:[#allocation3 + $0x6e0] ss:$144 sps:$4 sm:$0xff]   ;;  %v11633_v22 = vld [vmem:[#allocation3 + $0x6e8] ss:$144 sps:$4 sm:$0xff]  }
  0xc0   :  { %3680 = vmatpush1.bf16.msra.mxu0 %v11554_v23  ;;  %3721 = vmatpush1.bf16.msra.mxu1 %v11557_v24  ;;  %v11638_v23 = vld [vmem:[#allocation3 + $0x804] ss:$144 sps:$4 sm:$0xff]   ;;  %v11641_v24 = vld [vmem:[#allocation3 + $0x80c] ss:$144 sps:$4 sm:$0xff]  }
  0xc1   :  { %3681 = vmatprep.subr.bf16.mxu0 %v11562_v25  ;;  %3722 = vmatprep.subr.bf16.mxu1 %v11565_v26  ;;  %v11636_v25 = vld [vmem:[#allocation3 + $0x800] ss:$144 sps:$4 sm:$0xff]   ;;  %v11639_v26 = vld [vmem:[#allocation3 + $0x808] ss:$144 sps:$4 sm:$0xff]  }
  0xc4   :  { %3682 = vmatpush1.bf16.msra.mxu0 %v11560_v27  ;;  %3723 = vmatpush1.bf16.msra.mxu1 %v11563_v28  ;;  %v11644_v27 = vld [vmem:[#allocation3 + $0x924] ss:$144 sps:$4 sm:$0xff]   ;;  %v11647_v28 = vld [vmem:[#allocation3 + $0x92c] ss:$144 sps:$4 sm:$0xff]  }
  0xc5   :  { %3683 = vmatprep.subr.bf16.mxu0 %v11568_v29  ;;  %3724 = vmatprep.subr.bf16.mxu1 %v11571_v30  ;;  %v11642_v29 = vld [vmem:[#allocation3 + $0x920] ss:$144 sps:$4 sm:$0xff]   ;;  %v11645_v30 = vld [vmem:[#allocation3 + $0x928] ss:$144 sps:$4 sm:$0xff]  }
  0xc8   :  { %3684 = vmatpush1.bf16.msra.mxu0 %v11566_v31  ;;  %3725 = vmatpush1.bf16.msra.mxu1 %v11569_v32  ;;  %v11650_v31 = vld [vmem:[#allocation3 + $0xa44] ss:$144 sps:$4 sm:$0xff]   ;;  %v11653_v32 = vld [vmem:[#allocation3 + $0xa4c] ss:$144 sps:$4 sm:$0xff]  }
  0xc9   :  { %3685 = vmatprep.subr.bf16.mxu0 %v11574_v33  ;;  %3726 = vmatprep.subr.bf16.mxu1 %v11577_v34  ;;  %v11648_v33 = vld [vmem:[#allocation3 + $0xa40] ss:$144 sps:$4 sm:$0xff]   ;;  %v11651_v34 = vld [vmem:[#allocation3 + $0xa48] ss:$144 sps:$4 sm:$0xff]  }
  0xcc   :  { %3686 = vmatpush1.bf16.msra.mxu0 %v11572_v35  ;;  %3727 = vmatpush1.bf16.msra.mxu1 %v11575_v36  ;;  %v11656_v35 = vld [vmem:[#allocation3 + $0xb64] ss:$144 sps:$4 sm:$0xff]   ;;  %v11659_v36 = vld [vmem:[#allocation3 + $0xb6c] ss:$144 sps:$4 sm:$0xff]  }
  0xcd   :  { %3687 = vmatprep.subr.bf16.mxu0 %v11580_v37  ;;  %3728 = vmatprep.subr.bf16.mxu1 %v11583_v38  ;;  %v11654_v37 = vld [vmem:[#allocation3 + $0xb60] ss:$144 sps:$4 sm:$0xff]   ;;  %v11657_v38 = vld [vmem:[#allocation3 + $0xb68] ss:$144 sps:$4 sm:$0xff]  }
  0xd0   :  { %3688 = vmatpush1.bf16.msra.mxu0 %v11578_v39  ;;  %3729 = vmatpush1.bf16.msra.mxu1 %v11581_v40  ;;  %v11662_v39 = vld [vmem:[#allocation3 + $0xc84] ss:$144 sps:$4 sm:$0xff]   ;;  %v11665_v40 = vld [vmem:[#allocation3 + $0xc8c] ss:$144 sps:$4 sm:$0xff]  }
  0xd1   :  { %3689 = vmatprep.subr.bf16.mxu0 %v11586_v41  ;;  %3730 = vmatprep.subr.bf16.mxu1 %v11589_v42  ;;  %v551_v41 = vld [vmem:[#allocation3 + $0xda0] sm:$0x33]  ;;  %v552_v42 = vld [vmem:[#allocation3 + $0xda8] sm:$0x33] }
  0xd2   :  { %v10546_v50 = vcombine.low %v551_v41, %v551_v41  ;;  %v10548_v51 = vcombine.low %v552_v42, %v552_v42 }
  0xd4   :  { %3690 = vmatpush1.bf16.msra.mxu0 %v11584_v46  ;;  %3731 = vmatpush1.bf16.msra.mxu1 %v11587_v47  ;;  %v12937_v46 = vcombine.high %v551_v41, %v551_v41  ;;  %v12939_v47 = vcombine.high %v552_v42, %v552_v42  ;;  %v11738_v41 = vld [vmem:[#allocation3 + $0xc94] ss:$144 sps:$4 sm:$0xff]   ;;  %v11741_v42 = vld [vmem:[#allocation3 + $0xc9c] ss:$144 sps:$4 sm:$0xff]  }
  0xd5   :  { %10578 = vmatprep.subr.msk.bf16.mxu0 %vm3476_vm1, %v12915_v48  ;;  %10580 = vmatprep.subr.msk.bf16.mxu1 %vm3476_vm1, %v12917_v49 }
  0xd8   :  { %3692 = vmatpush1.bf16.msra.mxu0 %v12924_v53  ;;  %3733 = vmatpush1.bf16.msra.mxu1 %v12927_v56 }
  0xd9   :  { %3749 = vmatprep.subr.bf16.mxu0 %v11596_v52  ;;  %3790 = vmatprep.subr.bf16.mxu1 %v11599_v57  ;;  %v11672_v52 = vld [vmem:[#allocation3 + $0x34] ss:$144 sps:$4 sm:$0xff]   ;;  %v12946_v57 = vsel %vm3476_vm1, %v10546_v50, 0  ;;  %v11736_v50 = vld [vmem:[#allocation3 + $0xc90] ss:$144 sps:$4 sm:$0xff]  }
  0xdb   :  { %3700 = vmatmul.mubr.bf16.vlgmr.msra.gmra.mrb[4].mxu0 %v12905_v62  ;;  %3741 = vmatmul.mubr.bf16.vlgmr.msra.gmra.mrb[4].mxu1 %v12905_v62 }
  0xdc   :  { %3750 = vmatpush1.bf16.msra.mxu0 %v11594_v58  ;;  %3791 = vmatpush1.bf16.msra.mxu1 %v11597_v61  ;;  %v12949_v58 = vsel %vm3476_vm1, %v10548_v51, 0  ;;  %v11675_v61 = vld [vmem:[#allocation3 + $0x3c] ss:$144 sps:$4 sm:$0xff]   ;;  %v11739_v51 = vld [vmem:[#allocation3 + $0xc98] ss:$144 sps:$4 sm:$0xff]  }
  0xdd   :  { %3751 = vmatprep.subr.bf16.mxu0 %v11602_v63  ;;  %3792 = vmatprep.subr.bf16.mxu1 %v11605_v0  ;;  %v11670_v63 = vld [vmem:[#allocation3 + $0x30] ss:$144 sps:$4 sm:$0xff]   ;;  %v11673_v0 = vld [vmem:[#allocation3 + $0x38] ss:$144 sps:$4 sm:$0xff]  }
  0xde   :  { %10583 = vmatprep.mubr.msk.bf16.mxu0 %vm3472_vm0, %v12885_v44  ;;  %10585 = vmatprep.mubr.msk.bf16.mxu1 %vm3472_vm0, %v12885_v44 }
  0xe0   :  { %3752 = vmatpush1.bf16.msra.mxu0 %v11600_v1  ;;  %3793 = vmatpush1.bf16.msra.mxu1 %v11603_v2  ;;  %v11678_v1 = vld [vmem:[#allocation3 + $0x154] ss:$144 sps:$4 sm:$0xff]   ;;  %v11681_v2 = vld [vmem:[#allocation3 + $0x15c] ss:$144 sps:$4 sm:$0xff]  }
  0xe1   :  { %3753 = vmatprep.subr.bf16.mxu0 %v11608_v3  ;;  %3794 = vmatprep.subr.bf16.mxu1 %v11611_v4  ;;  %v11676_v3 = vld [vmem:[#allocation3 + $0x150] ss:$144 sps:$4 sm:$0xff]   ;;  %v11679_v4 = vld [vmem:[#allocation3 + $0x158] ss:$144 sps:$4 sm:$0xff]  }
  0xe4   :  { %3754 = vmatpush1.bf16.msra.mxu0 %v11606_v5  ;;  %3795 = vmatpush1.bf16.msra.mxu1 %v11609_v6  ;;  %v11684_v5 = vld [vmem:[#allocation3 + $0x274] ss:$144 sps:$4 sm:$0xff]   ;;  %v11687_v6 = vld [vmem:[#allocation3 + $0x27c] ss:$144 sps:$4 sm:$0xff]  }
  0xe5   :  { %3755 = vmatprep.subr.bf16.mxu0 %v11614_v7  ;;  %3796 = vmatprep.subr.bf16.mxu1 %v11617_v8  ;;  %v11682_v7 = vld [vmem:[#allocation3 + $0x270] ss:$144 sps:$4 sm:$0xff]   ;;  %v11685_v8 = vld [vmem:[#allocation3 + $0x278] ss:$144 sps:$4 sm:$0xff]  }
  0xe8   :  { %3756 = vmatpush1.bf16.msra.mxu0 %v11612_v9  ;;  %3797 = vmatpush1.bf16.msra.mxu1 %v11615_v10  ;;  %v11690_v9 = vld [vmem:[#allocation3 + $0x394] ss:$144 sps:$4 sm:$0xff]   ;;  %v11693_v10 = vld [vmem:[#allocation3 + $0x39c] ss:$144 sps:$4 sm:$0xff]  }
  0xe9   :  { %3757 = vmatprep.subr.bf16.mxu0 %v11620_v11  ;;  %3798 = vmatprep.subr.bf16.mxu1 %v11623_v12  ;;  %v11688_v11 = vld [vmem:[#allocation3 + $0x390] ss:$144 sps:$4 sm:$0xff]   ;;  %v11691_v12 = vld [vmem:[#allocation3 + $0x398] ss:$144 sps:$4 sm:$0xff]  }
  0xec   :  { %3758 = vmatpush1.bf16.msra.mxu0 %v11618_v13  ;;  %3799 = vmatpush1.bf16.msra.mxu1 %v11621_v14  ;;  %v11696_v13 = vld [vmem:[#allocation3 + $0x4b4] ss:$144 sps:$4 sm:$0xff]   ;;  %v11699_v14 = vld [vmem:[#allocation3 + $0x4bc] ss:$144 sps:$4 sm:$0xff]  }
  0xed   :  { %3759 = vmatprep.subr.bf16.mxu0 %v11626_v15  ;;  %3800 = vmatprep.subr.bf16.mxu1 %v11629_v16  ;;  %v11694_v15 = vld [vmem:[#allocation3 + $0x4b0] ss:$144 sps:$4 sm:$0xff]   ;;  %v11697_v16 = vld [vmem:[#allocation3 + $0x4b8] ss:$144 sps:$4 sm:$0xff]  }
  0xf0   :  { %3760 = vmatpush1.bf16.msra.mxu0 %v11624_v17  ;;  %3801 = vmatpush1.bf16.msra.mxu1 %v11627_v18  ;;  %v11702_v17 = vld [vmem:[#allocation3 + $0x5d4] ss:$144 sps:$4 sm:$0xff]   ;;  %v11705_v18 = vld [vmem:[#allocation3 + $0x5dc] ss:$144 sps:$4 sm:$0xff]  }
  0xf1   :  { %3761 = vmatprep.subr.bf16.mxu0 %v11632_v19  ;;  %3802 = vmatprep.subr.bf16.mxu1 %v11635_v20  ;;  %v11700_v19 = vld [vmem:[#allocation3 + $0x5d0] ss:$144 sps:$4 sm:$0xff]   ;;  %v11703_v20 = vld [vmem:[#allocation3 + $0x5d8] ss:$144 sps:$4 sm:$0xff]  }
  0xf4   :  { %3762 = vmatpush1.bf16.msra.mxu0 %v11630_v21  ;;  %3803 = vmatpush1.bf16.msra.mxu1 %v11633_v22  ;;  %v11708_v21 = vld [vmem:[#allocation3 + $0x6f4] ss:$144 sps:$4 sm:$0xff]   ;;  %v11711_v22 = vld [vmem:[#allocation3 + $0x6fc] ss:$144 sps:$4 sm:$0xff]  }
  0xf5   :  { %3763 = vmatprep.subr.bf16.mxu0 %v11638_v23  ;;  %3804 = vmatprep.subr.bf16.mxu1 %v11641_v24  ;;  %v11706_v23 = vld [vmem:[#allocation3 + $0x6f0] ss:$144 sps:$4 sm:$0xff]   ;;  %v11709_v24 = vld [vmem:[#allocation3 + $0x6f8] ss:$144 sps:$4 sm:$0xff]  }
  0xf8   :  { %3764 = vmatpush1.bf16.msra.mxu0 %v11636_v25  ;;  %3805 = vmatpush1.bf16.msra.mxu1 %v11639_v26  ;;  %v11714_v25 = vld [vmem:[#allocation3 + $0x814] ss:$144 sps:$4 sm:$0xff]   ;;  %v11717_v26 = vld [vmem:[#allocation3 + $0x81c] ss:$144 sps:$4 sm:$0xff]  }
  0xf9   :  { %3765 = vmatprep.subr.bf16.mxu0 %v11644_v27  ;;  %3806 = vmatprep.subr.bf16.mxu1 %v11647_v28  ;;  %v11712_v27 = vld [vmem:[#allocation3 + $0x810] ss:$144 sps:$4 sm:$0xff]   ;;  %v11715_v28 = vld [vmem:[#allocation3 + $0x818] ss:$144 sps:$4 sm:$0xff]  }
  0xfc   :  { %3766 = vmatpush1.bf16.msra.mxu0 %v11642_v29  ;;  %3807 = vmatpush1.bf16.msra.mxu1 %v11645_v30  ;;  %v11720_v29 = vld [vmem:[#allocation3 + $0x934] ss:$144 sps:$4 sm:$0xff]   ;;  %v11723_v30 = vld [vmem:[#allocation3 + $0x93c] ss:$144 sps:$4 sm:$0xff]  }
  0xfd   :  { %3767 = vmatprep.subr.bf16.mxu0 %v11650_v31  ;;  %3808 = vmatprep.subr.bf16.mxu1 %v11653_v32  ;;  %v11718_v31 = vld [vmem:[#allocation3 + $0x930] ss:$144 sps:$4 sm:$0xff]   ;;  %v11721_v32 = vld [vmem:[#allocation3 + $0x938] ss:$144 sps:$4 sm:$0xff]  }
 0x100   :  { %3768 = vmatpush1.bf16.msra.mxu0 %v11648_v33  ;;  %3809 = vmatpush1.bf16.msra.mxu1 %v11651_v34  ;;  %v11726_v33 = vld [vmem:[#allocation3 + $0xa54] ss:$144 sps:$4 sm:$0xff]   ;;  %v11729_v34 = vld [vmem:[#allocation3 + $0xa5c] ss:$144 sps:$4 sm:$0xff]  }
 0x101   :  { %3769 = vmatprep.subr.bf16.mxu0 %v11656_v35  ;;  %3810 = vmatprep.subr.bf16.mxu1 %v11659_v36  ;;  %v11724_v35 = vld [vmem:[#allocation3 + $0xa50] ss:$144 sps:$4 sm:$0xff]   ;;  %v11727_v36 = vld [vmem:[#allocation3 + $0xa58] ss:$144 sps:$4 sm:$0xff]  }
 0x104   :  { %3770 = vmatpush1.bf16.msra.mxu0 %v11654_v37  ;;  %3811 = vmatpush1.bf16.msra.mxu1 %v11657_v38  ;;  %v11732_v37 = vld [vmem:[#allocation3 + $0xb74] ss:$144 sps:$4 sm:$0xff]   ;;  %v11735_v38 = vld [vmem:[#allocation3 + $0xb7c] ss:$144 sps:$4 sm:$0xff]  }
 0x105   :  { %3771 = vmatprep.subr.bf16.mxu0 %v11662_v39  ;;  %3812 = vmatprep.subr.bf16.mxu1 %v11665_v40  ;;  %v11730_v39 = vld [vmem:[#allocation3 + $0xb70] ss:$144 sps:$4 sm:$0xff]   ;;  %v11733_v40 = vld [vmem:[#allocation3 + $0xb78] ss:$144 sps:$4 sm:$0xff]  }
 0x108   :  { %3772 = vmatpush1.bf16.msra.mxu0 %v11660_v43  ;;  %3813 = vmatpush1.bf16.msra.mxu1 %v11663_v45  ;;  %v553_v43 = vld [vmem:[#allocation3 + $0xdb0] sm:$0x33]  ;;  %v554_v45 = vld [vmem:[#allocation3 + $0xdb8] sm:$0x33] }
 0x109   :  { %10582 = vmatprep.subr.msk.bf16.mxu0 %vm3476_vm1, %v12937_v46  ;;  %10584 = vmatprep.subr.msk.bf16.mxu1 %vm3476_vm1, %v12939_v47 }
 0x10c   :  { %3774 = vmatpush1.bf16.msra.mxu0 %v12946_v57  ;;  %3815 = vmatpush1.bf16.msra.mxu1 %v12949_v58 }
 0x10d   :  { %3831 = vmatprep.subr.bf16.mxu0 %v11672_v52  ;;  %3872 = vmatprep.subr.bf16.mxu1 %v11675_v61  ;;  %v12959_v52 = vcombine.high %v553_v43, %v553_v43  ;;  %v12961_v61 = vcombine.high %v554_v45, %v554_v45 }
 0x10f   :  { %3782 = vmatmul.mubr.bf16.vlgmr.msra.gmra.mrb[8].mxu0 %v12905_v62  ;;  %3823 = vmatmul.mubr.bf16.vlgmr.msra.gmra.mrb[8].mxu1 %v12905_v62 }
 0x110   :  { %3832 = vmatpush1.bf16.msra.mxu0 %v11670_v63  ;;  %3873 = vmatpush1.bf16.msra.mxu1 %v11673_v0  ;;  %v10550_v63 = vcombine.low %v553_v43, %v553_v43  ;;  %v10552_v0 = vcombine.low %v554_v45, %v554_v45  ;;  %v11808_v43 = vld [vmem:[#allocation3 + $0xb84] ss:$144 sps:$4 sm:$0xff]   ;;  %v11811_v45 = vld [vmem:[#allocation3 + $0xb8c] ss:$144 sps:$4 sm:$0xff]  }
 0x111   :  { %3833 = vmatprep.subr.bf16.mxu0 %v11678_v1  ;;  %3874 = vmatprep.subr.bf16.mxu1 %v11681_v2  ;;  %v11748_v1 = vld [vmem:[#allocation3 + $0x44] ss:$144 sps:$4 sm:$0xff]  }
 0x112   :  { %10587 = vmatprep.mubr.msk.bf16.mxu0 %vm3472_vm0, %v12885_v44  ;;  %10589 = vmatprep.mubr.msk.bf16.mxu1 %vm3472_vm0, %v12885_v44  ;;  %v12968_v2 = vsel %vm3476_vm1, %v10550_v63, 0  ;;  %v11814_v63 = vld [vmem:[#allocation3 + $0xca4] ss:$144 sps:$4 sm:$0xff]  }
 0x114   :  { %3834 = vmatpush1.bf16.msra.mxu0 %v11676_v3  ;;  %3875 = vmatpush1.bf16.msra.mxu1 %v11679_v4  ;;  %v12971_v3 = vsel %vm3476_vm1, %v10552_v0, 0  ;;  %v11751_v4 = vld [vmem:[#allocation3 + $0x4c] ss:$144 sps:$4 sm:$0xff]  }
 0x115   :  { %3835 = vmatprep.subr.bf16.mxu0 %v11684_v5  ;;  %3876 = vmatprep.subr.bf16.mxu1 %v11687_v6  ;;  %v11746_v5 = vld [vmem:[#allocation3 + $0x40] ss:$144 sps:$4 sm:$0xff]   ;;  %v11749_v6 = vld [vmem:[#allocation3 + $0x48] ss:$144 sps:$4 sm:$0xff]   ;;  %v11817_v0 = vld [vmem:[#allocation3 + $0xcac] ss:$144 sps:$4 sm:$0xff]  }
 0x118   :  { %3836 = vmatpush1.bf16.msra.mxu0 %v11682_v7  ;;  %3877 = vmatpush1.bf16.msra.mxu1 %v11685_v8  ;;  %v11754_v7 = vld [vmem:[#allocation3 + $0x164] ss:$144 sps:$4 sm:$0xff]   ;;  %v11757_v8 = vld [vmem:[#allocation3 + $0x16c] ss:$144 sps:$4 sm:$0xff]  }
 0x119   :  { %3837 = vmatprep.subr.bf16.mxu0 %v11690_v9  ;;  %3878 = vmatprep.subr.bf16.mxu1 %v11693_v10  ;;  %v11752_v9 = vld [vmem:[#allocation3 + $0x160] ss:$144 sps:$4 sm:$0xff]   ;;  %v11755_v10 = vld [vmem:[#allocation3 + $0x168] ss:$144 sps:$4 sm:$0xff]  }
 0x11c   :  { %3838 = vmatpush1.bf16.msra.mxu0 %v11688_v11  ;;  %3879 = vmatpush1.bf16.msra.mxu1 %v11691_v12  ;;  %v11760_v11 = vld [vmem:[#allocation3 + $0x284] ss:$144 sps:$4 sm:$0xff]   ;;  %v11763_v12 = vld [vmem:[#allocation3 + $0x28c] ss:$144 sps:$4 sm:$0xff]  }
 0x11d   :  { %3839 = vmatprep.subr.bf16.mxu0 %v11696_v13  ;;  %3880 = vmatprep.subr.bf16.mxu1 %v11699_v14  ;;  %v11758_v13 = vld [vmem:[#allocation3 + $0x280] ss:$144 sps:$4 sm:$0xff]   ;;  %v11761_v14 = vld [vmem:[#allocation3 + $0x288] ss:$144 sps:$4 sm:$0xff]  }
 0x120   :  { %3840 = vmatpush1.bf16.msra.mxu0 %v11694_v15  ;;  %3881 = vmatpush1.bf16.msra.mxu1 %v11697_v16  ;;  %v11766_v15 = vld [vmem:[#allocation3 + $0x3a4] ss:$144 sps:$4 sm:$0xff]   ;;  %v11769_v16 = vld [vmem:[#allocation3 + $0x3ac] ss:$144 sps:$4 sm:$0xff]  }
 0x121   :  { %3841 = vmatprep.subr.bf16.mxu0 %v11702_v17  ;;  %3882 = vmatprep.subr.bf16.mxu1 %v11705_v18  ;;  %v11764_v17 = vld [vmem:[#allocation3 + $0x3a0] ss:$144 sps:$4 sm:$0xff]   ;;  %v11767_v18 = vld [vmem:[#allocation3 + $0x3a8] ss:$144 sps:$4 sm:$0xff]  }
 0x124   :  { %3842 = vmatpush1.bf16.msra.mxu0 %v11700_v19  ;;  %3883 = vmatpush1.bf16.msra.mxu1 %v11703_v20  ;;  %v11772_v19 = vld [vmem:[#allocation3 + $0x4c4] ss:$144 sps:$4 sm:$0xff]   ;;  %v11775_v20 = vld [vmem:[#allocation3 + $0x4cc] ss:$144 sps:$4 sm:$0xff]  }
 0x125   :  { %3843 = vmatprep.subr.bf16.mxu0 %v11708_v21  ;;  %3884 = vmatprep.subr.bf16.mxu1 %v11711_v22  ;;  %v11770_v21 = vld [vmem:[#allocation3 + $0x4c0] ss:$144 sps:$4 sm:$0xff]   ;;  %v11773_v22 = vld [vmem:[#allocation3 + $0x4c8] ss:$144 sps:$4 sm:$0xff]  }
 0x128   :  { %3844 = vmatpush1.bf16.msra.mxu0 %v11706_v23  ;;  %3885 = vmatpush1.bf16.msra.mxu1 %v11709_v24  ;;  %v11778_v23 = vld [vmem:[#allocation3 + $0x5e4] ss:$144 sps:$4 sm:$0xff]   ;;  %v11781_v24 = vld [vmem:[#allocation3 + $0x5ec] ss:$144 sps:$4 sm:$0xff]  }
 0x129   :  { %3845 = vmatprep.subr.bf16.mxu0 %v11714_v25  ;;  %3886 = vmatprep.subr.bf16.mxu1 %v11717_v26  ;;  %v11776_v25 = vld [vmem:[#allocation3 + $0x5e0] ss:$144 sps:$4 sm:$0xff]   ;;  %v11779_v26 = vld [vmem:[#allocation3 + $0x5e8] ss:$144 sps:$4 sm:$0xff]  }
 0x12c   :  { %3846 = vmatpush1.bf16.msra.mxu0 %v11712_v27  ;;  %3887 = vmatpush1.bf16.msra.mxu1 %v11715_v28  ;;  %v11784_v27 = vld [vmem:[#allocation3 + $0x704] ss:$144 sps:$4 sm:$0xff]   ;;  %v11787_v28 = vld [vmem:[#allocation3 + $0x70c] ss:$144 sps:$4 sm:$0xff]  }
 0x12d   :  { %3847 = vmatprep.subr.bf16.mxu0 %v11720_v29  ;;  %3888 = vmatprep.subr.bf16.mxu1 %v11723_v30  ;;  %v11782_v29 = vld [vmem:[#allocation3 + $0x700] ss:$144 sps:$4 sm:$0xff]   ;;  %v11785_v30 = vld [vmem:[#allocation3 + $0x708] ss:$144 sps:$4 sm:$0xff]  }
 0x130   :  { %3848 = vmatpush1.bf16.msra.mxu0 %v11718_v31  ;;  %3889 = vmatpush1.bf16.msra.mxu1 %v11721_v32  ;;  %v11790_v31 = vld [vmem:[#allocation3 + $0x824] ss:$144 sps:$4 sm:$0xff]   ;;  %v11793_v32 = vld [vmem:[#allocation3 + $0x82c] ss:$144 sps:$4 sm:$0xff]  }
 0x131   :  { %3849 = vmatprep.subr.bf16.mxu0 %v11726_v33  ;;  %3890 = vmatprep.subr.bf16.mxu1 %v11729_v34  ;;  %v11788_v33 = vld [vmem:[#allocation3 + $0x820] ss:$144 sps:$4 sm:$0xff]   ;;  %v11791_v34 = vld [vmem:[#allocation3 + $0x828] ss:$144 sps:$4 sm:$0xff]  }
 0x134   :  { %3850 = vmatpush1.bf16.msra.mxu0 %v11724_v35  ;;  %3891 = vmatpush1.bf16.msra.mxu1 %v11727_v36  ;;  %v11796_v35 = vld [vmem:[#allocation3 + $0x944] ss:$144 sps:$4 sm:$0xff]   ;;  %v11799_v36 = vld [vmem:[#allocation3 + $0x94c] ss:$144 sps:$4 sm:$0xff]  }
 0x135   :  { %3851 = vmatprep.subr.bf16.mxu0 %v11732_v37  ;;  %3892 = vmatprep.subr.bf16.mxu1 %v11735_v38  ;;  %v11794_v37 = vld [vmem:[#allocation3 + $0x940] ss:$144 sps:$4 sm:$0xff]   ;;  %v11797_v38 = vld [vmem:[#allocation3 + $0x948] ss:$144 sps:$4 sm:$0xff]  }
 0x138   :  { %3852 = vmatpush1.bf16.msra.mxu0 %v11730_v39  ;;  %3893 = vmatpush1.bf16.msra.mxu1 %v11733_v40  ;;  %v11802_v39 = vld [vmem:[#allocation3 + $0xa64] ss:$144 sps:$4 sm:$0xff]   ;;  %v11805_v40 = vld [vmem:[#allocation3 + $0xa6c] ss:$144 sps:$4 sm:$0xff]  }
 0x139   :  { %3853 = vmatprep.subr.bf16.mxu0 %v11738_v41  ;;  %3894 = vmatprep.subr.bf16.mxu1 %v11741_v42  ;;  %v11800_v41 = vld [vmem:[#allocation3 + $0xa60] ss:$144 sps:$4 sm:$0xff]   ;;  %v11803_v42 = vld [vmem:[#allocation3 + $0xa68] ss:$144 sps:$4 sm:$0xff]  }
 0x13c   :  { %3854 = vmatpush1.bf16.msra.mxu0 %v11736_v50  ;;  %3895 = vmatpush1.bf16.msra.mxu1 %v11739_v51  ;;  %v11806_v50 = vld [vmem:[#allocation3 + $0xb80] ss:$144 sps:$4 sm:$0xff]   ;;  %v11809_v51 = vld [vmem:[#allocation3 + $0xb88] ss:$144 sps:$4 sm:$0xff]  }
 0x13d   :  { %10586 = vmatprep.subr.msk.bf16.mxu0 %vm3476_vm1, %v12959_v52  ;;  %10588 = vmatprep.subr.msk.bf16.mxu1 %vm3476_vm1, %v12961_v61 }
 0x140   :  { %3856 = vmatpush1.bf16.msra.mxu0 %v12968_v2  ;;  %3897 = vmatpush1.bf16.msra.mxu1 %v12971_v3 }
 0x141   :  { %3913 = vmatprep.subr.bf16.mxu0 %v11748_v1  ;;  %3954 = vmatprep.subr.bf16.mxu1 %v11751_v4  ;;  %v555_v1 = vld [vmem:[#allocation3 + $0xdc0] sm:$0x33]  ;;  %v556_v4 = vld [vmem:[#allocation3 + $0xdc8] sm:$0x33] }
 0x143   :  { %3864 = vmatmul.mubr.bf16.vlgmr.msra.gmra.mrb[12].mxu0 %v12905_v62  ;;  %3905 = vmatmul.mubr.bf16.vlgmr.msra.gmra.mrb[12].mxu1 %v12905_v62 }
 0x144   :  { %3914 = vmatpush1.bf16.msra.mxu0 %v11746_v5  ;;  %3955 = vmatpush1.bf16.msra.mxu1 %v11749_v6  ;;  %v11812_v5 = vld [vmem:[#allocation3 + $0xca0] ss:$144 sps:$4 sm:$0xff]   ;;  %v11815_v6 = vld [vmem:[#allocation3 + $0xca8] ss:$144 sps:$4 sm:$0xff]  }
 0x145   :  { %3915 = vmatprep.subr.bf16.mxu0 %v11754_v7  ;;  %3956 = vmatprep.subr.bf16.mxu1 %v11757_v8  ;;  %v12981_v7 = vcombine.high %v555_v1, %v555_v1  ;;  %v12983_v8 = vcombine.high %v556_v4, %v556_v4 }
 0x146   :  { %10591 = vmatprep.mubr.msk.bf16.mxu0 %vm3472_vm0, %v12885_v44  ;;  %10593 = vmatprep.mubr.msk.bf16.mxu1 %vm3472_vm0, %v12885_v44 }
 0x147   :  { %16677 = vst [vmem:[#allocation17_spill] sm:$0xff] %v12983_v8 }
 0x148   :  { %3916 = vmatpush1.bf16.msra.mxu0 %v11752_v9  ;;  %3957 = vmatpush1.bf16.msra.mxu1 %v11755_v10  ;;  %v10554_v9 = vcombine.low %v555_v1, %v555_v1  ;;  %v10556_v10 = vcombine.low %v556_v4, %v556_v4  ;;  %v11866_v1 = vld [vmem:[#allocation3 + $0x834] ss:$144 sps:$4 sm:$0xff]   ;;  %v11869_v4 = vld [vmem:[#allocation3 + $0x83c] ss:$144 sps:$4 sm:$0xff]  }
 0x149   :  { %3917 = vmatprep.subr.bf16.mxu0 %v11760_v11  ;;  %3958 = vmatprep.subr.bf16.mxu1 %v11763_v12  ;;  %v11824_v11 = vld [vmem:[#allocation3 + $0x54] ss:$144 sps:$4 sm:$0xff]  }
 0x14a   :  { %v12990_v12 = vsel %vm3476_vm1, %v10554_v9, 0  ;;  %v11872_v9 = vld [vmem:[#allocation3 + $0x954] ss:$144 sps:$4 sm:$0xff]  }
 0x14b   :  { %16678 = vst [vmem:[#allocation18_spill] sm:$0xff] %v12990_v12 }
 0x14c   :  { %3918 = vmatpush1.bf16.msra.mxu0 %v11758_v13  ;;  %3959 = vmatpush1.bf16.msra.mxu1 %v11761_v14  ;;  %v12993_v13 = vsel %vm3476_vm1, %v10556_v10, 0  ;;  %v11827_v14 = vld [vmem:[#allocation3 + $0x5c] ss:$144 sps:$4 sm:$0xff]  }
 0x14d   :  { %3919 = vmatprep.subr.bf16.mxu0 %v11766_v15  ;;  %3960 = vmatprep.subr.bf16.mxu1 %v11769_v16  ;;  %16679 = vst [vmem:[#allocation19_spill] sm:$0xff] %v12993_v13  ;;  %v11822_v15 = vld [vmem:[#allocation3 + $0x50] ss:$144 sps:$4 sm:$0xff]   ;;  %v11825_v16 = vld [vmem:[#allocation3 + $0x58] ss:$144 sps:$4 sm:$0xff]  }
 0x14e   :  { %v11875_v10 = vld [vmem:[#allocation3 + $0x95c] ss:$144 sps:$4 sm:$0xff]  }
 0x150   :  { %3920 = vmatpush1.bf16.msra.mxu0 %v11764_v17  ;;  %3961 = vmatpush1.bf16.msra.mxu1 %v11767_v18  ;;  %v11830_v17 = vld [vmem:[#allocation3 + $0x174] ss:$144 sps:$4 sm:$0xff]   ;;  %v11833_v18 = vld [vmem:[#allocation3 + $0x17c] ss:$144 sps:$4 sm:$0xff]  }
 0x151   :  { %3921 = vmatprep.subr.bf16.mxu0 %v11772_v19  ;;  %3962 = vmatprep.subr.bf16.mxu1 %v11775_v20  ;;  %v11828_v19 = vld [vmem:[#allocation3 + $0x170] ss:$144 sps:$4 sm:$0xff]   ;;  %v11831_v20 = vld [vmem:[#allocation3 + $0x178] ss:$144 sps:$4 sm:$0xff]  }
 0x154   :  { %3922 = vmatpush1.bf16.msra.mxu0 %v11770_v21  ;;  %3963 = vmatpush1.bf16.msra.mxu1 %v11773_v22  ;;  %v11836_v21 = vld [vmem:[#allocation3 + $0x294] ss:$144 sps:$4 sm:$0xff]   ;;  %v11839_v22 = vld [vmem:[#allocation3 + $0x29c] ss:$144 sps:$4 sm:$0xff]  }
 0x155   :  { %3923 = vmatprep.subr.bf16.mxu0 %v11778_v23  ;;  %3964 = vmatprep.subr.bf16.mxu1 %v11781_v24 }
 0x158   :  { %3924 = vmatpush1.bf16.msra.mxu0 %v11776_v25  ;;  %3965 = vmatpush1.bf16.msra.mxu1 %v11779_v26 }
 0x159   :  { %3925 = vmatprep.subr.bf16.mxu0 %v11784_v27  ;;  %3966 = vmatprep.subr.bf16.mxu1 %v11787_v28  ;;  %v11834_v28 = vld [vmem:[#allocation3 + $0x290] ss:$144 sps:$4 sm:$0xff]  }
 0x15c   :  { %3926 = vmatpush1.bf16.msra.mxu0 %v11782_v29  ;;  %3967 = vmatpush1.bf16.msra.mxu1 %v11785_v30  ;;  %v11837_v29 = vld [vmem:[#allocation3 + $0x298] ss:$144 sps:$4 sm:$0xff]  }
 0x15d   :  { %3927 = vmatprep.subr.bf16.mxu0 %v11790_v31  ;;  %3968 = vmatprep.subr.bf16.mxu1 %v11793_v32  ;;  %v11842_v32 = vld [vmem:[#allocation3 + $0x3b4] ss:$144 sps:$4 sm:$0xff]  }
 0x160   :  { %3928 = vmatpush1.bf16.msra.mxu0 %v11788_v33  ;;  %3969 = vmatpush1.bf16.msra.mxu1 %v11791_v34  ;;  %v11845_v33 = vld [vmem:[#allocation3 + $0x3bc] ss:$144 sps:$4 sm:$0xff]  }
 0x161   :  { %3929 = vmatprep.subr.bf16.mxu0 %v11796_v35  ;;  %3970 = vmatprep.subr.bf16.mxu1 %v11799_v36  ;;  %v11840_v35 = vld [vmem:[#allocation3 + $0x3b0] ss:$144 sps:$4 sm:$0xff]   ;;  %v11843_v36 = vld [vmem:[#allocation3 + $0x3b8] ss:$144 sps:$4 sm:$0xff]  }
 0x164   :  { %3930 = vmatpush1.bf16.msra.mxu0 %v11794_v37  ;;  %3971 = vmatpush1.bf16.msra.mxu1 %v11797_v38  ;;  %v11848_v37 = vld [vmem:[#allocation3 + $0x4d4] ss:$144 sps:$4 sm:$0xff]   ;;  %v11851_v38 = vld [vmem:[#allocation3 + $0x4dc] ss:$144 sps:$4 sm:$0xff]  }
 0x165   :  { %3931 = vmatprep.subr.bf16.mxu0 %v11802_v39  ;;  %3972 = vmatprep.subr.bf16.mxu1 %v11805_v40  ;;  %v11846_v39 = vld [vmem:[#allocation3 + $0x4d0] ss:$144 sps:$4 sm:$0xff]   ;;  %v11849_v40 = vld [vmem:[#allocation3 + $0x4d8] ss:$144 sps:$4 sm:$0xff]  }
 0x168   :  { %3932 = vmatpush1.bf16.msra.mxu0 %v11800_v41  ;;  %3973 = vmatpush1.bf16.msra.mxu1 %v11803_v42  ;;  %v11854_v41 = vld [vmem:[#allocation3 + $0x5f4] ss:$144 sps:$4 sm:$0xff]   ;;  %v11857_v42 = vld [vmem:[#allocation3 + $0x5fc] ss:$144 sps:$4 sm:$0xff]  }
 0x169   :  { %3933 = vmatprep.subr.bf16.mxu0 %v11808_v43  ;;  %3974 = vmatprep.subr.bf16.mxu1 %v11811_v45  ;;  %v11852_v43 = vld [vmem:[#allocation3 + $0x5f0] ss:$144 sps:$4 sm:$0xff]   ;;  %v11855_v45 = vld [vmem:[#allocation3 + $0x5f8] ss:$144 sps:$4 sm:$0xff]  }
 0x16c   :  { %3934 = vmatpush1.bf16.msra.mxu0 %v11806_v50  ;;  %3975 = vmatpush1.bf16.msra.mxu1 %v11809_v51  ;;  %v11860_v50 = vld [vmem:[#allocation3 + $0x714] ss:$144 sps:$4 sm:$0xff]   ;;  %v11863_v51 = vld [vmem:[#allocation3 + $0x71c] ss:$144 sps:$4 sm:$0xff]  }
 0x16d   :  { %3935 = vmatprep.subr.bf16.mxu0 %v11814_v63  ;;  %3976 = vmatprep.subr.bf16.mxu1 %v11817_v0  ;;  %v11858_v63 = vld [vmem:[#allocation3 + $0x710] ss:$144 sps:$4 sm:$0xff]   ;;  %v11861_v0 = vld [vmem:[#allocation3 + $0x718] ss:$144 sps:$4 sm:$0xff]  }
 0x170   :  { %3936 = vmatpush1.bf16.msra.mxu0 %v11812_v5  ;;  %3977 = vmatpush1.bf16.msra.mxu1 %v11815_v6  ;;  %v11864_v5 = vld [vmem:[#allocation3 + $0x830] ss:$144 sps:$4 sm:$0xff]   ;;  %v11867_v6 = vld [vmem:[#allocation3 + $0x838] ss:$144 sps:$4 sm:$0xff]  }
 0x171   :  { %10590 = vmatprep.subr.msk.bf16.mxu0 %vm3476_vm1, %v12981_v7  ;;  %10592 = vmatprep.subr.msk.bf16.mxu1 %vm3476_vm1, %v12983_v8 }
 0x174   :  { %3938 = vmatpush1.bf16.msra.mxu0 %v12990_v12  ;;  %3979 = vmatpush1.bf16.msra.mxu1 %v12993_v13  ;;  %v680_v13 = vld [vmem:[#allocation7 + $0x388] sm:$0xff] }
 0x175   :  { %3995 = vmatprep.subr.bf16.mxu0 %v11824_v11  ;;  %4036 = vmatprep.subr.bf16.mxu1 %v11827_v14  ;;  %v11870_v11 = vld [vmem:[#allocation3 + $0x950] ss:$144 sps:$4 sm:$0xff]   ;;  %v11873_v14 = vld [vmem:[#allocation3 + $0x958] ss:$144 sps:$4 sm:$0xff]  }
 0x176   :  { %v684_v12 = vld [vmem:[#allocation7 + $0x3a8] sm:$0xff] }
 0x177   :  { %3946 = vmatmul.mubr.bf16.vlgmr.msra.gmra.mrb[16].mxu0 %v12905_v62  ;;  %3987 = vmatmul.mubr.bf16.vlgmr.msra.gmra.mrb[16].mxu1 %v12905_v62 }
 0x178   :  { %3996 = vmatpush1.bf16.msra.mxu0 %v11822_v15  ;;  %4037 = vmatpush1.bf16.msra.mxu1 %v11825_v16  ;;  %v11878_v15 = vld [vmem:[#allocation3 + $0xa74] ss:$144 sps:$4 sm:$0xff]   ;;  %v11881_v16 = vld [vmem:[#allocation3 + $0xa7c] ss:$144 sps:$4 sm:$0xff]  }
 0x179   :  { %3997 = vmatprep.subr.bf16.mxu0 %v11830_v17  ;;  %4038 = vmatprep.subr.bf16.mxu1 %v11833_v18  ;;  %v11876_v17 = vld [vmem:[#allocation3 + $0xa70] ss:$144 sps:$4 sm:$0xff]   ;;  %v11879_v18 = vld [vmem:[#allocation3 + $0xa78] ss:$144 sps:$4 sm:$0xff]  }
 0x17a   :  { %v12999_v23 = vpop.f32.mrb[0].mxu0  ;;  %10595 = vmatprep.mubr.msk.bf16.mxu0 %vm3472_vm0, %v12885_v44  ;;  %10597 = vmatprep.mubr.msk.bf16.mxu1 %vm3472_vm0, %v12885_v44  ;;  %v13005_v24 = vpop.f32.mrb[0].mxu1 }
 0x17b   :  { %v13007_v25 = vpop.f32.mrb[1].mxu0  ;;  %v13009_v26 = vpop.f32.mrb[1].mxu1 }
 0x17c   :  { %v3623_v27 = vpop.f32.mrb[2].mxu0  ;;  %3998 = vmatpush1.bf16.msra.mxu0 %v11828_v19  ;;  %4039 = vmatpush1.bf16.msra.mxu1 %v11831_v20  ;;  %v3664_v30 = vpop.f32.mrb[2].mxu1  ;;  %v11884_v19 = vld [vmem:[#allocation3 + $0xb94] ss:$144 sps:$4 sm:$0xff]   ;;  %v11887_v20 = vld [vmem:[#allocation3 + $0xb9c] ss:$144 sps:$4 sm:$0xff]  }
 0x17d   :  { %v3624_v31 = vpop.f32.mrb[3].mxu0  ;;  %3999 = vmatprep.subr.bf16.mxu0 %v11836_v21  ;;  %4040 = vmatprep.subr.bf16.mxu1 %v11839_v22  ;;  %v3665_v34 = vpop.f32.mrb[3].mxu1  ;;  %v11882_v21 = vld [vmem:[#allocation3 + $0xb90] ss:$144 sps:$4 sm:$0xff]   ;;  %v11885_v22 = vld [vmem:[#allocation3 + $0xb98] ss:$144 sps:$4 sm:$0xff]  }
 0x17e   :  { %v11890_v27 = vld [vmem:[#allocation3 + $0xcb4] ss:$144 sps:$4 sm:$0xff]   ;;  %v558_v30 = vld [vmem:[#allocation3 + $0xdd8] sm:$0x33]  ;;  %v11888_v31 = vld [vmem:[#allocation3 + $0xcb0] ss:$144 sps:$4 sm:$0xff]  }
 0x17f   :  { %v13013_v34 = vcombine.high %v558_v30, %v558_v30 }
 0x180   :  { %4000 = vmatpush1.bf16.msra.mxu0 %v11834_v28  ;;  %4041 = vmatpush1.bf16.msra.mxu1 %v11837_v29  ;;  %v11893_v28 = vld [vmem:[#allocation3 + $0xcbc] ss:$144 sps:$4 sm:$0xff]   ;;  %v557_v29 = vld [vmem:[#allocation3 + $0xdd0] sm:$0x33] }
 0x181   :  { %4001 = vmatprep.subr.bf16.mxu0 %v11842_v32  ;;  %4042 = vmatprep.subr.bf16.mxu1 %v11845_v33  ;;  %v11891_v32 = vld [vmem:[#allocation3 + $0xcb8] ss:$144 sps:$4 sm:$0xff]   ;;  %v13011_v33 = vcombine.high %v557_v29, %v557_v29  ;;  %16681 = vst [vmem:[#allocation21_spill] sm:$0xff] %v13013_v34 }
 0x183   :  { %16680 = vst [vmem:[#allocation20_spill] sm:$0xff] %v13011_v33 }
 0x184   :  { %4002 = vmatpush1.bf16.msra.mxu0 %v11840_v35  ;;  %4043 = vmatpush1.bf16.msra.mxu1 %v11843_v36  ;;  %v10558_v35 = vcombine.low %v557_v29, %v557_v29  ;;  %v10560_v36 = vcombine.low %v558_v30, %v558_v30  ;;  %v11930_v29 = vld [vmem:[#allocation3 + $0x604] ss:$144 sps:$4 sm:$0xff]   ;;  %v11933_v30 = vld [vmem:[#allocation3 + $0x60c] ss:$144 sps:$4 sm:$0xff]  }
 0x185   :  { %4003 = vmatprep.subr.bf16.mxu0 %v11848_v37  ;;  %4044 = vmatprep.subr.bf16.mxu1 %v11851_v38 }
 0x186   :  { %v13020_v37 = vsel %vm3476_vm1, %v10558_v35, 0  ;;  %v13023_v38 = vsel %vm3476_vm1, %v10560_v36, 0  ;;  %v11936_v35 = vld [vmem:[#allocation3 + $0x724] ss:$144 sps:$4 sm:$0xff]   ;;  %v11939_v36 = vld [vmem:[#allocation3 + $0x72c] ss:$144 sps:$4 sm:$0xff]  }
 0x187   :  { %16682 = vst [vmem:[#allocation22_spill] sm:$0xff] %v13020_v37  ;;  %16683 = vst [vmem:[#allocation23_spill] sm:$0xff] %v13023_v38 }
 0x188   :  { %4004 = vmatpush1.bf16.msra.mxu0 %v11846_v39  ;;  %4045 = vmatpush1.bf16.msra.mxu1 %v11849_v40  ;;  %v11900_v39 = vld [vmem:[#allocation3 + $0x64] ss:$144 sps:$4 sm:$0xff]   ;;  %v11903_v40 = vld [vmem:[#allocation3 + $0x6c] ss:$144 sps:$4 sm:$0xff]  }
 0x189   :  { %4005 = vmatprep.subr.bf16.mxu0 %v11854_v41  ;;  %4046 = vmatprep.subr.bf16.mxu1 %v11857_v42  ;;  %v11898_v41 = vld [vmem:[#allocation3 + $0x60] ss:$144 sps:$4 sm:$0xff]   ;;  %v11901_v42 = vld [vmem:[#allocation3 + $0x68] ss:$144 sps:$4 sm:$0xff]  }
 0x18c   :  { %4006 = vmatpush1.bf16.msra.mxu0 %v11852_v43  ;;  %4047 = vmatpush1.bf16.msra.mxu1 %v11855_v45  ;;  %v11906_v43 = vld [vmem:[#allocation3 + $0x184] ss:$144 sps:$4 sm:$0xff]   ;;  %v11909_v45 = vld [vmem:[#allocation3 + $0x18c] ss:$144 sps:$4 sm:$0xff]  }
 0x18d   :  { %4007 = vmatprep.subr.bf16.mxu0 %v11860_v50  ;;  %4048 = vmatprep.subr.bf16.mxu1 %v11863_v51  ;;  %v11904_v50 = vld [vmem:[#allocation3 + $0x180] ss:$144 sps:$4 sm:$0xff]   ;;  %v11907_v51 = vld [vmem:[#allocation3 + $0x188] ss:$144 sps:$4 sm:$0xff]  }
 0x190   :  { %4008 = vmatpush1.bf16.msra.mxu0 %v11858_v63  ;;  %4049 = vmatpush1.bf16.msra.mxu1 %v11861_v0  ;;  %v11912_v63 = vld [vmem:[#allocation3 + $0x2a4] ss:$144 sps:$4 sm:$0xff]   ;;  %v11915_v0 = vld [vmem:[#allocation3 + $0x2ac] ss:$144 sps:$4 sm:$0xff]  }
 0x191   :  { %4009 = vmatprep.subr.bf16.mxu0 %v11866_v1  ;;  %4050 = vmatprep.subr.bf16.mxu1 %v11869_v4 }
 0x194   :  { %4010 = vmatpush1.bf16.msra.mxu0 %v11864_v5  ;;  %4051 = vmatpush1.bf16.msra.mxu1 %v11867_v6 }
 0x195   :  { %4011 = vmatprep.subr.bf16.mxu0 %v11872_v9  ;;  %4052 = vmatprep.subr.bf16.mxu1 %v11875_v10  ;;  %v11910_v10 = vld [vmem:[#allocation3 + $0x2a0] ss:$144 sps:$4 sm:$0xff]  }
 0x198   :  { %4012 = vmatpush1.bf16.msra.mxu0 %v11870_v11  ;;  %4053 = vmatpush1.bf16.msra.mxu1 %v11873_v14  ;;  %v11913_v11 = vld [vmem:[#allocation3 + $0x2a8] ss:$144 sps:$4 sm:$0xff]  }
 0x199   :  { %4013 = vmatprep.subr.bf16.mxu0 %v11878_v15  ;;  %4054 = vmatprep.subr.bf16.mxu1 %v11881_v16  ;;  %v11918_v16 = vld [vmem:[#allocation3 + $0x3c4] ss:$144 sps:$4 sm:$0xff]  }
 0x19c   :  { %4014 = vmatpush1.bf16.msra.mxu0 %v11876_v17  ;;  %4055 = vmatpush1.bf16.msra.mxu1 %v11879_v18  ;;  %v11921_v17 = vld [vmem:[#allocation3 + $0x3cc] ss:$144 sps:$4 sm:$0xff]  }
 0x19d   :  { %4015 = vmatprep.subr.bf16.mxu0 %v11884_v19  ;;  %4056 = vmatprep.subr.bf16.mxu1 %v11887_v20  ;;  %v11916_v19 = vld [vmem:[#allocation3 + $0x3c0] ss:$144 sps:$4 sm:$0xff]   ;;  %v11919_v20 = vld [vmem:[#allocation3 + $0x3c8] ss:$144 sps:$4 sm:$0xff]  }
 0x1a0   :  { %4016 = vmatpush1.bf16.msra.mxu0 %v11882_v21  ;;  %4057 = vmatpush1.bf16.msra.mxu1 %v11885_v22  ;;  %v11924_v21 = vld [vmem:[#allocation3 + $0x4e4] ss:$144 sps:$4 sm:$0xff]   ;;  %v11927_v22 = vld [vmem:[#allocation3 + $0x4ec] ss:$144 sps:$4 sm:$0xff]  }
 0x1a1   :  { %4017 = vmatprep.subr.bf16.mxu0 %v11890_v27  ;;  %4058 = vmatprep.subr.bf16.mxu1 %v11893_v28  ;;  %v11922_v27 = vld [vmem:[#allocation3 + $0x4e0] ss:$144 sps:$4 sm:$0xff]   ;;  %v11925_v28 = vld [vmem:[#allocation3 + $0x4e8] ss:$144 sps:$4 sm:$0xff]  }
 0x1a4   :  { %4018 = vmatpush1.bf16.msra.mxu0 %v11888_v31  ;;  %4059 = vmatpush1.bf16.msra.mxu1 %v11891_v32  ;;  %v11928_v31 = vld [vmem:[#allocation3 + $0x600] ss:$144 sps:$4 sm:$0xff]   ;;  %v11931_v32 = vld [vmem:[#allocation3 + $0x608] ss:$144 sps:$4 sm:$0xff]  }
 0x1a5   :  { %10594 = vmatprep.subr.msk.bf16.mxu0 %vm3476_vm1, %v13011_v33  ;;  %10596 = vmatprep.subr.msk.bf16.mxu1 %vm3476_vm1, %v13013_v34  ;;  %v679_v34 = vld [vmem:[#allocation7 + $0x380] sm:$0xff] }
 0x1a6   :  { %v683_v33 = vld [vmem:[#allocation7 + $0x3a0] sm:$0xff] }
 0x1a8   :  { %4020 = vmatpush1.bf16.msra.mxu0 %v13020_v37  ;;  %4061 = vmatpush1.bf16.msra.mxu1 %v13023_v38 }
 0x1a9   :  { %4077 = vmatprep.subr.bf16.mxu0 %v11900_v39  ;;  %4118 = vmatprep.subr.bf16.mxu1 %v11903_v40  ;;  %v11934_v39 = vld [vmem:[#allocation3 + $0x720] ss:$144 sps:$4 sm:$0xff]   ;;  %v11937_v40 = vld [vmem:[#allocation3 + $0x728] ss:$144 sps:$4 sm:$0xff]  }
 0x1ab   :  { %4028 = vmatmul.mubr.bf16.vlgmr.msra.gmra.mrb[20].mxu0 %v12905_v62  ;;  %4069 = vmatmul.mubr.bf16.vlgmr.msra.gmra.mrb[20].mxu1 %v12905_v62 }
 0x1ac   :  { %4078 = vmatpush1.bf16.msra.mxu0 %v11898_v41  ;;  %4119 = vmatpush1.bf16.msra.mxu1 %v11901_v42  ;;  %v11942_v41 = vld [vmem:[#allocation3 + $0x844] ss:$144 sps:$4 sm:$0xff]   ;;  %v11945_v42 = vld [vmem:[#allocation3 + $0x84c] ss:$144 sps:$4 sm:$0xff]  }
 0x1ad   :  { %4079 = vmatprep.subr.bf16.mxu0 %v11906_v43  ;;  %4120 = vmatprep.subr.bf16.mxu1 %v11909_v45  ;;  %v11940_v43 = vld [vmem:[#allocation3 + $0x840] ss:$144 sps:$4 sm:$0xff]   ;;  %v11943_v45 = vld [vmem:[#allocation3 + $0x848] ss:$144 sps:$4 sm:$0xff]  }
 0x1ae   :  { %v13029_v1 = vpop.f32.mrb[4].mxu0  ;;  %v13031_v4 = vpop.f32.mrb[4].mxu1  ;;  %10599 = vmatprep.mubr.msk.bf16.mxu0 %vm3472_vm0, %v12885_v44  ;;  %10601 = vmatprep.mubr.msk.bf16.mxu1 %vm3472_vm0, %v12885_v44 }
 0x1af   :  { %v13037_v5 = vpop.f32.mrb[5].mxu0  ;;  %v13039_v6 = vpop.f32.mrb[5].mxu1 }
 0x1b0   :  { %v3705_v9 = vpop.f32.mrb[6].mxu0  ;;  %4080 = vmatpush1.bf16.msra.mxu0 %v11904_v50  ;;  %4121 = vmatpush1.bf16.msra.mxu1 %v11907_v51  ;;  %v3746_v14 = vpop.f32.mrb[6].mxu1  ;;  %v11948_v50 = vld [vmem:[#allocation3 + $0x964] ss:$144 sps:$4 sm:$0xff]   ;;  %v11951_v51 = vld [vmem:[#allocation3 + $0x96c] ss:$144 sps:$4 sm:$0xff]  }
 0x1b1   :  { %v3706_v15 = vpop.f32.mrb[7].mxu0  ;;  %4081 = vmatprep.subr.bf16.mxu0 %v11912_v63  ;;  %4122 = vmatprep.subr.bf16.mxu1 %v11915_v0  ;;  %v3747_v18 = vpop.f32.mrb[7].mxu1  ;;  %v11946_v63 = vld [vmem:[#allocation3 + $0x960] ss:$144 sps:$4 sm:$0xff]   ;;  %v11949_v0 = vld [vmem:[#allocation3 + $0x968] ss:$144 sps:$4 sm:$0xff]  }
 0x1b2   :  { %v11954_v9 = vld [vmem:[#allocation3 + $0xa84] ss:$144 sps:$4 sm:$0xff]   ;;  %v11955_v14 = vld [vmem:[#allocation3 + $0xa88] ss:$144 sps:$4 sm:$0xff]  }
 0x1b3   :  { %v11960_v15 = vld [vmem:[#allocation3 + $0xba4] ss:$144 sps:$4 sm:$0xff]   ;;  %v11961_v18 = vld [vmem:[#allocation3 + $0xba8] ss:$144 sps:$4 sm:$0xff]  }
 0x1b4   :  { %4082 = vmatpush1.bf16.msra.mxu0 %v11910_v10  ;;  %4123 = vmatpush1.bf16.msra.mxu1 %v11913_v11  ;;  %v11957_v10 = vld [vmem:[#allocation3 + $0xa8c] ss:$144 sps:$4 sm:$0xff]   ;;  %v11952_v11 = vld [vmem:[#allocation3 + $0xa80] ss:$144 sps:$4 sm:$0xff]  }
 0x1b5   :  { %4083 = vmatprep.subr.bf16.mxu0 %v11918_v16  ;;  %4124 = vmatprep.subr.bf16.mxu1 %v11921_v17  ;;  %v11963_v16 = vld [vmem:[#allocation3 + $0xbac] ss:$144 sps:$4 sm:$0xff]   ;;  %v11958_v17 = vld [vmem:[#allocation3 + $0xba0] ss:$144 sps:$4 sm:$0xff]  }
 0x1b8   :  { %4084 = vmatpush1.bf16.msra.mxu0 %v11916_v19  ;;  %4125 = vmatpush1.bf16.msra.mxu1 %v11919_v20  ;;  %v11966_v19 = vld [vmem:[#allocation3 + $0xcc4] ss:$144 sps:$4 sm:$0xff]   ;;  %v11969_v20 = vld [vmem:[#allocation3 + $0xccc] ss:$144 sps:$4 sm:$0xff]  }
 0x1b9   :  { %4085 = vmatprep.subr.bf16.mxu0 %v11924_v21  ;;  %4126 = vmatprep.subr.bf16.mxu1 %v11927_v22  ;;  %v559_v21 = vld [vmem:[#allocation3 + $0xde0] sm:$0x33]  ;;  %v560_v22 = vld [vmem:[#allocation3 + $0xde8] sm:$0x33] }
 0x1bc   :  { %4086 = vmatpush1.bf16.msra.mxu0 %v11922_v27  ;;  %4127 = vmatpush1.bf16.msra.mxu1 %v11925_v28  ;;  %v11964_v27 = vld [vmem:[#allocation3 + $0xcc0] ss:$144 sps:$4 sm:$0xff]   ;;  %v11967_v28 = vld [vmem:[#allocation3 + $0xcc8] ss:$144 sps:$4 sm:$0xff]  }
 0x1bd   :  { %4087 = vmatprep.subr.bf16.mxu0 %v11930_v29  ;;  %4128 = vmatprep.subr.bf16.mxu1 %v11933_v30  ;;  %v13041_v29 = vcombine.high %v559_v21, %v559_v21  ;;  %v13043_v30 = vcombine.high %v560_v22, %v560_v22 }
 0x1bf   :  { %16684 = vst [vmem:[#allocation24_spill] sm:$0xff] %v13041_v29  ;;  %16685 = vst [vmem:[#allocation25_spill] sm:$0xff] %v13043_v30 }
 0x1c0   :  { %4088 = vmatpush1.bf16.msra.mxu0 %v11928_v31  ;;  %4129 = vmatpush1.bf16.msra.mxu1 %v11931_v32  ;;  %v10562_v31 = vcombine.low %v559_v21, %v559_v21  ;;  %v10564_v32 = vcombine.low %v560_v22, %v560_v22 }
 0x1c1   :  { %4089 = vmatprep.subr.bf16.mxu0 %v11936_v35  ;;  %4130 = vmatprep.subr.bf16.mxu1 %v11939_v36 }
 0x1c2   :  { %v13050_v35 = vsel %vm3476_vm1, %v10562_v31, 0  ;;  %v13053_v36 = vsel %vm3476_vm1, %v10564_v32, 0  ;;  %v11992_v32 = vld [vmem:[#allocation3 + $0x3d0] ss:$144 sps:$4 sm:$0xff]  }
 0x1c3   :  { %16686 = vst [vmem:[#allocation26_spill] sm:$0xff] %v13050_v35  ;;  %16687 = vst [vmem:[#allocation27_spill] sm:$0xff] %v13053_v36 }
 0x1c4   :  { %4090 = vmatpush1.bf16.msra.mxu0 %v11934_v39  ;;  %4131 = vmatpush1.bf16.msra.mxu1 %v11937_v40  ;;  %v11976_v39 = vld [vmem:[#allocation3 + $0x74] ss:$144 sps:$4 sm:$0xff]   ;;  %v11979_v40 = vld [vmem:[#allocation3 + $0x7c] ss:$144 sps:$4 sm:$0xff]  }
 0x1c5   :  { %4091 = vmatprep.subr.bf16.mxu0 %v11942_v41  ;;  %4132 = vmatprep.subr.bf16.mxu1 %v11945_v42  ;;  %v11974_v41 = vld [vmem:[#allocation3 + $0x70] ss:$144 sps:$4 sm:$0xff]   ;;  %v11977_v42 = vld [vmem:[#allocation3 + $0x78] ss:$144 sps:$4 sm:$0xff]  }
 0x1c8   :  { %4092 = vmatpush1.bf16.msra.mxu0 %v11940_v43  ;;  %4133 = vmatpush1.bf16.msra.mxu1 %v11943_v45  ;;  %v11982_v43 = vld [vmem:[#allocation3 + $0x194] ss:$144 sps:$4 sm:$0xff]   ;;  %v11985_v45 = vld [vmem:[#allocation3 + $0x19c] ss:$144 sps:$4 sm:$0xff]  }
 0x1c9   :  { %4093 = vmatprep.subr.bf16.mxu0 %v11948_v50  ;;  %4134 = vmatprep.subr.bf16.mxu1 %v11951_v51  ;;  %v11980_v50 = vld [vmem:[#allocation3 + $0x190] ss:$144 sps:$4 sm:$0xff]   ;;  %v11983_v51 = vld [vmem:[#allocation3 + $0x198] ss:$144 sps:$4 sm:$0xff]  }
 0x1cc   :  { %4094 = vmatpush1.bf16.msra.mxu0 %v11946_v63  ;;  %4135 = vmatpush1.bf16.msra.mxu1 %v11949_v0  ;;  %v11988_v63 = vld [vmem:[#allocation3 + $0x2b4] ss:$144 sps:$4 sm:$0xff]   ;;  %v11991_v0 = vld [vmem:[#allocation3 + $0x2bc] ss:$144 sps:$4 sm:$0xff]  }
 0x1cd   :  { %4095 = vmatprep.subr.bf16.mxu0 %v11954_v9  ;;  %4136 = vmatprep.subr.bf16.mxu1 %v11957_v10 }
 0x1d0   :  { %4096 = vmatpush1.bf16.msra.mxu0 %v11952_v11  ;;  %4137 = vmatpush1.bf16.msra.mxu1 %v11955_v14 }
 0x1d1   :  { %4097 = vmatprep.subr.bf16.mxu0 %v11960_v15  ;;  %4138 = vmatprep.subr.bf16.mxu1 %v11963_v16  ;;  %v12068_v16 = vld [vmem:[#allocation3 + $0x3e0] ss:$144 sps:$4 sm:$0xff]  }
 0x1d4   :  { %4098 = vmatpush1.bf16.msra.mxu0 %v11958_v17  ;;  %4139 = vmatpush1.bf16.msra.mxu1 %v11961_v18 }
 0x1d5   :  { %4099 = vmatprep.subr.bf16.mxu0 %v11966_v19  ;;  %4140 = vmatprep.subr.bf16.mxu1 %v11969_v20  ;;  %v11986_v19 = vld [vmem:[#allocation3 + $0x2b0] ss:$144 sps:$4 sm:$0xff]   ;;  %v11989_v20 = vld [vmem:[#allocation3 + $0x2b8] ss:$144 sps:$4 sm:$0xff]  }
 0x1d8   :  { %4100 = vmatpush1.bf16.msra.mxu0 %v11964_v27  ;;  %4141 = vmatpush1.bf16.msra.mxu1 %v11967_v28  ;;  %v11994_v27 = vld [vmem:[#allocation3 + $0x3d4] ss:$144 sps:$4 sm:$0xff]   ;;  %v11997_v28 = vld [vmem:[#allocation3 + $0x3dc] ss:$144 sps:$4 sm:$0xff]  }
 0x1d9   :  { %10598 = vmatprep.subr.msk.bf16.mxu0 %vm3476_vm1, %v13041_v29  ;;  %10600 = vmatprep.subr.msk.bf16.mxu1 %vm3476_vm1, %v13043_v30 }
 0x1dc   :  { %4102 = vmatpush1.bf16.msra.mxu0 %v13050_v35  ;;  %4143 = vmatpush1.bf16.msra.mxu1 %v13053_v36  ;;  %v588_v36 = vld [vmem:[#allocation7 + $0xa8] sm:$0xff] }
 0x1dd   :  { %4159 = vmatprep.subr.bf16.mxu0 %v11976_v39  ;;  %4200 = vmatprep.subr.bf16.mxu1 %v11979_v40  ;;  %v11995_v39 = vld [vmem:[#allocation3 + $0x3d8] ss:$144 sps:$4 sm:$0xff]   ;;  %v12000_v40 = vld [vmem:[#allocation3 + $0x4f4] ss:$144 sps:$4 sm:$0xff]  }
 0x1df   :  { %4110 = vmatmul.mubr.bf16.vlgmr.msra.gmra.mrb[24].mxu0 %v12905_v62  ;;  %4151 = vmatmul.mubr.bf16.vlgmr.msra.gmra.mrb[24].mxu1 %v12905_v62 }
 0x1e0   :  { %4160 = vmatpush1.bf16.msra.mxu0 %v11974_v41  ;;  %4201 = vmatpush1.bf16.msra.mxu1 %v11977_v42  ;;  %v12003_v41 = vld [vmem:[#allocation3 + $0x4fc] ss:$144 sps:$4 sm:$0xff]   ;;  %v11998_v42 = vld [vmem:[#allocation3 + $0x4f0] ss:$144 sps:$4 sm:$0xff]  }
 0x1e1   :  { %4161 = vmatprep.subr.bf16.mxu0 %v11982_v43  ;;  %4202 = vmatprep.subr.bf16.mxu1 %v11985_v45  ;;  %v12001_v43 = vld [vmem:[#allocation3 + $0x4f8] ss:$144 sps:$4 sm:$0xff]   ;;  %v12006_v45 = vld [vmem:[#allocation3 + $0x614] ss:$144 sps:$4 sm:$0xff]  }
 0x1e2   :  { %v13059_v9 = vpop.f32.mrb[8].mxu0  ;;  %v13061_v10 = vpop.f32.mrb[8].mxu1  ;;  %10603 = vmatprep.mubr.msk.bf16.mxu0 %vm3472_vm0, %v12885_v44  ;;  %10605 = vmatprep.mubr.msk.bf16.mxu1 %vm3472_vm0, %v12885_v44 }
 0x1e3   :  { %v13069_v14 = vpop.f32.mrb[9].mxu0  ;;  %v13071_v15 = vpop.f32.mrb[9].mxu1 }
 0x1e4   :  { %v3787_v18 = vpop.f32.mrb[10].mxu0  ;;  %4162 = vmatpush1.bf16.msra.mxu0 %v11980_v50  ;;  %4203 = vmatpush1.bf16.msra.mxu1 %v11983_v51  ;;  %v3828_v21 = vpop.f32.mrb[10].mxu1  ;;  %v12009_v50 = vld [vmem:[#allocation3 + $0x61c] ss:$144 sps:$4 sm:$0xff]   ;;  %v12004_v51 = vld [vmem:[#allocation3 + $0x610] ss:$144 sps:$4 sm:$0xff]  }
 0x1e5   :  { %v3788_v22 = vpop.f32.mrb[11].mxu0  ;;  %4163 = vmatprep.subr.bf16.mxu0 %v11988_v63  ;;  %4204 = vmatprep.subr.bf16.mxu1 %v11991_v0  ;;  %v3829_v31 = vpop.f32.mrb[11].mxu1  ;;  %v12007_v63 = vld [vmem:[#allocation3 + $0x618] ss:$144 sps:$4 sm:$0xff]   ;;  %v12012_v0 = vld [vmem:[#allocation3 + $0x734] ss:$144 sps:$4 sm:$0xff]  }
 0x1e6   :  { %v12015_v18 = vld [vmem:[#allocation3 + $0x73c] ss:$144 sps:$4 sm:$0xff]   ;;  %v12018_v21 = vld [vmem:[#allocation3 + $0x854] ss:$144 sps:$4 sm:$0xff]  }
 0x1e7   :  { %v12021_v22 = vld [vmem:[#allocation3 + $0x85c] ss:$144 sps:$4 sm:$0xff]   ;;  %v12024_v31 = vld [vmem:[#allocation3 + $0x974] ss:$144 sps:$4 sm:$0xff]  }
 0x1e8   :  { %4164 = vmatpush1.bf16.msra.mxu0 %v11986_v19  ;;  %4205 = vmatpush1.bf16.msra.mxu1 %v11989_v20  ;;  %v12010_v19 = vld [vmem:[#allocation3 + $0x730] ss:$144 sps:$4 sm:$0xff]   ;;  %v12013_v20 = vld [vmem:[#allocation3 + $0x738] ss:$144 sps:$4 sm:$0xff]  }
 0x1e9   :  { %4165 = vmatprep.subr.bf16.mxu0 %v11994_v27  ;;  %4206 = vmatprep.subr.bf16.mxu1 %v11997_v28  ;;  %v12016_v27 = vld [vmem:[#allocation3 + $0x850] ss:$144 sps:$4 sm:$0xff]   ;;  %v12019_v28 = vld [vmem:[#allocation3 + $0x858] ss:$144 sps:$4 sm:$0xff]  }
 0x1ec   :  { %4166 = vmatpush1.bf16.msra.mxu0 %v11992_v32  ;;  %4207 = vmatpush1.bf16.msra.mxu1 %v11995_v39  ;;  %v12027_v32 = vld [vmem:[#allocation3 + $0x97c] ss:$144 sps:$4 sm:$0xff]   ;;  %v12022_v39 = vld [vmem:[#allocation3 + $0x970] ss:$144 sps:$4 sm:$0xff]  }
 0x1ed   :  { %4167 = vmatprep.subr.bf16.mxu0 %v12000_v40  ;;  %4208 = vmatprep.subr.bf16.mxu1 %v12003_v41  ;;  %v12025_v40 = vld [vmem:[#allocation3 + $0x978] ss:$144 sps:$4 sm:$0xff]   ;;  %v12030_v41 = vld [vmem:[#allocation3 + $0xa94] ss:$144 sps:$4 sm:$0xff]  }
 0x1f0   :  { %4168 = vmatpush1.bf16.msra.mxu0 %v11998_v42  ;;  %4209 = vmatpush1.bf16.msra.mxu1 %v12001_v43  ;;  %v12033_v42 = vld [vmem:[#allocation3 + $0xa9c] ss:$144 sps:$4 sm:$0xff]   ;;  %v12028_v43 = vld [vmem:[#allocation3 + $0xa90] ss:$144 sps:$4 sm:$0xff]  }
 0x1f1   :  { %4169 = vmatprep.subr.bf16.mxu0 %v12006_v45  ;;  %4210 = vmatprep.subr.bf16.mxu1 %v12009_v50  ;;  %v12031_v45 = vld [vmem:[#allocation3 + $0xa98] ss:$144 sps:$4 sm:$0xff]   ;;  %v12036_v50 = vld [vmem:[#allocation3 + $0xbb4] ss:$144 sps:$4 sm:$0xff]  }
 0x1f4   :  { %4170 = vmatpush1.bf16.msra.mxu0 %v12004_v51  ;;  %4211 = vmatpush1.bf16.msra.mxu1 %v12007_v63  ;;  %v12039_v51 = vld [vmem:[#allocation3 + $0xbbc] ss:$144 sps:$4 sm:$0xff]   ;;  %v12034_v63 = vld [vmem:[#allocation3 + $0xbb0] ss:$144 sps:$4 sm:$0xff]  }
 0x1f5   :  { %4171 = vmatprep.subr.bf16.mxu0 %v12012_v0  ;;  %4212 = vmatprep.subr.bf16.mxu1 %v12015_v18  ;;  %v12037_v0 = vld [vmem:[#allocation3 + $0xbb8] ss:$144 sps:$4 sm:$0xff]   ;;  %v12042_v18 = vld [vmem:[#allocation3 + $0xcd4] ss:$144 sps:$4 sm:$0xff]  }
 0x1f8   :  { %4172 = vmatpush1.bf16.msra.mxu0 %v12010_v19  ;;  %4213 = vmatpush1.bf16.msra.mxu1 %v12013_v20  ;;  %v12045_v19 = vld [vmem:[#allocation3 + $0xcdc] ss:$144 sps:$4 sm:$0xff]   ;;  %v561_v20 = vld [vmem:[#allocation3 + $0xdf0] sm:$0x33] }
 0x1f9   :  { %4173 = vmatprep.subr.bf16.mxu0 %v12018_v21  ;;  %4214 = vmatprep.subr.bf16.mxu1 %v12021_v22  ;;  %v562_v21 = vld [vmem:[#allocation3 + $0xdf8] sm:$0x33]  ;;  %v12040_v22 = vld [vmem:[#allocation3 + $0xcd0] ss:$144 sps:$4 sm:$0xff]  }
 0x1fc   :  { %4174 = vmatpush1.bf16.msra.mxu0 %v12016_v27  ;;  %4215 = vmatpush1.bf16.msra.mxu1 %v12019_v28  ;;  %v12043_v27 = vld [vmem:[#allocation3 + $0xcd8] ss:$144 sps:$4 sm:$0xff]   ;;  %v13077_v28 = vcombine.high %v561_v20, %v561_v20 }
 0x1fd   :  { %4175 = vmatprep.subr.bf16.mxu0 %v12024_v31  ;;  %4216 = vmatprep.subr.bf16.mxu1 %v12027_v32  ;;  %v13079_v31 = vcombine.high %v562_v21, %v562_v21  ;;  %v10566_v32 = vcombine.low %v561_v20, %v561_v20  ;;  %v12067_v20 = vld [vmem:[#allocation3 + $0x2cc] ss:$144 sps:$4 sm:$0xff]  }
 0x1fe   :  { %16688 = vst [vmem:[#allocation28_spill] sm:$0xff] %v13077_v28 }
 0x1ff   :  { %16689 = vst [vmem:[#allocation29_spill] sm:$0xff] %v13079_v31 }
 0x200   :  { %4176 = vmatpush1.bf16.msra.mxu0 %v12022_v39  ;;  %4217 = vmatpush1.bf16.msra.mxu1 %v12025_v40  ;;  %v10568_v39 = vcombine.low %v562_v21, %v562_v21  ;;  %v13086_v40 = vsel %vm3476_vm1, %v10566_v32, 0  ;;  %v12070_v32 = vld [vmem:[#allocation3 + $0x3e4] ss:$144 sps:$4 sm:$0xff]  }
 0x201   :  { %4177 = vmatprep.subr.bf16.mxu0 %v12030_v41  ;;  %4218 = vmatprep.subr.bf16.mxu1 %v12033_v42  ;;  %16690 = vst [vmem:[#allocation30_spill] sm:$0xff] %v13086_v40  ;;  %v12052_v42 = vld [vmem:[#allocation3 + $0x84] ss:$144 sps:$4 sm:$0xff]  }
 0x202   :  { %v13089_v41 = vsel %vm3476_vm1, %v10568_v39, 0 }
 0x203   :  { %16691 = vst [vmem:[#allocation31_spill] sm:$0xff] %v13089_v41 }
 0x204   :  { %4178 = vmatpush1.bf16.msra.mxu0 %v12028_v43  ;;  %4219 = vmatpush1.bf16.msra.mxu1 %v12031_v45  ;;  %v12055_v43 = vld [vmem:[#allocation3 + $0x8c] ss:$144 sps:$4 sm:$0xff]   ;;  %v12050_v45 = vld [vmem:[#allocation3 + $0x80] ss:$144 sps:$4 sm:$0xff]  }
 0x205   :  { %4179 = vmatprep.subr.bf16.mxu0 %v12036_v50  ;;  %4220 = vmatprep.subr.bf16.mxu1 %v12039_v51  ;;  %v12053_v50 = vld [vmem:[#allocation3 + $0x88] ss:$144 sps:$4 sm:$0xff]   ;;  %v12058_v51 = vld [vmem:[#allocation3 + $0x1a4] ss:$144 sps:$4 sm:$0xff]  }
 0x208   :  { %4180 = vmatpush1.bf16.msra.mxu0 %v12034_v63  ;;  %4221 = vmatpush1.bf16.msra.mxu1 %v12037_v0  ;;  %v12061_v63 = vld [vmem:[#allocation3 + $0x1ac] ss:$144 sps:$4 sm:$0xff]   ;;  %v12056_v0 = vld [vmem:[#allocation3 + $0x1a0] ss:$144 sps:$4 sm:$0xff]  }
 0x209   :  { %4181 = vmatprep.subr.bf16.mxu0 %v12042_v18  ;;  %4222 = vmatprep.subr.bf16.mxu1 %v12045_v19  ;;  %v12059_v18 = vld [vmem:[#allocation3 + $0x1a8] ss:$144 sps:$4 sm:$0xff]   ;;  %v12064_v19 = vld [vmem:[#allocation3 + $0x2c4] ss:$144 sps:$4 sm:$0xff]  }
 0x20c   :  { %4182 = vmatpush1.bf16.msra.mxu0 %v12040_v22  ;;  %4223 = vmatpush1.bf16.msra.mxu1 %v12043_v27  ;;  %v12073_v27 = vld [vmem:[#allocation3 + $0x3ec] ss:$144 sps:$4 sm:$0xff]  }
 0x20d   :  { %10602 = vmatprep.subr.msk.bf16.mxu0 %vm3476_vm1, %v13077_v28  ;;  %10604 = vmatprep.subr.msk.bf16.mxu1 %vm3476_vm1, %v13079_v31  ;;  %v587_v31 = vld [vmem:[#allocation7 + $0xa0] sm:$0xff]  ;;  %v584_v28 = vld [vmem:[#allocation7 + $0x88] sm:$0xff] }
 0x20e   :  { %v13175_v35 = vcombine.low %v584_v28, %v588_v36 }
 0x210   :  { %4184 = vmatpush1.bf16.msra.mxu0 %v13086_v40  ;;  %4225 = vmatpush1.bf16.msra.mxu1 %v13089_v41  ;;  %v12071_v41 = vld [vmem:[#allocation3 + $0x3e8] ss:$144 sps:$4 sm:$0xff]   ;;  %16707 = vst [vmem:[#allocation47_spill] sm:$0xff] %v13175_v35 }
 0x211   :  { %4241 = vmatprep.subr.bf16.mxu0 %v12052_v42  ;;  %4282 = vmatprep.subr.bf16.mxu1 %v12055_v43  ;;  %v12076_v43 = vld [vmem:[#allocation3 + $0x504] ss:$144 sps:$4 sm:$0xff]   ;;  %v583_v40 = vld [vmem:[#allocation7 + $0x80] sm:$0xff] }
 0x213   :  { %4192 = vmatmul.mubr.bf16.vlgmr.msra.gmra.mrb[28].mxu0 %v12905_v62  ;;  %4233 = vmatmul.mubr.bf16.vlgmr.msra.gmra.mrb[28].mxu1 %v12905_v62 }
 0x214   :  { %4242 = vmatpush1.bf16.msra.mxu0 %v12050_v45  ;;  %4283 = vmatpush1.bf16.msra.mxu1 %v12053_v50  ;;  %v12079_v45 = vld [vmem:[#allocation3 + $0x50c] ss:$144 sps:$4 sm:$0xff]  }
 0x215   :  { %4243 = vmatprep.subr.bf16.mxu0 %v12058_v51  ;;  %4284 = vmatprep.subr.bf16.mxu1 %v12061_v63  ;;  %v12065_v51 = vld [vmem:[#allocation3 + $0x2c8] ss:$144 sps:$4 sm:$0xff]  }
 0x216   :  { %v13095_v21 = vpop.f32.mrb[12].mxu0  ;;  %v13097_v22 = vpop.f32.mrb[12].mxu1  ;;  %10607 = vmatprep.mubr.msk.bf16.mxu0 %vm3472_vm0, %v12885_v44  ;;  %10609 = vmatprep.mubr.msk.bf16.mxu1 %vm3472_vm0, %v12885_v44  ;;  %v12062_v44 = vld [vmem:[#allocation3 + $0x2c0] ss:$144 sps:$4 sm:$0xff]  }
 0x217   :  { %v13107_v39 = vpop.f32.mrb[13].mxu0  ;;  %v13109_v42 = vpop.f32.mrb[13].mxu1 }
 0x218   :  { %v3869_v50 = vpop.f32.mrb[14].mxu0  ;;  %4244 = vmatpush1.bf16.msra.mxu0 %v12056_v0  ;;  %4285 = vmatpush1.bf16.msra.mxu1 %v12059_v18  ;;  %v3910_v63 = vpop.f32.mrb[14].mxu1  ;;  %v12074_v0 = vld [vmem:[#allocation3 + $0x500] ss:$144 sps:$4 sm:$0xff]   ;;  %v12077_v18 = vld [vmem:[#allocation3 + $0x508] ss:$144 sps:$4 sm:$0xff]  }
 0x219   :  { %v3870_v17 = vpop.f32.mrb[15].mxu0  ;;  %4245 = vmatprep.subr.bf16.mxu0 %v12064_v19  ;;  %4286 = vmatprep.subr.bf16.mxu1 %v12067_v20  ;;  %v3911_v11 = vpop.f32.mrb[15].mxu1  ;;  %v12085_v19 = vld [vmem:[#allocation3 + $0x62c] ss:$144 sps:$4 sm:$0xff]   ;;  %v12080_v20 = vld [vmem:[#allocation3 + $0x620] ss:$144 sps:$4 sm:$0xff]  }
 0x21a   :  { %v12082_v17 = vld [vmem:[#allocation3 + $0x624] ss:$144 sps:$4 sm:$0xff]   ;;  %v12083_v11 = vld [vmem:[#allocation3 + $0x628] ss:$144 sps:$4 sm:$0xff]   ;;  %v12103_v63 = vld [vmem:[#allocation3 + $0x98c] ss:$144 sps:$4 sm:$0xff]  }
 0x21b   :  { %v12088_v50 = vld [vmem:[#allocation3 + $0x744] ss:$144 sps:$4 sm:$0xff]  }
 0x21c   :  { %4246 = vmatpush1.bf16.msra.mxu0 %v12062_v44  ;;  %4287 = vmatpush1.bf16.msra.mxu1 %v12065_v51  ;;  %v12091_v44 = vld [vmem:[#allocation3 + $0x74c] ss:$144 sps:$4 sm:$0xff]   ;;  %v12100_v51 = vld [vmem:[#allocation3 + $0x984] ss:$144 sps:$4 sm:$0xff]  }
 0x21d   :  { %4247 = vmatprep.subr.bf16.mxu0 %v12070_v32  ;;  %4288 = vmatprep.subr.bf16.mxu1 %v12073_v27  ;;  %v12086_v27 = vld [vmem:[#allocation3 + $0x740] ss:$144 sps:$4 sm:$0xff]   ;;  %v12089_v32 = vld [vmem:[#allocation3 + $0x748] ss:$144 sps:$4 sm:$0xff]  }
 0x220   :  { %4248 = vmatpush1.bf16.msra.mxu0 %v12068_v16  ;;  %4289 = vmatpush1.bf16.msra.mxu1 %v12071_v41  ;;  %v12094_v16 = vld [vmem:[#allocation3 + $0x864] ss:$144 sps:$4 sm:$0xff]   ;;  %v12097_v41 = vld [vmem:[#allocation3 + $0x86c] ss:$144 sps:$4 sm:$0xff]  }
 0x221   :  { %4249 = vmatprep.subr.bf16.mxu0 %v12076_v43  ;;  %4290 = vmatprep.subr.bf16.mxu1 %v12079_v45  ;;  %v12092_v43 = vld [vmem:[#allocation3 + $0x860] ss:$144 sps:$4 sm:$0xff]   ;;  %v12095_v45 = vld [vmem:[#allocation3 + $0x868] ss:$144 sps:$4 sm:$0xff]  }
 0x224   :  { %4250 = vmatpush1.bf16.msra.mxu0 %v12074_v0  ;;  %4291 = vmatpush1.bf16.msra.mxu1 %v12077_v18  ;;  %v12098_v0 = vld [vmem:[#allocation3 + $0x980] ss:$144 sps:$4 sm:$0xff]   ;;  %v12101_v18 = vld [vmem:[#allocation3 + $0x988] ss:$144 sps:$4 sm:$0xff]  }
 0x225   :  { %4251 = vmatprep.subr.bf16.mxu0 %v12082_v17  ;;  %4292 = vmatprep.subr.bf16.mxu1 %v12085_v19  ;;  %v12106_v17 = vld [vmem:[#allocation3 + $0xaa4] ss:$144 sps:$4 sm:$0xff]   ;;  %v12109_v19 = vld [vmem:[#allocation3 + $0xaac] ss:$144 sps:$4 sm:$0xff]  }
 0x228   :  { %4252 = vmatpush1.bf16.msra.mxu0 %v12080_v20  ;;  %4293 = vmatpush1.bf16.msra.mxu1 %v12083_v11  ;;  %v12104_v20 = vld [vmem:[#allocation3 + $0xaa0] ss:$144 sps:$4 sm:$0xff]   ;;  %v12107_v11 = vld [vmem:[#allocation3 + $0xaa8] ss:$144 sps:$4 sm:$0xff]  }
 0x229   :  { %4253 = vmatprep.subr.bf16.mxu0 %v12088_v50  ;;  %4294 = vmatprep.subr.bf16.mxu1 %v12091_v44  ;;  %v12112_v50 = vld [vmem:[#allocation3 + $0xbc4] ss:$144 sps:$4 sm:$0xff]   ;;  %v12115_v44 = vld [vmem:[#allocation3 + $0xbcc] ss:$144 sps:$4 sm:$0xff]  }
 0x22c   :  { %4254 = vmatpush1.bf16.msra.mxu0 %v12086_v27  ;;  %4295 = vmatpush1.bf16.msra.mxu1 %v12089_v32  ;;  %v12110_v27 = vld [vmem:[#allocation3 + $0xbc0] ss:$144 sps:$4 sm:$0xff]   ;;  %v12113_v32 = vld [vmem:[#allocation3 + $0xbc8] ss:$144 sps:$4 sm:$0xff]  }
 0x22d   :  { %4255 = vmatprep.subr.bf16.mxu0 %v12094_v16  ;;  %4296 = vmatprep.subr.bf16.mxu1 %v12097_v41  ;;  %v12118_v16 = vld [vmem:[#allocation3 + $0xce4] ss:$144 sps:$4 sm:$0xff]   ;;  %v12121_v41 = vld [vmem:[#allocation3 + $0xcec] ss:$144 sps:$4 sm:$0xff]  }
 0x230   :  { %4256 = vmatpush1.bf16.msra.mxu0 %v12092_v43  ;;  %4297 = vmatpush1.bf16.msra.mxu1 %v12095_v45  ;;  %v563_v43 = vld [vmem:[#allocation3 + $0xe00] sm:$0x33]  ;;  %v564_v45 = vld [vmem:[#allocation3 + $0xe08] sm:$0x33] }
 0x231   :  { %4257 = vmatprep.subr.bf16.mxu0 %v12100_v51  ;;  %4298 = vmatprep.subr.bf16.mxu1 %v12103_v63  ;;  %v12116_v51 = vld [vmem:[#allocation3 + $0xce0] ss:$144 sps:$4 sm:$0xff]   ;;  %v12119_v63 = vld [vmem:[#allocation3 + $0xce8] ss:$144 sps:$4 sm:$0xff]  }
 0x234   :  { %4258 = vmatpush1.bf16.msra.mxu0 %v12098_v0  ;;  %4299 = vmatpush1.bf16.msra.mxu1 %v12101_v18  ;;  %v13115_v0 = vcombine.high %v563_v43, %v563_v43  ;;  %v13117_v18 = vcombine.high %v564_v45, %v564_v45 }
 0x235   :  { %4259 = vmatprep.subr.bf16.mxu0 %v12106_v17  ;;  %4300 = vmatprep.subr.bf16.mxu1 %v12109_v19  ;;  %v10570_v17 = vcombine.low %v563_v43, %v563_v43  ;;  %v10572_v19 = vcombine.low %v564_v45, %v564_v45  ;;  %v575_v43 = vld [vmem:[#allocation7 + $0x40] sm:$0xff] }
 0x236   :  { %16692 = vst [vmem:[#allocation32_spill] sm:$0xff] %v13115_v0  ;;  %16693 = vst [vmem:[#allocation33_spill] sm:$0xff] %v13117_v18  ;;  %v579_v45 = vld [vmem:[#allocation7 + $0x60] sm:$0xff] }
 0x238   :  { %4260 = vmatpush1.bf16.msra.mxu0 %v12104_v20  ;;  %4301 = vmatpush1.bf16.msra.mxu1 %v12107_v11  ;;  %v567_v20 = vld [vmem:[#allocation7] sm:$0xff] }
 0x239   :  { %4261 = vmatprep.subr.bf16.mxu0 %v12112_v50  ;;  %4302 = vmatprep.subr.bf16.mxu1 %v12115_v44  ;;  %v571_v11 = vld [vmem:[#allocation7 + $0x20] sm:$0xff]  ;;  %v568_v50 = vld [vmem:[#allocation7 + $0x8] sm:$0xff] }
 0x23a   :  { %v572_v44 = vld [vmem:[#allocation7 + $0x28] sm:$0xff] }
 0x23c   :  { %4262 = vmatpush1.bf16.msra.mxu0 %v12110_v27  ;;  %4303 = vmatpush1.bf16.msra.mxu1 %v12113_v32  ;;  %v13124_v27 = vsel %vm3476_vm1, %v10570_v17, 0  ;;  %v13127_v32 = vsel %vm3476_vm1, %v10572_v19, 0  ;;  %v13141_v17 = vcombine.high %v575_v43, %v579_v45 }
 0x23d   :  { %4263 = vmatprep.subr.bf16.mxu0 %v12118_v16  ;;  %4304 = vmatprep.subr.bf16.mxu1 %v12121_v41  ;;  %16694 = vst [vmem:[#allocation34_spill] sm:$0xff] %v13124_v27  ;;  %16695 = vst [vmem:[#allocation35_spill] sm:$0xff] %v13127_v32  ;;  %v13129_v16 = vcombine.high %v567_v20, %v571_v11  ;;  %v13131_v41 = vcombine.high %v568_v50, %v572_v44 }
 0x23e   :  { %16700 = vst [vmem:[#allocation40_spill] sm:$0xff] %v13141_v17 }
 0x23f   :  { %16696 = vst [vmem:[#allocation36_spill] sm:$0xff] %v13129_v16  ;;  %16697 = vst [vmem:[#allocation37_spill] sm:$0xff] %v13131_v41 }
 0x240   :  { %4264 = vmatpush1.bf16.msra.mxu0 %v12116_v51  ;;  %4305 = vmatpush1.bf16.msra.mxu1 %v12119_v63  ;;  %v576_v51 = vld [vmem:[#allocation7 + $0x48] sm:$0xff] }
 0x241   :  { %10606 = vmatprep.subr.msk.bf16.mxu0 %vm3476_vm1, %v13115_v0  ;;  %10608 = vmatprep.subr.msk.bf16.mxu1 %vm3476_vm1, %v13117_v18  ;;  %v580_v63 = vld [vmem:[#allocation7 + $0x68] sm:$0xff]  ;;  %v13135_v0 = vcombine.low %v567_v20, %v571_v11  ;;  %v13137_v18 = vcombine.low %v568_v50, %v572_v44  ;;  %v13149_v20 = vcombine.low %v575_v43, %v579_v45 }
 0x242   :  { %v13143_v19 = vcombine.high %v576_v51, %v580_v63  ;;  %v13151_v11 = vcombine.low %v576_v51, %v580_v63  ;;  %v13155_v50 = vcombine.high %v583_v40, %v587_v31  ;;  %v13157_v44 = vcombine.high %v584_v28, %v588_v36  ;;  %v600_v63 = vld [vmem:[#allocation7 + $0x108] sm:$0xff] }
 0x243   :  { %16698 = vst [vmem:[#allocation38_spill] sm:$0xff] %v13135_v0  ;;  %16699 = vst [vmem:[#allocation39_spill] sm:$0xff] %v13137_v18 }
 0x244   :  { %4266 = vmatpush1.bf16.msra.mxu0 %v13124_v27  ;;  %4307 = vmatpush1.bf16.msra.mxu1 %v13127_v32  ;;  %16701 = vst [vmem:[#allocation41_spill] sm:$0xff] %v13143_v19  ;;  %16702 = vst [vmem:[#allocation42_spill] sm:$0xff] %v13149_v20  ;;  %v592_v32 = vld [vmem:[#allocation7 + $0xc8] sm:$0xff]  ;;  %v13173_v27 = vcombine.low %v583_v40, %v587_v31  ;;  %v607_v31 = vld [vmem:[#allocation7 + $0x140] sm:$0xff] }
 0x245   :  { %7304 = vmatprep.subr.bf16.mxu0 %v13129_v16  ;;  %7509 = vmatprep.subr.bf16.mxu1 %v13131_v41  ;;  %16703 = vst [vmem:[#allocation43_spill] sm:$0xff] %v13151_v11  ;;  %16704 = vst [vmem:[#allocation44_spill] sm:$0xff] %v13155_v50  ;;  %v591_v41 = vld [vmem:[#allocation7 + $0xc0] sm:$0xff] }
 0x246   :  { %16705 = vst [vmem:[#allocation45_spill] sm:$0xff] %v13157_v44  ;;  %16706 = vst [vmem:[#allocation46_spill] sm:$0xff] %v13173_v27  ;;  %v611_v40 = vld [vmem:[#allocation7 + $0x160] sm:$0xff] }
 0x247   :  { %4274 = vmatmul.mubr.bf16.vlgmr.msra.gmra.mrb[32].mxu0 %v12905_v62  ;;  %4315 = vmatmul.mubr.bf16.vlgmr.msra.gmra.mrb[32].mxu1 %v12905_v62 }
 0x248   :  { %7305 = vmatpush1.bf16.msra.mxu0 %v13135_v0  ;;  %7510 = vmatpush1.bf16.msra.mxu1 %v13137_v18  ;;  %v595_v0 = vld [vmem:[#allocation7 + $0xe0] sm:$0xff]  ;;  %v596_v18 = vld [vmem:[#allocation7 + $0xe8] sm:$0xff] }
 0x249   :  { %7306 = vmatprep.subr.bf16.mxu0 %v13141_v17  ;;  %7511 = vmatprep.subr.bf16.mxu1 %v13143_v19  ;;  %v13179_v43 = vcombine.high %v591_v41, %v595_v0  ;;  %v13181_v38 = vcombine.high %v592_v32, %v596_v18  ;;  %v13185_v36 = vcombine.low %v591_v41, %v595_v0 }
 0x24a   :  { %v13159_v16 = vpop.f32.mrb[16].mxu0  ;;  %v13161_v62 = vpop.f32.mrb[16].mxu1 }
 0x24b   :  { %v13165_v45 = vpop.f32.mrb[17].mxu0  ;;  %v13167_v51 = vpop.f32.mrb[17].mxu1  ;;  %16708 = vst [vmem:[#allocation48_spill] sm:$0xff] %v13179_v43  ;;  %16709 = vst [vmem:[#allocation49_spill] sm:$0xff] %v13181_v38 }
 0x24c   :  { %v3951_v19 = vpop.f32.mrb[18].mxu0  ;;  %v3992_v17 = vpop.f32.mrb[18].mxu1  ;;  %7307 = vmatpush1.bf16.msra.mxu0 %v13149_v20  ;;  %7512 = vmatpush1.bf16.msra.mxu1 %v13151_v11  ;;  %v604_v20 = vld [vmem:[#allocation7 + $0x128] sm:$0xff]  ;;  %16710 = vst [vmem:[#allocation50_spill] sm:$0xff] %v13185_v36  ;;  %v13279_v11 = vld [vmem:[#allocation7 + $0x400] sm:$0xff] }
 0x24d   :  { %v3952_v30 = vpop.f32.mrb[19].mxu0  ;;  %v3993_v29 = vpop.f32.mrb[19].mxu1  ;;  %7308 = vmatprep.subr.bf16.mxu0 %v13155_v50  ;;  %7513 = vmatprep.subr.bf16.mxu1 %v13157_v44  ;;  %v599_v19 = vld [vmem:[#allocation7 + $0x100] sm:$0xff]  ;;  %v13193_v28 = vcombine.high %v600_v63, %v604_v20  ;;  %v608_v44 = vld [vmem:[#allocation7 + $0x148] sm:$0xff] }
 0x24e   :  { %v603_v17 = vld [vmem:[#allocation7 + $0x120] sm:$0xff]  ;;  %v13187_v30 = vcombine.low %v592_v32, %v596_v18  ;;  %v612_v50 = vld [vmem:[#allocation7 + $0x168] sm:$0xff]  ;;  %v13199_v18 = vcombine.low %v600_v63, %v604_v20  ;;  %v13203_v32 = vcombine.high %v607_v31, %v611_v40 }
 0x24f   :  { %v13191_v29 = vcombine.high %v599_v19, %v603_v17  ;;  %16713 = vst [vmem:[#allocation53_spill] sm:$0xff] %v13193_v28  ;;  %v13197_v0 = vcombine.low %v599_v19, %v603_v17  ;;  %v13205_v41 = vcombine.high %v608_v44, %v612_v50  ;;  %v13209_v19 = vcombine.low %v607_v31, %v611_v40 }
 0x250   :  { %7309 = vmatpush1.bf16.msra.mxu0 %v13173_v27  ;;  %7514 = vmatpush1.bf16.msra.mxu1 %v13175_v35  ;;  %16711 = vst [vmem:[#allocation51_spill] sm:$0xff] %v13187_v30  ;;  %16715 = vst [vmem:[#allocation55_spill] sm:$0xff] %v13199_v18  ;;  %v616_v35 = vld [vmem:[#allocation7 + $0x188] sm:$0xff]  ;;  %v13211_v20 = vcombine.low %v608_v44, %v612_v50 }
 0x251   :  { %7310 = vmatprep.subr.bf16.mxu0 %v13179_v43  ;;  %7515 = vmatprep.subr.bf16.mxu1 %v13181_v38  ;;  %16712 = vst [vmem:[#allocation52_spill] sm:$0xff] %v13191_v29  ;;  %16714 = vst [vmem:[#allocation54_spill] sm:$0xff] %v13197_v0  ;;  %v615_v38 = vld [vmem:[#allocation7 + $0x180] sm:$0xff]  ;;  %v620_v27 = vld [vmem:[#allocation7 + $0x1a8] sm:$0xff] }
 0x252   :  { %16716 = vst [vmem:[#allocation56_spill] sm:$0xff] %v13203_v32  ;;  %16717 = vst [vmem:[#allocation57_spill] sm:$0xff] %v13205_v41  ;;  %v619_v43 = vld [vmem:[#allocation7 + $0x1a0] sm:$0xff]  ;;  %v13217_v17 = vcombine.high %v616_v35, %v620_v27  ;;  %v13223_v50 = vcombine.low %v616_v35, %v620_v27 }
 0x253   :  { %16718 = vst [vmem:[#allocation58_spill] sm:$0xff] %v13209_v19  ;;  %16719 = vst [vmem:[#allocation59_spill] sm:$0xff] %v13211_v20  ;;  %v13215_v63 = vcombine.high %v615_v38, %v619_v43  ;;  %v13221_v31 = vcombine.low %v615_v38, %v619_v43 }
 0x254   :  { %7311 = vmatpush1.bf16.msra.mxu0 %v13185_v36  ;;  %7516 = vmatpush1.bf16.msra.mxu1 %v13187_v30  ;;  %16721 = vst [vmem:[#allocation61_spill] sm:$0xff] %v13217_v17  ;;  %v624_v30 = vld [vmem:[#allocation7 + $0x1c8] sm:$0xff]  ;;  %16723 = vst [vmem:[#allocation63_spill] sm:$0xff] %v13223_v50 }
 0x255   :  { %7312 = vmatprep.subr.bf16.mxu0 %v13191_v29  ;;  %7517 = vmatprep.subr.bf16.mxu1 %v13193_v28  ;;  %16720 = vst [vmem:[#allocation60_spill] sm:$0xff] %v13215_v63  ;;  %v623_v28 = vld [vmem:[#allocation7 + $0x1c0] sm:$0xff]  ;;  %v628_v36 = vld [vmem:[#allocation7 + $0x1e8] sm:$0xff]  ;;  %16722 = vst [vmem:[#allocation62_spill] sm:$0xff] %v13221_v31 }
 0x256   :  { %v627_v29 = vld [vmem:[#allocation7 + $0x1e0] sm:$0xff]  ;;  %v13229_v40 = vcombine.high %v624_v30, %v628_v36  ;;  %v13235_v35 = vcombine.low %v624_v30, %v628_v36 }
 0x257   :  { %v13227_v44 = vcombine.high %v623_v28, %v627_v29  ;;  %v13233_v38 = vcombine.low %v623_v28, %v627_v29 }
 0x258   :  { %7313 = vmatpush1.bf16.msra.mxu0 %v13197_v0  ;;  %7518 = vmatpush1.bf16.msra.mxu1 %v13199_v18  ;;  %16725 = vst [vmem:[#allocation65_spill] sm:$0xff] %v13229_v40  ;;  %v632_v18 = vld [vmem:[#allocation7 + $0x208] sm:$0xff]  ;;  %16727 = vst [vmem:[#allocation67_spill] sm:$0xff] %v13235_v35 }
 0x259   :  { %7314 = vmatprep.subr.bf16.mxu0 %v13203_v32  ;;  %7519 = vmatprep.subr.bf16.mxu1 %v13205_v41  ;;  %16724 = vst [vmem:[#allocation64_spill] sm:$0xff] %v13227_v44  ;;  %v631_v41 = vld [vmem:[#allocation7 + $0x200] sm:$0xff]  ;;  %v636_v0 = vld [vmem:[#allocation7 + $0x228] sm:$0xff]  ;;  %16726 = vst [vmem:[#allocation66_spill] sm:$0xff] %v13233_v38 }
 0x25a   :  { %v635_v32 = vld [vmem:[#allocation7 + $0x220] sm:$0xff]  ;;  %v13241_v43 = vcombine.high %v632_v18, %v636_v0  ;;  %v13247_v36 = vcombine.low %v632_v18, %v636_v0 }
 0x25b   :  { %v13239_v27 = vcombine.high %v631_v41, %v635_v32  ;;  %v13245_v29 = vcombine.low %v631_v41, %v635_v32 }
 0x25c   :  { %7315 = vmatpush1.bf16.msra.mxu0 %v13209_v19  ;;  %7520 = vmatpush1.bf16.msra.mxu1 %v13211_v20  ;;  %16729 = vst [vmem:[#allocation69_spill] sm:$0xff] %v13241_v43  ;;  %v640_v20 = vld [vmem:[#allocation7 + $0x248] sm:$0xff]  ;;  %16731 = vst [vmem:[#allocation71_spill] sm:$0xff] %v13247_v36 }
 0x25d   :  { %7316 = vmatprep.subr.bf16.mxu0 %v13215_v63  ;;  %7521 = vmatprep.subr.bf16.mxu1 %v13217_v17  ;;  %16728 = vst [vmem:[#allocation68_spill] sm:$0xff] %v13239_v27  ;;  %v639_v17 = vld [vmem:[#allocation7 + $0x240] sm:$0xff]  ;;  %v644_v19 = vld [vmem:[#allocation7 + $0x268] sm:$0xff]  ;;  %16730 = vst [vmem:[#allocation70_spill] sm:$0xff] %v13245_v29 }
 0x25e   :  { %v643_v63 = vld [vmem:[#allocation7 + $0x260] sm:$0xff]  ;;  %v13253_v28 = vcombine.high %v640_v20, %v644_v19  ;;  %v13259_v0 = vcombine.low %v640_v20, %v644_v19 }
 0x25f   :  { %v13251_v30 = vcombine.high %v639_v17, %v643_v63  ;;  %v13257_v32 = vcombine.low %v639_v17, %v643_v63  ;;  %v663_v20 = vld [vmem:[#allocation7 + $0x300] sm:$0xff] }
 0x260   :  { %7317 = vmatpush1.bf16.msra.mxu0 %v13221_v31  ;;  %7522 = vmatpush1.bf16.msra.mxu1 %v13223_v50  ;;  %16733 = vst [vmem:[#allocation73_spill] sm:$0xff] %v13253_v28  ;;  %v648_v50 = vld [vmem:[#allocation7 + $0x288] sm:$0xff]  ;;  %16735 = vst [vmem:[#allocation75_spill] sm:$0xff] %v13259_v0 }
 0x261   :  { %7318 = vmatprep.subr.bf16.mxu0 %v13227_v44  ;;  %7523 = vmatprep.subr.bf16.mxu1 %v13229_v40  ;;  %16732 = vst [vmem:[#allocation72_spill] sm:$0xff] %v13251_v30  ;;  %v647_v40 = vld [vmem:[#allocation7 + $0x280] sm:$0xff]  ;;  %v652_v31 = vld [vmem:[#allocation7 + $0x2a8] sm:$0xff]  ;;  %16734 = vst [vmem:[#allocation74_spill] sm:$0xff] %v13257_v32 }
 0x262   :  { %v651_v44 = vld [vmem:[#allocation7 + $0x2a0] sm:$0xff]  ;;  %v13265_v41 = vcombine.high %v648_v50, %v652_v31  ;;  %v13271_v19 = vcombine.low %v648_v50, %v652_v31  ;;  %v700_v50 = vld [vmem:[#allocation7 + $0x428] sm:$0xff] }
 0x263   :  { %v13263_v18 = vcombine.high %v647_v40, %v651_v44  ;;  %v13269_v63 = vcombine.low %v647_v40, %v651_v44  ;;  %v13283_v44 = vld [vmem:[#allocation7 + $0x408] sm:$0xff] }
 0x264   :  { %7319 = vmatpush1.bf16.msra.mxu0 %v13233_v38  ;;  %7524 = vmatpush1.bf16.msra.mxu1 %v13235_v35  ;;  %16737 = vst [vmem:[#allocation77_spill] sm:$0xff] %v13265_v41  ;;  %v656_v35 = vld [vmem:[#allocation7 + $0x2c8] sm:$0xff]  ;;  %16739 = vst [vmem:[#allocation79_spill] sm:$0xff] %v13271_v19 }
 0x265   :  { %7320 = vmatprep.subr.bf16.mxu0 %v13239_v27  ;;  %7525 = vmatprep.subr.bf16.mxu1 %v13241_v43  ;;  %16736 = vst [vmem:[#allocation76_spill] sm:$0xff] %v13263_v18  ;;  %v655_v43 = vld [vmem:[#allocation7 + $0x2c0] sm:$0xff]  ;;  %v660_v38 = vld [vmem:[#allocation7 + $0x2e8] sm:$0xff]  ;;  %16738 = vst [vmem:[#allocation78_spill] sm:$0xff] %v13269_v63 }
 0x266   :  { %v659_v27 = vld [vmem:[#allocation7 + $0x2e0] sm:$0xff]  ;;  %v13289_v40 = vcombine.low %v656_v35, %v660_v38 }
 0x267   :  { %v13275_v17 = vcombine.high %v655_v43, %v659_v27  ;;  %v13285_v31 = vcombine.low %v655_v43, %v659_v27 }
 0x268   :  { %7321 = vmatpush1.bf16.msra.mxu0 %v13245_v29  ;;  %7526 = vmatpush1.bf16.msra.mxu1 %v13247_v36  ;;  %v664_v36 = vld [vmem:[#allocation7 + $0x308] sm:$0xff]  ;;  %16743 = vst [vmem:[#allocation83_spill] sm:$0xff] %v13289_v40 }
 0x269   :  { %7322 = vmatprep.subr.bf16.mxu0 %v13251_v30  ;;  %7527 = vmatprep.subr.bf16.mxu1 %v13253_v28  ;;  %16740 = vst [vmem:[#allocation80_spill] sm:$0xff] %v13275_v17  ;;  %v13277_v28 = vcombine.high %v656_v35, %v660_v38  ;;  %v667_v30 = vld [vmem:[#allocation7 + $0x320] sm:$0xff]  ;;  %v668_v29 = vld [vmem:[#allocation7 + $0x328] sm:$0xff]  ;;  %16742 = vst [vmem:[#allocation82_spill] sm:$0xff] %v13285_v31 }
 0x26a   :  { %v13300_v27 = vcombine.high %v663_v20, %v667_v30  ;;  %v13302_v43 = vcombine.high %v664_v36, %v668_v29  ;;  %v676_v38 = vld [vmem:[#allocation7 + $0x368] sm:$0xff]  ;;  %v13306_v35 = vcombine.low %v663_v20, %v667_v30  ;;  %v13308_v37 = vcombine.low %v664_v36, %v668_v29 }
 0x26b   :  { %16741 = vst [vmem:[#allocation81_spill] sm:$0xff] %v13277_v28  ;;  %v13324_v36 = vcombine.high %v679_v34, %v683_v33  ;;  %v13326_v20 = vcombine.high %v680_v13, %v684_v12 }
 0x26c   :  { %7323 = vmatpush1.bf16.msra.mxu0 %v13257_v32  ;;  %7528 = vmatpush1.bf16.msra.mxu1 %v13259_v0  ;;  %v13281_v32 = vld [vmem:[#allocation7 + $0x420] sm:$0xff]  ;;  %16744 = vst [vmem:[#allocation84_spill] sm:$0xff] %v13300_v27  ;;  %16745 = vst [vmem:[#allocation85_spill] sm:$0xff] %v13302_v43 }
 0x26d   :  { %7324 = vmatprep.subr.bf16.mxu0 %v13263_v18  ;;  %7529 = vmatprep.subr.bf16.mxu1 %v13265_v41  ;;  %v13293_v41 = vcombine.low %v13279_v11, %v13281_v32  ;;  %v13296_v18 = vcombine.low %v13283_v44, %v700_v50  ;;  %v675_v0 = vld [vmem:[#allocation7 + $0x360] sm:$0xff]  ;;  %16746 = vst [vmem:[#allocation86_spill] sm:$0xff] %v13306_v35  ;;  %16747 = vst [vmem:[#allocation87_spill] sm:$0xff] %v13308_v37 }
 0x26e   :  { %16752 = vst [vmem:[#allocation92_spill] sm:$0xff] %v13324_v36  ;;  %16753 = vst [vmem:[#allocation93_spill] sm:$0xff] %v13326_v20 }
 0x270   :  { %7325 = vmatpush1.bf16.msra.mxu0 %v13269_v63  ;;  %7530 = vmatpush1.bf16.msra.mxu1 %v13271_v19  ;;  %v671_v63 = vld [vmem:[#allocation7 + $0x340] sm:$0xff]  ;;  %v672_v19 = vld [vmem:[#allocation7 + $0x348] sm:$0xff] }
 0x271   :  { %7326 = vmatprep.subr.bf16.mxu0 %v13275_v17  ;;  %7531 = vmatprep.subr.bf16.mxu1 %v13277_v28  ;;  %v13312_v28 = vcombine.high %v671_v63, %v675_v0  ;;  %v13314_v17 = vcombine.high %v672_v19, %v676_v38  ;;  %v13318_v30 = vcombine.low %v671_v63, %v675_v0 }
 0x272   :  { %v13320_v29 = vcombine.low %v672_v19, %v676_v38  ;;  %v13330_v0 = vcombine.low %v679_v34, %v683_v33  ;;  %v13332_v63 = vcombine.low %v680_v13, %v684_v12 }
 0x273   :  { %16748 = vst [vmem:[#allocation88_spill] sm:$0xff] %v13312_v28  ;;  %16749 = vst [vmem:[#allocation89_spill] sm:$0xff] %v13314_v17 }
 0x274   :  { %7327 = vmatpush1.bf16.msra.mxu0 %v13285_v31  ;;  %7532 = vmatpush1.bf16.msra.mxu1 %v13289_v40  ;;  %16750 = vst [vmem:[#allocation90_spill] sm:$0xff] %v13318_v30  ;;  %16751 = vst [vmem:[#allocation91_spill] sm:$0xff] %v13320_v29  ;;  %v688_v40 = vld [vmem:[#allocation7 + $0x3c8] sm:$0xff] }
 0x275   :  { %7328 = vmatprep.subr.bf16.mxu0 %v13300_v27  ;;  %7533 = vmatprep.subr.bf16.mxu1 %v13302_v43  ;;  %v687_v43 = vld [vmem:[#allocation7 + $0x3c0] sm:$0xff]  ;;  %v692_v31 = vld [vmem:[#allocation7 + $0x3e8] sm:$0xff]  ;;  %16754 = vst [vmem:[#allocation94_spill] sm:$0xff] %v13330_v0  ;;  %16755 = vst [vmem:[#allocation95_spill] sm:$0xff] %v13332_v63 }
 0x276   :  { %v691_v27 = vld [vmem:[#allocation7 + $0x3e0] sm:$0xff]  ;;  %v13338_v38 = vcombine.high %v688_v40, %v692_v31  ;;  %v13346_v13 = vcombine.low %v688_v40, %v692_v31 }
 0x277   :  { %v13336_v19 = vcombine.high %v687_v43, %v691_v27  ;;  %v13344_v12 = vcombine.low %v687_v43, %v691_v27 }
 0x278   :  { %7329 = vmatpush1.bf16.msra.mxu0 %v13306_v35  ;;  %7534 = vmatpush1.bf16.msra.mxu1 %v13308_v37  ;;  %16757 = vst [vmem:[#allocation97_spill] sm:$0xff] %v13338_v38  ;;  %16759 = vst [vmem:[#allocation99_spill] sm:$0xff] %v13346_v13 }
 0x279   :  { %7330 = vmatprep.subr.bf16.mxu0 %v13312_v28  ;;  %7535 = vmatprep.subr.bf16.mxu1 %v13314_v17  ;;  %16756 = vst [vmem:[#allocation96_spill] sm:$0xff] %v13336_v19  ;;  %16758 = vst [vmem:[#allocation98_spill] sm:$0xff] %v13344_v12 }
 0x27c   :  { %7331 = vmatpush1.bf16.msra.mxu0 %v13318_v30  ;;  %7536 = vmatpush1.bf16.msra.mxu1 %v13320_v29 }
 0x27d   :  { %7332 = vmatprep.subr.bf16.mxu0 %v13324_v36  ;;  %7537 = vmatprep.subr.bf16.mxu1 %v13326_v20  ;;  %v13352_v20 = vcombine.high %v13279_v11, %v13281_v32 }
 0x27e   :  { %v4029_v17 = vpop.f32.mrb[20].mxu0  ;;  %v4070_v28 = vpop.f32.mrb[20].mxu1 }
 0x27f   :  { %v4031_v37 = vpop.f32.mrb[21].mxu0  ;;  %v13340_v35 = vpop.f32.mrb[21].mxu1  ;;  %16760 = vst [vmem:[#allocation100_spill] sm:$0xff] %v13352_v20 }
 0x280   :  { %v4033_v30 = vpop.f32.mrb[22].mxu0  ;;  %v4074_v8 = vpop.f32.mrb[22].mxu1  ;;  %7333 = vmatpush1.bf16.msra.mxu0 %v13330_v0  ;;  %7538 = vmatpush1.bf16.msra.mxu1 %v13332_v63 }
 0x281   :  { %v4034_v33 = vpop.f32.mrb[23].mxu0  ;;  %v4075_v34 = vpop.f32.mrb[23].mxu1  ;;  %7334 = vmatprep.subr.bf16.mxu0 %v13336_v19  ;;  %7539 = vmatprep.subr.bf16.mxu1 %v13338_v38  ;;  %v13355_v8 = vcombine.high %v13283_v44, %v700_v50 }
 0x282   :  { %v16762_v33 = vmax.f32 %v12999_v23, %v13069_v14 }
 0x283   :  { %16761 = vst [vmem:[#allocation101_spill] sm:$0xff] %v13355_v8 }
 0x284   :  { %7335 = vmatpush1.bf16.msra.mxu0 %v13344_v12  ;;  %7540 = vmatpush1.bf16.msra.mxu1 %v13346_v13  ;;  %v13374_v12 = vld [vmem:[#allocation5] sm:$0xff] }
 0x285   :  { %7345 = vmatprep.subr.bf16.mxu0 %v13352_v20  ;;  %7550 = vmatprep.subr.bf16.mxu1 %v13355_v8  ;;  %v4352_v20 = vlaneseq }
 0x287   :  { %v13371_v13 = vshrl.u32 %v4352_v20, 7 }
 0x289   :  { %16763 = vst [vmem:[#allocation102_spill] sm:$0xff] %v13371_v13  ;;  %v16169_v8 = vsub.s32 0, %v13371_v13  ;;  %v16172_v38 = vsub.s32 1, %v13371_v13  ;;  %v4366_v19 = vsub.s32 3, %v13371_v13 }
 0x28b   :  { %v13387_v14 = vrot.slane %v13374_v12, %v16172_v38  ;;  %v16765_v38 = vmax.f32 %v13009_v26, %v13095_v21  ;;  %v703_v26 = vld [vmem:[#allocation7 + $0x440] sm:$0xff] }
 0x2b2   :  { %v13361_v31 = vpop.f32.mrb[24].mxu0  ;;  %v13363_v40 = vpop.f32.mrb[24].mxu1 }
 0x2b3   :  { %v13365_v27 = vpop.f32.mrb[25].mxu0  ;;  %v4154_v43 = vpop.f32.mrb[25].mxu1 }
 0x2b4   :  { %v4332_v11 = vmax.f32 %v13161_v62, %v4154_v43  ;;  %v4115_v32 = vpop.f32.mrb[26].mxu0  ;;  %v4156_v44 = vpop.f32.mrb[26].mxu1  ;;  %v13381_v62 = vrot.slane %v13374_v12, %v16169_v8 }
 0x2b5   :  { %v4116_v50 = vpop.f32.mrb[27].mxu0  ;;  %v4157_v30 = vpop.f32.mrb[27].mxu1 }
 0x2b6   :  { %v4341_v34 = vmax.f32 %v16762_v33, %v4332_v11  ;;  %v13390_v11 = vrot.slane %v13374_v12, %v4366_v19  ;;  %v16766_v19 = vmax.f32 %v13005_v24, %v13071_v15  ;;  %v711_v15 = vld [vmem:[#allocation7 + $0x480] sm:$0xff] }
 0x2b8   :  { %v4397_v30 = vadd.f32 %v13381_v62, %v4341_v34  ;;  %v704_v34 = vld [vmem:[#allocation7 + $0x448] sm:$0xff] }
 0x2e6   :  { %v4193_v43 = vpop.f32.mrb[28].mxu0  ;;  %v4234_v32 = vpop.f32.mrb[28].mxu1 }
 0x2e7   :  { %v4333_v23 = vmax.f32 %v13167_v51, %v4193_v43  ;;  %v4335_v20 = vmax.f32 %v4031_v37, %v4234_v32  ;;  %v4195_v44 = vpop.f32.mrb[29].mxu0  ;;  %v4236_v50 = vpop.f32.mrb[29].mxu1  ;;  %v16764_v51 = vmax.f32 %v13007_v25, %v13061_v10  ;;  %v4406_v10 = vmax.f32 %v4397_v30, 0.0 }
 0x2e8   :  { %v4334_v33 = vmax.f32 %v4029_v17, %v4195_v44  ;;  %v4336_v8 = vmax.f32 %v4070_v28, %v4236_v50  ;;  %v4197_v63 = vpop.f32.mrb[30].mxu0  ;;  %v4238_v0 = vpop.f32.mrb[30].mxu1  ;;  %v16767_v28 = vmax.f32 %v13029_v1, %v13107_v39  ;;  %v716_v44 = vld [vmem:[#allocation7 + $0x4a8] sm:$0xff] }
 0x2e9   :  { %v4342_v43 = vmax.f32 %v16764_v51, %v4333_v23  ;;  %v4344_v36 = vmax.f32 %v16765_v38, %v4335_v20  ;;  %v4198_v37 = vpop.f32.mrb[31].mxu0  ;;  %v4239_v32 = vpop.f32.mrb[31].mxu1  ;;  %v707_v38 = vld [vmem:[#allocation7 + $0x460] sm:$0xff]  ;;  %v708_v23 = vld [vmem:[#allocation7 + $0x468] sm:$0xff]  ;;  %v13413_v24 = vpack.c.bf16 %v4406_v10, %v4406_v10 }
 0x2ea   :  { %v13402_v29 = vmax.f32 %v16766_v19, %v4334_v33  ;;  %v13407_v17 = vmax.f32 %v16767_v28, %v4336_v8  ;;  %v13417_v1 = vcombine.high %v703_v26, %v707_v38  ;;  %v13419_v39 = vcombine.high %v704_v34, %v708_v23  ;;  %v712_v8 = vld [vmem:[#allocation7 + $0x488] sm:$0xff]  ;;  %v719_v37 = vld [vmem:[#allocation7 + $0x4c0] sm:$0xff] }
 0x2eb   :  { %v4398_v0 = vadd.f32 %v13387_v14, %v4342_v43  ;;  %v4400_v25 = vadd.f32 %v13390_v11, %v4344_v36  ;;  %v715_v36 = vld [vmem:[#allocation7 + $0x4a0] sm:$0xff]  ;;  %v13427_v30 = vcombine.low %v703_v26, %v707_v38  ;;  %v13429_v33 = vcombine.low %v704_v34, %v708_v23  ;;  %v720_v19 = vld [vmem:[#allocation7 + $0x4c8] sm:$0xff] }
 0x2ec   :  { %16768 = vst [vmem:[#allocation103_spill] sm:$0xff] %v13417_v1  ;;  %16769 = vst [vmem:[#allocation104_spill] sm:$0xff] %v13419_v39  ;;  %v13433_v51 = vcombine.high %v711_v15, %v715_v36  ;;  %v13435_v43 = vcombine.high %v712_v8, %v716_v44  ;;  %v723_v32 = vld [vmem:[#allocation7 + $0x4e0] sm:$0xff]  ;;  %v724_v28 = vld [vmem:[#allocation7 + $0x4e8] sm:$0xff] }
 0x2ed   :  { %v4407_v63 = vmax.f32 %v4398_v0, 0.0  ;;  %v4409_v21 = vmax.f32 %v4400_v25, 0.0  ;;  %16770 = vst [vmem:[#allocation105_spill] sm:$0xff] %v13427_v30  ;;  %16771 = vst [vmem:[#allocation106_spill] sm:$0xff] %v13429_v33  ;;  %v13441_v0 = vcombine.low %v711_v15, %v715_v36  ;;  %v13443_v25 = vcombine.low %v712_v8, %v716_v44  ;;  %v727_v26 = vld [vmem:[#allocation7 + $0x500] sm:$0xff]  ;;  %v728_v38 = vld [vmem:[#allocation7 + $0x508] sm:$0xff] }
 0x2ee   :  { %16772 = vst [vmem:[#allocation107_spill] sm:$0xff] %v13433_v51  ;;  %16773 = vst [vmem:[#allocation108_spill] sm:$0xff] %v13435_v43  ;;  %v13447_v10 = vcombine.high %v719_v37, %v723_v32  ;;  %v732_v34 = vld [vmem:[#allocation7 + $0x528] sm:$0xff]  ;;  %v13453_v23 = vcombine.low %v719_v37, %v723_v32  ;;  %v13455_v15 = vcombine.low %v720_v19, %v724_v28  ;;  %v735_v44 = vld [vmem:[#allocation7 + $0x540] sm:$0xff] }
 0x2ef   :  { %v13411_v20 = vpack.c.bf16 %v4407_v63, %v4407_v63  ;;  %v13421_v50 = vpack.c.bf16 %v4409_v21, %v4409_v21  ;;  %16774 = vst [vmem:[#allocation109_spill] sm:$0xff] %v13441_v0  ;;  %16775 = vst [vmem:[#allocation110_spill] sm:$0xff] %v13443_v25  ;;  %v13449_v63 = vcombine.high %v720_v19, %v724_v28  ;;  %v731_v21 = vld [vmem:[#allocation7 + $0x520] sm:$0xff] }
 0x2f0   :  { %16776 = vst [vmem:[#allocation111_spill] sm:$0xff] %v13447_v10  ;;  %16778 = vst [vmem:[#allocation113_spill] sm:$0xff] %v13453_v23  ;;  %v13459_v36 = vcombine.high %v727_v26, %v731_v21  ;;  %v13461_v8 = vcombine.high %v728_v38, %v732_v34  ;;  %v13465_v37 = vcombine.low %v727_v26, %v731_v21 }
 0x2f1   :  { %7336 = vmatprep.mubr.bf16.mxu0 %v13411_v20  ;;  %7541 = vmatprep.mubr.bf16.mxu1 %v13411_v20  ;;  %16777 = vst [vmem:[#allocation112_spill] sm:$0xff] %v13449_v63  ;;  %16779 = vst [vmem:[#allocation114_spill] sm:$0xff] %v13455_v15  ;;  %v13467_v32 = vcombine.low %v728_v38, %v732_v34 }
 0x2f2   :  { %7337 = vmatmul.mubr.bf16.vlgmr.msra.gmra.mrb[36].mxu0 %v13413_v24  ;;  %7542 = vmatmul.mubr.bf16.vlgmr.msra.gmra.mrb[36].mxu1 %v13413_v24  ;;  %16780 = vst [vmem:[#allocation115_spill] sm:$0xff] %v13459_v36  ;;  %16781 = vst [vmem:[#allocation116_spill] sm:$0xff] %v13461_v8 }
 0x2f3   :  { %7346 = vmatpush1.bf16.msra.mxu0 %v13293_v41  ;;  %7551 = vmatpush1.bf16.msra.mxu1 %v13296_v18  ;;  %16782 = vst [vmem:[#allocation117_spill] sm:$0xff] %v13465_v37  ;;  %16783 = vst [vmem:[#allocation118_spill] sm:$0xff] %v13467_v32 }
 0x2f4   :  { %7377 = vmatprep.mubr.bf16.mxu0 %v13421_v50  ;;  %7582 = vmatprep.mubr.bf16.mxu1 %v13421_v50 }
 0x2f5   :  { %7347 = vmatprep.subr.bf16.mxu0 %v13417_v1  ;;  %7552 = vmatprep.subr.bf16.mxu1 %v13419_v39 }
 0x2f7   :  { %7348 = vmatpush1.bf16.msra.mxu0 %v13427_v30  ;;  %7553 = vmatpush1.bf16.msra.mxu1 %v13429_v33  ;;  %v740_v33 = vld [vmem:[#allocation7 + $0x568] sm:$0xff] }
 0x2f8   :  { %7349 = vmatprep.subr.bf16.mxu0 %v13433_v51  ;;  %7554 = vmatprep.subr.bf16.mxu1 %v13435_v43  ;;  %v739_v43 = vld [vmem:[#allocation7 + $0x560] sm:$0xff]  ;;  %v736_v51 = vld [vmem:[#allocation7 + $0x548] sm:$0xff] }
 0x2f9   :  { %v13471_v19 = vcombine.high %v735_v44, %v739_v43  ;;  %v13473_v28 = vcombine.high %v736_v51, %v740_v33  ;;  %v13477_v26 = vcombine.low %v735_v44, %v739_v43  ;;  %v13479_v21 = vcombine.low %v736_v51, %v740_v33 }
 0x2fb   :  { %7350 = vmatpush1.bf16.msra.mxu0 %v13441_v0  ;;  %7555 = vmatpush1.bf16.msra.mxu1 %v13443_v25  ;;  %16784 = vst [vmem:[#allocation119_spill] sm:$0xff] %v13471_v19  ;;  %16785 = vst [vmem:[#allocation120_spill] sm:$0xff] %v13473_v28  ;;  %v744_v25 = vld [vmem:[#allocation7 + $0x588] sm:$0xff] }
 0x2fc   :  { %7351 = vmatprep.subr.bf16.mxu0 %v13447_v10  ;;  %7556 = vmatprep.subr.bf16.mxu1 %v13449_v63  ;;  %v743_v63 = vld [vmem:[#allocation7 + $0x580] sm:$0xff]  ;;  %v748_v0 = vld [vmem:[#allocation7 + $0x5a8] sm:$0xff]  ;;  %16786 = vst [vmem:[#allocation121_spill] sm:$0xff] %v13477_v26  ;;  %16787 = vst [vmem:[#allocation122_spill] sm:$0xff] %v13479_v21 }
 0x2fd   :  { %v747_v10 = vld [vmem:[#allocation7 + $0x5a0] sm:$0xff]  ;;  %v13485_v34 = vcombine.high %v744_v25, %v748_v0  ;;  %v13491_v33 = vcombine.low %v744_v25, %v748_v0 }
 0x2fe   :  { %v13483_v38 = vcombine.high %v743_v63, %v747_v10  ;;  %v13489_v43 = vcombine.low %v743_v63, %v747_v10 }
 0x2ff   :  { %7352 = vmatpush1.bf16.msra.mxu0 %v13453_v23  ;;  %7557 = vmatpush1.bf16.msra.mxu1 %v13455_v15  ;;  %16789 = vst [vmem:[#allocation124_spill] sm:$0xff] %v13485_v34  ;;  %v752_v15 = vld [vmem:[#allocation7 + $0x5c8] sm:$0xff]  ;;  %16791 = vst [vmem:[#allocation126_spill] sm:$0xff] %v13491_v33 }
 0x300   :  { %7353 = vmatprep.subr.bf16.mxu0 %v13459_v36  ;;  %7558 = vmatprep.subr.bf16.mxu1 %v13461_v8  ;;  %16788 = vst [vmem:[#allocation123_spill] sm:$0xff] %v13483_v38  ;;  %v751_v8 = vld [vmem:[#allocation7 + $0x5c0] sm:$0xff]  ;;  %v756_v23 = vld [vmem:[#allocation7 + $0x5e8] sm:$0xff]  ;;  %16790 = vst [vmem:[#allocation125_spill] sm:$0xff] %v13489_v43 }
 0x301   :  { %v755_v36 = vld [vmem:[#allocation7 + $0x5e0] sm:$0xff]  ;;  %v13497_v44 = vcombine.high %v752_v15, %v756_v23  ;;  %v13503_v0 = vcombine.low %v752_v15, %v756_v23 }
 0x302   :  { %v13495_v51 = vcombine.high %v751_v8, %v755_v36  ;;  %v13501_v10 = vcombine.low %v751_v8, %v755_v36 }
 0x303   :  { %7354 = vmatpush1.bf16.msra.mxu0 %v13465_v37  ;;  %7559 = vmatpush1.bf16.msra.mxu1 %v13467_v32  ;;  %16793 = vst [vmem:[#allocation128_spill] sm:$0xff] %v13497_v44  ;;  %v760_v32 = vld [vmem:[#allocation7 + $0x608] sm:$0xff]  ;;  %16795 = vst [vmem:[#allocation130_spill] sm:$0xff] %v13503_v0 }
 0x304   :  { %7355 = vmatprep.subr.bf16.mxu0 %v13471_v19  ;;  %7560 = vmatprep.subr.bf16.mxu1 %v13473_v28  ;;  %16792 = vst [vmem:[#allocation127_spill] sm:$0xff] %v13495_v51  ;;  %v759_v28 = vld [vmem:[#allocation7 + $0x600] sm:$0xff]  ;;  %v764_v37 = vld [vmem:[#allocation7 + $0x628] sm:$0xff]  ;;  %16794 = vst [vmem:[#allocation129_spill] sm:$0xff] %v13501_v10 }
 0x305   :  { %v763_v19 = vld [vmem:[#allocation7 + $0x620] sm:$0xff]  ;;  %v13509_v63 = vcombine.high %v760_v32, %v764_v37  ;;  %v13515_v23 = vcombine.low %v760_v32, %v764_v37 }
 0x306   :  { %v13507_v25 = vcombine.high %v759_v28, %v763_v19  ;;  %v13513_v36 = vcombine.low %v759_v28, %v763_v19 }
 0x307   :  { %7356 = vmatpush1.bf16.msra.mxu0 %v13477_v26  ;;  %7561 = vmatpush1.bf16.msra.mxu1 %v13479_v21  ;;  %16797 = vst [vmem:[#allocation132_spill] sm:$0xff] %v13509_v63  ;;  %v768_v21 = vld [vmem:[#allocation7 + $0x648] sm:$0xff]  ;;  %16799 = vst [vmem:[#allocation134_spill] sm:$0xff] %v13515_v23 }
 0x308   :  { %7357 = vmatprep.subr.bf16.mxu0 %v13483_v38  ;;  %7562 = vmatprep.subr.bf16.mxu1 %v13485_v34  ;;  %16796 = vst [vmem:[#allocation131_spill] sm:$0xff] %v13507_v25  ;;  %v767_v34 = vld [vmem:[#allocation7 + $0x640] sm:$0xff]  ;;  %v772_v26 = vld [vmem:[#allocation7 + $0x668] sm:$0xff]  ;;  %16798 = vst [vmem:[#allocation133_spill] sm:$0xff] %v13513_v36 }
 0x309   :  { %v771_v38 = vld [vmem:[#allocation7 + $0x660] sm:$0xff]  ;;  %v13521_v8 = vcombine.high %v768_v21, %v772_v26  ;;  %v13527_v37 = vcombine.low %v768_v21, %v772_v26 }
 0x30a   :  { %v13519_v15 = vcombine.high %v767_v34, %v771_v38  ;;  %v13525_v19 = vcombine.low %v767_v34, %v771_v38 }
 0x30b   :  { %7358 = vmatpush1.bf16.msra.mxu0 %v13489_v43  ;;  %7563 = vmatpush1.bf16.msra.mxu1 %v13491_v33  ;;  %16801 = vst [vmem:[#allocation136_spill] sm:$0xff] %v13521_v8  ;;  %v776_v33 = vld [vmem:[#allocation7 + $0x688] sm:$0xff]  ;;  %16803 = vst [vmem:[#allocation138_spill] sm:$0xff] %v13527_v37 }
 0x30c   :  { %7359 = vmatprep.subr.bf16.mxu0 %v13495_v51  ;;  %7564 = vmatprep.subr.bf16.mxu1 %v13497_v44  ;;  %16800 = vst [vmem:[#allocation135_spill] sm:$0xff] %v13519_v15  ;;  %v775_v44 = vld [vmem:[#allocation7 + $0x680] sm:$0xff]  ;;  %v780_v43 = vld [vmem:[#allocation7 + $0x6a8] sm:$0xff]  ;;  %16802 = vst [vmem:[#allocation137_spill] sm:$0xff] %v13525_v19 }
 0x30d   :  { %v779_v51 = vld [vmem:[#allocation7 + $0x6a0] sm:$0xff]  ;;  %v13533_v28 = vcombine.high %v776_v33, %v780_v43  ;;  %v13539_v26 = vcombine.low %v776_v33, %v780_v43 }
 0x30e   :  { %v13531_v32 = vcombine.high %v775_v44, %v779_v51  ;;  %v13537_v38 = vcombine.low %v775_v44, %v779_v51 }
 0x30f   :  { %7360 = vmatpush1.bf16.msra.mxu0 %v13501_v10  ;;  %7565 = vmatpush1.bf16.msra.mxu1 %v13503_v0  ;;  %16805 = vst [vmem:[#allocation140_spill] sm:$0xff] %v13533_v28  ;;  %v784_v0 = vld [vmem:[#allocation7 + $0x6c8] sm:$0xff]  ;;  %16806 = vst [vmem:[#allocation141_spill] sm:$0xff] %v13539_v26 }
 0x310   :  { %7361 = vmatprep.subr.bf16.mxu0 %v13507_v25  ;;  %7566 = vmatprep.subr.bf16.mxu1 %v13509_v63  ;;  %16804 = vst [vmem:[#allocation139_spill] sm:$0xff] %v13531_v32  ;;  %v783_v63 = vld [vmem:[#allocation7 + $0x6c0] sm:$0xff]  ;;  %v788_v10 = vld [vmem:[#allocation7 + $0x6e8] sm:$0xff] }
 0x311   :  { %v787_v25 = vld [vmem:[#allocation7 + $0x6e0] sm:$0xff]  ;;  %v13545_v34 = vcombine.high %v784_v0, %v788_v10  ;;  %v13549_v51 = vcombine.low %v784_v0, %v788_v10  ;;  %v16809_v0 = vmax.f32 %v13037_v5, %v13097_v22 }
 0x312   :  { %v13543_v21 = vcombine.high %v783_v63, %v787_v25  ;;  %v13547_v39 = vcombine.low %v783_v63, %v787_v25  ;;  %v16810_v63 = vmax.f32 %v13039_v6, %v13159_v16  ;;  %v4362_v16 = vsub.s32 2, %v13371_v13 }
 0x313   :  { %7362 = vmatpush1.bf16.msra.mxu0 %v13513_v36  ;;  %7567 = vmatpush1.bf16.msra.mxu1 %v13515_v23  ;;  %16808 = vst [vmem:[#allocation143_spill] sm:$0xff] %v13545_v34  ;;  %v792_v23 = vld [vmem:[#allocation7 + $0x708] sm:$0xff] }
 0x314   :  { %7363 = vmatprep.subr.bf16.mxu0 %v13519_v15  ;;  %7568 = vmatprep.subr.bf16.mxu1 %v13521_v8  ;;  %16807 = vst [vmem:[#allocation142_spill] sm:$0xff] %v13543_v21  ;;  %v791_v8 = vld [vmem:[#allocation7 + $0x700] sm:$0xff]  ;;  %v796_v36 = vld [vmem:[#allocation7 + $0x728] sm:$0xff] }
 0x315   :  { %v795_v15 = vld [vmem:[#allocation7 + $0x720] sm:$0xff]  ;;  %v13561_v10 = vcombine.high %v792_v23, %v796_v36  ;;  %v13585_v22 = vcombine.low %v792_v23, %v796_v36 }
 0x316   :  { %v13583_v6 = vcombine.low %v791_v8, %v795_v15 }
 0x317   :  { %7364 = vmatpush1.bf16.msra.mxu0 %v13525_v19  ;;  %7569 = vmatpush1.bf16.msra.mxu1 %v13527_v37 }
 0x318   :  { %7365 = vmatprep.subr.bf16.mxu0 %v13531_v32  ;;  %7570 = vmatprep.subr.bf16.mxu1 %v13533_v28  ;;  %v13555_v32 = vcombine.high %v791_v8, %v795_v15  ;;  %v13602_v15 = vrot.slane %v13374_v12, %v4362_v16 }
 0x31a   :  { %v4275_v30 = vpop.f32.mrb[32].mxu0  ;;  %v4316_v19 = vpop.f32.mrb[32].mxu1  ;;  %16814 = vst [vmem:[#allocation145_spill] sm:$0xff] %v13602_v15 }
 0x31b   :  { %v4337_v43 = vmax.f32 %v13340_v35, %v4275_v30  ;;  %v4339_v33 = vmax.f32 %v13365_v27, %v4316_v19  ;;  %7366 = vmatpush1.bf16.msra.mxu0 %v13537_v38  ;;  %7571 = vmatpush1.bf16.msra.mxu1 %v13539_v26  ;;  %v4277_v44 = vpop.f32.mrb[33].mxu0  ;;  %v4318_v28 = vpop.f32.mrb[33].mxu1  ;;  %v799_v35 = vld [vmem:[#allocation7 + $0x740] sm:$0xff] }
 0x31c   :  { %v4338_v37 = vmax.f32 %v13361_v31, %v4277_v44  ;;  %v4340_v1 = vmax.f32 %v13363_v40, %v4318_v28  ;;  %7367 = vmatprep.subr.bf16.mxu0 %v13543_v21  ;;  %7572 = vmatprep.subr.bf16.mxu1 %v13545_v34  ;;  %v4279_v27 = vpop.f32.mrb[34].mxu0  ;;  %v4320_v30 = vpop.f32.mrb[34].mxu1  ;;  %v803_v31 = vld [vmem:[#allocation7 + $0x760] sm:$0xff]  ;;  %v800_v40 = vld [vmem:[#allocation7 + $0x748] sm:$0xff]  ;;  %v16811_v34 = vmax.f32 %v13031_v4, %v13109_v42 }
 0x31d   :  { %v4346_v25 = vmax.f32 %v16809_v0, %v4337_v43  ;;  %v13569_v19 = vmax.f32 %v16810_v63, %v4339_v33  ;;  %v804_v28 = vld [vmem:[#allocation7 + $0x768] sm:$0xff]  ;;  %v4280_v44 = vpop.f32.mrb[35].mxu0  ;;  %v4321_v21 = vpop.f32.mrb[35].mxu1  ;;  %v16812_v27 = vmax.f32 %v13059_v9, %v13165_v45  ;;  %v13590_v4 = vcombine.high %v799_v35, %v803_v31  ;;  %v807_v9 = vld [vmem:[#allocation7 + $0x780] sm:$0xff] }
 0x31e   :  { %v13574_v26 = vmax.f32 %v16811_v34, %v4338_v37  ;;  %v13592_v42 = vcombine.high %v800_v40, %v804_v28  ;;  %v4374_v45 = vsub.s32 5, %v13371_v13  ;;  %v808_v37 = vld [vmem:[#allocation7 + $0x788] sm:$0xff]  ;;  %v13597_v36 = vcombine.low %v799_v35, %v803_v31  ;;  %v815_v43 = vld [vmem:[#allocation7 + $0x7c0] sm:$0xff] }
 0x31f   :  { %v13579_v5 = vmax.f32 %v16812_v27, %v4340_v1  ;;  %7368 = vmatpush1.bf16.msra.mxu0 %v13547_v39  ;;  %7573 = vmatpush1.bf16.msra.mxu1 %v13549_v51  ;;  %v811_v1 = vld [vmem:[#allocation7 + $0x7a0] sm:$0xff]  ;;  %v812_v21 = vld [vmem:[#allocation7 + $0x7a8] sm:$0xff]  ;;  %v13599_v23 = vcombine.low %v800_v40, %v804_v28  ;;  %v4399_v40 = vadd.f32 %v13602_v15, %v13402_v29 }
 0x320   :  { %7369 = vmatprep.subr.bf16.mxu0 %v13555_v32  ;;  %7574 = vmatprep.subr.bf16.mxu1 %v13561_v10  ;;  %v13606_v8 = vcombine.high %v807_v9, %v811_v1  ;;  %v13608_v34 = vcombine.high %v808_v37, %v812_v21  ;;  %v13611_v33 = vrot.slane %v13374_v12, %v4374_v45  ;;  %v819_v30 = vld [vmem:[#allocation7 + $0x7e0] sm:$0xff]  ;;  %v816_v35 = vld [vmem:[#allocation7 + $0x7c8] sm:$0xff] }
 0x321   :  { %16813 = vst [vmem:[#allocation144_spill] sm:$0xff] %v13599_v23  ;;  %v820_v0 = vld [vmem:[#allocation7 + $0x7e8] sm:$0xff]  ;;  %v13615_v63 = vcombine.low %v807_v9, %v811_v1  ;;  %v13617_v31 = vcombine.low %v808_v37, %v812_v21  ;;  %v13623_v28 = vcombine.high %v815_v43, %v819_v30  ;;  %v823_v27 = vld [vmem:[#allocation7 + $0x800] sm:$0xff]  ;;  %v13630_v1 = vcombine.low %v815_v43, %v819_v30 }
 0x322   :  { %16815 = vst [vmem:[#allocation146_spill] sm:$0xff] %v13606_v8  ;;  %16816 = vst [vmem:[#allocation147_spill] sm:$0xff] %v13608_v34  ;;  %v13625_v44 = vcombine.high %v816_v35, %v820_v0  ;;  %v4402_v16 = vadd.f32 %v13611_v33, %v4346_v25  ;;  %v827_v45 = vld [vmem:[#allocation7 + $0x820] sm:$0xff]  ;;  %v828_v9 = vld [vmem:[#allocation7 + $0x828] sm:$0xff]  ;;  %v13632_v29 = vcombine.low %v816_v35, %v820_v0  ;;  %v4408_v37 = vmax.f32 %v4399_v40, 0.0 }
 0x323   :  { %7370 = vmatpush1.bf16.msra.mxu0 %v13583_v6  ;;  %7575 = vmatpush1.bf16.msra.mxu1 %v13585_v22  ;;  %16817 = vst [vmem:[#allocation148_spill] sm:$0xff] %v13611_v33  ;;  %16818 = vst [vmem:[#allocation149_spill] sm:$0xff] %v13615_v63  ;;  %v13636_v21 = vcombine.high %v823_v27, %v827_v45  ;;  %v831_v33 = vld [vmem:[#allocation7 + $0x840] sm:$0xff]  ;;  %v832_v15 = vld [vmem:[#allocation7 + $0x848] sm:$0xff]  ;;  %v13642_v43 = vcombine.low %v823_v27, %v827_v45 }
 0x324   :  { %7371 = vmatprep.subr.bf16.mxu0 %v13590_v4  ;;  %7576 = vmatprep.subr.bf16.mxu1 %v13592_v42  ;;  %16819 = vst [vmem:[#allocation150_spill] sm:$0xff] %v13617_v31  ;;  %16820 = vst [vmem:[#allocation151_spill] sm:$0xff] %v13623_v28  ;;  %v4411_v25 = vmax.f32 %v4402_v16, 0.0  ;;  %v13644_v30 = vpack.c.bf16 %v4408_v37, %v4408_v37  ;;  %v840_v27 = vld [vmem:[#allocation7 + $0x888] sm:$0xff] }
 0x325   :  { %16821 = vst [vmem:[#allocation152_spill] sm:$0xff] %v13625_v44  ;;  %16822 = vst [vmem:[#allocation153_spill] sm:$0xff] %v13630_v1  ;;  %v844_v45 = vld [vmem:[#allocation7 + $0x8a8] sm:$0xff] }
 0x326   :  { %16823 = vst [vmem:[#allocation154_spill] sm:$0xff] %v13632_v29  ;;  %16824 = vst [vmem:[#allocation155_spill] sm:$0xff] %v13636_v21  ;;  %v13650_v0 = vpack.c.bf16 %v4411_v25, %v4411_v25  ;;  %v13670_v25 = vcombine.high %v840_v27, %v844_v45 }
 0x327   :  { %7372 = vmatpush1.bf16.msra.mxu0 %v13597_v36  ;;  %7577 = vmatpush1.bf16.msra.mxu1 %v13599_v23  ;;  %v824_v23 = vld [vmem:[#allocation7 + $0x808] sm:$0xff]  ;;  %16826 = vst [vmem:[#allocation157_spill] sm:$0xff] %v13642_v43 }
 0x328   :  { %7373 = vmatprep.subr.bf16.mxu0 %v13606_v8  ;;  %7578 = vmatprep.subr.bf16.mxu1 %v13608_v34  ;;  %v13638_v34 = vcombine.high %v824_v23, %v828_v9  ;;  %v835_v8 = vld [vmem:[#allocation7 + $0x860] sm:$0xff]  ;;  %v13647_v35 = vcombine.low %v824_v23, %v828_v9  ;;  %16833 = vst [vmem:[#allocation164_spill] sm:$0xff] %v13670_v25 }
 0x329   :  { %v13652_v40 = vcombine.high %v831_v33, %v835_v8  ;;  %v13660_v23 = vcombine.low %v831_v33, %v835_v8 }
 0x32a   :  { %16825 = vst [vmem:[#allocation156_spill] sm:$0xff] %v13638_v34  ;;  %16827 = vst [vmem:[#allocation158_spill] sm:$0xff] %v13647_v35 }
 0x32b   :  { %7374 = vmatpush1.bf16.msra.mxu0 %v13615_v63  ;;  %7579 = vmatpush1.bf16.msra.mxu1 %v13617_v31  ;;  %v836_v63 = vld [vmem:[#allocation7 + $0x868] sm:$0xff]  ;;  %16828 = vst [vmem:[#allocation159_spill] sm:$0xff] %v13652_v40  ;;  %16830 = vst [vmem:[#allocation161_spill] sm:$0xff] %v13660_v23  ;;  %v947_v31 = vld [vmem:[#allocation7 + $0xbe0] sm:$0xff] }
 0x32c   :  { %7375 = vmatprep.subr.bf16.mxu0 %v13623_v28  ;;  %7580 = vmatprep.subr.bf16.mxu1 %v13625_v44  ;;  %v13654_v16 = vcombine.high %v832_v15, %v836_v63  ;;  %v839_v44 = vld [vmem:[#allocation7 + $0x880] sm:$0xff]  ;;  %v13664_v9 = vcombine.low %v832_v15, %v836_v63  ;;  %v13677_v15 = vcombine.low %v840_v27, %v844_v45  ;;  %v860_v28 = vld [vmem:[#allocation7 + $0x928] sm:$0xff] }
 0x32e   :  { %16829 = vst [vmem:[#allocation160_spill] sm:$0xff] %v13654_v16  ;;  %16831 = vst [vmem:[#allocation162_spill] sm:$0xff] %v13664_v9 }
 0x32f   :  { %7376 = vmatpush1.bf16.msra.mxu0 %v13630_v1  ;;  %7581 = vmatpush1.bf16.msra.mxu1 %v13632_v29  ;;  %v843_v1 = vld [vmem:[#allocation7 + $0x8a0] sm:$0xff]  ;;  %v852_v29 = vld [vmem:[#allocation7 + $0x8e8] sm:$0xff]  ;;  %16835 = vst [vmem:[#allocation166_spill] sm:$0xff] %v13677_v15 }
 0x330   :  { %7386 = vmatprep.subr.bf16.mxu0 %v13636_v21  ;;  %7591 = vmatprep.subr.bf16.mxu1 %v13638_v34  ;;  %v13666_v37 = vcombine.high %v839_v44, %v843_v1  ;;  %v847_v34 = vld [vmem:[#allocation7 + $0x8c0] sm:$0xff]  ;;  %v848_v21 = vld [vmem:[#allocation7 + $0x8c8] sm:$0xff]  ;;  %v13673_v8 = vcombine.low %v839_v44, %v843_v1 }
 0x331   :  { %v13682_v63 = vcombine.high %v848_v21, %v852_v29  ;;  %v13689_v1 = vcombine.low %v848_v21, %v852_v29 }
 0x332   :  { %7378 = vmatmul.mubr.bf16.vlgmr.msra.gmra.mrb[36].mxu0 %v13644_v30  ;;  %7583 = vmatmul.mubr.bf16.vlgmr.msra.gmra.mrb[36].mxu1 %v13644_v30  ;;  %16832 = vst [vmem:[#allocation163_spill] sm:$0xff] %v13666_v37  ;;  %16834 = vst [vmem:[#allocation165_spill] sm:$0xff] %v13673_v8 }
 0x333   :  { %7387 = vmatpush1.bf16.msra.mxu0 %v13642_v43  ;;  %7418 = vmatprep.mubr.bf16.mxu0 %v13650_v0  ;;  %v851_v43 = vld [vmem:[#allocation7 + $0x8e0] sm:$0xff]  ;;  %16837 = vst [vmem:[#allocation168_spill] sm:$0xff] %v13682_v63  ;;  %16839 = vst [vmem:[#allocation170_spill] sm:$0xff] %v13689_v1 }
 0x334   :  { %7592 = vmatpush1.bf16.msra.mxu1 %v13647_v35  ;;  %7623 = vmatprep.mubr.bf16.mxu1 %v13650_v0  ;;  %v13679_v33 = vcombine.high %v847_v34, %v851_v43  ;;  %v856_v35 = vld [vmem:[#allocation7 + $0x908] sm:$0xff]  ;;  %v13685_v44 = vcombine.low %v847_v34, %v851_v43 }
 0x335   :  { %7388 = vmatprep.subr.bf16.mxu0 %v13652_v40  ;;  %7593 = vmatprep.subr.bf16.mxu1 %v13654_v16  ;;  %v855_v16 = vld [vmem:[#allocation7 + $0x900] sm:$0xff]  ;;  %v13694_v45 = vcombine.high %v856_v35, %v860_v28  ;;  %v13701_v29 = vcombine.low %v856_v35, %v860_v28 }
 0x336   :  { %16836 = vst [vmem:[#allocation167_spill] sm:$0xff] %v13679_v33  ;;  %v859_v40 = vld [vmem:[#allocation7 + $0x920] sm:$0xff]  ;;  %16838 = vst [vmem:[#allocation169_spill] sm:$0xff] %v13685_v44 }
 0x337   :  { %7389 = vmatpush1.bf16.msra.mxu0 %v13660_v23  ;;  %v13691_v27 = vcombine.high %v855_v16, %v859_v40  ;;  %16841 = vst [vmem:[#allocation172_spill] sm:$0xff] %v13694_v45  ;;  %v868_v23 = vld [vmem:[#allocation7 + $0x968] sm:$0xff]  ;;  %v13697_v34 = vcombine.low %v855_v16, %v859_v40  ;;  %16843 = vst [vmem:[#allocation174_spill] sm:$0xff] %v13701_v29 }
 0x338   :  { %7594 = vmatpush1.bf16.msra.mxu1 %v13664_v9  ;;  %7390 = vmatprep.subr.bf16.mxu0 %v13666_v37  ;;  %v867_v37 = vld [vmem:[#allocation7 + $0x960] sm:$0xff]  ;;  %v864_v9 = vld [vmem:[#allocation7 + $0x948] sm:$0xff] }
 0x339   :  { %7595 = vmatprep.subr.bf16.mxu1 %v13670_v25  ;;  %16840 = vst [vmem:[#allocation171_spill] sm:$0xff] %v13691_v27  ;;  %v863_v25 = vld [vmem:[#allocation7 + $0x940] sm:$0xff]  ;;  %16842 = vst [vmem:[#allocation173_spill] sm:$0xff] %v13697_v34  ;;  %v13706_v43 = vcombine.high %v864_v9, %v868_v23  ;;  %v13713_v28 = vcombine.low %v864_v9, %v868_v23 }
 0x33a   :  { %v13703_v21 = vcombine.high %v863_v25, %v867_v37  ;;  %v13709_v40 = vcombine.low %v863_v25, %v867_v37 }
 0x33b   :  { %7391 = vmatpush1.bf16.msra.mxu0 %v13673_v8  ;;  %16845 = vst [vmem:[#allocation176_spill] sm:$0xff] %v13706_v43  ;;  %v876_v8 = vld [vmem:[#allocation7 + $0x9a8] sm:$0xff]  ;;  %16847 = vst [vmem:[#allocation178_spill] sm:$0xff] %v13713_v28 }
 0x33c   :  { %7596 = vmatpush1.bf16.msra.mxu1 %v13677_v15  ;;  %7392 = vmatprep.subr.bf16.mxu0 %v13679_v33  ;;  %16844 = vst [vmem:[#allocation175_spill] sm:$0xff] %v13703_v21  ;;  %v875_v33 = vld [vmem:[#allocation7 + $0x9a0] sm:$0xff]  ;;  %v872_v15 = vld [vmem:[#allocation7 + $0x988] sm:$0xff]  ;;  %16846 = vst [vmem:[#allocation177_spill] sm:$0xff] %v13709_v40 }
 0x33d   :  { %7597 = vmatprep.subr.bf16.mxu1 %v13682_v63  ;;  %v871_v63 = vld [vmem:[#allocation7 + $0x980] sm:$0xff]  ;;  %v13718_v16 = vcombine.high %v872_v15, %v876_v8  ;;  %v13725_v23 = vcombine.low %v872_v15, %v876_v8 }
 0x33e   :  { %v13715_v35 = vcombine.high %v871_v63, %v875_v33  ;;  %v13721_v37 = vcombine.low %v871_v63, %v875_v33 }
 0x33f   :  { %7393 = vmatpush1.bf16.msra.mxu0 %v13685_v44  ;;  %16849 = vst [vmem:[#allocation180_spill] sm:$0xff] %v13718_v16  ;;  %v884_v44 = vld [vmem:[#allocation7 + $0x9e8] sm:$0xff]  ;;  %16851 = vst [vmem:[#allocation182_spill] sm:$0xff] %v13725_v23 }
 0x340   :  { %7598 = vmatpush1.bf16.msra.mxu1 %v13689_v1  ;;  %7394 = vmatprep.subr.bf16.mxu0 %v13691_v27  ;;  %16848 = vst [vmem:[#allocation179_spill] sm:$0xff] %v13715_v35  ;;  %v883_v27 = vld [vmem:[#allocation7 + $0x9e0] sm:$0xff]  ;;  %v880_v1 = vld [vmem:[#allocation7 + $0x9c8] sm:$0xff]  ;;  %16850 = vst [vmem:[#allocation181_spill] sm:$0xff] %v13721_v37 }
 0x341   :  { %7599 = vmatprep.subr.bf16.mxu1 %v13694_v45  ;;  %v879_v45 = vld [vmem:[#allocation7 + $0x9c0] sm:$0xff]  ;;  %v13730_v25 = vcombine.high %v880_v1, %v884_v44  ;;  %v13737_v8 = vcombine.low %v880_v1, %v884_v44 }
 0x342   :  { %v13727_v9 = vcombine.high %v879_v45, %v883_v27  ;;  %v13733_v33 = vcombine.low %v879_v45, %v883_v27 }
 0x343   :  { %7395 = vmatpush1.bf16.msra.mxu0 %v13697_v34  ;;  %16853 = vst [vmem:[#allocation184_spill] sm:$0xff] %v13730_v25  ;;  %v892_v34 = vld [vmem:[#allocation7 + $0xa28] sm:$0xff]  ;;  %16855 = vst [vmem:[#allocation186_spill] sm:$0xff] %v13737_v8 }
 0x344   :  { %7600 = vmatpush1.bf16.msra.mxu1 %v13701_v29  ;;  %7396 = vmatprep.subr.bf16.mxu0 %v13703_v21  ;;  %16852 = vst [vmem:[#allocation183_spill] sm:$0xff] %v13727_v9  ;;  %v891_v21 = vld [vmem:[#allocation7 + $0xa20] sm:$0xff]  ;;  %v888_v29 = vld [vmem:[#allocation7 + $0xa08] sm:$0xff]  ;;  %16854 = vst [vmem:[#allocation185_spill] sm:$0xff] %v13733_v33 }
 0x345   :  { %7601 = vmatprep.subr.bf16.mxu1 %v13706_v43  ;;  %v887_v43 = vld [vmem:[#allocation7 + $0xa00] sm:$0xff]  ;;  %v13742_v63 = vcombine.high %v888_v29, %v892_v34  ;;  %v13749_v44 = vcombine.low %v888_v29, %v892_v34 }
 0x346   :  { %v13739_v15 = vcombine.high %v887_v43, %v891_v21  ;;  %v13745_v27 = vcombine.low %v887_v43, %v891_v21 }
 0x347   :  { %7397 = vmatpush1.bf16.msra.mxu0 %v13709_v40  ;;  %16857 = vst [vmem:[#allocation188_spill] sm:$0xff] %v13742_v63  ;;  %v900_v40 = vld [vmem:[#allocation7 + $0xa68] sm:$0xff]  ;;  %16859 = vst [vmem:[#allocation190_spill] sm:$0xff] %v13749_v44 }
 0x348   :  { %7602 = vmatpush1.bf16.msra.mxu1 %v13713_v28  ;;  %7398 = vmatprep.subr.bf16.mxu0 %v13715_v35  ;;  %16856 = vst [vmem:[#allocation187_spill] sm:$0xff] %v13739_v15  ;;  %v899_v35 = vld [vmem:[#allocation7 + $0xa60] sm:$0xff]  ;;  %v896_v28 = vld [vmem:[#allocation7 + $0xa48] sm:$0xff]  ;;  %16858 = vst [vmem:[#allocation189_spill] sm:$0xff] %v13745_v27 }
 0x349   :  { %7603 = vmatprep.subr.bf16.mxu1 %v13718_v16  ;;  %v895_v16 = vld [vmem:[#allocation7 + $0xa40] sm:$0xff]  ;;  %v13754_v45 = vcombine.high %v896_v28, %v900_v40  ;;  %v13761_v34 = vcombine.low %v896_v28, %v900_v40 }
 0x34a   :  { %v13751_v1 = vcombine.high %v895_v16, %v899_v35  ;;  %v13757_v21 = vcombine.low %v895_v16, %v899_v35 }
 0x34b   :  { %7399 = vmatpush1.bf16.msra.mxu0 %v13721_v37  ;;  %16861 = vst [vmem:[#allocation192_spill] sm:$0xff] %v13754_v45  ;;  %v908_v37 = vld [vmem:[#allocation7 + $0xaa8] sm:$0xff]  ;;  %16863 = vst [vmem:[#allocation194_spill] sm:$0xff] %v13761_v34 }
 0x34c   :  { %7604 = vmatpush1.bf16.msra.mxu1 %v13725_v23  ;;  %7400 = vmatprep.subr.bf16.mxu0 %v13727_v9  ;;  %16860 = vst [vmem:[#allocation191_spill] sm:$0xff] %v13751_v1  ;;  %v907_v9 = vld [vmem:[#allocation7 + $0xaa0] sm:$0xff]  ;;  %v904_v23 = vld [vmem:[#allocation7 + $0xa88] sm:$0xff]  ;;  %16862 = vst [vmem:[#allocation193_spill] sm:$0xff] %v13757_v21 }
 0x34d   :  { %7605 = vmatprep.subr.bf16.mxu1 %v13730_v25  ;;  %v903_v25 = vld [vmem:[#allocation7 + $0xa80] sm:$0xff]  ;;  %v13766_v43 = vcombine.high %v904_v23, %v908_v37  ;;  %v13773_v40 = vcombine.low %v904_v23, %v908_v37 }
 0x34e   :  { %v13763_v29 = vcombine.high %v903_v25, %v907_v9  ;;  %v13769_v35 = vcombine.low %v903_v25, %v907_v9 }
 0x34f   :  { %7401 = vmatpush1.bf16.msra.mxu0 %v13733_v33  ;;  %16865 = vst [vmem:[#allocation196_spill] sm:$0xff] %v13766_v43  ;;  %v916_v33 = vld [vmem:[#allocation7 + $0xae8] sm:$0xff]  ;;  %16867 = vst [vmem:[#allocation198_spill] sm:$0xff] %v13773_v40 }
 0x350   :  { %7606 = vmatpush1.bf16.msra.mxu1 %v13737_v8  ;;  %7402 = vmatprep.subr.bf16.mxu0 %v13739_v15  ;;  %16864 = vst [vmem:[#allocation195_spill] sm:$0xff] %v13763_v29  ;;  %v915_v15 = vld [vmem:[#allocation7 + $0xae0] sm:$0xff]  ;;  %v912_v8 = vld [vmem:[#allocation7 + $0xac8] sm:$0xff]  ;;  %16866 = vst [vmem:[#allocation197_spill] sm:$0xff] %v13769_v35 }
 0x351   :  { %7607 = vmatprep.subr.bf16.mxu1 %v13742_v63  ;;  %v911_v63 = vld [vmem:[#allocation7 + $0xac0] sm:$0xff]  ;;  %v13778_v16 = vcombine.high %v912_v8, %v916_v33  ;;  %v13785_v37 = vcombine.low %v912_v8, %v916_v33 }
 0x352   :  { %v13775_v28 = vcombine.high %v911_v63, %v915_v15  ;;  %v13781_v9 = vcombine.low %v911_v63, %v915_v15  ;;  %v4370_v63 = vsub.s32 4, %v13371_v13 }
 0x353   :  { %7403 = vmatpush1.bf16.msra.mxu0 %v13745_v27  ;;  %16869 = vst [vmem:[#allocation200_spill] sm:$0xff] %v13778_v16  ;;  %v924_v27 = vld [vmem:[#allocation7 + $0xb28] sm:$0xff]  ;;  %16871 = vst [vmem:[#allocation202_spill] sm:$0xff] %v13785_v37 }
 0x354   :  { %7608 = vmatpush1.bf16.msra.mxu1 %v13749_v44  ;;  %7404 = vmatprep.subr.bf16.mxu0 %v13751_v1  ;;  %16868 = vst [vmem:[#allocation199_spill] sm:$0xff] %v13775_v28  ;;  %v923_v1 = vld [vmem:[#allocation7 + $0xb20] sm:$0xff]  ;;  %v920_v44 = vld [vmem:[#allocation7 + $0xb08] sm:$0xff]  ;;  %16870 = vst [vmem:[#allocation201_spill] sm:$0xff] %v13781_v9 }
 0x355   :  { %7609 = vmatprep.subr.bf16.mxu1 %v13754_v45  ;;  %v919_v45 = vld [vmem:[#allocation7 + $0xb00] sm:$0xff]  ;;  %v13790_v25 = vcombine.high %v920_v44, %v924_v27  ;;  %v13798_v33 = vcombine.low %v920_v44, %v924_v27 }
 0x356   :  { %v13787_v23 = vcombine.high %v919_v45, %v923_v1  ;;  %v13793_v15 = vcombine.low %v919_v45, %v923_v1  ;;  %v936_v1 = vld [vmem:[#allocation7 + $0xb88] sm:$0xff] }
 0x357   :  { %7405 = vmatpush1.bf16.msra.mxu0 %v13757_v21  ;;  %16873 = vst [vmem:[#allocation204_spill] sm:$0xff] %v13790_v25  ;;  %v932_v21 = vld [vmem:[#allocation7 + $0xb68] sm:$0xff]  ;;  %16874 = vst [vmem:[#allocation205_spill] sm:$0xff] %v13798_v33 }
 0x358   :  { %7610 = vmatpush1.bf16.msra.mxu1 %v13761_v34  ;;  %7406 = vmatprep.subr.bf16.mxu0 %v13763_v29  ;;  %16872 = vst [vmem:[#allocation203_spill] sm:$0xff] %v13787_v23  ;;  %v931_v29 = vld [vmem:[#allocation7 + $0xb60] sm:$0xff]  ;;  %v928_v34 = vld [vmem:[#allocation7 + $0xb48] sm:$0xff] }
 0x359   :  { %7611 = vmatprep.subr.bf16.mxu1 %v13766_v43  ;;  %v927_v43 = vld [vmem:[#allocation7 + $0xb40] sm:$0xff]  ;;  %v940_v45 = vld [vmem:[#allocation7 + $0xba8] sm:$0xff]  ;;  %v13814_v27 = vcombine.low %v928_v34, %v932_v21 }
 0x35a   :  { %v13800_v8 = vcombine.high %v927_v43, %v931_v29 }
 0x35b   :  { %7407 = vmatpush1.bf16.msra.mxu0 %v13769_v35  ;;  %v13807_v35 = vcombine.low %v927_v43, %v931_v29  ;;  %16878 = vst [vmem:[#allocation209_spill] sm:$0xff] %v13814_v27  ;;  %v944_v43 = vld [vmem:[#allocation7 + $0xbc8] sm:$0xff] }
 0x35c   :  { %7612 = vmatpush1.bf16.msra.mxu1 %v13773_v40  ;;  %7408 = vmatprep.subr.bf16.mxu0 %v13775_v28  ;;  %16875 = vst [vmem:[#allocation206_spill] sm:$0xff] %v13800_v8  ;;  %v935_v28 = vld [vmem:[#allocation7 + $0xb80] sm:$0xff] }
 0x35d   :  { %7613 = vmatprep.subr.bf16.mxu1 %v13778_v16  ;;  %v13803_v16 = vcombine.high %v928_v34, %v932_v21  ;;  %v939_v40 = vld [vmem:[#allocation7 + $0xba0] sm:$0xff]  ;;  %16877 = vst [vmem:[#allocation208_spill] sm:$0xff] %v13807_v35  ;;  %v13831_v34 = vcombine.low %v936_v1, %v940_v45 }
 0x35e   :  { %v13816_v44 = vcombine.high %v935_v28, %v939_v40 }
 0x35f   :  { %7409 = vmatpush1.bf16.msra.mxu0 %v13781_v9  ;;  %16876 = vst [vmem:[#allocation207_spill] sm:$0xff] %v13803_v16  ;;  %v4382_v9 = vsub.s32 7, %v13371_v13  ;;  %16883 = vst [vmem:[#allocation214_spill] sm:$0xff] %v13831_v34 }
 0x360   :  { %7614 = vmatpush1.bf16.msra.mxu1 %v13785_v37  ;;  %7410 = vmatprep.subr.bf16.mxu0 %v13787_v23  ;;  %v13810_v23 = vrot.slane %v13374_v12, %v4370_v63  ;;  %16879 = vst [vmem:[#allocation210_spill] sm:$0xff] %v13816_v44  ;;  %v943_v37 = vld [vmem:[#allocation7 + $0xbc0] sm:$0xff]  ;;  %v948_v63 = vld [vmem:[#allocation7 + $0xbe8] sm:$0xff] }
 0x361   :  { %7615 = vmatprep.subr.bf16.mxu1 %v13790_v25  ;;  %v13819_v25 = vcombine.high %v936_v1, %v940_v45  ;;  %v13822_v29 = vrot.slane %v13374_v12, %v4382_v9  ;;  %v13836_v12 = vcombine.high %v944_v43, %v948_v63  ;;  %v951_v9 = vld [vmem:[#allocation7 + $0xc00] sm:$0xff]  ;;  %v13845_v1 = vcombine.low %v944_v43, %v948_v63 }
 0x362   :  { %v4401_v21 = vadd.f32 %v13810_v23, %v13407_v17  ;;  %v13841_v17 = vcombine.low %v943_v37, %v947_v31 }
 0x363   :  { %7411 = vmatpush1.bf16.msra.mxu0 %v13793_v15  ;;  %16880 = vst [vmem:[#allocation211_spill] sm:$0xff] %v13819_v25  ;;  %16881 = vst [vmem:[#allocation212_spill] sm:$0xff] %v13822_v29 }
 0x364   :  { %7616 = vmatpush1.bf16.msra.mxu1 %v13798_v33  ;;  %7412 = vmatprep.subr.bf16.mxu0 %v13800_v8  ;;  %v13825_v33 = vcombine.low %v935_v28, %v939_v40  ;;  %16885 = vst [vmem:[#allocation216_spill] sm:$0xff] %v13836_v12  ;;  %v955_v8 = vld [vmem:[#allocation7 + $0xc20] sm:$0xff]  ;;  %v4404_v40 = vadd.f32 %v13822_v29, %v13569_v19  ;;  %v952_v28 = vld [vmem:[#allocation7 + $0xc08] sm:$0xff]  ;;  %16886 = vst [vmem:[#allocation217_spill] sm:$0xff] %v13841_v17 }
 0x365   :  { %7617 = vmatprep.subr.bf16.mxu1 %v13803_v16  ;;  %v13833_v16 = vcombine.high %v943_v37, %v947_v31  ;;  %16887 = vst [vmem:[#allocation218_spill] sm:$0xff] %v13845_v1  ;;  %v13847_v45 = vcombine.high %v951_v9, %v955_v8  ;;  %v959_v29 = vld [vmem:[#allocation7 + $0xc40] sm:$0xff]  ;;  %v13853_v31 = vcombine.low %v951_v9, %v955_v8  ;;  %v960_v37 = vld [vmem:[#allocation7 + $0xc48] sm:$0xff] }
 0x366   :  { %16882 = vst [vmem:[#allocation213_spill] sm:$0xff] %v13825_v33  ;;  %v4413_v19 = vmax.f32 %v4404_v40, 0.0  ;;  %v967_v40 = vld [vmem:[#allocation7 + $0xc80] sm:$0xff]  ;;  %v972_v9 = vld [vmem:[#allocation7 + $0xca8] sm:$0xff] }
 0x367   :  { %7413 = vmatpush1.bf16.msra.mxu0 %v13807_v35  ;;  %16884 = vst [vmem:[#allocation215_spill] sm:$0xff] %v13833_v16  ;;  %v956_v35 = vld [vmem:[#allocation7 + $0xc28] sm:$0xff]  ;;  %16888 = vst [vmem:[#allocation219_spill] sm:$0xff] %v13847_v45 }
 0x368   :  { %7618 = vmatpush1.bf16.msra.mxu1 %v13814_v27  ;;  %7414 = vmatprep.subr.bf16.mxu0 %v13816_v44  ;;  %v4410_v44 = vmax.f32 %v4401_v21, 0.0  ;;  %v963_v27 = vld [vmem:[#allocation7 + $0xc60] sm:$0xff]  ;;  %16890 = vst [vmem:[#allocation221_spill] sm:$0xff] %v13853_v31  ;;  %v964_v21 = vld [vmem:[#allocation7 + $0xc68] sm:$0xff]  ;;  %v13859_v43 = vcombine.low %v952_v28, %v956_v35 }
 0x369   :  { %7619 = vmatprep.subr.bf16.mxu1 %v13819_v25  ;;  %v13850_v25 = vcombine.high %v952_v28, %v956_v35  ;;  %v13862_v63 = vcombine.high %v959_v29, %v963_v27  ;;  %v13867_v8 = vcombine.high %v960_v37, %v964_v21  ;;  %v13871_v35 = vcombine.low %v959_v29, %v963_v27  ;;  %v976_v27 = vld [vmem:[#allocation7 + $0xcc8] sm:$0xff] }
 0x36a   :  { %16891 = vst [vmem:[#allocation222_spill] sm:$0xff] %v13859_v43  ;;  %v13875_v28 = vcombine.low %v960_v37, %v964_v21  ;;  %v980_v29 = vld [vmem:[#allocation7 + $0xce8] sm:$0xff] }
 0x36b   :  { %7415 = vmatpush1.bf16.msra.mxu0 %v13825_v33  ;;  %16889 = vst [vmem:[#allocation220_spill] sm:$0xff] %v13850_v25  ;;  %16892 = vst [vmem:[#allocation223_spill] sm:$0xff] %v13862_v63  ;;  %v988_v33 = vld [vmem:[#allocation7 + $0xd28] sm:$0xff] }
 0x36c   :  { %7620 = vmatpush1.bf16.msra.mxu1 %v13831_v34  ;;  %7416 = vmatprep.subr.bf16.mxu0 %v13833_v16  ;;  %v13855_v34 = vpack.c.bf16 %v4410_v44, %v4410_v44  ;;  %v13864_v16 = vpack.c.bf16 %v4413_v19, %v4413_v19  ;;  %16893 = vst [vmem:[#allocation224_spill] sm:$0xff] %v13867_v8  ;;  %v968_v44 = vld [vmem:[#allocation7 + $0xc88] sm:$0xff]  ;;  %16894 = vst [vmem:[#allocation225_spill] sm:$0xff] %v13871_v35 }
 0x36d   :  { %7621 = vmatprep.subr.bf16.mxu1 %v13836_v12  ;;  %v971_v12 = vld [vmem:[#allocation7 + $0xca0] sm:$0xff]  ;;  %16895 = vst [vmem:[#allocation226_spill] sm:$0xff] %v13875_v28  ;;  %v13889_v37 = vcombine.low %v968_v44, %v972_v9 }
 0x36e   :  { %v13877_v19 = vcombine.high %v967_v40, %v971_v12 }
 0x36f   :  { %7417 = vmatpush1.bf16.msra.mxu0 %v13841_v17  ;;  %16899 = vst [vmem:[#allocation230_spill] sm:$0xff] %v13889_v37  ;;  %v984_v17 = vld [vmem:[#allocation7 + $0xd08] sm:$0xff] }
 0x370   :  { %7622 = vmatpush1.bf16.msra.mxu1 %v13845_v1  ;;  %7427 = vmatprep.subr.bf16.mxu0 %v13847_v45  ;;  %16896 = vst [vmem:[#allocation227_spill] sm:$0xff] %v13877_v19  ;;  %v975_v45 = vld [vmem:[#allocation7 + $0xcc0] sm:$0xff] }
 0x371   :  { %7632 = vmatprep.subr.bf16.mxu1 %v13850_v25  ;;  %v13881_v25 = vcombine.high %v968_v44, %v972_v9  ;;  %v979_v1 = vld [vmem:[#allocation7 + $0xce0] sm:$0xff]  ;;  %v13906_v9 = vcombine.high %v984_v17, %v988_v33 }
 0x372   :  { %7419 = vmatmul.mubr.bf16.vlgmr.msra.gmra.mrb[36].mxu0 %v13855_v34  ;;  %v13891_v21 = vcombine.high %v975_v45, %v979_v1 }
 0x373   :  { %7624 = vmatmul.mubr.bf16.vlgmr.msra.gmra.mrb[36].mxu1 %v13855_v34  ;;  %7428 = vmatpush1.bf16.msra.mxu0 %v13853_v31  ;;  %16897 = vst [vmem:[#allocation228_spill] sm:$0xff] %v13881_v25  ;;  %v13885_v31 = vcombine.low %v967_v40, %v971_v12  ;;  %v13897_v12 = vcombine.low %v975_v45, %v979_v1  ;;  %16905 = vst [vmem:[#allocation236_spill] sm:$0xff] %v13906_v9 }
 0x374   :  { %7459 = vmatprep.mubr.bf16.mxu0 %v13864_v16  ;;  %7633 = vmatpush1.bf16.msra.mxu1 %v13859_v43  ;;  %16900 = vst [vmem:[#allocation231_spill] sm:$0xff] %v13891_v21  ;;  %v983_v43 = vld [vmem:[#allocation7 + $0xd00] sm:$0xff]  ;;  %v13901_v40 = vcombine.low %v976_v27, %v980_v29  ;;  %v13913_v45 = vcombine.low %v984_v17, %v988_v33 }
 0x375   :  { %7664 = vmatprep.mubr.bf16.mxu1 %v13864_v16  ;;  %7429 = vmatprep.subr.bf16.mxu0 %v13862_v63  ;;  %16898 = vst [vmem:[#allocation229_spill] sm:$0xff] %v13885_v31  ;;  %v13894_v63 = vcombine.high %v976_v27, %v980_v29  ;;  %16902 = vst [vmem:[#allocation233_spill] sm:$0xff] %v13897_v12 }
 0x376   :  { %7634 = vmatprep.subr.bf16.mxu1 %v13867_v8  ;;  %v987_v8 = vld [vmem:[#allocation7 + $0xd20] sm:$0xff]  ;;  %16903 = vst [vmem:[#allocation234_spill] sm:$0xff] %v13901_v40  ;;  %16907 = vst [vmem:[#allocation238_spill] sm:$0xff] %v13913_v45 }
 0x377   :  { %7430 = vmatpush1.bf16.msra.mxu0 %v13871_v35  ;;  %16901 = vst [vmem:[#allocation232_spill] sm:$0xff] %v13894_v63  ;;  %v13903_v44 = vcombine.high %v983_v43, %v987_v8  ;;  %v996_v35 = vld [vmem:[#allocation7 + $0xd68] sm:$0xff]  ;;  %v13909_v1 = vcombine.low %v983_v43, %v987_v8 }
 0x378   :  { %7635 = vmatpush1.bf16.msra.mxu1 %v13875_v28  ;;  %7431 = vmatprep.subr.bf16.mxu0 %v13877_v19  ;;  %v995_v19 = vld [vmem:[#allocation7 + $0xd60] sm:$0xff]  ;;  %v992_v28 = vld [vmem:[#allocation7 + $0xd48] sm:$0xff] }
 0x379   :  { %7636 = vmatprep.subr.bf16.mxu1 %v13881_v25  ;;  %16904 = vst [vmem:[#allocation235_spill] sm:$0xff] %v13903_v44  ;;  %v991_v25 = vld [vmem:[#allocation7 + $0xd40] sm:$0xff]  ;;  %16906 = vst [vmem:[#allocation237_spill] sm:$0xff] %v13909_v1  ;;  %v13918_v29 = vcombine.high %v992_v28, %v996_v35  ;;  %v13925_v33 = vcombine.low %v992_v28, %v996_v35 }
 0x37a   :  { %v13915_v27 = vcombine.high %v991_v25, %v995_v19  ;;  %v13921_v43 = vcombine.low %v991_v25, %v995_v19 }
 0x37b   :  { %7432 = vmatpush1.bf16.msra.mxu0 %v13885_v31  ;;  %16909 = vst [vmem:[#allocation240_spill] sm:$0xff] %v13918_v29  ;;  %v1004_v31 = vld [vmem:[#allocation7 + $0xda8] sm:$0xff]  ;;  %16911 = vst [vmem:[#allocation242_spill] sm:$0xff] %v13925_v33 }
 0x37c   :  { %7637 = vmatpush1.bf16.msra.mxu1 %v13889_v37  ;;  %7433 = vmatprep.subr.bf16.mxu0 %v13891_v21  ;;  %16908 = vst [vmem:[#allocation239_spill] sm:$0xff] %v13915_v27  ;;  %v1003_v21 = vld [vmem:[#allocation7 + $0xda0] sm:$0xff]  ;;  %v1000_v37 = vld [vmem:[#allocation7 + $0xd88] sm:$0xff]  ;;  %16910 = vst [vmem:[#allocation241_spill] sm:$0xff] %v13921_v43 }
 0x37d   :  { %7638 = vmatprep.subr.bf16.mxu1 %v13894_v63  ;;  %v999_v63 = vld [vmem:[#allocation7 + $0xd80] sm:$0xff]  ;;  %v13930_v8 = vcombine.high %v1000_v37, %v1004_v31  ;;  %v13937_v35 = vcombine.low %v1000_v37, %v1004_v31 }
 0x37e   :  { %v13927_v17 = vcombine.high %v999_v63, %v1003_v21  ;;  %v13933_v25 = vcombine.low %v999_v63, %v1003_v21 }
 0x37f   :  { %7434 = vmatpush1.bf16.msra.mxu0 %v13897_v12  ;;  %16913 = vst [vmem:[#allocation244_spill] sm:$0xff] %v13930_v8  ;;  %v1012_v12 = vld [vmem:[#allocation7 + $0xde8] sm:$0xff]  ;;  %16915 = vst [vmem:[#allocation246_spill] sm:$0xff] %v13937_v35 }
 0x380   :  { %7639 = vmatpush1.bf16.msra.mxu1 %v13901_v40  ;;  %7435 = vmatprep.subr.bf16.mxu0 %v13903_v44  ;;  %16912 = vst [vmem:[#allocation243_spill] sm:$0xff] %v13927_v17  ;;  %v1011_v44 = vld [vmem:[#allocation7 + $0xde0] sm:$0xff]  ;;  %v1008_v40 = vld [vmem:[#allocation7 + $0xdc8] sm:$0xff]  ;;  %16914 = vst [vmem:[#allocation245_spill] sm:$0xff] %v13933_v25 }
 0x381   :  { %7640 = vmatprep.subr.bf16.mxu1 %v13906_v9  ;;  %v1007_v9 = vld [vmem:[#allocation7 + $0xdc0] sm:$0xff]  ;;  %v13942_v19 = vcombine.high %v1008_v40, %v1012_v12  ;;  %v13949_v31 = vcombine.low %v1008_v40, %v1012_v12 }
 0x382   :  { %v13939_v28 = vcombine.high %v1007_v9, %v1011_v44  ;;  %v13945_v63 = vcombine.low %v1007_v9, %v1011_v44 }
 0x383   :  { %7436 = vmatpush1.bf16.msra.mxu0 %v13909_v1  ;;  %16917 = vst [vmem:[#allocation248_spill] sm:$0xff] %v13942_v19  ;;  %v1020_v1 = vld [vmem:[#allocation7 + $0xe28] sm:$0xff]  ;;  %16919 = vst [vmem:[#allocation250_spill] sm:$0xff] %v13949_v31 }
 0x384   :  { %7641 = vmatpush1.bf16.msra.mxu1 %v13913_v45  ;;  %7437 = vmatprep.subr.bf16.mxu0 %v13915_v27  ;;  %16916 = vst [vmem:[#allocation247_spill] sm:$0xff] %v13939_v28  ;;  %v1019_v27 = vld [vmem:[#allocation7 + $0xe20] sm:$0xff]  ;;  %v1016_v45 = vld [vmem:[#allocation7 + $0xe08] sm:$0xff]  ;;  %16918 = vst [vmem:[#allocation249_spill] sm:$0xff] %v13945_v63 }
 0x385   :  { %7642 = vmatprep.subr.bf16.mxu1 %v13918_v29  ;;  %v1015_v29 = vld [vmem:[#allocation7 + $0xe00] sm:$0xff]  ;;  %v13954_v21 = vcombine.high %v1016_v45, %v1020_v1  ;;  %v13961_v12 = vcombine.low %v1016_v45, %v1020_v1 }
 0x386   :  { %v13951_v37 = vcombine.high %v1015_v29, %v1019_v27  ;;  %v13957_v44 = vcombine.low %v1015_v29, %v1019_v27 }
 0x387   :  { %7438 = vmatpush1.bf16.msra.mxu0 %v13921_v43  ;;  %16921 = vst [vmem:[#allocation252_spill] sm:$0xff] %v13954_v21  ;;  %v1028_v43 = vld [vmem:[#allocation7 + $0xe68] sm:$0xff]  ;;  %16923 = vst [vmem:[#allocation254_spill] sm:$0xff] %v13961_v12 }
 0x388   :  { %7643 = vmatpush1.bf16.msra.mxu1 %v13925_v33  ;;  %7439 = vmatprep.subr.bf16.mxu0 %v13927_v17  ;;  %16920 = vst [vmem:[#allocation251_spill] sm:$0xff] %v13951_v37  ;;  %v1027_v17 = vld [vmem:[#allocation7 + $0xe60] sm:$0xff]  ;;  %v1024_v33 = vld [vmem:[#allocation7 + $0xe48] sm:$0xff]  ;;  %16922 = vst [vmem:[#allocation253_spill] sm:$0xff] %v13957_v44 }
 0x389   :  { %7644 = vmatprep.subr.bf16.mxu1 %v13930_v8  ;;  %v1023_v8 = vld [vmem:[#allocation7 + $0xe40] sm:$0xff]  ;;  %v13966_v9 = vcombine.high %v1024_v33, %v1028_v43  ;;  %v13973_v1 = vcombine.low %v1024_v33, %v1028_v43 }
 0x38a   :  { %v13963_v40 = vcombine.high %v1023_v8, %v1027_v17  ;;  %v13969_v27 = vcombine.low %v1023_v8, %v1027_v17 }
 0x38b   :  { %7440 = vmatpush1.bf16.msra.mxu0 %v13933_v25  ;;  %16925 = vst [vmem:[#allocation256_spill] sm:$0xff] %v13966_v9  ;;  %v1036_v25 = vld [vmem:[#allocation7 + $0xea8] sm:$0xff]  ;;  %16927 = vst [vmem:[#allocation258_spill] sm:$0xff] %v13973_v1 }
 0x38c   :  { %7645 = vmatpush1.bf16.msra.mxu1 %v13937_v35  ;;  %7441 = vmatprep.subr.bf16.mxu0 %v13939_v28  ;;  %16924 = vst [vmem:[#allocation255_spill] sm:$0xff] %v13963_v40  ;;  %v1035_v28 = vld [vmem:[#allocation7 + $0xea0] sm:$0xff]  ;;  %v1032_v35 = vld [vmem:[#allocation7 + $0xe88] sm:$0xff]  ;;  %16926 = vst [vmem:[#allocation257_spill] sm:$0xff] %v13969_v27 }
 0x38d   :  { %7646 = vmatprep.subr.bf16.mxu1 %v13942_v19  ;;  %v1031_v19 = vld [vmem:[#allocation7 + $0xe80] sm:$0xff]  ;;  %v13978_v29 = vcombine.high %v1032_v35, %v1036_v25  ;;  %v13985_v43 = vcombine.low %v1032_v35, %v1036_v25 }
 0x38e   :  { %v13975_v45 = vcombine.high %v1031_v19, %v1035_v28  ;;  %v13981_v17 = vcombine.low %v1031_v19, %v1035_v28 }
 0x38f   :  { %7442 = vmatpush1.bf16.msra.mxu0 %v13945_v63  ;;  %16929 = vst [vmem:[#allocation260_spill] sm:$0xff] %v13978_v29  ;;  %v1044_v63 = vld [vmem:[#allocation7 + $0xee8] sm:$0xff]  ;;  %16931 = vst [vmem:[#allocation262_spill] sm:$0xff] %v13985_v43 }
 0x390   :  { %7647 = vmatpush1.bf16.msra.mxu1 %v13949_v31  ;;  %7443 = vmatprep.subr.bf16.mxu0 %v13951_v37  ;;  %16928 = vst [vmem:[#allocation259_spill] sm:$0xff] %v13975_v45  ;;  %v1043_v37 = vld [vmem:[#allocation7 + $0xee0] sm:$0xff]  ;;  %v1040_v31 = vld [vmem:[#allocation7 + $0xec8] sm:$0xff]  ;;  %16930 = vst [vmem:[#allocation261_spill] sm:$0xff] %v13981_v17 }
 0x391   :  { %7648 = vmatprep.subr.bf16.mxu1 %v13954_v21  ;;  %v1039_v21 = vld [vmem:[#allocation7 + $0xec0] sm:$0xff]  ;;  %v13990_v8 = vcombine.high %v1040_v31, %v1044_v63  ;;  %v13997_v25 = vcombine.low %v1040_v31, %v1044_v63 }
 0x392   :  { %v13987_v33 = vcombine.high %v1039_v21, %v1043_v37  ;;  %v13993_v28 = vcombine.low %v1039_v21, %v1043_v37  ;;  %v4378_v21 = vsub.s32 6, %v13371_v13 }
 0x393   :  { %7444 = vmatpush1.bf16.msra.mxu0 %v13957_v44  ;;  %16933 = vst [vmem:[#allocation264_spill] sm:$0xff] %v13990_v8  ;;  %v1052_v44 = vld [vmem:[#allocation7 + $0xf28] sm:$0xff]  ;;  %16935 = vst [vmem:[#allocation266_spill] sm:$0xff] %v13997_v25 }
 0x394   :  { %7649 = vmatpush1.bf16.msra.mxu1 %v13961_v12  ;;  %7445 = vmatprep.subr.bf16.mxu0 %v13963_v40  ;;  %16932 = vst [vmem:[#allocation263_spill] sm:$0xff] %v13987_v33  ;;  %v1051_v40 = vld [vmem:[#allocation7 + $0xf20] sm:$0xff]  ;;  %v1048_v12 = vld [vmem:[#allocation7 + $0xf08] sm:$0xff]  ;;  %16934 = vst [vmem:[#allocation265_spill] sm:$0xff] %v13993_v28 }
 0x395   :  { %7650 = vmatprep.subr.bf16.mxu1 %v13966_v9  ;;  %v1047_v9 = vld [vmem:[#allocation7 + $0xf00] sm:$0xff]  ;;  %v14002_v19 = vcombine.high %v1048_v12, %v1052_v44  ;;  %v14010_v63 = vcombine.low %v1048_v12, %v1052_v44 }
 0x396   :  { %v13999_v35 = vcombine.high %v1047_v9, %v1051_v40  ;;  %v14005_v37 = vcombine.low %v1047_v9, %v1051_v40  ;;  %v12162_v9 = vld [vmem:[#allocation5] sm:$0xff] }
 0x397   :  { %7446 = vmatpush1.bf16.msra.mxu0 %v13969_v27  ;;  %16937 = vst [vmem:[#allocation268_spill] sm:$0xff] %v14002_v19  ;;  %v1060_v27 = vld [vmem:[#allocation7 + $0xf68] sm:$0xff]  ;;  %16939 = vst [vmem:[#allocation270_spill] sm:$0xff] %v14010_v63  ;;  %v14020_v13 = vrot.slane %v12162_v9, %v4378_v21 }
 0x398   :  { %7651 = vmatpush1.bf16.msra.mxu1 %v13973_v1  ;;  %7447 = vmatprep.subr.bf16.mxu0 %v13975_v45  ;;  %16936 = vst [vmem:[#allocation267_spill] sm:$0xff] %v13999_v35  ;;  %v1059_v45 = vld [vmem:[#allocation7 + $0xf60] sm:$0xff]  ;;  %v1056_v1 = vld [vmem:[#allocation7 + $0xf48] sm:$0xff]  ;;  %16938 = vst [vmem:[#allocation269_spill] sm:$0xff] %v14005_v37 }
 0x399   :  { %7652 = vmatprep.subr.bf16.mxu1 %v13978_v29  ;;  %v1055_v29 = vld [vmem:[#allocation7 + $0xf40] sm:$0xff]  ;;  %16943 = vst [vmem:[#allocation274_spill] sm:$0xff] %v14020_v13  ;;  %v14024_v44 = vcombine.low %v1056_v1, %v1060_v27  ;;  %v4403_v21 = vadd.f32 %v14020_v13, %v13574_v26  ;;  %v1088_v13 = vld [vmem:[#allocation7 + $0x1048] sm:$0xff] }
 0x39a   :  { %v14012_v31 = vcombine.high %v1055_v29, %v1059_v45  ;;  %v14018_v40 = vcombine.low %v1055_v29, %v1059_v45  ;;  %v1076_v45 = vld [vmem:[#allocation7 + $0xfe8] sm:$0xff] }
 0x39b   :  { %7448 = vmatpush1.bf16.msra.mxu0 %v13981_v17  ;;  %v1064_v17 = vld [vmem:[#allocation7 + $0xf88] sm:$0xff]  ;;  %16944 = vst [vmem:[#allocation275_spill] sm:$0xff] %v14024_v44  ;;  %v4412_v26 = vmax.f32 %v4403_v21, 0.0 }
 0x39c   :  { %7653 = vmatpush1.bf16.msra.mxu1 %v13985_v43  ;;  %7449 = vmatprep.subr.bf16.mxu0 %v13987_v33  ;;  %16940 = vst [vmem:[#allocation271_spill] sm:$0xff] %v14012_v31  ;;  %v1063_v33 = vld [vmem:[#allocation7 + $0xf80] sm:$0xff]  ;;  %16942 = vst [vmem:[#allocation273_spill] sm:$0xff] %v14018_v40 }
 0x39d   :  { %7654 = vmatprep.subr.bf16.mxu1 %v13990_v8  ;;  %v14015_v8 = vcombine.high %v1056_v1, %v1060_v27  ;;  %v1067_v43 = vld [vmem:[#allocation7 + $0xfa0] sm:$0xff] }
 0x39e   :  { %v14026_v12 = vcombine.high %v1063_v33, %v1067_v43  ;;  %v14032_v29 = vcombine.low %v1063_v33, %v1067_v43  ;;  %v1084_v43 = vld [vmem:[#allocation7 + $0x1028] sm:$0xff] }
 0x39f   :  { %7450 = vmatpush1.bf16.msra.mxu0 %v13993_v28  ;;  %16941 = vst [vmem:[#allocation272_spill] sm:$0xff] %v14015_v8  ;;  %v1068_v28 = vld [vmem:[#allocation7 + $0xfa8] sm:$0xff] }
 0x3a0   :  { %7655 = vmatpush1.bf16.msra.mxu1 %v13997_v25  ;;  %7451 = vmatprep.subr.bf16.mxu0 %v13999_v35  ;;  %16945 = vst [vmem:[#allocation276_spill] sm:$0xff] %v14026_v12  ;;  %v1071_v35 = vld [vmem:[#allocation7 + $0xfc0] sm:$0xff]  ;;  %16947 = vst [vmem:[#allocation278_spill] sm:$0xff] %v14032_v29  ;;  %v14038_v27 = vcombine.low %v1064_v17, %v1068_v28 }
 0x3a1   :  { %7656 = vmatprep.subr.bf16.mxu1 %v14002_v19  ;;  %v14029_v19 = vcombine.high %v1064_v17, %v1068_v28  ;;  %v1075_v25 = vld [vmem:[#allocation7 + $0xfe0] sm:$0xff] }
 0x3a2   :  { %16948 = vst [vmem:[#allocation279_spill] sm:$0xff] %v14038_v27  ;;  %v14040_v1 = vcombine.high %v1071_v35, %v1075_v25  ;;  %v14046_v33 = vcombine.low %v1071_v35, %v1075_v25  ;;  %v14060_v35 = vpack.c.bf16 %v4412_v26, %v4412_v26 }
 0x3a3   :  { %7452 = vmatpush1.bf16.msra.mxu0 %v14005_v37  ;;  %16946 = vst [vmem:[#allocation277_spill] sm:$0xff] %v14029_v19  ;;  %v1072_v37 = vld [vmem:[#allocation7 + $0xfc8] sm:$0xff] }
 0x3a4   :  { %7657 = vmatpush1.bf16.msra.mxu1 %v14010_v63  ;;  %7453 = vmatprep.subr.bf16.mxu0 %v14012_v31  ;;  %16949 = vst [vmem:[#allocation280_spill] sm:$0xff] %v14040_v1  ;;  %v14043_v9 = vcombine.high %v1072_v37, %v1076_v45  ;;  %v1083_v31 = vld [vmem:[#allocation7 + $0x1020] sm:$0xff]  ;;  %16951 = vst [vmem:[#allocation282_spill] sm:$0xff] %v14046_v33  ;;  %v14050_v17 = vcombine.low %v1072_v37, %v1076_v45  ;;  %v1092_v63 = vld [vmem:[#allocation7 + $0x1068] sm:$0xff] }
 0x3a5   :  { %7658 = vmatprep.subr.bf16.mxu1 %v14015_v8  ;;  %v1079_v8 = vld [vmem:[#allocation7 + $0x1000] sm:$0xff]  ;;  %v14069_v21 = vcombine.high %v1088_v13, %v1092_v63 }
 0x3a6   :  { %16950 = vst [vmem:[#allocation281_spill] sm:$0xff] %v14043_v9  ;;  %16952 = vst [vmem:[#allocation283_spill] sm:$0xff] %v14050_v17  ;;  %v14052_v28 = vcombine.high %v1079_v8, %v1083_v31  ;;  %v14058_v25 = vcombine.low %v1079_v8, %v1083_v31  ;;  %v1096_v8 = vld [vmem:[#allocation7 + $0x1088] sm:$0xff] }
 0x3a7   :  { %7454 = vmatpush1.bf16.msra.mxu0 %v14018_v40  ;;  %v1080_v40 = vld [vmem:[#allocation7 + $0x1008] sm:$0xff]  ;;  %16958 = vst [vmem:[#allocation289_spill] sm:$0xff] %v14069_v21 }
 0x3a8   :  { %7659 = vmatpush1.bf16.msra.mxu1 %v14024_v44  ;;  %7455 = vmatprep.subr.bf16.mxu0 %v14026_v12  ;;  %16953 = vst [vmem:[#allocation284_spill] sm:$0xff] %v14052_v28  ;;  %v1087_v12 = vld [vmem:[#allocation7 + $0x1040] sm:$0xff]  ;;  %16955 = vst [vmem:[#allocation286_spill] sm:$0xff] %v14058_v25  ;;  %v14064_v37 = vcombine.low %v1080_v40, %v1084_v43  ;;  %v1100_v31 = vld [vmem:[#allocation7 + $0x10a8] sm:$0xff] }
 0x3a9   :  { %7660 = vmatprep.subr.bf16.mxu1 %v14029_v19  ;;  %v14055_v19 = vcombine.high %v1080_v40, %v1084_v43  ;;  %v1091_v44 = vld [vmem:[#allocation7 + $0x1060] sm:$0xff]  ;;  %v14078_v40 = vcombine.low %v1088_v13, %v1092_v63  ;;  %v14092_v13 = vcombine.low %v1096_v8, %v1100_v31 }
 0x3aa   :  { %16956 = vst [vmem:[#allocation287_spill] sm:$0xff] %v14064_v37  ;;  %v14066_v45 = vcombine.high %v1087_v12, %v1091_v44  ;;  %v14074_v26 = vcombine.low %v1087_v12, %v1091_v44  ;;  %v1108_v44 = vld [vmem:[#allocation7 + $0x10e8] sm:$0xff] }
 0x3ab   :  { %7456 = vmatpush1.bf16.msra.mxu0 %v14032_v29  ;;  %16954 = vst [vmem:[#allocation285_spill] sm:$0xff] %v14055_v19  ;;  %16960 = vst [vmem:[#allocation291_spill] sm:$0xff] %v14078_v40  ;;  %v1140_v29 = vld [vmem:[#allocation7 + $0x11e8] sm:$0xff] }
 0x3ac   :  { %7661 = vmatpush1.bf16.msra.mxu1 %v14038_v27  ;;  %7457 = vmatprep.subr.bf16.mxu0 %v14040_v1  ;;  %16957 = vst [vmem:[#allocation288_spill] sm:$0xff] %v14066_v45  ;;  %v1099_v1 = vld [vmem:[#allocation7 + $0x10a0] sm:$0xff]  ;;  %16959 = vst [vmem:[#allocation290_spill] sm:$0xff] %v14074_v26  ;;  %v1112_v27 = vld [vmem:[#allocation7 + $0x1108] sm:$0xff] }
 0x3ad   :  { %7662 = vmatprep.subr.bf16.mxu1 %v14043_v9  ;;  %v1095_v9 = vld [vmem:[#allocation7 + $0x1080] sm:$0xff]  ;;  %16964 = vst [vmem:[#allocation295_spill] sm:$0xff] %v14092_v13 }
 0x3ae   :  { %v14080_v43 = vcombine.high %v1095_v9, %v1099_v1  ;;  %v14088_v12 = vcombine.low %v1095_v9, %v1099_v1 }
 0x3af   :  { %7458 = vmatpush1.bf16.msra.mxu0 %v14046_v33  ;;  %v16363_v33 = vmov 0  }
 0x3b0   :  { %7663 = vmatpush1.bf16.msra.mxu1 %v14050_v17  ;;  %7468 = vmatprep.subr.bf16.mxu0 %v14052_v28  ;;  %16961 = vst [vmem:[#allocation292_spill] sm:$0xff] %v14080_v43  ;;  %v1103_v28 = vld [vmem:[#allocation7 + $0x10c0] sm:$0xff]  ;;  %16963 = vst [vmem:[#allocation294_spill] sm:$0xff] %v14088_v12 }
 0x3b1   :  { %7673 = vmatprep.subr.bf16.mxu1 %v14055_v19  ;;  %v14083_v19 = vcombine.high %v1096_v8, %v1100_v31  ;;  %v1107_v17 = vld [vmem:[#allocation7 + $0x10e0] sm:$0xff] }
 0x3b2   :  { %7460 = vmatmul.mubr.bf16.vlgmr.msra.gmra.mrb[36].mxu0 %v14060_v35  ;;  %v14094_v63 = vcombine.high %v1103_v28, %v1107_v17  ;;  %v14100_v1 = vcombine.low %v1103_v28, %v1107_v17 }
 0x3b3   :  { %7665 = vmatmul.mubr.bf16.vlgmr.msra.gmra.mrb[36].mxu1 %v14060_v35  ;;  %7469 = vmatpush1.bf16.msra.mxu0 %v14058_v25  ;;  %16962 = vst [vmem:[#allocation293_spill] sm:$0xff] %v14083_v19  ;;  %v1104_v25 = vld [vmem:[#allocation7 + $0x10c8] sm:$0xff] }
 0x3b4   :  { %7674 = vmatpush1.bf16.msra.mxu1 %v14064_v37  ;;  %7470 = vmatprep.subr.bf16.mxu0 %v14066_v45  ;;  %16965 = vst [vmem:[#allocation296_spill] sm:$0xff] %v14094_v63  ;;  %v1111_v45 = vld [vmem:[#allocation7 + $0x1100] sm:$0xff]  ;;  %16967 = vst [vmem:[#allocation298_spill] sm:$0xff] %v14100_v1  ;;  %v14104_v9 = vcombine.low %v1104_v25, %v1108_v44 }
 0x3b5   :  { %7675 = vmatprep.subr.bf16.mxu1 %v14069_v21  ;;  %7500 = vmatprep.mubr.bf16.mxu0 %v16363_v33  ;;  %v14097_v21 = vcombine.high %v1104_v25, %v1108_v44  ;;  %v1115_v37 = vld [vmem:[#allocation7 + $0x1120] sm:$0xff] }
 0x3b6   :  { %7705 = vmatprep.mubr.bf16.mxu1 %v16363_v33  ;;  %v1116_v33 = vld [vmem:[#allocation7 + $0x1128] sm:$0xff]  ;;  %16968 = vst [vmem:[#allocation299_spill] sm:$0xff] %v14104_v9  ;;  %v14106_v8 = vcombine.high %v1111_v45, %v1115_v37  ;;  %v14112_v17 = vcombine.low %v1111_v45, %v1115_v37  ;;  %v10610_v45 = vld [vmem:[#allocation5 + $0x8] ss:$0 sm:$0xff] }
 0x3b7   :  { %7471 = vmatpush1.bf16.msra.mxu0 %v14074_v26  ;;  %16966 = vst [vmem:[#allocation297_spill] sm:$0xff] %v14097_v21  ;;  %v14109_v31 = vcombine.high %v1112_v27, %v1116_v33  ;;  %v1124_v26 = vld [vmem:[#allocation7 + $0x1168] sm:$0xff]  ;;  %v14116_v28 = vcombine.low %v1112_v27, %v1116_v33 }
 0x3b8   :  { %7676 = vmatpush1.bf16.msra.mxu1 %v14078_v40  ;;  %7472 = vmatprep.subr.bf16.mxu0 %v14080_v43  ;;  %16969 = vst [vmem:[#allocation300_spill] sm:$0xff] %v14106_v8  ;;  %v1123_v43 = vld [vmem:[#allocation7 + $0x1160] sm:$0xff]  ;;  %v1120_v40 = vld [vmem:[#allocation7 + $0x1148] sm:$0xff]  ;;  %16971 = vst [vmem:[#allocation302_spill] sm:$0xff] %v14112_v17 }
 0x3b9   :  { %7677 = vmatprep.subr.bf16.mxu1 %v14083_v19  ;;  %16970 = vst [vmem:[#allocation301_spill] sm:$0xff] %v14109_v31  ;;  %v1119_v19 = vld [vmem:[#allocation7 + $0x1140] sm:$0xff]  ;;  %16972 = vst [vmem:[#allocation303_spill] sm:$0xff] %v14116_v28  ;;  %v14121_v44 = vcombine.high %v1120_v40, %v1124_v26  ;;  %v14128_v27 = vcombine.low %v1120_v40, %v1124_v26 }
 0x3ba   :  { %v14118_v25 = vcombine.high %v1119_v19, %v1123_v43  ;;  %v14124_v37 = vcombine.low %v1119_v19, %v1123_v43  ;;  %v4405_v43 = vadd.f32 %v10610_v45, %v13579_v5  ;;  %v577_v45 = vld [vmem:[#allocation7 + $0x50] sm:$0xff] }
 0x3bb   :  { %7473 = vmatpush1.bf16.msra.mxu0 %v14088_v12  ;;  %16974 = vst [vmem:[#allocation305_spill] sm:$0xff] %v14121_v44  ;;  %v1132_v12 = vld [vmem:[#allocation7 + $0x11a8] sm:$0xff] }
 0x3bc   :  { %7678 = vmatpush1.bf16.msra.mxu1 %v14092_v13  ;;  %7474 = vmatprep.subr.bf16.mxu0 %v14094_v63  ;;  %16973 = vst [vmem:[#allocation304_spill] sm:$0xff] %v14118_v25  ;;  %v1131_v63 = vld [vmem:[#allocation7 + $0x11a0] sm:$0xff]  ;;  %v1128_v13 = vld [vmem:[#allocation7 + $0x1188] sm:$0xff]  ;;  %16975 = vst [vmem:[#allocation306_spill] sm:$0xff] %v14124_v37  ;;  %v4414_v5 = vmax.f32 %v4405_v43, 0.0 }
 0x3bd   :  { %7679 = vmatprep.subr.bf16.mxu1 %v14097_v21  ;;  %v1127_v21 = vld [vmem:[#allocation7 + $0x1180] sm:$0xff]  ;;  %v14141_v26 = vcombine.low %v1128_v13, %v1132_v12 }
 0x3be   :  { %v14130_v33 = vcombine.high %v1127_v21, %v1131_v63  ;;  %v14136_v19 = vcombine.low %v1127_v21, %v1131_v63  ;;  %v14163_v43 = vpack.c.bf16 %v4414_v5, %v4414_v5 }
 0x3bf   :  { %7475 = vmatpush1.bf16.msra.mxu0 %v14100_v1  ;;  %v1136_v1 = vld [vmem:[#allocation7 + $0x11c8] sm:$0xff]  ;;  %16978 = vst [vmem:[#allocation309_spill] sm:$0xff] %v14141_v26 }
 0x3c0   :  { %7680 = vmatpush1.bf16.msra.mxu1 %v14104_v9  ;;  %7476 = vmatprep.subr.bf16.mxu0 %v14106_v8  ;;  %v1135_v8 = vld [vmem:[#allocation7 + $0x11c0] sm:$0xff]  ;;  %16977 = vst [vmem:[#allocation308_spill] sm:$0xff] %v14136_v19 }
 0x3c1   :  { %7681 = vmatprep.subr.bf16.mxu1 %v14109_v31  ;;  %v14133_v31 = vcombine.high %v1128_v13, %v1132_v12  ;;  %v1139_v9 = vld [vmem:[#allocation7 + $0x11e0] sm:$0xff]  ;;  %v14153_v12 = vcombine.low %v1136_v1, %v1140_v29 }
 0x3c2   :  { %v14143_v40 = vcombine.high %v1135_v8, %v1139_v9  ;;  %v14149_v21 = vcombine.low %v1135_v8, %v1139_v9  ;;  %v578_v9 = vld [vmem:[#allocation7 + $0x58] sm:$0xff] }
 0x3c3   :  { %7477 = vmatpush1.bf16.msra.mxu0 %v14112_v17  ;;  %16976 = vst [vmem:[#allocation307_spill] sm:$0xff] %v14133_v31  ;;  %v570_v17 = vld [vmem:[#allocation7 + $0x18] sm:$0xff]  ;;  %16982 = vst [vmem:[#allocation313_spill] sm:$0xff] %v14153_v12 }
 0x3c4   :  { %7682 = vmatpush1.bf16.msra.mxu1 %v14116_v28  ;;  %7478 = vmatprep.subr.bf16.mxu0 %v14118_v25  ;;  %16979 = vst [vmem:[#allocation310_spill] sm:$0xff] %v14143_v40  ;;  %v569_v25 = vld [vmem:[#allocation7 + $0x10] sm:$0xff]  ;;  %16981 = vst [vmem:[#allocation312_spill] sm:$0xff] %v14149_v21  ;;  %v582_v8 = vld [vmem:[#allocation7 + $0x78] sm:$0xff] }
 0x3c5   :  { %7683 = vmatprep.subr.bf16.mxu1 %v14121_v44  ;;  %v14146_v44 = vcombine.high %v1136_v1, %v1140_v29  ;;  %v573_v28 = vld [vmem:[#allocation7 + $0x30] sm:$0xff] }
 0x3c6   :  { %v14155_v13 = vcombine.high %v569_v25, %v573_v28 }
 0x3c7   :  { %7479 = vmatpush1.bf16.msra.mxu0 %v14124_v37  ;;  %16980 = vst [vmem:[#allocation311_spill] sm:$0xff] %v14146_v44  ;;  %v574_v37 = vld [vmem:[#allocation7 + $0x38] sm:$0xff] }
 0x3c8   :  { %7684 = vmatpush1.bf16.msra.mxu1 %v14128_v27  ;;  %7480 = vmatprep.subr.bf16.mxu0 %v14130_v33  ;;  %16983 = vst [vmem:[#allocation314_spill] sm:$0xff] %v14155_v13  ;;  %v14158_v63 = vcombine.high %v570_v17, %v574_v37  ;;  %v14167_v29 = vcombine.low %v570_v17, %v574_v37 }
 0x3c9   :  { %7685 = vmatprep.subr.bf16.mxu1 %v14133_v31  ;;  %v581_v31 = vld [vmem:[#allocation7 + $0x70] sm:$0xff]  ;;  %v14181_v17 = vcombine.low %v578_v9, %v582_v8 }
 0x3ca   :  { %16984 = vst [vmem:[#allocation315_spill] sm:$0xff] %v14158_v63  ;;  %16986 = vst [vmem:[#allocation317_spill] sm:$0xff] %v14167_v29  ;;  %v14170_v1 = vcombine.high %v577_v45, %v581_v31  ;;  %v14177_v5 = vcombine.low %v577_v45, %v581_v31  ;;  %v594_v31 = vld [vmem:[#allocation7 + $0xd8] sm:$0xff] }
 0x3cb   :  { %7481 = vmatpush1.bf16.msra.mxu0 %v14136_v19  ;;  %v14161_v19 = vcombine.low %v569_v25, %v573_v28  ;;  %v14173_v28 = vcombine.high %v578_v9, %v582_v8  ;;  %v586_v25 = vld [vmem:[#allocation7 + $0x98] sm:$0xff]  ;;  %16990 = vst [vmem:[#allocation321_spill] sm:$0xff] %v14181_v17 }
 0x3cc   :  { %7686 = vmatpush1.bf16.msra.mxu1 %v14141_v26  ;;  %7482 = vmatprep.subr.bf16.mxu0 %v14143_v40  ;;  %16987 = vst [vmem:[#allocation318_spill] sm:$0xff] %v14170_v1  ;;  %v589_v40 = vld [vmem:[#allocation7 + $0xb0] sm:$0xff]  ;;  %16989 = vst [vmem:[#allocation320_spill] sm:$0xff] %v14177_v5  ;;  %v598_v45 = vld [vmem:[#allocation7 + $0xf8] sm:$0xff] }
 0x3cd   :  { %7687 = vmatprep.subr.bf16.mxu1 %v14146_v44  ;;  %16985 = vst [vmem:[#allocation316_spill] sm:$0xff] %v14161_v19  ;;  %v585_v44 = vld [vmem:[#allocation7 + $0x90] sm:$0xff]  ;;  %16988 = vst [vmem:[#allocation319_spill] sm:$0xff] %v14173_v28  ;;  %v14200_v8 = vcombine.high %v594_v31, %v598_v45  ;;  %v606_v26 = vld [vmem:[#allocation7 + $0x138] sm:$0xff] }
 0x3ce   :  { %v14183_v37 = vcombine.high %v585_v44, %v589_v40 }
 0x3cf   :  { %7483 = vmatpush1.bf16.msra.mxu0 %v14149_v21  ;;  %v590_v21 = vld [vmem:[#allocation7 + $0xb8] sm:$0xff]  ;;  %16996 = vst [vmem:[#allocation327_spill] sm:$0xff] %v14200_v8 }
 0x3d0   :  { %7688 = vmatpush1.bf16.msra.mxu1 %v14153_v12  ;;  %7714 = vmatprep.subr.bf16.mxu0 %v14155_v13  ;;  %16991 = vst [vmem:[#allocation322_spill] sm:$0xff] %v14183_v37  ;;  %v593_v13 = vld [vmem:[#allocation7 + $0xd0] sm:$0xff]  ;;  %v14195_v9 = vcombine.low %v586_v25, %v590_v21 }
 0x3d1   :  { %7919 = vmatprep.subr.bf16.mxu1 %v14158_v63  ;;  %v14187_v63 = vcombine.high %v586_v25, %v590_v21  ;;  %v597_v12 = vld [vmem:[#allocation7 + $0xf0] sm:$0xff] }
 0x3d2   :  { %7501 = vmatmul.mubr.bf16.vlgmr.msra.gmra.mrb[36].mxu0 %v14163_v43  ;;  %16994 = vst [vmem:[#allocation325_spill] sm:$0xff] %v14195_v9 }
 0x3d3   :  { %7706 = vmatmul.mubr.bf16.vlgmr.msra.gmra.mrb[36].mxu1 %v14163_v43  ;;  %7715 = vmatpush1.bf16.msra.mxu0 %v14161_v19  ;;  %16992 = vst [vmem:[#allocation323_spill] sm:$0xff] %v14187_v63  ;;  %v14191_v19 = vcombine.low %v585_v44, %v589_v40  ;;  %v14203_v44 = vcombine.low %v593_v13, %v597_v12 }
 0x3d4   :  { %7746 = vmatprep.mubr.bf16.mxu0 %v13411_v20  ;;  %7920 = vmatpush1.bf16.msra.mxu1 %v14167_v29  ;;  %v602_v29 = vld [vmem:[#allocation7 + $0x118] sm:$0xff]  ;;  %v14207_v40 = vcombine.low %v594_v31, %v598_v45 }
 0x3d5   :  { %7951 = vmatprep.mubr.bf16.mxu1 %v13411_v20  ;;  %7716 = vmatprep.subr.bf16.mxu0 %v14170_v1  ;;  %16993 = vst [vmem:[#allocation324_spill] sm:$0xff] %v14191_v19  ;;  %v14197_v20 = vcombine.high %v593_v13, %v597_v12  ;;  %v601_v1 = vld [vmem:[#allocation7 + $0x110] sm:$0xff]  ;;  %16997 = vst [vmem:[#allocation328_spill] sm:$0xff] %v14203_v44  ;;  %v14212_v25 = vcombine.high %v602_v29, %v606_v26 }
 0x3d6   :  { %7921 = vmatprep.subr.bf16.mxu1 %v14173_v28  ;;  %v605_v28 = vld [vmem:[#allocation7 + $0x130] sm:$0xff]  ;;  %16998 = vst [vmem:[#allocation329_spill] sm:$0xff] %v14207_v40  ;;  %v14219_v13 = vcombine.low %v602_v29, %v606_v26 }
 0x3d7   :  { %7717 = vmatpush1.bf16.msra.mxu0 %v14177_v5  ;;  %16995 = vst [vmem:[#allocation326_spill] sm:$0xff] %v14197_v20  ;;  %v14209_v21 = vcombine.high %v601_v1, %v605_v28  ;;  %17000 = vst [vmem:[#allocation331_spill] sm:$0xff] %v14212_v25  ;;  %v614_v5 = vld [vmem:[#allocation7 + $0x178] sm:$0xff]  ;;  %v14215_v12 = vcombine.low %v601_v1, %v605_v28 }
 0x3d8   :  { %7922 = vmatpush1.bf16.msra.mxu1 %v14181_v17  ;;  %7718 = vmatprep.subr.bf16.mxu0 %v14183_v37  ;;  %v613_v37 = vld [vmem:[#allocation7 + $0x170] sm:$0xff]  ;;  %v610_v17 = vld [vmem:[#allocation7 + $0x158] sm:$0xff]  ;;  %17002 = vst [vmem:[#allocation333_spill] sm:$0xff] %v14219_v13 }
 0x3d9   :  { %7923 = vmatprep.subr.bf16.mxu1 %v14187_v63  ;;  %16999 = vst [vmem:[#allocation330_spill] sm:$0xff] %v14209_v21  ;;  %v609_v63 = vld [vmem:[#allocation7 + $0x150] sm:$0xff]  ;;  %17001 = vst [vmem:[#allocation332_spill] sm:$0xff] %v14215_v12  ;;  %v14224_v45 = vcombine.high %v610_v17, %v614_v5  ;;  %v14231_v26 = vcombine.low %v610_v17, %v614_v5 }
 0x3da   :  { %v14221_v31 = vcombine.high %v609_v63, %v613_v37  ;;  %v14227_v1 = vcombine.low %v609_v63, %v613_v37 }
 0x3db   :  { %7719 = vmatpush1.bf16.msra.mxu0 %v14191_v19  ;;  %17004 = vst [vmem:[#allocation335_spill] sm:$0xff] %v14224_v45  ;;  %v622_v19 = vld [vmem:[#allocation7 + $0x1b8] sm:$0xff]  ;;  %17006 = vst [vmem:[#allocation337_spill] sm:$0xff] %v14231_v26 }
 0x3dc   :  { %7924 = vmatpush1.bf16.msra.mxu1 %v14195_v9  ;;  %7720 = vmatprep.subr.bf16.mxu0 %v14197_v20  ;;  %17003 = vst [vmem:[#allocation334_spill] sm:$0xff] %v14221_v31  ;;  %v621_v20 = vld [vmem:[#allocation7 + $0x1b0] sm:$0xff]  ;;  %v618_v9 = vld [vmem:[#allocation7 + $0x198] sm:$0xff]  ;;  %17005 = vst [vmem:[#allocation336_spill] sm:$0xff] %v14227_v1 }
 0x3dd   :  { %7925 = vmatprep.subr.bf16.mxu1 %v14200_v8  ;;  %v617_v8 = vld [vmem:[#allocation7 + $0x190] sm:$0xff]  ;;  %v14236_v28 = vcombine.high %v618_v9, %v622_v19  ;;  %v14243_v5 = vcombine.low %v618_v9, %v622_v19 }
 0x3de   :  { %v14233_v29 = vcombine.high %v617_v8, %v621_v20  ;;  %v14239_v63 = vcombine.low %v617_v8, %v621_v20 }
 0x3df   :  { %7721 = vmatpush1.bf16.msra.mxu0 %v14203_v44  ;;  %17008 = vst [vmem:[#allocation339_spill] sm:$0xff] %v14236_v28  ;;  %v630_v44 = vld [vmem:[#allocation7 + $0x1f8] sm:$0xff]  ;;  %17010 = vst [vmem:[#allocation341_spill] sm:$0xff] %v14243_v5 }
 0x3e0   :  { %7926 = vmatpush1.bf16.msra.mxu1 %v14207_v40  ;;  %7722 = vmatprep.subr.bf16.mxu0 %v14209_v21  ;;  %17007 = vst [vmem:[#allocation338_spill] sm:$0xff] %v14233_v29  ;;  %v629_v21 = vld [vmem:[#allocation7 + $0x1f0] sm:$0xff]  ;;  %v626_v40 = vld [vmem:[#allocation7 + $0x1d8] sm:$0xff]  ;;  %17009 = vst [vmem:[#allocation340_spill] sm:$0xff] %v14239_v63 }
 0x3e1   :  { %7927 = vmatprep.subr.bf16.mxu1 %v14212_v25  ;;  %v625_v25 = vld [vmem:[#allocation7 + $0x1d0] sm:$0xff]  ;;  %v14248_v37 = vcombine.high %v626_v40, %v630_v44  ;;  %v14255_v19 = vcombine.low %v626_v40, %v630_v44 }
 0x3e2   :  { %v14245_v17 = vcombine.high %v625_v25, %v629_v21  ;;  %v14251_v20 = vcombine.low %v625_v25, %v629_v21 }
 0x3e3   :  { %7723 = vmatpush1.bf16.msra.mxu0 %v14215_v12  ;;  %17012 = vst [vmem:[#allocation343_spill] sm:$0xff] %v14248_v37  ;;  %v638_v12 = vld [vmem:[#allocation7 + $0x238] sm:$0xff]  ;;  %17014 = vst [vmem:[#allocation345_spill] sm:$0xff] %v14255_v19 }
 0x3e4   :  { %7928 = vmatpush1.bf16.msra.mxu1 %v14219_v13  ;;  %7724 = vmatprep.subr.bf16.mxu0 %v14221_v31  ;;  %17011 = vst [vmem:[#allocation342_spill] sm:$0xff] %v14245_v17  ;;  %v637_v31 = vld [vmem:[#allocation7 + $0x230] sm:$0xff]  ;;  %v634_v13 = vld [vmem:[#allocation7 + $0x218] sm:$0xff]  ;;  %17013 = vst [vmem:[#allocation344_spill] sm:$0xff] %v14251_v20 }
 0x3e5   :  { %7929 = vmatprep.subr.bf16.mxu1 %v14224_v45  ;;  %v633_v45 = vld [vmem:[#allocation7 + $0x210] sm:$0xff]  ;;  %v14260_v8 = vcombine.high %v634_v13, %v638_v12  ;;  %v14267_v44 = vcombine.low %v634_v13, %v638_v12 }
 0x3e6   :  { %v14257_v9 = vcombine.high %v633_v45, %v637_v31  ;;  %v14263_v21 = vcombine.low %v633_v45, %v637_v31 }
 0x3e7   :  { %7725 = vmatpush1.bf16.msra.mxu0 %v14227_v1  ;;  %17016 = vst [vmem:[#allocation347_spill] sm:$0xff] %v14260_v8  ;;  %v646_v1 = vld [vmem:[#allocation7 + $0x278] sm:$0xff]  ;;  %17018 = vst [vmem:[#allocation349_spill] sm:$0xff] %v14267_v44 }
 0x3e8   :  { %7930 = vmatpush1.bf16.msra.mxu1 %v14231_v26  ;;  %7726 = vmatprep.subr.bf16.mxu0 %v14233_v29  ;;  %17015 = vst [vmem:[#allocation346_spill] sm:$0xff] %v14257_v9  ;;  %v645_v29 = vld [vmem:[#allocation7 + $0x270] sm:$0xff]  ;;  %v642_v26 = vld [vmem:[#allocation7 + $0x258] sm:$0xff]  ;;  %17017 = vst [vmem:[#allocation348_spill] sm:$0xff] %v14263_v21 }
 0x3e9   :  { %7931 = vmatprep.subr.bf16.mxu1 %v14236_v28  ;;  %v641_v28 = vld [vmem:[#allocation7 + $0x250] sm:$0xff]  ;;  %v14272_v25 = vcombine.high %v642_v26, %v646_v1  ;;  %v14279_v12 = vcombine.low %v642_v26, %v646_v1 }
 0x3ea   :  { %v14269_v40 = vcombine.high %v641_v28, %v645_v29  ;;  %v14275_v31 = vcombine.low %v641_v28, %v645_v29 }
 0x3eb   :  { %7727 = vmatpush1.bf16.msra.mxu0 %v14239_v63  ;;  %17020 = vst [vmem:[#allocation351_spill] sm:$0xff] %v14272_v25  ;;  %v654_v63 = vld [vmem:[#allocation7 + $0x2b8] sm:$0xff]  ;;  %17022 = vst [vmem:[#allocation353_spill] sm:$0xff] %v14279_v12 }
 0x3ec   :  { %7932 = vmatpush1.bf16.msra.mxu1 %v14243_v5  ;;  %7728 = vmatprep.subr.bf16.mxu0 %v14245_v17  ;;  %17019 = vst [vmem:[#allocation350_spill] sm:$0xff] %v14269_v40  ;;  %v653_v17 = vld [vmem:[#allocation7 + $0x2b0] sm:$0xff]  ;;  %v650_v5 = vld [vmem:[#allocation7 + $0x298] sm:$0xff]  ;;  %17021 = vst [vmem:[#allocation352_spill] sm:$0xff] %v14275_v31 }
 0x3ed   :  { %7933 = vmatprep.subr.bf16.mxu1 %v14248_v37  ;;  %v649_v37 = vld [vmem:[#allocation7 + $0x290] sm:$0xff]  ;;  %v14284_v45 = vcombine.high %v650_v5, %v654_v63  ;;  %v14291_v1 = vcombine.low %v650_v5, %v654_v63 }
 0x3ee   :  { %v14281_v13 = vcombine.high %v649_v37, %v653_v17  ;;  %v14287_v29 = vcombine.low %v649_v37, %v653_v17 }
 0x3ef   :  { %7729 = vmatpush1.bf16.msra.mxu0 %v14251_v20  ;;  %17024 = vst [vmem:[#allocation355_spill] sm:$0xff] %v14284_v45  ;;  %v662_v20 = vld [vmem:[#allocation7 + $0x2f8] sm:$0xff]  ;;  %17026 = vst [vmem:[#allocation357_spill] sm:$0xff] %v14291_v1 }
 0x3f0   :  { %7934 = vmatpush1.bf16.msra.mxu1 %v14255_v19  ;;  %7730 = vmatprep.subr.bf16.mxu0 %v14257_v9  ;;  %17023 = vst [vmem:[#allocation354_spill] sm:$0xff] %v14281_v13  ;;  %v661_v9 = vld [vmem:[#allocation7 + $0x2f0] sm:$0xff]  ;;  %v658_v19 = vld [vmem:[#allocation7 + $0x2d8] sm:$0xff]  ;;  %17025 = vst [vmem:[#allocation356_spill] sm:$0xff] %v14287_v29 }
 0x3f1   :  { %7935 = vmatprep.subr.bf16.mxu1 %v14260_v8  ;;  %v657_v8 = vld [vmem:[#allocation7 + $0x2d0] sm:$0xff]  ;;  %v14296_v28 = vcombine.high %v658_v19, %v662_v20  ;;  %v14303_v63 = vcombine.low %v658_v19, %v662_v20 }
 0x3f2   :  { %v14293_v26 = vcombine.high %v657_v8, %v661_v9  ;;  %v14299_v17 = vcombine.low %v657_v8, %v661_v9 }
 0x3f3   :  { %7731 = vmatpush1.bf16.msra.mxu0 %v14263_v21  ;;  %17028 = vst [vmem:[#allocation359_spill] sm:$0xff] %v14296_v28  ;;  %v670_v21 = vld [vmem:[#allocation7 + $0x338] sm:$0xff]  ;;  %17030 = vst [vmem:[#allocation361_spill] sm:$0xff] %v14303_v63 }
 0x3f4   :  { %7936 = vmatpush1.bf16.msra.mxu1 %v14267_v44  ;;  %7732 = vmatprep.subr.bf16.mxu0 %v14269_v40  ;;  %17027 = vst [vmem:[#allocation358_spill] sm:$0xff] %v14293_v26  ;;  %v669_v40 = vld [vmem:[#allocation7 + $0x330] sm:$0xff]  ;;  %v666_v44 = vld [vmem:[#allocation7 + $0x318] sm:$0xff]  ;;  %17029 = vst [vmem:[#allocation360_spill] sm:$0xff] %v14299_v17 }
 0x3f5   :  { %7937 = vmatprep.subr.bf16.mxu1 %v14272_v25  ;;  %v665_v25 = vld [vmem:[#allocation7 + $0x310] sm:$0xff]  ;;  %v14308_v37 = vcombine.high %v666_v44, %v670_v21  ;;  %v14315_v20 = vcombine.low %v666_v44, %v670_v21 }
 0x3f6   :  { %v14305_v5 = vcombine.high %v665_v25, %v669_v40  ;;  %v14311_v9 = vcombine.low %v665_v25, %v669_v40 }
 0x3f7   :  { %7733 = vmatpush1.bf16.msra.mxu0 %v14275_v31  ;;  %17032 = vst [vmem:[#allocation363_spill] sm:$0xff] %v14308_v37  ;;  %v678_v31 = vld [vmem:[#allocation7 + $0x378] sm:$0xff]  ;;  %17034 = vst [vmem:[#allocation365_spill] sm:$0xff] %v14315_v20 }
 0x3f8   :  { %7938 = vmatpush1.bf16.msra.mxu1 %v14279_v12  ;;  %7734 = vmatprep.subr.bf16.mxu0 %v14281_v13  ;;  %17031 = vst [vmem:[#allocation362_spill] sm:$0xff] %v14305_v5  ;;  %v677_v13 = vld [vmem:[#allocation7 + $0x370] sm:$0xff]  ;;  %v674_v12 = vld [vmem:[#allocation7 + $0x358] sm:$0xff]  ;;  %17033 = vst [vmem:[#allocation364_spill] sm:$0xff] %v14311_v9 }
 0x3f9   :  { %7939 = vmatprep.subr.bf16.mxu1 %v14284_v45  ;;  %v673_v45 = vld [vmem:[#allocation7 + $0x350] sm:$0xff]  ;;  %v14320_v8 = vcombine.high %v674_v12, %v678_v31  ;;  %v14327_v21 = vcombine.low %v674_v12, %v678_v31 }
 0x3fa   :  { %v14317_v19 = vcombine.high %v673_v45, %v677_v13  ;;  %v14323_v40 = vcombine.low %v673_v45, %v677_v13 }
 0x3fb   :  { %7735 = vmatpush1.bf16.msra.mxu0 %v14287_v29  ;;  %17036 = vst [vmem:[#allocation367_spill] sm:$0xff] %v14320_v8  ;;  %v686_v29 = vld [vmem:[#allocation7 + $0x3b8] sm:$0xff]  ;;  %17037 = vst [vmem:[#allocation368_spill] sm:$0xff] %v14327_v21 }
 0x3fc   :  { %7940 = vmatpush1.bf16.msra.mxu1 %v14291_v1  ;;  %7736 = vmatprep.subr.bf16.mxu0 %v14293_v26  ;;  %17035 = vst [vmem:[#allocation366_spill] sm:$0xff] %v14317_v19  ;;  %v685_v26 = vld [vmem:[#allocation7 + $0x3b0] sm:$0xff]  ;;  %v682_v1 = vld [vmem:[#allocation7 + $0x398] sm:$0xff] }
 0x3fd   :  { %7941 = vmatprep.subr.bf16.mxu1 %v14296_v28  ;;  %v681_v28 = vld [vmem:[#allocation7 + $0x390] sm:$0xff]  ;;  %v14332_v25 = vcombine.high %v682_v1, %v686_v29  ;;  %v14339_v31 = vcombine.low %v682_v1, %v686_v29 }
 0x3fe   :  { %v14329_v44 = vcombine.high %v681_v28, %v685_v26  ;;  %v14335_v13 = vcombine.low %v681_v28, %v685_v26 }
 0x3ff   :  { %7737 = vmatpush1.bf16.msra.mxu0 %v14299_v17  ;;  %17039 = vst [vmem:[#allocation370_spill] sm:$0xff] %v14332_v25  ;;  %v694_v17 = vld [vmem:[#allocation7 + $0x3f8] sm:$0xff]  ;;  %17041 = vst [vmem:[#allocation372_spill] sm:$0xff] %v14339_v31 }
 0x400   :  { %7942 = vmatpush1.bf16.msra.mxu1 %v14303_v63  ;;  %7738 = vmatprep.subr.bf16.mxu0 %v14305_v5  ;;  %17038 = vst [vmem:[#allocation369_spill] sm:$0xff] %v14329_v44  ;;  %v693_v5 = vld [vmem:[#allocation7 + $0x3f0] sm:$0xff]  ;;  %v690_v63 = vld [vmem:[#allocation7 + $0x3d8] sm:$0xff]  ;;  %17040 = vst [vmem:[#allocation371_spill] sm:$0xff] %v14335_v13 }
 0x401   :  { %7943 = vmatprep.subr.bf16.mxu1 %v14308_v37  ;;  %v689_v37 = vld [vmem:[#allocation7 + $0x3d0] sm:$0xff]  ;;  %v14344_v45 = vcombine.high %v690_v63, %v694_v17  ;;  %v14351_v29 = vcombine.low %v690_v63, %v694_v17 }
 0x402   :  { %v14341_v12 = vcombine.high %v689_v37, %v693_v5  ;;  %v14347_v26 = vcombine.low %v689_v37, %v693_v5  ;;  %v706_v5 = vld [vmem:[#allocation7 + $0x458] sm:$0xff] }
 0x403   :  { %7739 = vmatpush1.bf16.msra.mxu0 %v14311_v9  ;;  %17043 = vst [vmem:[#allocation374_spill] sm:$0xff] %v14344_v45  ;;  %v702_v9 = vld [vmem:[#allocation7 + $0x438] sm:$0xff]  ;;  %17045 = vst [vmem:[#allocation376_spill] sm:$0xff] %v14351_v29 }
 0x404   :  { %7944 = vmatpush1.bf16.msra.mxu1 %v14315_v20  ;;  %7740 = vmatprep.subr.bf16.mxu0 %v14317_v19  ;;  %17042 = vst [vmem:[#allocation373_spill] sm:$0xff] %v14341_v12  ;;  %v701_v19 = vld [vmem:[#allocation7 + $0x430] sm:$0xff]  ;;  %v698_v20 = vld [vmem:[#allocation7 + $0x418] sm:$0xff]  ;;  %17044 = vst [vmem:[#allocation375_spill] sm:$0xff] %v14347_v26 }
 0x405   :  { %7945 = vmatprep.subr.bf16.mxu1 %v14320_v8  ;;  %v697_v8 = vld [vmem:[#allocation7 + $0x410] sm:$0xff]  ;;  %v14356_v28 = vcombine.high %v698_v20, %v702_v9  ;;  %v710_v37 = vld [vmem:[#allocation7 + $0x478] sm:$0xff]  ;;  %v14363_v17 = vcombine.low %v698_v20, %v702_v9 }
 0x406   :  { %v14353_v1 = vcombine.high %v697_v8, %v701_v19  ;;  %v14377_v9 = vcombine.low %v706_v5, %v710_v37 }
 0x407   :  { %7741 = vmatpush1.bf16.msra.mxu0 %v14323_v40  ;;  %17047 = vst [vmem:[#allocation378_spill] sm:$0xff] %v14356_v28  ;;  %17049 = vst [vmem:[#allocation380_spill] sm:$0xff] %v14363_v17 }
 0x408   :  { %7946 = vmatpush1.bf16.msra.mxu1 %v14327_v21  ;;  %7742 = vmatprep.subr.bf16.mxu0 %v14329_v44  ;;  %17046 = vst [vmem:[#allocation377_spill] sm:$0xff] %v14353_v1  ;;  %v709_v44 = vld [vmem:[#allocation7 + $0x470] sm:$0xff]  ;;  %v14359_v21 = vcombine.low %v697_v8, %v701_v19  ;;  %v714_v19 = vld [vmem:[#allocation7 + $0x498] sm:$0xff]  ;;  %17053 = vst [vmem:[#allocation384_spill] sm:$0xff] %v14377_v9 }
 0x409   :  { %7947 = vmatprep.subr.bf16.mxu1 %v14332_v25  ;;  %v705_v25 = vld [vmem:[#allocation7 + $0x450] sm:$0xff]  ;;  %v718_v8 = vld [vmem:[#allocation7 + $0x4b8] sm:$0xff] }
 0x40a   :  { %17048 = vst [vmem:[#allocation379_spill] sm:$0xff] %v14359_v21  ;;  %v14366_v63 = vcombine.high %v705_v25, %v709_v44 }
 0x40b   :  { %7743 = vmatpush1.bf16.msra.mxu0 %v14335_v13  ;;  %v1022_v13 = vld [vmem:[#allocation7 + $0xe38] sm:$0xff] }
 0x40c   :  { %7948 = vmatpush1.bf16.msra.mxu1 %v14339_v31  ;;  %7744 = vmatprep.subr.bf16.mxu0 %v14341_v12  ;;  %17050 = vst [vmem:[#allocation381_spill] sm:$0xff] %v14366_v63  ;;  %v717_v12 = vld [vmem:[#allocation7 + $0x4b0] sm:$0xff]  ;;  %v14369_v31 = vcombine.high %v706_v5, %v710_v37  ;;  %v14391_v5 = vcombine.low %v714_v19, %v718_v8 }
 0x40d   :  { %7949 = vmatprep.subr.bf16.mxu1 %v14344_v45  ;;  %v713_v45 = vld [vmem:[#allocation7 + $0x490] sm:$0xff] }
 0x40e   :  { %17051 = vst [vmem:[#allocation382_spill] sm:$0xff] %v14369_v31  ;;  %v14379_v20 = vcombine.high %v713_v45, %v717_v12  ;;  %17057 = vst [vmem:[#allocation388_spill] sm:$0xff] %v14391_v5 }
 0x40f   :  { %7745 = vmatpush1.bf16.msra.mxu0 %v14347_v26  ;;  %v734_v26 = vld [vmem:[#allocation7 + $0x538] sm:$0xff] }
 0x410   :  { %7950 = vmatpush1.bf16.msra.mxu1 %v14351_v29  ;;  %7755 = vmatprep.subr.bf16.mxu0 %v14353_v1  ;;  %v14373_v29 = vcombine.low %v705_v25, %v709_v44  ;;  %17054 = vst [vmem:[#allocation385_spill] sm:$0xff] %v14379_v20  ;;  %v721_v1 = vld [vmem:[#allocation7 + $0x4d0] sm:$0xff]  ;;  %v722_v44 = vld [vmem:[#allocation7 + $0x4d8] sm:$0xff] }
 0x411   :  { %7960 = vmatprep.subr.bf16.mxu1 %v14356_v28  ;;  %v14383_v28 = vcombine.high %v714_v19, %v718_v8  ;;  %v726_v25 = vld [vmem:[#allocation7 + $0x4f8] sm:$0xff] }
 0x412   :  { %7747 = vmatmul.mubr.bf16.vlgmr.msra.gmra.mrb[40].mxu0 %v13413_v24  ;;  %17052 = vst [vmem:[#allocation383_spill] sm:$0xff] %v14373_v29  ;;  %v14396_v37 = vcombine.high %v722_v44, %v726_v25 }
 0x413   :  { %7952 = vmatmul.mubr.bf16.vlgmr.msra.gmra.mrb[40].mxu1 %v13413_v24  ;;  %7756 = vmatpush1.bf16.msra.mxu0 %v14359_v21  ;;  %17055 = vst [vmem:[#allocation386_spill] sm:$0xff] %v14383_v28  ;;  %v725_v24 = vld [vmem:[#allocation7 + $0x4f0] sm:$0xff]  ;;  %v14387_v21 = vcombine.low %v713_v45, %v717_v12  ;;  %v14403_v45 = vcombine.low %v722_v44, %v726_v25 }
 0x414   :  { %7787 = vmatprep.mubr.bf16.mxu0 %v13421_v50  ;;  %7961 = vmatpush1.bf16.msra.mxu1 %v14363_v17  ;;  %17059 = vst [vmem:[#allocation390_spill] sm:$0xff] %v14396_v37  ;;  %v730_v17 = vld [vmem:[#allocation7 + $0x518] sm:$0xff]  ;;  %v14399_v12 = vcombine.low %v721_v1, %v725_v24 }
 0x415   :  { %7992 = vmatprep.mubr.bf16.mxu1 %v13421_v50  ;;  %7757 = vmatprep.subr.bf16.mxu0 %v14366_v63  ;;  %17056 = vst [vmem:[#allocation387_spill] sm:$0xff] %v14387_v21  ;;  %v14393_v50 = vcombine.high %v721_v1, %v725_v24  ;;  %v729_v63 = vld [vmem:[#allocation7 + $0x510] sm:$0xff]  ;;  %17061 = vst [vmem:[#allocation392_spill] sm:$0xff] %v14403_v45  ;;  %v14408_v8 = vcombine.high %v730_v17, %v734_v26 }
 0x416   :  { %7962 = vmatprep.subr.bf16.mxu1 %v14369_v31  ;;  %v733_v31 = vld [vmem:[#allocation7 + $0x530] sm:$0xff]  ;;  %17060 = vst [vmem:[#allocation391_spill] sm:$0xff] %v14399_v12  ;;  %v14415_v24 = vcombine.low %v730_v17, %v734_v26 }
 0x417   :  { %7758 = vmatpush1.bf16.msra.mxu0 %v14373_v29  ;;  %17058 = vst [vmem:[#allocation389_spill] sm:$0xff] %v14393_v50  ;;  %v14405_v19 = vcombine.high %v729_v63, %v733_v31  ;;  %17063 = vst [vmem:[#allocation394_spill] sm:$0xff] %v14408_v8  ;;  %v742_v29 = vld [vmem:[#allocation7 + $0x578] sm:$0xff]  ;;  %v14411_v1 = vcombine.low %v729_v63, %v733_v31 }
 0x418   :  { %7963 = vmatpush1.bf16.msra.mxu1 %v14377_v9  ;;  %7759 = vmatprep.subr.bf16.mxu0 %v14379_v20  ;;  %v741_v20 = vld [vmem:[#allocation7 + $0x570] sm:$0xff]  ;;  %v738_v9 = vld [vmem:[#allocation7 + $0x558] sm:$0xff]  ;;  %17065 = vst [vmem:[#allocation396_spill] sm:$0xff] %v14415_v24 }
 0x419   :  { %7964 = vmatprep.subr.bf16.mxu1 %v14383_v28  ;;  %17062 = vst [vmem:[#allocation393_spill] sm:$0xff] %v14405_v19  ;;  %v737_v28 = vld [vmem:[#allocation7 + $0x550] sm:$0xff]  ;;  %17064 = vst [vmem:[#allocation395_spill] sm:$0xff] %v14411_v1  ;;  %v14420_v25 = vcombine.high %v738_v9, %v742_v29  ;;  %v14427_v26 = vcombine.low %v738_v9, %v742_v29 }
 0x41a   :  { %v14417_v44 = vcombine.high %v737_v28, %v741_v20  ;;  %v14423_v31 = vcombine.low %v737_v28, %v741_v20 }
 0x41b   :  { %7760 = vmatpush1.bf16.msra.mxu0 %v14387_v21  ;;  %17067 = vst [vmem:[#allocation398_spill] sm:$0xff] %v14420_v25  ;;  %v750_v21 = vld [vmem:[#allocation7 + $0x5b8] sm:$0xff]  ;;  %17069 = vst [vmem:[#allocation400_spill] sm:$0xff] %v14427_v26 }
 0x41c   :  { %7965 = vmatpush1.bf16.msra.mxu1 %v14391_v5  ;;  %7761 = vmatprep.subr.bf16.mxu0 %v14393_v50  ;;  %17066 = vst [vmem:[#allocation397_spill] sm:$0xff] %v14417_v44  ;;  %v749_v50 = vld [vmem:[#allocation7 + $0x5b0] sm:$0xff]  ;;  %v746_v5 = vld [vmem:[#allocation7 + $0x598] sm:$0xff]  ;;  %17068 = vst [vmem:[#allocation399_spill] sm:$0xff] %v14423_v31 }
 0x41d   :  { %7966 = vmatprep.subr.bf16.mxu1 %v14396_v37  ;;  %v745_v37 = vld [vmem:[#allocation7 + $0x590] sm:$0xff]  ;;  %v14432_v63 = vcombine.high %v746_v5, %v750_v21  ;;  %v14439_v29 = vcombine.low %v746_v5, %v750_v21 }
 0x41e   :  { %v14429_v17 = vcombine.high %v745_v37, %v749_v50  ;;  %v14435_v28 = vcombine.low %v745_v37, %v749_v50 }
 0x41f   :  { %7762 = vmatpush1.bf16.msra.mxu0 %v14399_v12  ;;  %17071 = vst [vmem:[#allocation402_spill] sm:$0xff] %v14432_v63  ;;  %v758_v12 = vld [vmem:[#allocation7 + $0x5f8] sm:$0xff]  ;;  %17073 = vst [vmem:[#allocation404_spill] sm:$0xff] %v14439_v29 }
 0x420   :  { %7967 = vmatpush1.bf16.msra.mxu1 %v14403_v45  ;;  %7763 = vmatprep.subr.bf16.mxu0 %v14405_v19  ;;  %17070 = vst [vmem:[#allocation401_spill] sm:$0xff] %v14429_v17  ;;  %v757_v19 = vld [vmem:[#allocation7 + $0x5f0] sm:$0xff]  ;;  %v754_v45 = vld [vmem:[#allocation7 + $0x5d8] sm:$0xff]  ;;  %17072 = vst [vmem:[#allocation403_spill] sm:$0xff] %v14435_v28 }
 0x421   :  { %7968 = vmatprep.subr.bf16.mxu1 %v14408_v8  ;;  %v753_v8 = vld [vmem:[#allocation7 + $0x5d0] sm:$0xff]  ;;  %v14444_v20 = vcombine.high %v754_v45, %v758_v12  ;;  %v14451_v21 = vcombine.low %v754_v45, %v758_v12 }
 0x422   :  { %v14441_v9 = vcombine.high %v753_v8, %v757_v19  ;;  %v14447_v50 = vcombine.low %v753_v8, %v757_v19 }
 0x423   :  { %7764 = vmatpush1.bf16.msra.mxu0 %v14411_v1  ;;  %17075 = vst [vmem:[#allocation406_spill] sm:$0xff] %v14444_v20  ;;  %v766_v1 = vld [vmem:[#allocation7 + $0x638] sm:$0xff]  ;;  %17077 = vst [vmem:[#allocation408_spill] sm:$0xff] %v14451_v21 }
 0x424   :  { %7969 = vmatpush1.bf16.msra.mxu1 %v14415_v24  ;;  %7765 = vmatprep.subr.bf16.mxu0 %v14417_v44  ;;  %17074 = vst [vmem:[#allocation405_spill] sm:$0xff] %v14441_v9  ;;  %v765_v44 = vld [vmem:[#allocation7 + $0x630] sm:$0xff]  ;;  %v762_v24 = vld [vmem:[#allocation7 + $0x618] sm:$0xff]  ;;  %17076 = vst [vmem:[#allocation407_spill] sm:$0xff] %v14447_v50 }
 0x425   :  { %7970 = vmatprep.subr.bf16.mxu1 %v14420_v25  ;;  %v761_v25 = vld [vmem:[#allocation7 + $0x610] sm:$0xff]  ;;  %v14456_v37 = vcombine.high %v762_v24, %v766_v1  ;;  %v14463_v12 = vcombine.low %v762_v24, %v766_v1 }
 0x426   :  { %v14453_v5 = vcombine.high %v761_v25, %v765_v44  ;;  %v14459_v19 = vcombine.low %v761_v25, %v765_v44 }
 0x427   :  { %7766 = vmatpush1.bf16.msra.mxu0 %v14423_v31  ;;  %17079 = vst [vmem:[#allocation410_spill] sm:$0xff] %v14456_v37  ;;  %v774_v31 = vld [vmem:[#allocation7 + $0x678] sm:$0xff]  ;;  %17081 = vst [vmem:[#allocation412_spill] sm:$0xff] %v14463_v12 }
 0x428   :  { %7971 = vmatpush1.bf16.msra.mxu1 %v14427_v26  ;;  %7767 = vmatprep.subr.bf16.mxu0 %v14429_v17  ;;  %17078 = vst [vmem:[#allocation409_spill] sm:$0xff] %v14453_v5  ;;  %v773_v17 = vld [vmem:[#allocation7 + $0x670] sm:$0xff]  ;;  %v770_v26 = vld [vmem:[#allocation7 + $0x658] sm:$0xff]  ;;  %17080 = vst [vmem:[#allocation411_spill] sm:$0xff] %v14459_v19 }
 0x429   :  { %7972 = vmatprep.subr.bf16.mxu1 %v14432_v63  ;;  %v769_v63 = vld [vmem:[#allocation7 + $0x650] sm:$0xff]  ;;  %v14468_v8 = vcombine.high %v770_v26, %v774_v31  ;;  %v14475_v1 = vcombine.low %v770_v26, %v774_v31 }
 0x42a   :  { %v14465_v45 = vcombine.high %v769_v63, %v773_v17  ;;  %v14471_v44 = vcombine.low %v769_v63, %v773_v17 }
 0x42b   :  { %7768 = vmatpush1.bf16.msra.mxu0 %v14435_v28  ;;  %17083 = vst [vmem:[#allocation414_spill] sm:$0xff] %v14468_v8  ;;  %v782_v28 = vld [vmem:[#allocation7 + $0x6b8] sm:$0xff]  ;;  %17085 = vst [vmem:[#allocation416_spill] sm:$0xff] %v14475_v1 }
 0x42c   :  { %7973 = vmatpush1.bf16.msra.mxu1 %v14439_v29  ;;  %7769 = vmatprep.subr.bf16.mxu0 %v14441_v9  ;;  %17082 = vst [vmem:[#allocation413_spill] sm:$0xff] %v14465_v45  ;;  %v781_v9 = vld [vmem:[#allocation7 + $0x6b0] sm:$0xff]  ;;  %v778_v29 = vld [vmem:[#allocation7 + $0x698] sm:$0xff]  ;;  %17084 = vst [vmem:[#allocation415_spill] sm:$0xff] %v14471_v44 }
 0x42d   :  { %7974 = vmatprep.subr.bf16.mxu1 %v14444_v20  ;;  %v777_v20 = vld [vmem:[#allocation7 + $0x690] sm:$0xff]  ;;  %v14480_v25 = vcombine.high %v778_v29, %v782_v28  ;;  %v14487_v31 = vcombine.low %v778_v29, %v782_v28 }
 0x42e   :  { %v14477_v24 = vcombine.high %v777_v20, %v781_v9  ;;  %v14483_v17 = vcombine.low %v777_v20, %v781_v9 }
 0x42f   :  { %7770 = vmatpush1.bf16.msra.mxu0 %v14447_v50  ;;  %17087 = vst [vmem:[#allocation418_spill] sm:$0xff] %v14480_v25  ;;  %v790_v50 = vld [vmem:[#allocation7 + $0x6f8] sm:$0xff]  ;;  %17089 = vst [vmem:[#allocation420_spill] sm:$0xff] %v14487_v31 }
 0x430   :  { %7975 = vmatpush1.bf16.msra.mxu1 %v14451_v21  ;;  %7771 = vmatprep.subr.bf16.mxu0 %v14453_v5  ;;  %17086 = vst [vmem:[#allocation417_spill] sm:$0xff] %v14477_v24  ;;  %v789_v5 = vld [vmem:[#allocation7 + $0x6f0] sm:$0xff]  ;;  %v786_v21 = vld [vmem:[#allocation7 + $0x6d8] sm:$0xff]  ;;  %17088 = vst [vmem:[#allocation419_spill] sm:$0xff] %v14483_v17 }
 0x431   :  { %7976 = vmatprep.subr.bf16.mxu1 %v14456_v37  ;;  %v785_v37 = vld [vmem:[#allocation7 + $0x6d0] sm:$0xff]  ;;  %v14492_v63 = vcombine.high %v786_v21, %v790_v50  ;;  %v14499_v28 = vcombine.low %v786_v21, %v790_v50 }
 0x432   :  { %v14489_v26 = vcombine.high %v785_v37, %v789_v5  ;;  %v14495_v9 = vcombine.low %v785_v37, %v789_v5 }
 0x433   :  { %7772 = vmatpush1.bf16.msra.mxu0 %v14459_v19  ;;  %17091 = vst [vmem:[#allocation422_spill] sm:$0xff] %v14492_v63  ;;  %v798_v19 = vld [vmem:[#allocation7 + $0x738] sm:$0xff]  ;;  %17093 = vst [vmem:[#allocation424_spill] sm:$0xff] %v14499_v28 }
 0x434   :  { %7977 = vmatpush1.bf16.msra.mxu1 %v14463_v12  ;;  %7773 = vmatprep.subr.bf16.mxu0 %v14465_v45  ;;  %17090 = vst [vmem:[#allocation421_spill] sm:$0xff] %v14489_v26  ;;  %v797_v45 = vld [vmem:[#allocation7 + $0x730] sm:$0xff]  ;;  %v794_v12 = vld [vmem:[#allocation7 + $0x718] sm:$0xff]  ;;  %17092 = vst [vmem:[#allocation423_spill] sm:$0xff] %v14495_v9 }
 0x435   :  { %7978 = vmatprep.subr.bf16.mxu1 %v14468_v8  ;;  %v793_v8 = vld [vmem:[#allocation7 + $0x710] sm:$0xff]  ;;  %v14504_v20 = vcombine.high %v794_v12, %v798_v19  ;;  %v14511_v50 = vcombine.low %v794_v12, %v798_v19 }
 0x436   :  { %v14501_v29 = vcombine.high %v793_v8, %v797_v45  ;;  %v14507_v5 = vcombine.low %v793_v8, %v797_v45 }
 0x437   :  { %7774 = vmatpush1.bf16.msra.mxu0 %v14471_v44  ;;  %17095 = vst [vmem:[#allocation426_spill] sm:$0xff] %v14504_v20  ;;  %v806_v44 = vld [vmem:[#allocation7 + $0x778] sm:$0xff]  ;;  %17097 = vst [vmem:[#allocation428_spill] sm:$0xff] %v14511_v50 }
 0x438   :  { %7979 = vmatpush1.bf16.msra.mxu1 %v14475_v1  ;;  %7775 = vmatprep.subr.bf16.mxu0 %v14477_v24  ;;  %17094 = vst [vmem:[#allocation425_spill] sm:$0xff] %v14501_v29  ;;  %v805_v24 = vld [vmem:[#allocation7 + $0x770] sm:$0xff]  ;;  %v802_v1 = vld [vmem:[#allocation7 + $0x758] sm:$0xff]  ;;  %17096 = vst [vmem:[#allocation427_spill] sm:$0xff] %v14507_v5 }
 0x439   :  { %7980 = vmatprep.subr.bf16.mxu1 %v14480_v25  ;;  %v801_v25 = vld [vmem:[#allocation7 + $0x750] sm:$0xff]  ;;  %v14516_v37 = vcombine.high %v802_v1, %v806_v44  ;;  %v14523_v19 = vcombine.low %v802_v1, %v806_v44 }
 0x43a   :  { %v14513_v21 = vcombine.high %v801_v25, %v805_v24  ;;  %v14519_v45 = vcombine.low %v801_v25, %v805_v24 }
 0x43b   :  { %7776 = vmatpush1.bf16.msra.mxu0 %v14483_v17  ;;  %17099 = vst [vmem:[#allocation430_spill] sm:$0xff] %v14516_v37  ;;  %v814_v17 = vld [vmem:[#allocation7 + $0x7b8] sm:$0xff]  ;;  %17101 = vst [vmem:[#allocation432_spill] sm:$0xff] %v14523_v19 }
 0x43c   :  { %7981 = vmatpush1.bf16.msra.mxu1 %v14487_v31  ;;  %7777 = vmatprep.subr.bf16.mxu0 %v14489_v26  ;;  %17098 = vst [vmem:[#allocation429_spill] sm:$0xff] %v14513_v21  ;;  %v813_v26 = vld [vmem:[#allocation7 + $0x7b0] sm:$0xff]  ;;  %v810_v31 = vld [vmem:[#allocation7 + $0x798] sm:$0xff]  ;;  %17100 = vst [vmem:[#allocation431_spill] sm:$0xff] %v14519_v45 }
 0x43d   :  { %7982 = vmatprep.subr.bf16.mxu1 %v14492_v63  ;;  %v809_v63 = vld [vmem:[#allocation7 + $0x790] sm:$0xff]  ;;  %v14528_v8 = vcombine.high %v810_v31, %v814_v17  ;;  %v14535_v44 = vcombine.low %v810_v31, %v814_v17 }
 0x43e   :  { %v14525_v12 = vcombine.high %v809_v63, %v813_v26  ;;  %v14531_v24 = vcombine.low %v809_v63, %v813_v26 }
 0x43f   :  { %7778 = vmatpush1.bf16.msra.mxu0 %v14495_v9  ;;  %17103 = vst [vmem:[#allocation434_spill] sm:$0xff] %v14528_v8  ;;  %v822_v9 = vld [vmem:[#allocation7 + $0x7f8] sm:$0xff]  ;;  %17105 = vst [vmem:[#allocation436_spill] sm:$0xff] %v14535_v44 }
 0x440   :  { %7983 = vmatpush1.bf16.msra.mxu1 %v14499_v28  ;;  %7779 = vmatprep.subr.bf16.mxu0 %v14501_v29  ;;  %17102 = vst [vmem:[#allocation433_spill] sm:$0xff] %v14525_v12  ;;  %v821_v29 = vld [vmem:[#allocation7 + $0x7f0] sm:$0xff]  ;;  %v818_v28 = vld [vmem:[#allocation7 + $0x7d8] sm:$0xff]  ;;  %17104 = vst [vmem:[#allocation435_spill] sm:$0xff] %v14531_v24 }
 0x441   :  { %7984 = vmatprep.subr.bf16.mxu1 %v14504_v20  ;;  %v817_v20 = vld [vmem:[#allocation7 + $0x7d0] sm:$0xff]  ;;  %v14540_v25 = vcombine.high %v818_v28, %v822_v9  ;;  %v14547_v17 = vcombine.low %v818_v28, %v822_v9 }
 0x442   :  { %v14537_v1 = vcombine.high %v817_v20, %v821_v29  ;;  %v14543_v26 = vcombine.low %v817_v20, %v821_v29  ;;  %v834_v29 = vld [vmem:[#allocation7 + $0x858] sm:$0xff] }
 0x443   :  { %7780 = vmatpush1.bf16.msra.mxu0 %v14507_v5  ;;  %17107 = vst [vmem:[#allocation438_spill] sm:$0xff] %v14540_v25  ;;  %v830_v5 = vld [vmem:[#allocation7 + $0x838] sm:$0xff]  ;;  %17109 = vst [vmem:[#allocation440_spill] sm:$0xff] %v14547_v17 }
 0x444   :  { %7985 = vmatpush1.bf16.msra.mxu1 %v14511_v50  ;;  %7781 = vmatprep.subr.bf16.mxu0 %v14513_v21  ;;  %17106 = vst [vmem:[#allocation437_spill] sm:$0xff] %v14537_v1  ;;  %v829_v21 = vld [vmem:[#allocation7 + $0x830] sm:$0xff]  ;;  %v826_v50 = vld [vmem:[#allocation7 + $0x818] sm:$0xff]  ;;  %17108 = vst [vmem:[#allocation439_spill] sm:$0xff] %v14543_v26 }
 0x445   :  { %7986 = vmatprep.subr.bf16.mxu1 %v14516_v37  ;;  %v825_v37 = vld [vmem:[#allocation7 + $0x810] sm:$0xff]  ;;  %v14552_v63 = vcombine.high %v826_v50, %v830_v5  ;;  %v838_v20 = vld [vmem:[#allocation7 + $0x878] sm:$0xff]  ;;  %v14559_v9 = vcombine.low %v826_v50, %v830_v5 }
 0x446   :  { %v14549_v31 = vcombine.high %v825_v37, %v829_v21  ;;  %v14573_v5 = vcombine.low %v834_v29, %v838_v20 }
 0x447   :  { %7782 = vmatpush1.bf16.msra.mxu0 %v14519_v45  ;;  %17111 = vst [vmem:[#allocation442_spill] sm:$0xff] %v14552_v63  ;;  %17113 = vst [vmem:[#allocation444_spill] sm:$0xff] %v14559_v9 }
 0x448   :  { %7987 = vmatpush1.bf16.msra.mxu1 %v14523_v19  ;;  %7783 = vmatprep.subr.bf16.mxu0 %v14525_v12  ;;  %17110 = vst [vmem:[#allocation441_spill] sm:$0xff] %v14549_v31  ;;  %v837_v12 = vld [vmem:[#allocation7 + $0x870] sm:$0xff]  ;;  %v14555_v19 = vcombine.low %v825_v37, %v829_v21  ;;  %v842_v21 = vld [vmem:[#allocation7 + $0x898] sm:$0xff]  ;;  %17117 = vst [vmem:[#allocation448_spill] sm:$0xff] %v14573_v5 }
 0x449   :  { %7988 = vmatprep.subr.bf16.mxu1 %v14528_v8  ;;  %v833_v8 = vld [vmem:[#allocation7 + $0x850] sm:$0xff]  ;;  %v846_v37 = vld [vmem:[#allocation7 + $0x8b8] sm:$0xff] }
 0x44a   :  { %17112 = vst [vmem:[#allocation443_spill] sm:$0xff] %v14555_v19  ;;  %v14562_v28 = vcombine.high %v833_v8, %v837_v12 }
 0x44b   :  { %7784 = vmatpush1.bf16.msra.mxu0 %v14531_v24 }
 0x44c   :  { %7989 = vmatpush1.bf16.msra.mxu1 %v14535_v44  ;;  %7785 = vmatprep.subr.bf16.mxu0 %v14537_v1  ;;  %17114 = vst [vmem:[#allocation445_spill] sm:$0xff] %v14562_v28  ;;  %v845_v1 = vld [vmem:[#allocation7 + $0x8b0] sm:$0xff]  ;;  %v14565_v44 = vcombine.high %v834_v29, %v838_v20  ;;  %v14587_v29 = vcombine.low %v842_v21, %v846_v37 }
 0x44d   :  { %7990 = vmatprep.subr.bf16.mxu1 %v14540_v25  ;;  %v841_v25 = vld [vmem:[#allocation7 + $0x890] sm:$0xff] }
 0x44e   :  { %17115 = vst [vmem:[#allocation446_spill] sm:$0xff] %v14565_v44  ;;  %v14575_v50 = vcombine.high %v841_v25, %v845_v1  ;;  %17121 = vst [vmem:[#allocation452_spill] sm:$0xff] %v14587_v29 }
 0x44f   :  { %7786 = vmatpush1.bf16.msra.mxu0 %v14543_v26  ;;  %v862_v26 = vld [vmem:[#allocation7 + $0x938] sm:$0xff] }
 0x450   :  { %7991 = vmatpush1.bf16.msra.mxu1 %v14547_v17  ;;  %7796 = vmatprep.subr.bf16.mxu0 %v14549_v31  ;;  %v14569_v17 = vcombine.low %v833_v8, %v837_v12  ;;  %17118 = vst [vmem:[#allocation449_spill] sm:$0xff] %v14575_v50  ;;  %v849_v31 = vld [vmem:[#allocation7 + $0x8d0] sm:$0xff]  ;;  %v850_v12 = vld [vmem:[#allocation7 + $0x8d8] sm:$0xff] }
 0x451   :  { %8001 = vmatprep.subr.bf16.mxu1 %v14552_v63  ;;  %v14579_v63 = vcombine.high %v842_v21, %v846_v37  ;;  %v854_v8 = vld [vmem:[#allocation7 + $0x8f8] sm:$0xff] }
 0x452   :  { %7788 = vmatmul.mubr.bf16.vlgmr.msra.gmra.mrb[40].mxu0 %v13644_v30  ;;  %17116 = vst [vmem:[#allocation447_spill] sm:$0xff] %v14569_v17  ;;  %v14592_v20 = vcombine.high %v850_v12, %v854_v8 }
 0x453   :  { %7993 = vmatmul.mubr.bf16.vlgmr.msra.gmra.mrb[40].mxu1 %v13644_v30  ;;  %7797 = vmatpush1.bf16.msra.mxu0 %v14555_v19  ;;  %17119 = vst [vmem:[#allocation450_spill] sm:$0xff] %v14579_v63  ;;  %v853_v30 = vld [vmem:[#allocation7 + $0x8f0] sm:$0xff]  ;;  %v14583_v19 = vcombine.low %v841_v25, %v845_v1  ;;  %v14599_v25 = vcombine.low %v850_v12, %v854_v8 }
 0x454   :  { %7828 = vmatprep.mubr.bf16.mxu0 %v13650_v0  ;;  %8002 = vmatpush1.bf16.msra.mxu1 %v14559_v9  ;;  %17123 = vst [vmem:[#allocation454_spill] sm:$0xff] %v14592_v20  ;;  %v858_v9 = vld [vmem:[#allocation7 + $0x918] sm:$0xff]  ;;  %v14595_v1 = vcombine.low %v849_v31, %v853_v30 }
 0x455   :  { %8033 = vmatprep.mubr.bf16.mxu1 %v13650_v0  ;;  %7798 = vmatprep.subr.bf16.mxu0 %v14562_v28  ;;  %17120 = vst [vmem:[#allocation451_spill] sm:$0xff] %v14583_v19  ;;  %v14589_v0 = vcombine.high %v849_v31, %v853_v30  ;;  %v857_v28 = vld [vmem:[#allocation7 + $0x910] sm:$0xff]  ;;  %17125 = vst [vmem:[#allocation456_spill] sm:$0xff] %v14599_v25  ;;  %v14604_v37 = vcombine.high %v858_v9, %v862_v26 }
 0x456   :  { %8003 = vmatprep.subr.bf16.mxu1 %v14565_v44  ;;  %v861_v44 = vld [vmem:[#allocation7 + $0x930] sm:$0xff]  ;;  %17124 = vst [vmem:[#allocation455_spill] sm:$0xff] %v14595_v1  ;;  %v14611_v30 = vcombine.low %v858_v9, %v862_v26 }
 0x457   :  { %7799 = vmatpush1.bf16.msra.mxu0 %v14569_v17  ;;  %17122 = vst [vmem:[#allocation453_spill] sm:$0xff] %v14589_v0  ;;  %v14601_v21 = vcombine.high %v857_v28, %v861_v44  ;;  %17127 = vst [vmem:[#allocation458_spill] sm:$0xff] %v14604_v37  ;;  %v870_v17 = vld [vmem:[#allocation7 + $0x978] sm:$0xff]  ;;  %v14607_v31 = vcombine.low %v857_v28, %v861_v44 }
 0x458   :  { %8004 = vmatpush1.bf16.msra.mxu1 %v14573_v5  ;;  %7800 = vmatprep.subr.bf16.mxu0 %v14575_v50  ;;  %v869_v50 = vld [vmem:[#allocation7 + $0x970] sm:$0xff]  ;;  %v866_v5 = vld [vmem:[#allocation7 + $0x958] sm:$0xff]  ;;  %17129 = vst [vmem:[#allocation460_spill] sm:$0xff] %v14611_v30 }
 0x459   :  { %8005 = vmatprep.subr.bf16.mxu1 %v14579_v63  ;;  %17126 = vst [vmem:[#allocation457_spill] sm:$0xff] %v14601_v21  ;;  %v865_v63 = vld [vmem:[#allocation7 + $0x950] sm:$0xff]  ;;  %17128 = vst [vmem:[#allocation459_spill] sm:$0xff] %v14607_v31  ;;  %v14616_v8 = vcombine.high %v866_v5, %v870_v17  ;;  %v14623_v26 = vcombine.low %v866_v5, %v870_v17 }
 0x45a   :  { %v14613_v12 = vcombine.high %v865_v63, %v869_v50  ;;  %v14619_v44 = vcombine.low %v865_v63, %v869_v50 }
 0x45b   :  { %7801 = vmatpush1.bf16.msra.mxu0 %v14583_v19  ;;  %17131 = vst [vmem:[#allocation462_spill] sm:$0xff] %v14616_v8  ;;  %v878_v19 = vld [vmem:[#allocation7 + $0x9b8] sm:$0xff]  ;;  %17133 = vst [vmem:[#allocation464_spill] sm:$0xff] %v14623_v26 }
 0x45c   :  { %8006 = vmatpush1.bf16.msra.mxu1 %v14587_v29  ;;  %7802 = vmatprep.subr.bf16.mxu0 %v14589_v0  ;;  %17130 = vst [vmem:[#allocation461_spill] sm:$0xff] %v14613_v12  ;;  %v877_v0 = vld [vmem:[#allocation7 + $0x9b0] sm:$0xff]  ;;  %v874_v29 = vld [vmem:[#allocation7 + $0x998] sm:$0xff]  ;;  %17132 = vst [vmem:[#allocation463_spill] sm:$0xff] %v14619_v44 }
 0x45d   :  { %8007 = vmatprep.subr.bf16.mxu1 %v14592_v20  ;;  %v873_v20 = vld [vmem:[#allocation7 + $0x990] sm:$0xff]  ;;  %v14628_v28 = vcombine.high %v874_v29, %v878_v19  ;;  %v14635_v17 = vcombine.low %v874_v29, %v878_v19 }
 0x45e   :  { %v14625_v9 = vcombine.high %v873_v20, %v877_v0  ;;  %v14631_v63 = vcombine.low %v873_v20, %v877_v0 }
 0x45f   :  { %7803 = vmatpush1.bf16.msra.mxu0 %v14595_v1  ;;  %17135 = vst [vmem:[#allocation466_spill] sm:$0xff] %v14628_v28  ;;  %v886_v1 = vld [vmem:[#allocation7 + $0x9f8] sm:$0xff]  ;;  %17137 = vst [vmem:[#allocation468_spill] sm:$0xff] %v14635_v17 }
 0x460   :  { %8008 = vmatpush1.bf16.msra.mxu1 %v14599_v25  ;;  %7804 = vmatprep.subr.bf16.mxu0 %v14601_v21  ;;  %17134 = vst [vmem:[#allocation465_spill] sm:$0xff] %v14625_v9  ;;  %v885_v21 = vld [vmem:[#allocation7 + $0x9f0] sm:$0xff]  ;;  %v882_v25 = vld [vmem:[#allocation7 + $0x9d8] sm:$0xff]  ;;  %17136 = vst [vmem:[#allocation467_spill] sm:$0xff] %v14631_v63 }
 0x461   :  { %8009 = vmatprep.subr.bf16.mxu1 %v14604_v37  ;;  %v881_v37 = vld [vmem:[#allocation7 + $0x9d0] sm:$0xff]  ;;  %v14640_v50 = vcombine.high %v882_v25, %v886_v1  ;;  %v14647_v19 = vcombine.low %v882_v25, %v886_v1 }
 0x462   :  { %v14637_v5 = vcombine.high %v881_v37, %v885_v21  ;;  %v14643_v0 = vcombine.low %v881_v37, %v885_v21 }
 0x463   :  { %7805 = vmatpush1.bf16.msra.mxu0 %v14607_v31  ;;  %17139 = vst [vmem:[#allocation470_spill] sm:$0xff] %v14640_v50  ;;  %v894_v31 = vld [vmem:[#allocation7 + $0xa38] sm:$0xff]  ;;  %17141 = vst [vmem:[#allocation472_spill] sm:$0xff] %v14647_v19 }
 0x464   :  { %8010 = vmatpush1.bf16.msra.mxu1 %v14611_v30  ;;  %7806 = vmatprep.subr.bf16.mxu0 %v14613_v12  ;;  %17138 = vst [vmem:[#allocation469_spill] sm:$0xff] %v14637_v5  ;;  %v893_v12 = vld [vmem:[#allocation7 + $0xa30] sm:$0xff]  ;;  %v890_v30 = vld [vmem:[#allocation7 + $0xa18] sm:$0xff]  ;;  %17140 = vst [vmem:[#allocation471_spill] sm:$0xff] %v14643_v0 }
 0x465   :  { %8011 = vmatprep.subr.bf16.mxu1 %v14616_v8  ;;  %v889_v8 = vld [vmem:[#allocation7 + $0xa10] sm:$0xff]  ;;  %v14652_v20 = vcombine.high %v890_v30, %v894_v31  ;;  %v14659_v1 = vcombine.low %v890_v30, %v894_v31 }
 0x466   :  { %v14649_v29 = vcombine.high %v889_v8, %v893_v12  ;;  %v14655_v21 = vcombine.low %v889_v8, %v893_v12 }
 0x467   :  { %7807 = vmatpush1.bf16.msra.mxu0 %v14619_v44  ;;  %17143 = vst [vmem:[#allocation474_spill] sm:$0xff] %v14652_v20  ;;  %v902_v44 = vld [vmem:[#allocation7 + $0xa78] sm:$0xff]  ;;  %17145 = vst [vmem:[#allocation476_spill] sm:$0xff] %v14659_v1 }
 0x468   :  { %8012 = vmatpush1.bf16.msra.mxu1 %v14623_v26  ;;  %7808 = vmatprep.subr.bf16.mxu0 %v14625_v9  ;;  %17142 = vst [vmem:[#allocation473_spill] sm:$0xff] %v14649_v29  ;;  %v901_v9 = vld [vmem:[#allocation7 + $0xa70] sm:$0xff]  ;;  %v898_v26 = vld [vmem:[#allocation7 + $0xa58] sm:$0xff]  ;;  %17144 = vst [vmem:[#allocation475_spill] sm:$0xff] %v14655_v21 }
 0x469   :  { %8013 = vmatprep.subr.bf16.mxu1 %v14628_v28  ;;  %v897_v28 = vld [vmem:[#allocation7 + $0xa50] sm:$0xff]  ;;  %v14664_v37 = vcombine.high %v898_v26, %v902_v44  ;;  %v14671_v31 = vcombine.low %v898_v26, %v902_v44 }
 0x46a   :  { %v14661_v25 = vcombine.high %v897_v28, %v901_v9  ;;  %v14667_v12 = vcombine.low %v897_v28, %v901_v9 }
 0x46b   :  { %7809 = vmatpush1.bf16.msra.mxu0 %v14631_v63  ;;  %17147 = vst [vmem:[#allocation478_spill] sm:$0xff] %v14664_v37  ;;  %v910_v63 = vld [vmem:[#allocation7 + $0xab8] sm:$0xff]  ;;  %17149 = vst [vmem:[#allocation480_spill] sm:$0xff] %v14671_v31 }
 0x46c   :  { %8014 = vmatpush1.bf16.msra.mxu1 %v14635_v17  ;;  %7810 = vmatprep.subr.bf16.mxu0 %v14637_v5  ;;  %17146 = vst [vmem:[#allocation477_spill] sm:$0xff] %v14661_v25  ;;  %v909_v5 = vld [vmem:[#allocation7 + $0xab0] sm:$0xff]  ;;  %v906_v17 = vld [vmem:[#allocation7 + $0xa98] sm:$0xff]  ;;  %17148 = vst [vmem:[#allocation479_spill] sm:$0xff] %v14667_v12 }
 0x46d   :  { %8015 = vmatprep.subr.bf16.mxu1 %v14640_v50  ;;  %v905_v50 = vld [vmem:[#allocation7 + $0xa90] sm:$0xff]  ;;  %v14676_v8 = vcombine.high %v906_v17, %v910_v63  ;;  %v14683_v44 = vcombine.low %v906_v17, %v910_v63 }
 0x46e   :  { %v14673_v30 = vcombine.high %v905_v50, %v909_v5  ;;  %v14679_v9 = vcombine.low %v905_v50, %v909_v5 }
 0x46f   :  { %7811 = vmatpush1.bf16.msra.mxu0 %v14643_v0  ;;  %17151 = vst [vmem:[#allocation482_spill] sm:$0xff] %v14676_v8  ;;  %v918_v0 = vld [vmem:[#allocation7 + $0xaf8] sm:$0xff]  ;;  %17153 = vst [vmem:[#allocation484_spill] sm:$0xff] %v14683_v44 }
 0x470   :  { %8016 = vmatpush1.bf16.msra.mxu1 %v14647_v19  ;;  %7812 = vmatprep.subr.bf16.mxu0 %v14649_v29  ;;  %17150 = vst [vmem:[#allocation481_spill] sm:$0xff] %v14673_v30  ;;  %v917_v29 = vld [vmem:[#allocation7 + $0xaf0] sm:$0xff]  ;;  %v914_v19 = vld [vmem:[#allocation7 + $0xad8] sm:$0xff]  ;;  %17152 = vst [vmem:[#allocation483_spill] sm:$0xff] %v14679_v9 }
 0x471   :  { %8017 = vmatprep.subr.bf16.mxu1 %v14652_v20  ;;  %v913_v20 = vld [vmem:[#allocation7 + $0xad0] sm:$0xff]  ;;  %v14688_v28 = vcombine.high %v914_v19, %v918_v0  ;;  %v14695_v63 = vcombine.low %v914_v19, %v918_v0 }
 0x472   :  { %v14685_v26 = vcombine.high %v913_v20, %v917_v29  ;;  %v14691_v5 = vcombine.low %v913_v20, %v917_v29 }
 0x473   :  { %7813 = vmatpush1.bf16.msra.mxu0 %v14655_v21  ;;  %17155 = vst [vmem:[#allocation486_spill] sm:$0xff] %v14688_v28  ;;  %v926_v21 = vld [vmem:[#allocation7 + $0xb38] sm:$0xff]  ;;  %17157 = vst [vmem:[#allocation488_spill] sm:$0xff] %v14695_v63 }
 0x474   :  { %8018 = vmatpush1.bf16.msra.mxu1 %v14659_v1  ;;  %7814 = vmatprep.subr.bf16.mxu0 %v14661_v25  ;;  %17154 = vst [vmem:[#allocation485_spill] sm:$0xff] %v14685_v26  ;;  %v925_v25 = vld [vmem:[#allocation7 + $0xb30] sm:$0xff]  ;;  %v922_v1 = vld [vmem:[#allocation7 + $0xb18] sm:$0xff]  ;;  %17156 = vst [vmem:[#allocation487_spill] sm:$0xff] %v14691_v5 }
 0x475   :  { %8019 = vmatprep.subr.bf16.mxu1 %v14664_v37  ;;  %v921_v37 = vld [vmem:[#allocation7 + $0xb10] sm:$0xff]  ;;  %v14700_v50 = vcombine.high %v922_v1, %v926_v21  ;;  %v14707_v0 = vcombine.low %v922_v1, %v926_v21 }
 0x476   :  { %v14697_v17 = vcombine.high %v921_v37, %v925_v25  ;;  %v14703_v29 = vcombine.low %v921_v37, %v925_v25 }
 0x477   :  { %7815 = vmatpush1.bf16.msra.mxu0 %v14667_v12  ;;  %17159 = vst [vmem:[#allocation490_spill] sm:$0xff] %v14700_v50  ;;  %v934_v12 = vld [vmem:[#allocation7 + $0xb78] sm:$0xff]  ;;  %17161 = vst [vmem:[#allocation492_spill] sm:$0xff] %v14707_v0 }
 0x478   :  { %8020 = vmatpush1.bf16.msra.mxu1 %v14671_v31  ;;  %7816 = vmatprep.subr.bf16.mxu0 %v14673_v30  ;;  %17158 = vst [vmem:[#allocation489_spill] sm:$0xff] %v14697_v17  ;;  %v933_v30 = vld [vmem:[#allocation7 + $0xb70] sm:$0xff]  ;;  %v930_v31 = vld [vmem:[#allocation7 + $0xb58] sm:$0xff]  ;;  %17160 = vst [vmem:[#allocation491_spill] sm:$0xff] %v14703_v29 }
 0x479   :  { %8021 = vmatprep.subr.bf16.mxu1 %v14676_v8  ;;  %v929_v8 = vld [vmem:[#allocation7 + $0xb50] sm:$0xff]  ;;  %v14712_v20 = vcombine.high %v930_v31, %v934_v12  ;;  %v14719_v21 = vcombine.low %v930_v31, %v934_v12 }
 0x47a   :  { %v14709_v19 = vcombine.high %v929_v8, %v933_v30  ;;  %v14715_v25 = vcombine.low %v929_v8, %v933_v30 }
 0x47b   :  { %7817 = vmatpush1.bf16.msra.mxu0 %v14679_v9  ;;  %17163 = vst [vmem:[#allocation494_spill] sm:$0xff] %v14712_v20  ;;  %v942_v9 = vld [vmem:[#allocation7 + $0xbb8] sm:$0xff]  ;;  %17165 = vst [vmem:[#allocation496_spill] sm:$0xff] %v14719_v21 }
 0x47c   :  { %8022 = vmatpush1.bf16.msra.mxu1 %v14683_v44  ;;  %7818 = vmatprep.subr.bf16.mxu0 %v14685_v26  ;;  %17162 = vst [vmem:[#allocation493_spill] sm:$0xff] %v14709_v19  ;;  %v941_v26 = vld [vmem:[#allocation7 + $0xbb0] sm:$0xff]  ;;  %v938_v44 = vld [vmem:[#allocation7 + $0xb98] sm:$0xff]  ;;  %17164 = vst [vmem:[#allocation495_spill] sm:$0xff] %v14715_v25 }
 0x47d   :  { %8023 = vmatprep.subr.bf16.mxu1 %v14688_v28  ;;  %v937_v28 = vld [vmem:[#allocation7 + $0xb90] sm:$0xff]  ;;  %v14724_v37 = vcombine.high %v938_v44, %v942_v9  ;;  %v14731_v12 = vcombine.low %v938_v44, %v942_v9 }
 0x47e   :  { %v14721_v1 = vcombine.high %v937_v28, %v941_v26  ;;  %v14727_v30 = vcombine.low %v937_v28, %v941_v26 }
 0x47f   :  { %7819 = vmatpush1.bf16.msra.mxu0 %v14691_v5  ;;  %17167 = vst [vmem:[#allocation498_spill] sm:$0xff] %v14724_v37  ;;  %v950_v5 = vld [vmem:[#allocation7 + $0xbf8] sm:$0xff]  ;;  %17169 = vst [vmem:[#allocation500_spill] sm:$0xff] %v14731_v12 }
 0x480   :  { %8024 = vmatpush1.bf16.msra.mxu1 %v14695_v63  ;;  %7820 = vmatprep.subr.bf16.mxu0 %v14697_v17  ;;  %17166 = vst [vmem:[#allocation497_spill] sm:$0xff] %v14721_v1  ;;  %v949_v17 = vld [vmem:[#allocation7 + $0xbf0] sm:$0xff]  ;;  %v946_v63 = vld [vmem:[#allocation7 + $0xbd8] sm:$0xff]  ;;  %17168 = vst [vmem:[#allocation499_spill] sm:$0xff] %v14727_v30 }
 0x481   :  { %8025 = vmatprep.subr.bf16.mxu1 %v14700_v50  ;;  %v945_v50 = vld [vmem:[#allocation7 + $0xbd0] sm:$0xff]  ;;  %v14736_v8 = vcombine.high %v946_v63, %v950_v5  ;;  %v14743_v9 = vcombine.low %v946_v63, %v950_v5 }
 0x482   :  { %v14733_v31 = vcombine.high %v945_v50, %v949_v17  ;;  %v14739_v26 = vcombine.low %v945_v50, %v949_v17  ;;  %v962_v17 = vld [vmem:[#allocation7 + $0xc58] sm:$0xff] }
 0x483   :  { %7821 = vmatpush1.bf16.msra.mxu0 %v14703_v29  ;;  %17171 = vst [vmem:[#allocation502_spill] sm:$0xff] %v14736_v8  ;;  %v958_v29 = vld [vmem:[#allocation7 + $0xc38] sm:$0xff]  ;;  %17173 = vst [vmem:[#allocation504_spill] sm:$0xff] %v14743_v9 }
 0x484   :  { %8026 = vmatpush1.bf16.msra.mxu1 %v14707_v0  ;;  %7822 = vmatprep.subr.bf16.mxu0 %v14709_v19  ;;  %17170 = vst [vmem:[#allocation501_spill] sm:$0xff] %v14733_v31  ;;  %v957_v19 = vld [vmem:[#allocation7 + $0xc30] sm:$0xff]  ;;  %v954_v0 = vld [vmem:[#allocation7 + $0xc18] sm:$0xff]  ;;  %17172 = vst [vmem:[#allocation503_spill] sm:$0xff] %v14739_v26 }
 0x485   :  { %8027 = vmatprep.subr.bf16.mxu1 %v14712_v20  ;;  %v953_v20 = vld [vmem:[#allocation7 + $0xc10] sm:$0xff]  ;;  %v14748_v28 = vcombine.high %v954_v0, %v958_v29  ;;  %v966_v50 = vld [vmem:[#allocation7 + $0xc78] sm:$0xff]  ;;  %v14755_v5 = vcombine.low %v954_v0, %v958_v29 }
 0x486   :  { %v14745_v44 = vcombine.high %v953_v20, %v957_v19  ;;  %v14769_v29 = vcombine.low %v962_v17, %v966_v50 }
 0x487   :  { %7823 = vmatpush1.bf16.msra.mxu0 %v14715_v25  ;;  %17175 = vst [vmem:[#allocation506_spill] sm:$0xff] %v14748_v28  ;;  %17177 = vst [vmem:[#allocation508_spill] sm:$0xff] %v14755_v5 }
 0x488   :  { %8028 = vmatpush1.bf16.msra.mxu1 %v14719_v21  ;;  %7824 = vmatprep.subr.bf16.mxu0 %v14721_v1  ;;  %17174 = vst [vmem:[#allocation505_spill] sm:$0xff] %v14745_v44  ;;  %v965_v1 = vld [vmem:[#allocation7 + $0xc70] sm:$0xff]  ;;  %v14751_v21 = vcombine.low %v953_v20, %v957_v19  ;;  %v970_v19 = vld [vmem:[#allocation7 + $0xc98] sm:$0xff]  ;;  %17181 = vst [vmem:[#allocation512_spill] sm:$0xff] %v14769_v29 }
 0x489   :  { %8029 = vmatprep.subr.bf16.mxu1 %v14724_v37  ;;  %v961_v37 = vld [vmem:[#allocation7 + $0xc50] sm:$0xff]  ;;  %v974_v20 = vld [vmem:[#allocation7 + $0xcb8] sm:$0xff] }
 0x48a   :  { %17176 = vst [vmem:[#allocation507_spill] sm:$0xff] %v14751_v21  ;;  %v14758_v63 = vcombine.high %v961_v37, %v965_v1 }
 0x48b   :  { %7825 = vmatpush1.bf16.msra.mxu0 %v14727_v30 }
 0x48c   :  { %8030 = vmatpush1.bf16.msra.mxu1 %v14731_v12  ;;  %7826 = vmatprep.subr.bf16.mxu0 %v14733_v31  ;;  %17178 = vst [vmem:[#allocation509_spill] sm:$0xff] %v14758_v63  ;;  %v973_v31 = vld [vmem:[#allocation7 + $0xcb0] sm:$0xff]  ;;  %v14761_v12 = vcombine.high %v962_v17, %v966_v50  ;;  %v14783_v17 = vcombine.low %v970_v19, %v974_v20 }
 0x48d   :  { %8031 = vmatprep.subr.bf16.mxu1 %v14736_v8  ;;  %v969_v8 = vld [vmem:[#allocation7 + $0xc90] sm:$0xff] }
 0x48e   :  { %17179 = vst [vmem:[#allocation510_spill] sm:$0xff] %v14761_v12  ;;  %v14771_v0 = vcombine.high %v969_v8, %v973_v31  ;;  %17185 = vst [vmem:[#allocation516_spill] sm:$0xff] %v14783_v17 }
 0x48f   :  { %7827 = vmatpush1.bf16.msra.mxu0 %v14739_v26  ;;  %v990_v26 = vld [vmem:[#allocation7 + $0xd38] sm:$0xff] }
 0x490   :  { %8032 = vmatpush1.bf16.msra.mxu1 %v14743_v9  ;;  %7837 = vmatprep.subr.bf16.mxu0 %v14745_v44  ;;  %v14765_v9 = vcombine.low %v961_v37, %v965_v1  ;;  %17182 = vst [vmem:[#allocation513_spill] sm:$0xff] %v14771_v0  ;;  %v977_v44 = vld [vmem:[#allocation7 + $0xcd0] sm:$0xff]  ;;  %v978_v1 = vld [vmem:[#allocation7 + $0xcd8] sm:$0xff] }
 0x491   :  { %8042 = vmatprep.subr.bf16.mxu1 %v14748_v28  ;;  %v14775_v28 = vcombine.high %v970_v19, %v974_v20  ;;  %v982_v37 = vld [vmem:[#allocation7 + $0xcf8] sm:$0xff] }
 0x492   :  { %7829 = vmatmul.mubr.bf16.vlgmr.msra.gmra.mrb[40].mxu0 %v13855_v34  ;;  %17180 = vst [vmem:[#allocation511_spill] sm:$0xff] %v14765_v9  ;;  %v14788_v50 = vcombine.high %v978_v1, %v982_v37 }
 0x493   :  { %8034 = vmatmul.mubr.bf16.vlgmr.msra.gmra.mrb[40].mxu1 %v13855_v34  ;;  %7838 = vmatpush1.bf16.msra.mxu0 %v14751_v21  ;;  %17183 = vst [vmem:[#allocation514_spill] sm:$0xff] %v14775_v28  ;;  %v981_v34 = vld [vmem:[#allocation7 + $0xcf0] sm:$0xff]  ;;  %v14779_v21 = vcombine.low %v969_v8, %v973_v31  ;;  %v14795_v8 = vcombine.low %v978_v1, %v982_v37 }
 0x494   :  { %7869 = vmatprep.mubr.bf16.mxu0 %v13864_v16  ;;  %8043 = vmatpush1.bf16.msra.mxu1 %v14755_v5  ;;  %17187 = vst [vmem:[#allocation518_spill] sm:$0xff] %v14788_v50  ;;  %v986_v5 = vld [vmem:[#allocation7 + $0xd18] sm:$0xff]  ;;  %v14791_v31 = vcombine.low %v977_v44, %v981_v34 }
 0x495   :  { %8074 = vmatprep.mubr.bf16.mxu1 %v13864_v16  ;;  %7839 = vmatprep.subr.bf16.mxu0 %v14758_v63  ;;  %17184 = vst [vmem:[#allocation515_spill] sm:$0xff] %v14779_v21  ;;  %v14785_v16 = vcombine.high %v977_v44, %v981_v34  ;;  %v985_v63 = vld [vmem:[#allocation7 + $0xd10] sm:$0xff]  ;;  %17189 = vst [vmem:[#allocation520_spill] sm:$0xff] %v14795_v8  ;;  %v14800_v20 = vcombine.high %v986_v5, %v990_v26 }
 0x496   :  { %8044 = vmatprep.subr.bf16.mxu1 %v14761_v12  ;;  %v989_v12 = vld [vmem:[#allocation7 + $0xd30] sm:$0xff]  ;;  %17188 = vst [vmem:[#allocation519_spill] sm:$0xff] %v14791_v31  ;;  %v14807_v34 = vcombine.low %v986_v5, %v990_v26 }
 0x497   :  { %7840 = vmatpush1.bf16.msra.mxu0 %v14765_v9  ;;  %17186 = vst [vmem:[#allocation517_spill] sm:$0xff] %v14785_v16  ;;  %v14797_v19 = vcombine.high %v985_v63, %v989_v12  ;;  %17191 = vst [vmem:[#allocation522_spill] sm:$0xff] %v14800_v20  ;;  %v998_v9 = vld [vmem:[#allocation7 + $0xd78] sm:$0xff]  ;;  %v14803_v44 = vcombine.low %v985_v63, %v989_v12 }
 0x498   :  { %8045 = vmatpush1.bf16.msra.mxu1 %v14769_v29  ;;  %7841 = vmatprep.subr.bf16.mxu0 %v14771_v0  ;;  %v997_v0 = vld [vmem:[#allocation7 + $0xd70] sm:$0xff]  ;;  %v994_v29 = vld [vmem:[#allocation7 + $0xd58] sm:$0xff]  ;;  %17193 = vst [vmem:[#allocation524_spill] sm:$0xff] %v14807_v34 }
 0x499   :  { %8046 = vmatprep.subr.bf16.mxu1 %v14775_v28  ;;  %17190 = vst [vmem:[#allocation521_spill] sm:$0xff] %v14797_v19  ;;  %v993_v28 = vld [vmem:[#allocation7 + $0xd50] sm:$0xff]  ;;  %17192 = vst [vmem:[#allocation523_spill] sm:$0xff] %v14803_v44  ;;  %v14812_v37 = vcombine.high %v994_v29, %v998_v9  ;;  %v14819_v26 = vcombine.low %v994_v29, %v998_v9 }
 0x49a   :  { %v14809_v1 = vcombine.high %v993_v28, %v997_v0  ;;  %v14815_v12 = vcombine.low %v993_v28, %v997_v0  ;;  %v1010_v0 = vld [vmem:[#allocation7 + $0xdd8] sm:$0xff] }
 0x49b   :  { %7842 = vmatpush1.bf16.msra.mxu0 %v14779_v21  ;;  %17195 = vst [vmem:[#allocation526_spill] sm:$0xff] %v14812_v37  ;;  %v1006_v21 = vld [vmem:[#allocation7 + $0xdb8] sm:$0xff]  ;;  %17197 = vst [vmem:[#allocation528_spill] sm:$0xff] %v14819_v26 }
 0x49c   :  { %8047 = vmatpush1.bf16.msra.mxu1 %v14783_v17  ;;  %7843 = vmatprep.subr.bf16.mxu0 %v14785_v16  ;;  %17194 = vst [vmem:[#allocation525_spill] sm:$0xff] %v14809_v1  ;;  %v1005_v16 = vld [vmem:[#allocation7 + $0xdb0] sm:$0xff]  ;;  %v1002_v17 = vld [vmem:[#allocation7 + $0xd98] sm:$0xff]  ;;  %17196 = vst [vmem:[#allocation527_spill] sm:$0xff] %v14815_v12 }
 0x49d   :  { %8048 = vmatprep.subr.bf16.mxu1 %v14788_v50  ;;  %v1001_v50 = vld [vmem:[#allocation7 + $0xd90] sm:$0xff]  ;;  %v14843_v24 = vcombine.low %v1002_v17, %v1006_v21 }
 0x49e   :  { %v14821_v5 = vcombine.high %v1001_v50, %v1005_v16 }
 0x49f   :  { %7844 = vmatpush1.bf16.msra.mxu0 %v14791_v31  ;;  %17201 = vst [vmem:[#allocation532_spill] sm:$0xff] %v14843_v24 }
 0x4a0   :  { %8049 = vmatpush1.bf16.msra.mxu1 %v14795_v8  ;;  %7845 = vmatprep.subr.bf16.mxu0 %v14797_v19  ;;  %17198 = vst [vmem:[#allocation529_spill] sm:$0xff] %v14821_v5  ;;  %v1009_v19 = vld [vmem:[#allocation7 + $0xdd0] sm:$0xff] }
 0x4a1   :  { %8050 = vmatprep.subr.bf16.mxu1 %v14800_v20  ;;  %v14826_v20 = vcombine.high %v1002_v17, %v1006_v21  ;;  %v1013_v8 = vld [vmem:[#allocation7 + $0xdf0] sm:$0xff] }
 0x4a2   :  { %v14845_v45 = vcombine.high %v1009_v19, %v1013_v8 }
 0x4a3   :  { %7846 = vmatpush1.bf16.msra.mxu0 %v14803_v44  ;;  %17199 = vst [vmem:[#allocation530_spill] sm:$0xff] %v14826_v20  ;;  %v14837_v44 = vcombine.low %v1001_v50, %v1005_v16  ;;  %v1017_v16 = vld [vmem:[#allocation7 + $0xe10] sm:$0xff] }
 0x4a4   :  { %8051 = vmatpush1.bf16.msra.mxu1 %v14807_v34  ;;  %7847 = vmatprep.subr.bf16.mxu0 %v14809_v1  ;;  %v1014_v34 = vld [vmem:[#allocation7 + $0xdf8] sm:$0xff]  ;;  %17202 = vst [vmem:[#allocation533_spill] sm:$0xff] %v14845_v45  ;;  %v1021_v50 = vld [vmem:[#allocation7 + $0xe30] sm:$0xff] }
 0x4a5   :  { %v14823_v63 = vpop.f32.mrb[36].mxu0  ;;  %8052 = vmatprep.subr.bf16.mxu1 %v14812_v37  ;;  %17200 = vst [vmem:[#allocation531_spill] sm:$0xff] %v14837_v44  ;;  %v14857_v21 = vcombine.high %v1017_v16, %v1021_v50  ;;  %v1029_v37 = vld [vmem:[#allocation7 + $0xe70] sm:$0xff] }
 0x4a6   :  { %v14828_v31 = vpop.f32.mrb[36].mxu1  ;;  %v14830_v28 = vpop.f32.mrb[37].mxu0 }
 0x4a7   :  { %v14834_v29 = vpop.f32.mrb[37].mxu1  ;;  %v7506_v1 = vpop.f32.mrb[38].mxu0  ;;  %7848 = vmatpush1.bf16.msra.mxu0 %v14815_v12  ;;  %v1018_v12 = vld [vmem:[#allocation7 + $0xe18] sm:$0xff]  ;;  %17206 = vst [vmem:[#allocation537_spill] sm:$0xff] %v14857_v21 }
 0x4a8   :  { %v7711_v30 = vpop.f32.mrb[38].mxu1  ;;  %8053 = vmatpush1.bf16.msra.mxu1 %v14819_v26  ;;  %v7507_v25 = vpop.f32.mrb[39].mxu0  ;;  %7849 = vmatprep.subr.bf16.mxu0 %v14821_v5  ;;  %v14848_v1 = vcombine.high %v1010_v0, %v1014_v34  ;;  %v14860_v17 = vcombine.high %v1018_v12, %v1022_v13  ;;  %v1030_v5 = vld [vmem:[#allocation7 + $0xe78] sm:$0xff] }
 0x4a9   :  { %v7712_v9 = vpop.f32.mrb[39].mxu1  ;;  %8054 = vmatprep.subr.bf16.mxu1 %v14826_v20  ;;  %v14851_v30 = vcombine.low %v1009_v19, %v1013_v8  ;;  %v14855_v25 = vcombine.low %v1010_v0, %v1014_v34  ;;  %v1026_v20 = vld [vmem:[#allocation7 + $0xe58] sm:$0xff]  ;;  %v14863_v8 = vcombine.low %v1017_v16, %v1021_v50  ;;  %v14867_v19 = vcombine.low %v1018_v12, %v1022_v13 }
 0x4aa   :  { %17203 = vst [vmem:[#allocation534_spill] sm:$0xff] %v14848_v1  ;;  %17207 = vst [vmem:[#allocation538_spill] sm:$0xff] %v14860_v17  ;;  %v1025_v9 = vld [vmem:[#allocation7 + $0xe50] sm:$0xff]  ;;  %v14872_v0 = vcombine.high %v1026_v20, %v1030_v5  ;;  %v14879_v13 = vcombine.low %v1026_v20, %v1030_v5 }
 0x4ab   :  { %7850 = vmatpush1.bf16.msra.mxu0 %v14837_v44  ;;  %17204 = vst [vmem:[#allocation535_spill] sm:$0xff] %v14851_v30  ;;  %17205 = vst [vmem:[#allocation536_spill] sm:$0xff] %v14855_v25  ;;  %v14869_v34 = vcombine.high %v1025_v9, %v1029_v37  ;;  %v1038_v44 = vld [vmem:[#allocation7 + $0xeb8] sm:$0xff]  ;;  %v14875_v16 = vcombine.low %v1025_v9, %v1029_v37 }
 0x4ac   :  { %8055 = vmatpush1.bf16.msra.mxu1 %v14843_v24  ;;  %7851 = vmatprep.subr.bf16.mxu0 %v14845_v45  ;;  %17208 = vst [vmem:[#allocation539_spill] sm:$0xff] %v14863_v8  ;;  %17209 = vst [vmem:[#allocation540_spill] sm:$0xff] %v14867_v19  ;;  %v1037_v45 = vld [vmem:[#allocation7 + $0xeb0] sm:$0xff]  ;;  %v1034_v24 = vld [vmem:[#allocation7 + $0xe98] sm:$0xff] }
 0x4ad   :  { %8056 = vmatprep.subr.bf16.mxu1 %v14848_v1  ;;  %17210 = vst [vmem:[#allocation541_spill] sm:$0xff] %v14869_v34  ;;  %17211 = vst [vmem:[#allocation542_spill] sm:$0xff] %v14872_v0  ;;  %v1033_v1 = vld [vmem:[#allocation7 + $0xe90] sm:$0xff]  ;;  %v14884_v50 = vcombine.high %v1034_v24, %v1038_v44  ;;  %v14891_v20 = vcombine.low %v1034_v24, %v1038_v44 }
 0x4ae   :  { %17212 = vst [vmem:[#allocation543_spill] sm:$0xff] %v14875_v16  ;;  %17213 = vst [vmem:[#allocation544_spill] sm:$0xff] %v14879_v13  ;;  %v14881_v12 = vcombine.high %v1033_v1, %v1037_v45  ;;  %v14887_v37 = vcombine.low %v1033_v1, %v1037_v45 }
 0x4af   :  { %7852 = vmatpush1.bf16.msra.mxu0 %v14851_v30  ;;  %17215 = vst [vmem:[#allocation546_spill] sm:$0xff] %v14884_v50  ;;  %v1046_v30 = vld [vmem:[#allocation7 + $0xef8] sm:$0xff]  ;;  %17217 = vst [vmem:[#allocation548_spill] sm:$0xff] %v14891_v20 }
 0x4b0   :  { %8057 = vmatpush1.bf16.msra.mxu1 %v14855_v25  ;;  %7853 = vmatprep.subr.bf16.mxu0 %v14857_v21  ;;  %17214 = vst [vmem:[#allocation545_spill] sm:$0xff] %v14881_v12  ;;  %v1045_v21 = vld [vmem:[#allocation7 + $0xef0] sm:$0xff]  ;;  %v1042_v25 = vld [vmem:[#allocation7 + $0xed8] sm:$0xff]  ;;  %17216 = vst [vmem:[#allocation547_spill] sm:$0xff] %v14887_v37 }
 0x4b1   :  { %8058 = vmatprep.subr.bf16.mxu1 %v14860_v17  ;;  %v1041_v17 = vld [vmem:[#allocation7 + $0xed0] sm:$0xff]  ;;  %v14896_v9 = vcombine.high %v1042_v25, %v1046_v30  ;;  %v14903_v24 = vcombine.low %v1042_v25, %v1046_v30 }
 0x4b2   :  { %v14893_v5 = vcombine.high %v1041_v17, %v1045_v21  ;;  %v14899_v45 = vcombine.low %v1041_v17, %v1045_v21 }
 0x4b3   :  { %7854 = vmatpush1.bf16.msra.mxu0 %v14863_v8  ;;  %17219 = vst [vmem:[#allocation550_spill] sm:$0xff] %v14896_v9  ;;  %v1054_v8 = vld [vmem:[#allocation7 + $0xf38] sm:$0xff]  ;;  %17221 = vst [vmem:[#allocation552_spill] sm:$0xff] %v14903_v24 }
 0x4b4   :  { %8059 = vmatpush1.bf16.msra.mxu1 %v14867_v19  ;;  %7855 = vmatprep.subr.bf16.mxu0 %v14869_v34  ;;  %17218 = vst [vmem:[#allocation549_spill] sm:$0xff] %v14893_v5  ;;  %v1053_v34 = vld [vmem:[#allocation7 + $0xf30] sm:$0xff]  ;;  %v1050_v19 = vld [vmem:[#allocation7 + $0xf18] sm:$0xff]  ;;  %17220 = vst [vmem:[#allocation551_spill] sm:$0xff] %v14899_v45 }
 0x4b5   :  { %8060 = vmatprep.subr.bf16.mxu1 %v14872_v0  ;;  %v1049_v0 = vld [vmem:[#allocation7 + $0xf10] sm:$0xff]  ;;  %v14908_v1 = vcombine.high %v1050_v19, %v1054_v8  ;;  %v14915_v30 = vcombine.low %v1050_v19, %v1054_v8 }
 0x4b6   :  { %v14905_v44 = vcombine.high %v1049_v0, %v1053_v34  ;;  %v14911_v21 = vcombine.low %v1049_v0, %v1053_v34 }
 0x4b7   :  { %7856 = vmatpush1.bf16.msra.mxu0 %v14875_v16  ;;  %17223 = vst [vmem:[#allocation554_spill] sm:$0xff] %v14908_v1  ;;  %v1062_v16 = vld [vmem:[#allocation7 + $0xf78] sm:$0xff]  ;;  %17225 = vst [vmem:[#allocation556_spill] sm:$0xff] %v14915_v30 }
 0x4b8   :  { %8061 = vmatpush1.bf16.msra.mxu1 %v14879_v13  ;;  %7857 = vmatprep.subr.bf16.mxu0 %v14881_v12  ;;  %17222 = vst [vmem:[#allocation553_spill] sm:$0xff] %v14905_v44  ;;  %v1061_v12 = vld [vmem:[#allocation7 + $0xf70] sm:$0xff]  ;;  %v1058_v13 = vld [vmem:[#allocation7 + $0xf58] sm:$0xff]  ;;  %17224 = vst [vmem:[#allocation555_spill] sm:$0xff] %v14911_v21 }
 0x4b9   :  { %8062 = vmatprep.subr.bf16.mxu1 %v14884_v50  ;;  %v1057_v50 = vld [vmem:[#allocation7 + $0xf50] sm:$0xff]  ;;  %v14920_v17 = vcombine.high %v1058_v13, %v1062_v16  ;;  %v14927_v8 = vcombine.low %v1058_v13, %v1062_v16 }
 0x4ba   :  { %v14917_v25 = vcombine.high %v1057_v50, %v1061_v12  ;;  %v14923_v34 = vcombine.low %v1057_v50, %v1061_v12 }
 0x4bb   :  { %7858 = vmatpush1.bf16.msra.mxu0 %v14887_v37  ;;  %17227 = vst [vmem:[#allocation558_spill] sm:$0xff] %v14920_v17  ;;  %v1070_v37 = vld [vmem:[#allocation7 + $0xfb8] sm:$0xff]  ;;  %17229 = vst [vmem:[#allocation560_spill] sm:$0xff] %v14927_v8 }
 0x4bc   :  { %8063 = vmatpush1.bf16.msra.mxu1 %v14891_v20  ;;  %7859 = vmatprep.subr.bf16.mxu0 %v14893_v5  ;;  %17226 = vst [vmem:[#allocation557_spill] sm:$0xff] %v14917_v25  ;;  %v1069_v5 = vld [vmem:[#allocation7 + $0xfb0] sm:$0xff]  ;;  %v1066_v20 = vld [vmem:[#allocation7 + $0xf98] sm:$0xff]  ;;  %17228 = vst [vmem:[#allocation559_spill] sm:$0xff] %v14923_v34 }
 0x4bd   :  { %8064 = vmatprep.subr.bf16.mxu1 %v14896_v9  ;;  %v1065_v9 = vld [vmem:[#allocation7 + $0xf90] sm:$0xff]  ;;  %v14932_v0 = vcombine.high %v1066_v20, %v1070_v37  ;;  %v14939_v16 = vcombine.low %v1066_v20, %v1070_v37 }
 0x4be   :  { %v14929_v19 = vcombine.high %v1065_v9, %v1069_v5  ;;  %v14935_v12 = vcombine.low %v1065_v9, %v1069_v5 }
 0x4bf   :  { %7860 = vmatpush1.bf16.msra.mxu0 %v14899_v45  ;;  %17231 = vst [vmem:[#allocation562_spill] sm:$0xff] %v14932_v0  ;;  %v1078_v45 = vld [vmem:[#allocation7 + $0xff8] sm:$0xff]  ;;  %17233 = vst [vmem:[#allocation564_spill] sm:$0xff] %v14939_v16 }
 0x4c0   :  { %8065 = vmatpush1.bf16.msra.mxu1 %v14903_v24  ;;  %7861 = vmatprep.subr.bf16.mxu0 %v14905_v44  ;;  %17230 = vst [vmem:[#allocation561_spill] sm:$0xff] %v14929_v19  ;;  %v1077_v44 = vld [vmem:[#allocation7 + $0xff0] sm:$0xff]  ;;  %v1074_v24 = vld [vmem:[#allocation7 + $0xfd8] sm:$0xff]  ;;  %17232 = vst [vmem:[#allocation563_spill] sm:$0xff] %v14935_v12 }
 0x4c1   :  { %8066 = vmatprep.subr.bf16.mxu1 %v14908_v1  ;;  %v1073_v1 = vld [vmem:[#allocation7 + $0xfd0] sm:$0xff]  ;;  %v14944_v50 = vcombine.high %v1074_v24, %v1078_v45  ;;  %v14951_v37 = vcombine.low %v1074_v24, %v1078_v45 }
 0x4c2   :  { %v14941_v13 = vcombine.high %v1073_v1, %v1077_v44  ;;  %v14947_v5 = vcombine.low %v1073_v1, %v1077_v44 }
 0x4c3   :  { %7862 = vmatpush1.bf16.msra.mxu0 %v14911_v21  ;;  %17235 = vst [vmem:[#allocation566_spill] sm:$0xff] %v14944_v50  ;;  %v1086_v21 = vld [vmem:[#allocation7 + $0x1038] sm:$0xff]  ;;  %17237 = vst [vmem:[#allocation568_spill] sm:$0xff] %v14951_v37 }
 0x4c4   :  { %8067 = vmatpush1.bf16.msra.mxu1 %v14915_v30  ;;  %7863 = vmatprep.subr.bf16.mxu0 %v14917_v25  ;;  %17234 = vst [vmem:[#allocation565_spill] sm:$0xff] %v14941_v13  ;;  %v1085_v25 = vld [vmem:[#allocation7 + $0x1030] sm:$0xff]  ;;  %v1082_v30 = vld [vmem:[#allocation7 + $0x1018] sm:$0xff]  ;;  %17236 = vst [vmem:[#allocation567_spill] sm:$0xff] %v14947_v5 }
 0x4c5   :  { %8068 = vmatprep.subr.bf16.mxu1 %v14920_v17  ;;  %v1081_v17 = vld [vmem:[#allocation7 + $0x1010] sm:$0xff]  ;;  %v14956_v9 = vcombine.high %v1082_v30, %v1086_v21  ;;  %v14963_v45 = vcombine.low %v1082_v30, %v1086_v21 }
 0x4c6   :  { %v14953_v20 = vcombine.high %v1081_v17, %v1085_v25  ;;  %v14959_v44 = vcombine.low %v1081_v17, %v1085_v25 }
 0x4c7   :  { %7864 = vmatpush1.bf16.msra.mxu0 %v14923_v34  ;;  %17239 = vst [vmem:[#allocation570_spill] sm:$0xff] %v14956_v9  ;;  %v1094_v34 = vld [vmem:[#allocation7 + $0x1078] sm:$0xff]  ;;  %17241 = vst [vmem:[#allocation572_spill] sm:$0xff] %v14963_v45 }
 0x4c8   :  { %8069 = vmatpush1.bf16.msra.mxu1 %v14927_v8  ;;  %7865 = vmatprep.subr.bf16.mxu0 %v14929_v19  ;;  %17238 = vst [vmem:[#allocation569_spill] sm:$0xff] %v14953_v20  ;;  %v1093_v19 = vld [vmem:[#allocation7 + $0x1070] sm:$0xff]  ;;  %v1090_v8 = vld [vmem:[#allocation7 + $0x1058] sm:$0xff]  ;;  %17240 = vst [vmem:[#allocation571_spill] sm:$0xff] %v14959_v44 }
 0x4c9   :  { %8070 = vmatprep.subr.bf16.mxu1 %v14932_v0  ;;  %v1089_v0 = vld [vmem:[#allocation7 + $0x1050] sm:$0xff]  ;;  %v14968_v1 = vcombine.high %v1090_v8, %v1094_v34  ;;  %v14977_v21 = vcombine.low %v1090_v8, %v1094_v34 }
 0x4ca   :  { %v14965_v24 = vcombine.high %v1089_v0, %v1093_v19  ;;  %v14973_v25 = vcombine.low %v1089_v0, %v1093_v19 }
 0x4cb   :  { %7866 = vmatpush1.bf16.msra.mxu0 %v14935_v12  ;;  %17243 = vst [vmem:[#allocation574_spill] sm:$0xff] %v14968_v1  ;;  %17245 = vst [vmem:[#allocation576_spill] sm:$0xff] %v14977_v21  ;;  %v1118_v12 = vld [vmem:[#allocation7 + $0x1138] sm:$0xff] }
 0x4cc   :  { %8071 = vmatpush1.bf16.msra.mxu1 %v14939_v16  ;;  %7867 = vmatprep.subr.bf16.mxu0 %v14941_v13  ;;  %17242 = vst [vmem:[#allocation573_spill] sm:$0xff] %v14965_v24  ;;  %v1101_v13 = vld [vmem:[#allocation7 + $0x10b0] sm:$0xff]  ;;  %v1098_v16 = vld [vmem:[#allocation7 + $0x1098] sm:$0xff]  ;;  %17244 = vst [vmem:[#allocation575_spill] sm:$0xff] %v14973_v25 }
 0x4cd   :  { %8072 = vmatprep.subr.bf16.mxu1 %v14944_v50  ;;  %v1097_v50 = vld [vmem:[#allocation7 + $0x1090] sm:$0xff] }
 0x4ce   :  { %v14979_v30 = vcombine.high %v1097_v50, %v1101_v13  ;;  %v14987_v19 = vcombine.low %v1097_v50, %v1101_v13 }
 0x4cf   :  { %7868 = vmatpush1.bf16.msra.mxu0 %v14947_v5  ;;  %v1102_v5 = vld [vmem:[#allocation7 + $0x10b8] sm:$0xff] }
 0x4d0   :  { %8073 = vmatpush1.bf16.msra.mxu1 %v14951_v37  ;;  %7878 = vmatprep.subr.bf16.mxu0 %v14953_v20  ;;  %17246 = vst [vmem:[#allocation577_spill] sm:$0xff] %v14979_v30  ;;  %v14982_v17 = vcombine.high %v1098_v16, %v1102_v5  ;;  %v1109_v20 = vld [vmem:[#allocation7 + $0x10f0] sm:$0xff]  ;;  %v17248_v37 = vmov 0   ;;  %17249 = vst [vmem:[#allocation579_spill] sm:$0xff] %v14987_v19  ;;  %v14991_v34 = vcombine.low %v1098_v16, %v1102_v5 }
 0x4d1   :  { %8083 = vmatprep.subr.bf16.mxu1 %v14956_v9  ;;  %v1105_v9 = vld [vmem:[#allocation7 + $0x10d0] sm:$0xff] }
 0x4d2   :  { %7870 = vmatmul.mubr.bf16.vlgmr.msra.gmra.mrb[40].mxu0 %v14060_v35  ;;  %17247 = vst [vmem:[#allocation578_spill] sm:$0xff] %v14982_v17  ;;  %17250 = vst [vmem:[#allocation580_spill] sm:$0xff] %v14991_v34  ;;  %v14993_v8 = vcombine.high %v1105_v9, %v1109_v20  ;;  %v14999_v13 = vcombine.low %v1105_v9, %v1109_v20 }
 0x4d3   :  { %8075 = vmatmul.mubr.bf16.vlgmr.msra.gmra.mrb[40].mxu1 %v14060_v35  ;;  %7879 = vmatpush1.bf16.msra.mxu0 %v14959_v44  ;;  %v1106_v35 = vld [vmem:[#allocation7 + $0x10d8] sm:$0xff] }
 0x4d4   :  { %8084 = vmatpush1.bf16.msra.mxu1 %v14963_v45  ;;  %7880 = vmatprep.subr.bf16.mxu0 %v14965_v24  ;;  %v1110_v44 = vld [vmem:[#allocation7 + $0x10f8] sm:$0xff]  ;;  %17251 = vst [vmem:[#allocation581_spill] sm:$0xff] %v14993_v8  ;;  %v1117_v24 = vld [vmem:[#allocation7 + $0x1130] sm:$0xff]  ;;  %17253 = vst [vmem:[#allocation583_spill] sm:$0xff] %v14999_v13 }
 0x4d5   :  { %8085 = vmatprep.subr.bf16.mxu1 %v14968_v1  ;;  %7910 = vmatprep.mubr.bf16.mxu0 %v17248_v37  ;;  %v14996_v0 = vcombine.high %v1106_v35, %v1110_v44  ;;  %v1113_v1 = vld [vmem:[#allocation7 + $0x1110] sm:$0xff]  ;;  %v1114_v45 = vld [vmem:[#allocation7 + $0x1118] sm:$0xff]  ;;  %v15003_v16 = vcombine.low %v1106_v35, %v1110_v44 }
 0x4d6   :  { %8115 = vmatprep.mubr.bf16.mxu1 %v17248_v37  ;;  %v15005_v50 = vcombine.high %v1113_v1, %v1117_v24  ;;  %v15008_v5 = vcombine.high %v1114_v45, %v1118_v12  ;;  %v15011_v20 = vcombine.low %v1113_v1, %v1117_v24  ;;  %v15015_v9 = vcombine.low %v1114_v45, %v1118_v12 }
 0x4d7   :  { %7881 = vmatpush1.bf16.msra.mxu0 %v14973_v25  ;;  %17252 = vst [vmem:[#allocation582_spill] sm:$0xff] %v14996_v0  ;;  %17254 = vst [vmem:[#allocation584_spill] sm:$0xff] %v15003_v16  ;;  %v1126_v25 = vld [vmem:[#allocation7 + $0x1178] sm:$0xff] }
 0x4d8   :  { %8086 = vmatpush1.bf16.msra.mxu1 %v14977_v21  ;;  %7882 = vmatprep.subr.bf16.mxu0 %v14979_v30  ;;  %17255 = vst [vmem:[#allocation585_spill] sm:$0xff] %v15005_v50  ;;  %17256 = vst [vmem:[#allocation586_spill] sm:$0xff] %v15008_v5  ;;  %v1125_v30 = vld [vmem:[#allocation7 + $0x1170] sm:$0xff]  ;;  %v1122_v21 = vld [vmem:[#allocation7 + $0x1158] sm:$0xff] }
 0x4d9   :  { %8087 = vmatprep.subr.bf16.mxu1 %v14982_v17  ;;  %v1121_v17 = vld [vmem:[#allocation7 + $0x1150] sm:$0xff]  ;;  %17257 = vst [vmem:[#allocation587_spill] sm:$0xff] %v15011_v20  ;;  %17258 = vst [vmem:[#allocation588_spill] sm:$0xff] %v15015_v9  ;;  %v15020_v35 = vcombine.high %v1122_v21, %v1126_v25  ;;  %v15027_v12 = vcombine.low %v1122_v21, %v1126_v25 }
 0x4da   :  { %v15017_v44 = vcombine.high %v1121_v17, %v1125_v30  ;;  %v15023_v24 = vcombine.low %v1121_v17, %v1125_v30 }
 0x4db   :  { %7883 = vmatpush1.bf16.msra.mxu0 %v14987_v19  ;;  %17260 = vst [vmem:[#allocation590_spill] sm:$0xff] %v15020_v35  ;;  %v1134_v19 = vld [vmem:[#allocation7 + $0x11b8] sm:$0xff]  ;;  %17262 = vst [vmem:[#allocation592_spill] sm:$0xff] %v15027_v12 }
 0x4dc   :  { %8088 = vmatpush1.bf16.msra.mxu1 %v14991_v34  ;;  %7884 = vmatprep.subr.bf16.mxu0 %v14993_v8  ;;  %17259 = vst [vmem:[#allocation589_spill] sm:$0xff] %v15017_v44  ;;  %v1133_v8 = vld [vmem:[#allocation7 + $0x11b0] sm:$0xff]  ;;  %v1130_v34 = vld [vmem:[#allocation7 + $0x1198] sm:$0xff]  ;;  %17261 = vst [vmem:[#allocation591_spill] sm:$0xff] %v15023_v24 }
 0x4dd   :  { %8089 = vmatprep.subr.bf16.mxu1 %v14996_v0  ;;  %v1129_v0 = vld [vmem:[#allocation7 + $0x1190] sm:$0xff]  ;;  %v15032_v1 = vcombine.high %v1130_v34, %v1134_v19  ;;  %v15039_v25 = vcombine.low %v1130_v34, %v1134_v19 }
 0x4de   :  { %v15029_v45 = vcombine.high %v1129_v0, %v1133_v8  ;;  %v15035_v30 = vcombine.low %v1129_v0, %v1133_v8  ;;  %v12163_v0 = vld [vmem:[#allocation3 + $0x4] ss:$144 sps:$4 sm:$0xff]  }
 0x4df   :  { %7885 = vmatpush1.bf16.msra.mxu0 %v14999_v13  ;;  %17264 = vst [vmem:[#allocation594_spill] sm:$0xff] %v15032_v1  ;;  %v1142_v13 = vld [vmem:[#allocation7 + $0x11f8] sm:$0xff]  ;;  %17266 = vst [vmem:[#allocation596_spill] sm:$0xff] %v15039_v25 }
 0x4e0   :  { %8090 = vmatpush1.bf16.msra.mxu1 %v15003_v16  ;;  %7886 = vmatprep.subr.bf16.mxu0 %v15005_v50  ;;  %17263 = vst [vmem:[#allocation593_spill] sm:$0xff] %v15029_v45  ;;  %v1141_v50 = vld [vmem:[#allocation7 + $0x11f0] sm:$0xff]  ;;  %v1138_v16 = vld [vmem:[#allocation7 + $0x11d8] sm:$0xff]  ;;  %17265 = vst [vmem:[#allocation595_spill] sm:$0xff] %v15035_v30 }
 0x4e1   :  { %8091 = vmatprep.subr.bf16.mxu1 %v15008_v5  ;;  %v1137_v5 = vld [vmem:[#allocation7 + $0x11d0] sm:$0xff]  ;;  %v15044_v17 = vcombine.high %v1138_v16, %v1142_v13  ;;  %v15056_v19 = vcombine.low %v1138_v16, %v1142_v13 }
 0x4e2   :  { %v15041_v21 = vcombine.high %v1137_v5, %v1141_v50  ;;  %v15052_v8 = vcombine.low %v1137_v5, %v1141_v50  ;;  %v12165_v13 = vld [vmem:[#allocation3] ss:$144 sps:$4 sm:$0xff]   ;;  %v12166_v16 = vld [vmem:[#allocation3 + $0x8] ss:$144 sps:$4 sm:$0xff]   ;;  %v12167_v5 = vld [vmem:[#allocation3 + $0x124] ss:$144 sps:$4 sm:$0xff]  }
 0x4e3   :  { %7887 = vmatpush1.bf16.msra.mxu0 %v15011_v20  ;;  %17268 = vst [vmem:[#allocation598_spill] sm:$0xff] %v15044_v17  ;;  %17270 = vst [vmem:[#allocation600_spill] sm:$0xff] %v15056_v19 }
 0x4e4   :  { %8092 = vmatpush1.bf16.msra.mxu1 %v15015_v9  ;;  %7888 = vmatprep.subr.bf16.mxu0 %v15017_v44  ;;  %17267 = vst [vmem:[#allocation597_spill] sm:$0xff] %v15041_v21  ;;  %17269 = vst [vmem:[#allocation599_spill] sm:$0xff] %v15052_v8 }
 0x4e5   :  { %8093 = vmatprep.subr.bf16.mxu1 %v15020_v35  ;;  %v15049_v35 = vld.sshfl [vmem:[%s16077_s1] sm:$0x33 pattern:$0x76325410] }
 0x4e6   :  { %v8154_v34 = vcombine.high %v15049_v35, %v15049_v35 }
 0x4e7   :  { %7889 = vmatpush1.bf16.msra.mxu0 %v15023_v24 }
 0x4e8   :  { %8094 = vmatpush1.bf16.msra.mxu1 %v15027_v12  ;;  %7890 = vmatprep.subr.bf16.mxu0 %v15029_v45  ;;  %v15063_v50 = vpack.c.bf16 %v8154_v34, %v8154_v34  ;;  %v12170_v34 = vld [vmem:[#allocation3 + $0x128] ss:$144 sps:$4 sm:$0xff]  }
 0x4e9   :  { %8095 = vmatprep.subr.bf16.mxu1 %v15032_v1 }
 0x4eb   :  { %7891 = vmatpush1.bf16.msra.mxu0 %v15035_v30  ;;  %v12164_v30 = vld [vmem:[#allocation3 + $0xc] ss:$144 sps:$4 sm:$0xff]  }
 0x4ec   :  { %8096 = vmatpush1.bf16.msra.mxu1 %v15039_v25  ;;  %7892 = vmatprep.subr.bf16.mxu0 %v15041_v21  ;;  %v12179_v21 = vld [vmem:[#allocation3 + $0x484] ss:$144 sps:$4 sm:$0xff]  }
 0x4ed   :  { %8097 = vmatprep.subr.bf16.mxu1 %v15044_v17  ;;  %v12168_v17 = vld [vmem:[#allocation3 + $0x12c] ss:$144 sps:$4 sm:$0xff]   ;;  %v17353_v25 = vld [vmem:[#allocation95_spill] sm:$0xff] }
 0x4ef   :  { %7893 = vmatpush1.bf16.msra.mxu0 %v15052_v8  ;;  %v12178_v8 = vld [vmem:[#allocation3 + $0x368] ss:$144 sps:$4 sm:$0xff]  }
 0x4f0   :  { %8098 = vmatpush1.bf16.msra.mxu1 %v15056_v19  ;;  %8162 = vmatprep.subr.bf16.mxu0 %v12163_v0  ;;  %v12171_v0 = vld [vmem:[#allocation3 + $0x244] ss:$144 sps:$4 sm:$0xff]   ;;  %v12177_v19 = vld [vmem:[#allocation3 + $0x360] ss:$144 sps:$4 sm:$0xff]  }
 0x4f1   :  { %8203 = vmatprep.subr.bf16.mxu1 %v12164_v30  ;;  %v12169_v30 = vld [vmem:[#allocation3 + $0x120] ss:$144 sps:$4 sm:$0xff]  }
 0x4f2   :  { %7911 = vmatmul.mubr.bf16.vlgmr.msra.gmra.mrb[40].mxu0 %v14163_v43 }
 0x4f3   :  { %8116 = vmatmul.mubr.bf16.vlgmr.msra.gmra.mrb[40].mxu1 %v14163_v43  ;;  %8163 = vmatpush1.bf16.msra.mxu0 %v12165_v13  ;;  %v12172_v43 = vld [vmem:[#allocation3 + $0x24c] ss:$144 sps:$4 sm:$0xff]   ;;  %v12173_v13 = vld [vmem:[#allocation3 + $0x240] ss:$144 sps:$4 sm:$0xff]  }
 0x4f4   :  { %8204 = vmatpush1.bf16.msra.mxu1 %v12166_v16  ;;  %8164 = vmatprep.subr.bf16.mxu0 %v12167_v5  ;;  %v12174_v16 = vld [vmem:[#allocation3 + $0x248] ss:$144 sps:$4 sm:$0xff]   ;;  %v12175_v5 = vld [vmem:[#allocation3 + $0x364] ss:$144 sps:$4 sm:$0xff]  }
 0x4f5   :  { %8205 = vmatprep.subr.bf16.mxu1 %v12168_v17  ;;  %11189 = vmatprep.mubr.msk.bf16.mxu0 %vm3472_vm0, %v15063_v50  ;;  %v12176_v17 = vld [vmem:[#allocation3 + $0x36c] ss:$144 sps:$4 sm:$0xff]  }
 0x4f6   :  { %11191 = vmatprep.mubr.msk.bf16.mxu1 %vm3472_vm0, %v15063_v50 }
 0x4f7   :  { %8165 = vmatpush1.bf16.msra.mxu0 %v12169_v30  ;;  %v12180_v30 = vld [vmem:[#allocation3 + $0x48c] ss:$144 sps:$4 sm:$0xff]  }
 0x4f8   :  { %8206 = vmatpush1.bf16.msra.mxu1 %v12170_v34  ;;  %8166 = vmatprep.subr.bf16.mxu0 %v12171_v0  ;;  %v12181_v34 = vld [vmem:[#allocation3 + $0x480] ss:$144 sps:$4 sm:$0xff]   ;;  %v12182_v0 = vld [vmem:[#allocation3 + $0x488] ss:$144 sps:$4 sm:$0xff]  }
 0x4f9   :  { %8207 = vmatprep.subr.bf16.mxu1 %v12172_v43  ;;  %v12183_v43 = vld [vmem:[#allocation3 + $0x5a4] ss:$144 sps:$4 sm:$0xff]  }
 0x4fb   :  { %8167 = vmatpush1.bf16.msra.mxu0 %v12173_v13  ;;  %v12184_v13 = vld [vmem:[#allocation3 + $0x5ac] ss:$144 sps:$4 sm:$0xff]  }
 0x4fc   :  { %8208 = vmatpush1.bf16.msra.mxu1 %v12174_v16  ;;  %8168 = vmatprep.subr.bf16.mxu0 %v12175_v5  ;;  %v12185_v16 = vld [vmem:[#allocation3 + $0x5a0] ss:$144 sps:$4 sm:$0xff]   ;;  %v12186_v5 = vld [vmem:[#allocation3 + $0x5a8] ss:$144 sps:$4 sm:$0xff]  }
 0x4fd   :  { %8209 = vmatprep.subr.bf16.mxu1 %v12176_v17  ;;  %v12187_v17 = vld [vmem:[#allocation3 + $0x6c4] ss:$144 sps:$4 sm:$0xff]  }
 0x4ff   :  { %8169 = vmatpush1.bf16.msra.mxu0 %v12177_v19  ;;  %v12188_v19 = vld [vmem:[#allocation3 + $0x6cc] ss:$144 sps:$4 sm:$0xff]  }
 0x500   :  { %8210 = vmatpush1.bf16.msra.mxu1 %v12178_v8  ;;  %8170 = vmatprep.subr.bf16.mxu0 %v12179_v21  ;;  %v12189_v8 = vld [vmem:[#allocation3 + $0x6c0] ss:$144 sps:$4 sm:$0xff]   ;;  %v12190_v21 = vld [vmem:[#allocation3 + $0x6c8] ss:$144 sps:$4 sm:$0xff]  }
 0x501   :  { %8211 = vmatprep.subr.bf16.mxu1 %v12180_v30  ;;  %v12191_v30 = vld [vmem:[#allocation3 + $0x7e4] ss:$144 sps:$4 sm:$0xff]  }
 0x503   :  { %8171 = vmatpush1.bf16.msra.mxu0 %v12181_v34  ;;  %v12192_v34 = vld [vmem:[#allocation3 + $0x7ec] ss:$144 sps:$4 sm:$0xff]  }
 0x504   :  { %8212 = vmatpush1.bf16.msra.mxu1 %v12182_v0  ;;  %8172 = vmatprep.subr.bf16.mxu0 %v12183_v43  ;;  %v12193_v0 = vld [vmem:[#allocation3 + $0x7e0] ss:$144 sps:$4 sm:$0xff]   ;;  %v12194_v43 = vld [vmem:[#allocation3 + $0x7e8] ss:$144 sps:$4 sm:$0xff]  }
 0x505   :  { %8213 = vmatprep.subr.bf16.mxu1 %v12184_v13  ;;  %v12195_v13 = vld [vmem:[#allocation3 + $0x904] ss:$144 sps:$4 sm:$0xff]  }
 0x507   :  { %8173 = vmatpush1.bf16.msra.mxu0 %v12185_v16  ;;  %v12196_v16 = vld [vmem:[#allocation3 + $0x90c] ss:$144 sps:$4 sm:$0xff]  }
 0x508   :  { %8214 = vmatpush1.bf16.msra.mxu1 %v12186_v5  ;;  %8174 = vmatprep.subr.bf16.mxu0 %v12187_v17  ;;  %v12197_v5 = vld [vmem:[#allocation3 + $0x900] ss:$144 sps:$4 sm:$0xff]   ;;  %v12198_v17 = vld [vmem:[#allocation3 + $0x908] ss:$144 sps:$4 sm:$0xff]  }
 0x509   :  { %8215 = vmatprep.subr.bf16.mxu1 %v12188_v19  ;;  %v12199_v19 = vld [vmem:[#allocation3 + $0xa24] ss:$144 sps:$4 sm:$0xff]  }
 0x50b   :  { %8175 = vmatpush1.bf16.msra.mxu0 %v12189_v8  ;;  %v12200_v8 = vld [vmem:[#allocation3 + $0xa2c] ss:$144 sps:$4 sm:$0xff]  }
 0x50c   :  { %8216 = vmatpush1.bf16.msra.mxu1 %v12190_v21  ;;  %8176 = vmatprep.subr.bf16.mxu0 %v12191_v30  ;;  %v12201_v21 = vld [vmem:[#allocation3 + $0xa20] ss:$144 sps:$4 sm:$0xff]   ;;  %v12202_v30 = vld [vmem:[#allocation3 + $0xa28] ss:$144 sps:$4 sm:$0xff]  }
 0x50d   :  { %8217 = vmatprep.subr.bf16.mxu1 %v12192_v34  ;;  %v12203_v34 = vld [vmem:[#allocation3 + $0xb44] ss:$144 sps:$4 sm:$0xff]  }
 0x50f   :  { %8177 = vmatpush1.bf16.msra.mxu0 %v12193_v0  ;;  %v12204_v0 = vld [vmem:[#allocation3 + $0xb4c] ss:$144 sps:$4 sm:$0xff]  }
 0x510   :  { %8218 = vmatpush1.bf16.msra.mxu1 %v12194_v43  ;;  %8178 = vmatprep.subr.bf16.mxu0 %v12195_v13  ;;  %v12205_v43 = vld [vmem:[#allocation3 + $0xb40] ss:$144 sps:$4 sm:$0xff]   ;;  %v12206_v13 = vld [vmem:[#allocation3 + $0xb48] ss:$144 sps:$4 sm:$0xff]  }
 0x511   :  { %8219 = vmatprep.subr.bf16.mxu1 %v12196_v16  ;;  %v12207_v16 = vld [vmem:[#allocation3 + $0xc64] ss:$144 sps:$4 sm:$0xff]  }
 0x513   :  { %8179 = vmatpush1.bf16.msra.mxu0 %v12197_v5  ;;  %v12208_v5 = vld [vmem:[#allocation3 + $0xc6c] ss:$144 sps:$4 sm:$0xff]  }
 0x514   :  { %8220 = vmatpush1.bf16.msra.mxu1 %v12198_v17  ;;  %8180 = vmatprep.subr.bf16.mxu0 %v12199_v19  ;;  %v12209_v17 = vld [vmem:[#allocation3 + $0xc60] ss:$144 sps:$4 sm:$0xff]   ;;  %v12210_v19 = vld [vmem:[#allocation3 + $0xc68] ss:$144 sps:$4 sm:$0xff]  }
 0x515   :  { %8221 = vmatprep.subr.bf16.mxu1 %v12200_v8  ;;  %v15077_v8 = vpack.c.bf16 %v15049_v35, %v15049_v35  ;;  %v12216_v35 = vld [vmem:[#allocation3 + $0x13c] ss:$144 sps:$4 sm:$0xff]  }
 0x517   :  { %8181 = vmatpush1.bf16.msra.mxu0 %v12201_v21  ;;  %v12211_v21 = vld [vmem:[#allocation3 + $0x14] ss:$144 sps:$4 sm:$0xff]  }
 0x518   :  { %8222 = vmatpush1.bf16.msra.mxu1 %v12202_v30  ;;  %8182 = vmatprep.subr.bf16.mxu0 %v12203_v34  ;;  %v12212_v30 = vld [vmem:[#allocation3 + $0x1c] ss:$144 sps:$4 sm:$0xff]   ;;  %v12214_v34 = vld [vmem:[#allocation3 + $0x18] ss:$144 sps:$4 sm:$0xff]  }
 0x519   :  { %8223 = vmatprep.subr.bf16.mxu1 %v12204_v0  ;;  %v12219_v0 = vld [vmem:[#allocation3 + $0x254] ss:$144 sps:$4 sm:$0xff]  }
 0x51b   :  { %8183 = vmatpush1.bf16.msra.mxu0 %v12205_v43  ;;  %v12220_v43 = vld [vmem:[#allocation3 + $0x25c] ss:$144 sps:$4 sm:$0xff]  }
 0x51c   :  { %8224 = vmatpush1.bf16.msra.mxu1 %v12206_v13  ;;  %8184 = vmatprep.subr.bf16.mxu0 %v12207_v16  ;;  %v12221_v13 = vld [vmem:[#allocation3 + $0x250] ss:$144 sps:$4 sm:$0xff]   ;;  %v12222_v16 = vld [vmem:[#allocation3 + $0x258] ss:$144 sps:$4 sm:$0xff]  }
 0x51d   :  { %8225 = vmatprep.subr.bf16.mxu1 %v12208_v5  ;;  %v12223_v5 = vld [vmem:[#allocation3 + $0x374] ss:$144 sps:$4 sm:$0xff]  }
 0x51f   :  { %8185 = vmatpush1.bf16.msra.mxu0 %v12209_v17  ;;  %v12224_v17 = vld [vmem:[#allocation3 + $0x37c] ss:$144 sps:$4 sm:$0xff]  }
 0x520   :  { %8226 = vmatpush1.bf16.msra.mxu1 %v12210_v19  ;;  %11188 = vmatprep.subr.msk.bf16.mxu0 %vm3476_vm1, %v12891_v54  ;;  %v12213_v54 = vld [vmem:[#allocation3 + $0x10] ss:$144 sps:$4 sm:$0xff]  }
 0x521   :  { %11190 = vmatprep.subr.msk.bf16.mxu1 %vm3476_vm1, %v12893_v55  ;;  %v12215_v55 = vld [vmem:[#allocation3 + $0x134] ss:$144 sps:$4 sm:$0xff]   ;;  %v12225_v19 = vld [vmem:[#allocation3 + $0x370] ss:$144 sps:$4 sm:$0xff]  }
 0x523   :  { %8187 = vmatpush1.bf16.msra.mxu0 %v12900_v59  ;;  %v12217_v59 = vld [vmem:[#allocation3 + $0x130] ss:$144 sps:$4 sm:$0xff]  }
 0x524   :  { %8228 = vmatpush1.bf16.msra.mxu1 %v12903_v60  ;;  %8244 = vmatprep.subr.bf16.mxu0 %v12211_v21  ;;  %v12218_v60 = vld [vmem:[#allocation3 + $0x138] ss:$144 sps:$4 sm:$0xff]  }
 0x525   :  { %8285 = vmatprep.subr.bf16.mxu1 %v12212_v30  ;;  %v12226_v21 = vld [vmem:[#allocation3 + $0x378] ss:$144 sps:$4 sm:$0xff]   ;;  %v12227_v30 = vld [vmem:[#allocation3 + $0x494] ss:$144 sps:$4 sm:$0xff]  }
 0x526   :  { %8195 = vmatmul.mubr.bf16.vlgmr.msra.gmra.mrb[44].mxu0 %v15077_v8 }
 0x527   :  { %8236 = vmatmul.mubr.bf16.vlgmr.msra.gmra.mrb[44].mxu1 %v15077_v8  ;;  %8245 = vmatpush1.bf16.msra.mxu0 %v12213_v54  ;;  %v12228_v54 = vld [vmem:[#allocation3 + $0x49c] ss:$144 sps:$4 sm:$0xff]  }
 0x528   :  { %8286 = vmatpush1.bf16.msra.mxu1 %v12214_v34  ;;  %8246 = vmatprep.subr.bf16.mxu0 %v12215_v55  ;;  %v12229_v34 = vld [vmem:[#allocation3 + $0x490] ss:$144 sps:$4 sm:$0xff]   ;;  %v12230_v55 = vld [vmem:[#allocation3 + $0x498] ss:$144 sps:$4 sm:$0xff]  }
 0x529   :  { %8287 = vmatprep.subr.bf16.mxu1 %v12216_v35  ;;  %11193 = vmatprep.mubr.msk.bf16.mxu0 %vm3472_vm0, %v15063_v50  ;;  %v12231_v35 = vld [vmem:[#allocation3 + $0x5b4] ss:$144 sps:$4 sm:$0xff]  }
 0x52a   :  { %11195 = vmatprep.mubr.msk.bf16.mxu1 %vm3472_vm0, %v15063_v50 }
 0x52b   :  { %8247 = vmatpush1.bf16.msra.mxu0 %v12217_v59  ;;  %v12232_v59 = vld [vmem:[#allocation3 + $0x5bc] ss:$144 sps:$4 sm:$0xff]  }
 0x52c   :  { %8288 = vmatpush1.bf16.msra.mxu1 %v12218_v60  ;;  %8248 = vmatprep.subr.bf16.mxu0 %v12219_v0  ;;  %v12233_v60 = vld [vmem:[#allocation3 + $0x5b0] ss:$144 sps:$4 sm:$0xff]   ;;  %v12234_v0 = vld [vmem:[#allocation3 + $0x5b8] ss:$144 sps:$4 sm:$0xff]  }
 0x52d   :  { %8289 = vmatprep.subr.bf16.mxu1 %v12220_v43  ;;  %v12235_v43 = vld [vmem:[#allocation3 + $0x6d4] ss:$144 sps:$4 sm:$0xff]  }
 0x52f   :  { %8249 = vmatpush1.bf16.msra.mxu0 %v12221_v13  ;;  %v12236_v13 = vld [vmem:[#allocation3 + $0x6dc] ss:$144 sps:$4 sm:$0xff]  }
 0x530   :  { %8290 = vmatpush1.bf16.msra.mxu1 %v12222_v16  ;;  %8250 = vmatprep.subr.bf16.mxu0 %v12223_v5  ;;  %v12237_v16 = vld [vmem:[#allocation3 + $0x6d0] ss:$144 sps:$4 sm:$0xff]   ;;  %v12238_v5 = vld [vmem:[#allocation3 + $0x6d8] ss:$144 sps:$4 sm:$0xff]  }
 0x531   :  { %8291 = vmatprep.subr.bf16.mxu1 %v12224_v17  ;;  %v12239_v17 = vld [vmem:[#allocation3 + $0x7f4] ss:$144 sps:$4 sm:$0xff]  }
 0x533   :  { %8251 = vmatpush1.bf16.msra.mxu0 %v12225_v19  ;;  %v12240_v19 = vld [vmem:[#allocation3 + $0x7fc] ss:$144 sps:$4 sm:$0xff]  }
 0x534   :  { %8292 = vmatpush1.bf16.msra.mxu1 %v12226_v21  ;;  %8252 = vmatprep.subr.bf16.mxu0 %v12227_v30  ;;  %v12241_v21 = vld [vmem:[#allocation3 + $0x7f0] ss:$144 sps:$4 sm:$0xff]   ;;  %v12242_v30 = vld [vmem:[#allocation3 + $0x7f8] ss:$144 sps:$4 sm:$0xff]  }
 0x535   :  { %8293 = vmatprep.subr.bf16.mxu1 %v12228_v54  ;;  %v12243_v54 = vld [vmem:[#allocation3 + $0x914] ss:$144 sps:$4 sm:$0xff]  }
 0x537   :  { %8253 = vmatpush1.bf16.msra.mxu0 %v12229_v34  ;;  %v12244_v34 = vld [vmem:[#allocation3 + $0x91c] ss:$144 sps:$4 sm:$0xff]  }
 0x538   :  { %8294 = vmatpush1.bf16.msra.mxu1 %v12230_v55  ;;  %8254 = vmatprep.subr.bf16.mxu0 %v12231_v35  ;;  %v12245_v55 = vld [vmem:[#allocation3 + $0x910] ss:$144 sps:$4 sm:$0xff]   ;;  %v12246_v35 = vld [vmem:[#allocation3 + $0x918] ss:$144 sps:$4 sm:$0xff]  }
 0x539   :  { %8295 = vmatprep.subr.bf16.mxu1 %v12232_v59  ;;  %v12247_v59 = vld [vmem:[#allocation3 + $0xa34] ss:$144 sps:$4 sm:$0xff]  }
 0x53b   :  { %8255 = vmatpush1.bf16.msra.mxu0 %v12233_v60  ;;  %v12248_v60 = vld [vmem:[#allocation3 + $0xa3c] ss:$144 sps:$4 sm:$0xff]  }
 0x53c   :  { %8296 = vmatpush1.bf16.msra.mxu1 %v12234_v0  ;;  %8256 = vmatprep.subr.bf16.mxu0 %v12235_v43  ;;  %v12249_v0 = vld [vmem:[#allocation3 + $0xa30] ss:$144 sps:$4 sm:$0xff]   ;;  %v12250_v43 = vld [vmem:[#allocation3 + $0xa38] ss:$144 sps:$4 sm:$0xff]  }
 0x53d   :  { %8297 = vmatprep.subr.bf16.mxu1 %v12236_v13  ;;  %v12251_v13 = vld [vmem:[#allocation3 + $0xb54] ss:$144 sps:$4 sm:$0xff]  }
 0x53f   :  { %8257 = vmatpush1.bf16.msra.mxu0 %v12237_v16  ;;  %v12252_v16 = vld [vmem:[#allocation3 + $0xb5c] ss:$144 sps:$4 sm:$0xff]  }
 0x540   :  { %8298 = vmatpush1.bf16.msra.mxu1 %v12238_v5  ;;  %8258 = vmatprep.subr.bf16.mxu0 %v12239_v17  ;;  %v12253_v5 = vld [vmem:[#allocation3 + $0xb50] ss:$144 sps:$4 sm:$0xff]   ;;  %v12254_v17 = vld [vmem:[#allocation3 + $0xb58] ss:$144 sps:$4 sm:$0xff]  }
 0x541   :  { %8299 = vmatprep.subr.bf16.mxu1 %v12240_v19  ;;  %v12255_v19 = vld [vmem:[#allocation3 + $0xc74] ss:$144 sps:$4 sm:$0xff]  }
 0x543   :  { %8259 = vmatpush1.bf16.msra.mxu0 %v12241_v21  ;;  %v12256_v21 = vld [vmem:[#allocation3 + $0xc7c] ss:$144 sps:$4 sm:$0xff]  }
 0x544   :  { %8300 = vmatpush1.bf16.msra.mxu1 %v12242_v30  ;;  %8260 = vmatprep.subr.bf16.mxu0 %v12243_v54  ;;  %v12257_v30 = vld [vmem:[#allocation3 + $0xc70] ss:$144 sps:$4 sm:$0xff]   ;;  %v12258_v54 = vld [vmem:[#allocation3 + $0xc78] ss:$144 sps:$4 sm:$0xff]  }
 0x545   :  { %8301 = vmatprep.subr.bf16.mxu1 %v12244_v34  ;;  %v12259_v34 = vld [vmem:[#allocation3 + $0x24] ss:$144 sps:$4 sm:$0xff]  }
 0x547   :  { %8261 = vmatpush1.bf16.msra.mxu0 %v12245_v55  ;;  %v12260_v55 = vld [vmem:[#allocation3 + $0x2c] ss:$144 sps:$4 sm:$0xff]  }
 0x548   :  { %8302 = vmatpush1.bf16.msra.mxu1 %v12246_v35  ;;  %8262 = vmatprep.subr.bf16.mxu0 %v12247_v59  ;;  %v12261_v35 = vld [vmem:[#allocation3 + $0x20] ss:$144 sps:$4 sm:$0xff]   ;;  %v12262_v59 = vld [vmem:[#allocation3 + $0x28] ss:$144 sps:$4 sm:$0xff]  }
 0x549   :  { %8303 = vmatprep.subr.bf16.mxu1 %v12248_v60  ;;  %v12264_v60 = vld [vmem:[#allocation3 + $0x14c] ss:$144 sps:$4 sm:$0xff]  }
 0x54b   :  { %8263 = vmatpush1.bf16.msra.mxu0 %v12249_v0  ;;  %v12268_v0 = vld [vmem:[#allocation3 + $0x26c] ss:$144 sps:$4 sm:$0xff]  }
 0x54c   :  { %8304 = vmatpush1.bf16.msra.mxu1 %v12250_v43  ;;  %8264 = vmatprep.subr.bf16.mxu0 %v12251_v13  ;;  %v12269_v43 = vld [vmem:[#allocation3 + $0x260] ss:$144 sps:$4 sm:$0xff]   ;;  %v12270_v13 = vld [vmem:[#allocation3 + $0x268] ss:$144 sps:$4 sm:$0xff]  }
 0x54d   :  { %8305 = vmatprep.subr.bf16.mxu1 %v12252_v16  ;;  %v12271_v16 = vld [vmem:[#allocation3 + $0x384] ss:$144 sps:$4 sm:$0xff]  }
 0x54f   :  { %8265 = vmatpush1.bf16.msra.mxu0 %v12253_v5  ;;  %v12272_v5 = vld [vmem:[#allocation3 + $0x38c] ss:$144 sps:$4 sm:$0xff]  }
 0x550   :  { %8306 = vmatpush1.bf16.msra.mxu1 %v12254_v17  ;;  %8266 = vmatprep.subr.bf16.mxu0 %v12255_v19  ;;  %v12273_v17 = vld [vmem:[#allocation3 + $0x380] ss:$144 sps:$4 sm:$0xff]   ;;  %v12274_v19 = vld [vmem:[#allocation3 + $0x388] ss:$144 sps:$4 sm:$0xff]  }
 0x551   :  { %8307 = vmatprep.subr.bf16.mxu1 %v12256_v21  ;;  %v12275_v21 = vld [vmem:[#allocation3 + $0x4a4] ss:$144 sps:$4 sm:$0xff]  }
 0x553   :  { %8267 = vmatpush1.bf16.msra.mxu0 %v12257_v30  ;;  %v12276_v30 = vld [vmem:[#allocation3 + $0x4ac] ss:$144 sps:$4 sm:$0xff]  }
 0x554   :  { %8308 = vmatpush1.bf16.msra.mxu1 %v12258_v54  ;;  %11192 = vmatprep.subr.msk.bf16.mxu0 %vm3476_vm1, %v12915_v48  ;;  %v12263_v48 = vld [vmem:[#allocation3 + $0x144] ss:$144 sps:$4 sm:$0xff]   ;;  %v12277_v54 = vld [vmem:[#allocation3 + $0x4a0] ss:$144 sps:$4 sm:$0xff]  }
 0x555   :  { %11194 = vmatprep.subr.msk.bf16.mxu1 %vm3476_vm1, %v12917_v49  ;;  %v12265_v49 = vld [vmem:[#allocation3 + $0x140] ss:$144 sps:$4 sm:$0xff]  }
 0x557   :  { %8269 = vmatpush1.bf16.msra.mxu0 %v12924_v53  ;;  %v12266_v53 = vld [vmem:[#allocation3 + $0x148] ss:$144 sps:$4 sm:$0xff]  }
 0x558   :  { %8310 = vmatpush1.bf16.msra.mxu1 %v12927_v56  ;;  %8326 = vmatprep.subr.bf16.mxu0 %v12259_v34  ;;  %v12267_v56 = vld [vmem:[#allocation3 + $0x264] ss:$144 sps:$4 sm:$0xff]   ;;  %v12278_v34 = vld [vmem:[#allocation3 + $0x4a8] ss:$144 sps:$4 sm:$0xff]  }
 0x559   :  { %8367 = vmatprep.subr.bf16.mxu1 %v12260_v55  ;;  %v12279_v55 = vld [vmem:[#allocation3 + $0x5c4] ss:$144 sps:$4 sm:$0xff]  }
 0x55a   :  { %8277 = vmatmul.mubr.bf16.vlgmr.msra.gmra.mrb[48].mxu0 %v15077_v8 }
 0x55b   :  { %8318 = vmatmul.mubr.bf16.vlgmr.msra.gmra.mrb[48].mxu1 %v15077_v8  ;;  %8327 = vmatpush1.bf16.msra.mxu0 %v12261_v35  ;;  %v12280_v35 = vld [vmem:[#allocation3 + $0x5cc] ss:$144 sps:$4 sm:$0xff]  }
 0x55c   :  { %8368 = vmatpush1.bf16.msra.mxu1 %v12262_v59  ;;  %8328 = vmatprep.subr.bf16.mxu0 %v12263_v48  ;;  %v12281_v59 = vld [vmem:[#allocation3 + $0x5c0] ss:$144 sps:$4 sm:$0xff]   ;;  %v12282_v48 = vld [vmem:[#allocation3 + $0x5c8] ss:$144 sps:$4 sm:$0xff]  }
 0x55d   :  { %8369 = vmatprep.subr.bf16.mxu1 %v12264_v60  ;;  %11197 = vmatprep.mubr.msk.bf16.mxu0 %vm3472_vm0, %v15063_v50  ;;  %v12283_v60 = vld [vmem:[#allocation3 + $0x6e4] ss:$144 sps:$4 sm:$0xff]  }
 0x55e   :  { %11199 = vmatprep.mubr.msk.bf16.mxu1 %vm3472_vm0, %v15063_v50 }
 0x55f   :  { %8329 = vmatpush1.bf16.msra.mxu0 %v12265_v49  ;;  %v12284_v49 = vld [vmem:[#allocation3 + $0x6ec] ss:$144 sps:$4 sm:$0xff]  }
 0x560   :  { %8370 = vmatpush1.bf16.msra.mxu1 %v12266_v53  ;;  %8330 = vmatprep.subr.bf16.mxu0 %v12267_v56  ;;  %v12285_v53 = vld [vmem:[#allocation3 + $0x6e0] ss:$144 sps:$4 sm:$0xff]   ;;  %v12286_v56 = vld [vmem:[#allocation3 + $0x6e8] ss:$144 sps:$4 sm:$0xff]  }
 0x561   :  { %8371 = vmatprep.subr.bf16.mxu1 %v12268_v0  ;;  %v12287_v0 = vld [vmem:[#allocation3 + $0x804] ss:$144 sps:$4 sm:$0xff]  }
 0x563   :  { %8331 = vmatpush1.bf16.msra.mxu0 %v12269_v43  ;;  %v12288_v43 = vld [vmem:[#allocation3 + $0x80c] ss:$144 sps:$4 sm:$0xff]  }
 0x564   :  { %8372 = vmatpush1.bf16.msra.mxu1 %v12270_v13  ;;  %8332 = vmatprep.subr.bf16.mxu0 %v12271_v16  ;;  %v12289_v13 = vld [vmem:[#allocation3 + $0x800] ss:$144 sps:$4 sm:$0xff]   ;;  %v12290_v16 = vld [vmem:[#allocation3 + $0x808] ss:$144 sps:$4 sm:$0xff]  }
 0x565   :  { %8373 = vmatprep.subr.bf16.mxu1 %v12272_v5  ;;  %v12291_v5 = vld [vmem:[#allocation3 + $0x924] ss:$144 sps:$4 sm:$0xff]  }
 0x567   :  { %8333 = vmatpush1.bf16.msra.mxu0 %v12273_v17  ;;  %v12292_v17 = vld [vmem:[#allocation3 + $0x92c] ss:$144 sps:$4 sm:$0xff]  }
 0x568   :  { %8374 = vmatpush1.bf16.msra.mxu1 %v12274_v19  ;;  %8334 = vmatprep.subr.bf16.mxu0 %v12275_v21  ;;  %v12293_v19 = vld [vmem:[#allocation3 + $0x920] ss:$144 sps:$4 sm:$0xff]   ;;  %v12294_v21 = vld [vmem:[#allocation3 + $0x928] ss:$144 sps:$4 sm:$0xff]  }
 0x569   :  { %8375 = vmatprep.subr.bf16.mxu1 %v12276_v30  ;;  %v12295_v30 = vld [vmem:[#allocation3 + $0xa44] ss:$144 sps:$4 sm:$0xff]  }
 0x56b   :  { %8335 = vmatpush1.bf16.msra.mxu0 %v12277_v54  ;;  %v12296_v54 = vld [vmem:[#allocation3 + $0xa4c] ss:$144 sps:$4 sm:$0xff]  }
 0x56c   :  { %8376 = vmatpush1.bf16.msra.mxu1 %v12278_v34  ;;  %8336 = vmatprep.subr.bf16.mxu0 %v12279_v55  ;;  %v12297_v34 = vld [vmem:[#allocation3 + $0xa40] ss:$144 sps:$4 sm:$0xff]   ;;  %v12298_v55 = vld [vmem:[#allocation3 + $0xa48] ss:$144 sps:$4 sm:$0xff]  }
 0x56d   :  { %8377 = vmatprep.subr.bf16.mxu1 %v12280_v35  ;;  %v12299_v35 = vld [vmem:[#allocation3 + $0xb64] ss:$144 sps:$4 sm:$0xff]  }
 0x56f   :  { %8337 = vmatpush1.bf16.msra.mxu0 %v12281_v59  ;;  %v12300_v59 = vld [vmem:[#allocation3 + $0xb6c] ss:$144 sps:$4 sm:$0xff]  }
 0x570   :  { %8378 = vmatpush1.bf16.msra.mxu1 %v12282_v48  ;;  %8338 = vmatprep.subr.bf16.mxu0 %v12283_v60  ;;  %v12301_v48 = vld [vmem:[#allocation3 + $0xb60] ss:$144 sps:$4 sm:$0xff]   ;;  %v12302_v60 = vld [vmem:[#allocation3 + $0xb68] ss:$144 sps:$4 sm:$0xff]  }
 0x571   :  { %8379 = vmatprep.subr.bf16.mxu1 %v12284_v49  ;;  %v12303_v49 = vld [vmem:[#allocation3 + $0xc84] ss:$144 sps:$4 sm:$0xff]  }
 0x573   :  { %8339 = vmatpush1.bf16.msra.mxu0 %v12285_v53  ;;  %v12304_v53 = vld [vmem:[#allocation3 + $0xc8c] ss:$144 sps:$4 sm:$0xff]  }
 0x574   :  { %8380 = vmatpush1.bf16.msra.mxu1 %v12286_v56  ;;  %8340 = vmatprep.subr.bf16.mxu0 %v12287_v0  ;;  %v12305_v56 = vld [vmem:[#allocation3 + $0xc80] ss:$144 sps:$4 sm:$0xff]   ;;  %v12306_v0 = vld [vmem:[#allocation3 + $0xc88] ss:$144 sps:$4 sm:$0xff]  }
 0x575   :  { %8381 = vmatprep.subr.bf16.mxu1 %v12288_v43  ;;  %v12307_v43 = vld [vmem:[#allocation3 + $0x34] ss:$144 sps:$4 sm:$0xff]  }
 0x577   :  { %8341 = vmatpush1.bf16.msra.mxu0 %v12289_v13  ;;  %v12308_v13 = vld [vmem:[#allocation3 + $0x3c] ss:$144 sps:$4 sm:$0xff]  }
 0x578   :  { %8382 = vmatpush1.bf16.msra.mxu1 %v12290_v16  ;;  %8342 = vmatprep.subr.bf16.mxu0 %v12291_v5  ;;  %v12309_v16 = vld [vmem:[#allocation3 + $0x30] ss:$144 sps:$4 sm:$0xff]   ;;  %v12310_v5 = vld [vmem:[#allocation3 + $0x38] ss:$144 sps:$4 sm:$0xff]  }
 0x579   :  { %8383 = vmatprep.subr.bf16.mxu1 %v12292_v17  ;;  %v12312_v17 = vld [vmem:[#allocation3 + $0x15c] ss:$144 sps:$4 sm:$0xff]  }
 0x57b   :  { %8343 = vmatpush1.bf16.msra.mxu0 %v12293_v19  ;;  %v12316_v19 = vld [vmem:[#allocation3 + $0x27c] ss:$144 sps:$4 sm:$0xff]  }
 0x57c   :  { %8384 = vmatpush1.bf16.msra.mxu1 %v12294_v21  ;;  %8344 = vmatprep.subr.bf16.mxu0 %v12295_v30  ;;  %v12317_v21 = vld [vmem:[#allocation3 + $0x270] ss:$144 sps:$4 sm:$0xff]   ;;  %v12318_v30 = vld [vmem:[#allocation3 + $0x278] ss:$144 sps:$4 sm:$0xff]  }
 0x57d   :  { %8385 = vmatprep.subr.bf16.mxu1 %v12296_v54  ;;  %v12319_v54 = vld [vmem:[#allocation3 + $0x394] ss:$144 sps:$4 sm:$0xff]  }
 0x57f   :  { %8345 = vmatpush1.bf16.msra.mxu0 %v12297_v34  ;;  %v12320_v34 = vld [vmem:[#allocation3 + $0x39c] ss:$144 sps:$4 sm:$0xff]  }
 0x580   :  { %8386 = vmatpush1.bf16.msra.mxu1 %v12298_v55  ;;  %8346 = vmatprep.subr.bf16.mxu0 %v12299_v35  ;;  %v12321_v55 = vld [vmem:[#allocation3 + $0x390] ss:$144 sps:$4 sm:$0xff]   ;;  %v12322_v35 = vld [vmem:[#allocation3 + $0x398] ss:$144 sps:$4 sm:$0xff]  }
 0x581   :  { %8387 = vmatprep.subr.bf16.mxu1 %v12300_v59  ;;  %v12323_v59 = vld [vmem:[#allocation3 + $0x4b4] ss:$144 sps:$4 sm:$0xff]  }
 0x583   :  { %8347 = vmatpush1.bf16.msra.mxu0 %v12301_v48  ;;  %v12324_v48 = vld [vmem:[#allocation3 + $0x4bc] ss:$144 sps:$4 sm:$0xff]  }
 0x584   :  { %8388 = vmatpush1.bf16.msra.mxu1 %v12302_v60  ;;  %8348 = vmatprep.subr.bf16.mxu0 %v12303_v49  ;;  %v12325_v60 = vld [vmem:[#allocation3 + $0x4b0] ss:$144 sps:$4 sm:$0xff]   ;;  %v12326_v49 = vld [vmem:[#allocation3 + $0x4b8] ss:$144 sps:$4 sm:$0xff]  }
 0x585   :  { %8389 = vmatprep.subr.bf16.mxu1 %v12304_v53  ;;  %v12327_v53 = vld [vmem:[#allocation3 + $0x5d4] ss:$144 sps:$4 sm:$0xff]  }
 0x587   :  { %8349 = vmatpush1.bf16.msra.mxu0 %v12305_v56  ;;  %v12328_v56 = vld [vmem:[#allocation3 + $0x5dc] ss:$144 sps:$4 sm:$0xff]  }
 0x588   :  { %8390 = vmatpush1.bf16.msra.mxu1 %v12306_v0  ;;  %11196 = vmatprep.subr.msk.bf16.mxu0 %vm3476_vm1, %v12937_v46  ;;  %v12311_v46 = vld [vmem:[#allocation3 + $0x154] ss:$144 sps:$4 sm:$0xff]   ;;  %v12329_v0 = vld [vmem:[#allocation3 + $0x5d0] ss:$144 sps:$4 sm:$0xff]  }
 0x589   :  { %11198 = vmatprep.subr.msk.bf16.mxu1 %vm3476_vm1, %v12939_v47  ;;  %v12313_v47 = vld [vmem:[#allocation3 + $0x150] ss:$144 sps:$4 sm:$0xff]  }
 0x58b   :  { %8351 = vmatpush1.bf16.msra.mxu0 %v12946_v57  ;;  %v12314_v57 = vld [vmem:[#allocation3 + $0x158] ss:$144 sps:$4 sm:$0xff]  }
 0x58c   :  { %8392 = vmatpush1.bf16.msra.mxu1 %v12949_v58  ;;  %8408 = vmatprep.subr.bf16.mxu0 %v12307_v43  ;;  %v12315_v58 = vld [vmem:[#allocation3 + $0x274] ss:$144 sps:$4 sm:$0xff]   ;;  %v12330_v43 = vld [vmem:[#allocation3 + $0x5d8] ss:$144 sps:$4 sm:$0xff]  }
 0x58d   :  { %8449 = vmatprep.subr.bf16.mxu1 %v12308_v13  ;;  %v12331_v13 = vld [vmem:[#allocation3 + $0x6f4] ss:$144 sps:$4 sm:$0xff]  }
 0x58e   :  { %8359 = vmatmul.mubr.bf16.vlgmr.msra.gmra.mrb[52].mxu0 %v15077_v8 }
 0x58f   :  { %8400 = vmatmul.mubr.bf16.vlgmr.msra.gmra.mrb[52].mxu1 %v15077_v8  ;;  %8409 = vmatpush1.bf16.msra.mxu0 %v12309_v16  ;;  %v12332_v16 = vld [vmem:[#allocation3 + $0x6fc] ss:$144 sps:$4 sm:$0xff]  }
 0x590   :  { %8450 = vmatpush1.bf16.msra.mxu1 %v12310_v5  ;;  %8410 = vmatprep.subr.bf16.mxu0 %v12311_v46  ;;  %v12333_v5 = vld [vmem:[#allocation3 + $0x6f0] ss:$144 sps:$4 sm:$0xff]   ;;  %v12334_v46 = vld [vmem:[#allocation3 + $0x6f8] ss:$144 sps:$4 sm:$0xff]  }
 0x591   :  { %8451 = vmatprep.subr.bf16.mxu1 %v12312_v17  ;;  %11201 = vmatprep.mubr.msk.bf16.mxu0 %vm3472_vm0, %v15063_v50  ;;  %v12335_v17 = vld [vmem:[#allocation3 + $0x814] ss:$144 sps:$4 sm:$0xff]  }
 0x592   :  { %11203 = vmatprep.mubr.msk.bf16.mxu1 %vm3472_vm0, %v15063_v50 }
 0x593   :  { %8411 = vmatpush1.bf16.msra.mxu0 %v12313_v47  ;;  %v12336_v47 = vld [vmem:[#allocation3 + $0x81c] ss:$144 sps:$4 sm:$0xff]  }
 0x594   :  { %8452 = vmatpush1.bf16.msra.mxu1 %v12314_v57  ;;  %8412 = vmatprep.subr.bf16.mxu0 %v12315_v58  ;;  %v12337_v57 = vld [vmem:[#allocation3 + $0x810] ss:$144 sps:$4 sm:$0xff]   ;;  %v12338_v58 = vld [vmem:[#allocation3 + $0x818] ss:$144 sps:$4 sm:$0xff]  }
 0x595   :  { %8453 = vmatprep.subr.bf16.mxu1 %v12316_v19  ;;  %v12339_v19 = vld [vmem:[#allocation3 + $0x934] ss:$144 sps:$4 sm:$0xff]  }
 0x597   :  { %8413 = vmatpush1.bf16.msra.mxu0 %v12317_v21  ;;  %v12340_v21 = vld [vmem:[#allocation3 + $0x93c] ss:$144 sps:$4 sm:$0xff]  }
 0x598   :  { %8454 = vmatpush1.bf16.msra.mxu1 %v12318_v30  ;;  %8414 = vmatprep.subr.bf16.mxu0 %v12319_v54  ;;  %v12341_v30 = vld [vmem:[#allocation3 + $0x930] ss:$144 sps:$4 sm:$0xff]   ;;  %v12342_v54 = vld [vmem:[#allocation3 + $0x938] ss:$144 sps:$4 sm:$0xff]  }
 0x599   :  { %8455 = vmatprep.subr.bf16.mxu1 %v12320_v34  ;;  %v12343_v34 = vld [vmem:[#allocation3 + $0xa54] ss:$144 sps:$4 sm:$0xff]  }
 0x59b   :  { %8415 = vmatpush1.bf16.msra.mxu0 %v12321_v55  ;;  %v12344_v55 = vld [vmem:[#allocation3 + $0xa5c] ss:$144 sps:$4 sm:$0xff]  }
 0x59c   :  { %8456 = vmatpush1.bf16.msra.mxu1 %v12322_v35  ;;  %8416 = vmatprep.subr.bf16.mxu0 %v12323_v59  ;;  %v12345_v35 = vld [vmem:[#allocation3 + $0xa50] ss:$144 sps:$4 sm:$0xff]   ;;  %v12346_v59 = vld [vmem:[#allocation3 + $0xa58] ss:$144 sps:$4 sm:$0xff]  }
 0x59d   :  { %8457 = vmatprep.subr.bf16.mxu1 %v12324_v48  ;;  %v12347_v48 = vld [vmem:[#allocation3 + $0xb74] ss:$144 sps:$4 sm:$0xff]  }
 0x59f   :  { %8417 = vmatpush1.bf16.msra.mxu0 %v12325_v60  ;;  %v12348_v60 = vld [vmem:[#allocation3 + $0xb7c] ss:$144 sps:$4 sm:$0xff]  }
 0x5a0   :  { %8458 = vmatpush1.bf16.msra.mxu1 %v12326_v49  ;;  %8418 = vmatprep.subr.bf16.mxu0 %v12327_v53  ;;  %v12349_v49 = vld [vmem:[#allocation3 + $0xb70] ss:$144 sps:$4 sm:$0xff]   ;;  %v12350_v53 = vld [vmem:[#allocation3 + $0xb78] ss:$144 sps:$4 sm:$0xff]  }
 0x5a1   :  { %8459 = vmatprep.subr.bf16.mxu1 %v12328_v56  ;;  %v12351_v56 = vld [vmem:[#allocation3 + $0xc94] ss:$144 sps:$4 sm:$0xff]  }
 0x5a3   :  { %8419 = vmatpush1.bf16.msra.mxu0 %v12329_v0  ;;  %v12352_v0 = vld [vmem:[#allocation3 + $0xc9c] ss:$144 sps:$4 sm:$0xff]  }
 0x5a4   :  { %8460 = vmatpush1.bf16.msra.mxu1 %v12330_v43  ;;  %8420 = vmatprep.subr.bf16.mxu0 %v12331_v13  ;;  %v12353_v43 = vld [vmem:[#allocation3 + $0xc90] ss:$144 sps:$4 sm:$0xff]   ;;  %v12354_v13 = vld [vmem:[#allocation3 + $0xc98] ss:$144 sps:$4 sm:$0xff]  }
 0x5a5   :  { %8461 = vmatprep.subr.bf16.mxu1 %v12332_v16  ;;  %v12355_v16 = vld [vmem:[#allocation3 + $0x44] ss:$144 sps:$4 sm:$0xff]  }
 0x5a7   :  { %8421 = vmatpush1.bf16.msra.mxu0 %v12333_v5  ;;  %v12356_v5 = vld [vmem:[#allocation3 + $0x4c] ss:$144 sps:$4 sm:$0xff]  }
 0x5a8   :  { %8462 = vmatpush1.bf16.msra.mxu1 %v12334_v46  ;;  %8422 = vmatprep.subr.bf16.mxu0 %v12335_v17  ;;  %v12357_v46 = vld [vmem:[#allocation3 + $0x40] ss:$144 sps:$4 sm:$0xff]   ;;  %v12358_v17 = vld [vmem:[#allocation3 + $0x48] ss:$144 sps:$4 sm:$0xff]  }
 0x5a9   :  { %8463 = vmatprep.subr.bf16.mxu1 %v12336_v47 }
 0x5ab   :  { %8423 = vmatpush1.bf16.msra.mxu0 %v12337_v57 }
 0x5ac   :  { %8464 = vmatpush1.bf16.msra.mxu1 %v12338_v58  ;;  %8424 = vmatprep.subr.bf16.mxu0 %v12339_v19 }
 0x5ad   :  { %8465 = vmatprep.subr.bf16.mxu1 %v12340_v21  ;;  %v12361_v21 = vld [vmem:[#allocation3 + $0x160] ss:$144 sps:$4 sm:$0xff]  }
 0x5af   :  { %8425 = vmatpush1.bf16.msra.mxu0 %v12341_v30 }
 0x5b0   :  { %8466 = vmatpush1.bf16.msra.mxu1 %v12342_v54  ;;  %8426 = vmatprep.subr.bf16.mxu0 %v12343_v34  ;;  %v12362_v34 = vld [vmem:[#allocation3 + $0x168] ss:$144 sps:$4 sm:$0xff]  }
 0x5b1   :  { %8467 = vmatprep.subr.bf16.mxu1 %v12344_v55 }
 0x5b3   :  { %8427 = vmatpush1.bf16.msra.mxu0 %v12345_v35  ;;  %v12363_v35 = vld [vmem:[#allocation3 + $0x284] ss:$144 sps:$4 sm:$0xff]  }
 0x5b4   :  { %8468 = vmatpush1.bf16.msra.mxu1 %v12346_v59  ;;  %8428 = vmatprep.subr.bf16.mxu0 %v12347_v48  ;;  %v17271_v59 = vmax.f32 %v14823_v63, %v14828_v31  ;;  %v12370_v31 = vld [vmem:[#allocation3 + $0x3a8] ss:$144 sps:$4 sm:$0xff]   ;;  %v12371_v63 = vld [vmem:[#allocation3 + $0x4c4] ss:$144 sps:$4 sm:$0xff]  }
 0x5b5   :  { %8469 = vmatprep.subr.bf16.mxu1 %v12348_v60 }
 0x5b7   :  { %8429 = vmatpush1.bf16.msra.mxu0 %v12349_v49  ;;  %v12364_v49 = vld [vmem:[#allocation3 + $0x28c] ss:$144 sps:$4 sm:$0xff]  }
 0x5b8   :  { %8470 = vmatpush1.bf16.msra.mxu1 %v12350_v53  ;;  %8430 = vmatprep.subr.bf16.mxu0 %v12351_v56  ;;  %v17273_v53 = vmax.f32 %v14830_v28, %v14834_v29  ;;  %v12374_v28 = vld [vmem:[#allocation3 + $0x4c8] ss:$144 sps:$4 sm:$0xff]   ;;  %v12375_v29 = vld [vmem:[#allocation3 + $0x5e4] ss:$144 sps:$4 sm:$0xff]  }
 0x5b9   :  { %8471 = vmatprep.subr.bf16.mxu1 %v12352_v0  ;;  %v12365_v0 = vld [vmem:[#allocation3 + $0x280] ss:$144 sps:$4 sm:$0xff]  }
 0x5bb   :  { %8431 = vmatpush1.bf16.msra.mxu0 %v12353_v43  ;;  %v12366_v43 = vld [vmem:[#allocation3 + $0x288] ss:$144 sps:$4 sm:$0xff]  }
 0x5bc   :  { %8472 = vmatpush1.bf16.msra.mxu1 %v12354_v13  ;;  %11200 = vmatprep.subr.msk.bf16.mxu0 %vm3476_vm1, %v12959_v52  ;;  %v12359_v52 = vld [vmem:[#allocation3 + $0x164] ss:$144 sps:$4 sm:$0xff]  }
 0x5bd   :  { %11202 = vmatprep.subr.msk.bf16.mxu1 %vm3476_vm1, %v12961_v61  ;;  %v12360_v61 = vld [vmem:[#allocation3 + $0x16c] ss:$144 sps:$4 sm:$0xff]   ;;  %v12367_v13 = vld [vmem:[#allocation3 + $0x3a4] ss:$144 sps:$4 sm:$0xff]  }
 0x5bf   :  { %8433 = vmatpush1.bf16.msra.mxu0 %v12968_v2 }
 0x5c0   :  { %8474 = vmatpush1.bf16.msra.mxu1 %v12971_v3  ;;  %8490 = vmatprep.subr.bf16.mxu0 %v12355_v16  ;;  %v12368_v16 = vld [vmem:[#allocation3 + $0x3ac] ss:$144 sps:$4 sm:$0xff]  }
 0x5c1   :  { %8531 = vmatprep.subr.bf16.mxu1 %v12356_v5  ;;  %v12369_v5 = vld [vmem:[#allocation3 + $0x3a0] ss:$144 sps:$4 sm:$0xff]  }
 0x5c2   :  { %8441 = vmatmul.mubr.bf16.vlgmr.msra.gmra.mrb[56].mxu0 %v15077_v8 }
 0x5c3   :  { %8482 = vmatmul.mubr.bf16.vlgmr.msra.gmra.mrb[56].mxu1 %v15077_v8  ;;  %8491 = vmatpush1.bf16.msra.mxu0 %v12357_v46  ;;  %v12372_v46 = vld [vmem:[#allocation3 + $0x4cc] ss:$144 sps:$4 sm:$0xff]  }
 0x5c4   :  { %8532 = vmatpush1.bf16.msra.mxu1 %v12358_v17  ;;  %8492 = vmatprep.subr.bf16.mxu0 %v12359_v52  ;;  %v12373_v17 = vld [vmem:[#allocation3 + $0x4c0] ss:$144 sps:$4 sm:$0xff]   ;;  %v12376_v52 = vld [vmem:[#allocation3 + $0x5ec] ss:$144 sps:$4 sm:$0xff]  }
 0x5c5   :  { %v7912_v47 = vpop.f32.mrb[40].mxu0  ;;  %8533 = vmatprep.subr.bf16.mxu1 %v12360_v61  ;;  %11205 = vmatprep.mubr.msk.bf16.mxu0 %vm3472_vm0, %v15063_v50  ;;  %v12378_v61 = vld [vmem:[#allocation3 + $0x5e8] ss:$144 sps:$4 sm:$0xff]  }
 0x5c6   :  { %v8117_v2 = vpop.f32.mrb[40].mxu1  ;;  %v7914_v3 = vpop.f32.mrb[41].mxu0  ;;  %11207 = vmatprep.mubr.msk.bf16.mxu1 %vm3472_vm0, %v15063_v50 }
 0x5c7   :  { %v8126_v57 = vmax.f32 %v7912_v47, %v8117_v2  ;;  %v8119_v58 = vpop.f32.mrb[41].mxu1  ;;  %v7916_v19 = vpop.f32.mrb[42].mxu0  ;;  %8493 = vmatpush1.bf16.msra.mxu0 %v12361_v21  ;;  %v12377_v47 = vld [vmem:[#allocation3 + $0x5e0] ss:$144 sps:$4 sm:$0xff]   ;;  %v12379_v2 = vld [vmem:[#allocation3 + $0x704] ss:$144 sps:$4 sm:$0xff]  }
 0x5c8   :  { %v8127_v30 = vmax.f32 %v7914_v3, %v8119_v58  ;;  %v8121_v54 = vpop.f32.mrb[42].mxu1  ;;  %8534 = vmatpush1.bf16.msra.mxu1 %v12362_v34  ;;  %v7917_v55 = vpop.f32.mrb[43].mxu0  ;;  %8494 = vmatprep.subr.bf16.mxu0 %v12363_v35  ;;  %v12380_v3 = vld [vmem:[#allocation3 + $0x70c] ss:$144 sps:$4 sm:$0xff]   ;;  %v12382_v58 = vld [vmem:[#allocation3 + $0x708] ss:$144 sps:$4 sm:$0xff]  }
 0x5c9   :  { %v15126_v48 = vmax.f32 %v17271_v59, %v8126_v57  ;;  %v8122_v60 = vpop.f32.mrb[43].mxu1  ;;  %8535 = vmatprep.subr.bf16.mxu1 %v12364_v49  ;;  %v12381_v57 = vld [vmem:[#allocation3 + $0x700] ss:$144 sps:$4 sm:$0xff]   ;;  %v12383_v19 = vld [vmem:[#allocation3 + $0x824] ss:$144 sps:$4 sm:$0xff]  }
 0x5ca   :  { %v15131_v56 = vmax.f32 %v17273_v53, %v8127_v30  ;;  %v12384_v21 = vld [vmem:[#allocation3 + $0x82c] ss:$144 sps:$4 sm:$0xff]   ;;  %v12385_v30 = vld [vmem:[#allocation3 + $0x820] ss:$144 sps:$4 sm:$0xff]   ;;  %v12386_v54 = vld [vmem:[#allocation3 + $0x828] ss:$144 sps:$4 sm:$0xff]  }
 0x5cb   :  { %17272 = vst [vmem:[#allocation601_spill] sm:$0xff] %v15126_v48  ;;  %8495 = vmatpush1.bf16.msra.mxu0 %v12365_v0  ;;  %v12387_v34 = vld [vmem:[#allocation3 + $0x944] ss:$144 sps:$4 sm:$0xff]   ;;  %v12388_v55 = vld [vmem:[#allocation3 + $0x94c] ss:$144 sps:$4 sm:$0xff]  }
 0x5cc   :  { %17274 = vst [vmem:[#allocation602_spill] sm:$0xff] %v15131_v56  ;;  %8536 = vmatpush1.bf16.msra.mxu1 %v12366_v43  ;;  %8496 = vmatprep.subr.bf16.mxu0 %v12367_v13  ;;  %v12389_v35 = vld [vmem:[#allocation3 + $0x940] ss:$144 sps:$4 sm:$0xff]   ;;  %v12390_v59 = vld [vmem:[#allocation3 + $0x948] ss:$144 sps:$4 sm:$0xff]  }
 0x5cd   :  { %8537 = vmatprep.subr.bf16.mxu1 %v12368_v16  ;;  %v12391_v60 = vld [vmem:[#allocation3 + $0xa64] ss:$144 sps:$4 sm:$0xff]   ;;  %v12392_v49 = vld [vmem:[#allocation3 + $0xa6c] ss:$144 sps:$4 sm:$0xff]   ;;  %v12393_v53 = vld [vmem:[#allocation3 + $0xa60] ss:$144 sps:$4 sm:$0xff]  }
 0x5ce   :  { %v12394_v0 = vld [vmem:[#allocation3 + $0xa68] ss:$144 sps:$4 sm:$0xff]   ;;  %v12395_v43 = vld [vmem:[#allocation3 + $0xb84] ss:$144 sps:$4 sm:$0xff]   ;;  %v12396_v13 = vld [vmem:[#allocation3 + $0xb8c] ss:$144 sps:$4 sm:$0xff]  }
 0x5cf   :  { %8497 = vmatpush1.bf16.msra.mxu0 %v12369_v5  ;;  %v12397_v16 = vld [vmem:[#allocation3 + $0xb80] ss:$144 sps:$4 sm:$0xff]   ;;  %v12398_v5 = vld [vmem:[#allocation3 + $0xb88] ss:$144 sps:$4 sm:$0xff]  }
 0x5d0   :  { %8538 = vmatpush1.bf16.msra.mxu1 %v12370_v31  ;;  %8498 = vmatprep.subr.bf16.mxu0 %v12371_v63  ;;  %v12399_v31 = vld [vmem:[#allocation3 + $0xca4] ss:$144 sps:$4 sm:$0xff]   ;;  %v12400_v63 = vld [vmem:[#allocation3 + $0xcac] ss:$144 sps:$4 sm:$0xff]  }
 0x5d1   :  { %8539 = vmatprep.subr.bf16.mxu1 %v12372_v46  ;;  %v12401_v46 = vld [vmem:[#allocation3 + $0xca0] ss:$144 sps:$4 sm:$0xff]  }
 0x5d2   :  { %v17357_v56 = vld [vmem:[#allocation99_spill] sm:$0xff] }
 0x5d3   :  { %8499 = vmatpush1.bf16.msra.mxu0 %v12373_v17  ;;  %v12402_v17 = vld [vmem:[#allocation3 + $0xca8] ss:$144 sps:$4 sm:$0xff]  }
 0x5d4   :  { %8540 = vmatpush1.bf16.msra.mxu1 %v12374_v28  ;;  %8500 = vmatprep.subr.bf16.mxu0 %v12375_v29  ;;  %v17275_v28 = vld [vmem:[#allocation17_spill] sm:$0xff]  ;;  %v17276_v29 = vld [vmem:[#allocation18_spill] sm:$0xff] }
 0x5d5   :  { %8541 = vmatprep.subr.bf16.mxu1 %v12376_v52  ;;  %v17277_v52 = vld [vmem:[#allocation19_spill] sm:$0xff] }
 0x5d7   :  { %8501 = vmatpush1.bf16.msra.mxu0 %v12377_v47  ;;  %v12403_v47 = vld [vmem:[#allocation3 + $0x54] ss:$144 sps:$4 sm:$0xff]  }
 0x5d8   :  { %8542 = vmatpush1.bf16.msra.mxu1 %v12378_v61  ;;  %8502 = vmatprep.subr.bf16.mxu0 %v12379_v2  ;;  %v12404_v61 = vld [vmem:[#allocation3 + $0x5c] ss:$144 sps:$4 sm:$0xff]   ;;  %v12405_v2 = vld [vmem:[#allocation3 + $0x50] ss:$144 sps:$4 sm:$0xff]  }
 0x5d9   :  { %8543 = vmatprep.subr.bf16.mxu1 %v12380_v3  ;;  %v12406_v3 = vld [vmem:[#allocation3 + $0x58] ss:$144 sps:$4 sm:$0xff]  }
 0x5db   :  { %8503 = vmatpush1.bf16.msra.mxu0 %v12381_v57 }
 0x5dc   :  { %8544 = vmatpush1.bf16.msra.mxu1 %v12382_v58  ;;  %8504 = vmatprep.subr.bf16.mxu0 %v12383_v19  ;;  %v12408_v58 = vld [vmem:[#allocation3 + $0x17c] ss:$144 sps:$4 sm:$0xff]  }
 0x5dd   :  { %8545 = vmatprep.subr.bf16.mxu1 %v12384_v21 }
 0x5df   :  { %8505 = vmatpush1.bf16.msra.mxu0 %v12385_v30 }
 0x5e0   :  { %8546 = vmatpush1.bf16.msra.mxu1 %v12386_v54  ;;  %8506 = vmatprep.subr.bf16.mxu0 %v12387_v34  ;;  %v12409_v54 = vld [vmem:[#allocation3 + $0x170] ss:$144 sps:$4 sm:$0xff]  }
 0x5e1   :  { %8547 = vmatprep.subr.bf16.mxu1 %v12388_v55  ;;  %v12410_v55 = vld [vmem:[#allocation3 + $0x178] ss:$144 sps:$4 sm:$0xff]  }
 0x5e3   :  { %8507 = vmatpush1.bf16.msra.mxu0 %v12389_v35 }
 0x5e4   :  { %8548 = vmatpush1.bf16.msra.mxu1 %v12390_v59  ;;  %8508 = vmatprep.subr.bf16.mxu0 %v12391_v60  ;;  %v12411_v59 = vld [vmem:[#allocation3 + $0x294] ss:$144 sps:$4 sm:$0xff]  }
 0x5e5   :  { %8549 = vmatprep.subr.bf16.mxu1 %v12392_v49  ;;  %v12412_v49 = vld [vmem:[#allocation3 + $0x29c] ss:$144 sps:$4 sm:$0xff]  }
 0x5e7   :  { %8509 = vmatpush1.bf16.msra.mxu0 %v12393_v53 }
 0x5e8   :  { %8550 = vmatpush1.bf16.msra.mxu1 %v12394_v0  ;;  %8510 = vmatprep.subr.bf16.mxu0 %v12395_v43  ;;  %v12413_v0 = vld [vmem:[#allocation3 + $0x290] ss:$144 sps:$4 sm:$0xff]   ;;  %v12414_v43 = vld [vmem:[#allocation3 + $0x298] ss:$144 sps:$4 sm:$0xff]  }
 0x5e9   :  { %8551 = vmatprep.subr.bf16.mxu1 %v12396_v13  ;;  %v12415_v13 = vld [vmem:[#allocation3 + $0x3b4] ss:$144 sps:$4 sm:$0xff]  }
 0x5eb   :  { %8511 = vmatpush1.bf16.msra.mxu0 %v12397_v16  ;;  %v12416_v16 = vld [vmem:[#allocation3 + $0x3bc] ss:$144 sps:$4 sm:$0xff]  }
 0x5ec   :  { %8552 = vmatpush1.bf16.msra.mxu1 %v12398_v5  ;;  %8512 = vmatprep.subr.bf16.mxu0 %v12399_v31  ;;  %v12417_v5 = vld [vmem:[#allocation3 + $0x3b0] ss:$144 sps:$4 sm:$0xff]   ;;  %v12418_v31 = vld [vmem:[#allocation3 + $0x3b8] ss:$144 sps:$4 sm:$0xff]  }
 0x5ed   :  { %8553 = vmatprep.subr.bf16.mxu1 %v12400_v63  ;;  %v12419_v63 = vld [vmem:[#allocation3 + $0x4d4] ss:$144 sps:$4 sm:$0xff]  }
 0x5ef   :  { %8513 = vmatpush1.bf16.msra.mxu0 %v12401_v46  ;;  %v12420_v46 = vld [vmem:[#allocation3 + $0x4dc] ss:$144 sps:$4 sm:$0xff]  }
 0x5f0   :  { %8554 = vmatpush1.bf16.msra.mxu1 %v12402_v17  ;;  %11204 = vmatprep.subr.msk.bf16.mxu0 %vm3476_vm1, %v12981_v7  ;;  %v12407_v7 = vld [vmem:[#allocation3 + $0x174] ss:$144 sps:$4 sm:$0xff]   ;;  %v12421_v17 = vld [vmem:[#allocation3 + $0x4d0] ss:$144 sps:$4 sm:$0xff]  }
 0x5f1   :  { %11206 = vmatprep.subr.msk.bf16.mxu1 %vm3476_vm1, %v17275_v28  ;;  %v12422_v28 = vld [vmem:[#allocation3 + $0x4d8] ss:$144 sps:$4 sm:$0xff]  }
 0x5f3   :  { %8515 = vmatpush1.bf16.msra.mxu0 %v17276_v29  ;;  %v12423_v29 = vld [vmem:[#allocation3 + $0x5f4] ss:$144 sps:$4 sm:$0xff]  }
 0x5f4   :  { %8556 = vmatpush1.bf16.msra.mxu1 %v17277_v52  ;;  %8572 = vmatprep.subr.bf16.mxu0 %v12403_v47  ;;  %v12424_v52 = vld [vmem:[#allocation3 + $0x5fc] ss:$144 sps:$4 sm:$0xff]   ;;  %v12425_v47 = vld [vmem:[#allocation3 + $0x5f0] ss:$144 sps:$4 sm:$0xff]  }
 0x5f5   :  { %8613 = vmatprep.subr.bf16.mxu1 %v12404_v61  ;;  %v12426_v61 = vld [vmem:[#allocation3 + $0x5f8] ss:$144 sps:$4 sm:$0xff]  }
 0x5f6   :  { %8523 = vmatmul.mubr.bf16.vlgmr.msra.gmra.mrb[60].mxu0 %v15077_v8 }
 0x5f7   :  { %8564 = vmatmul.mubr.bf16.vlgmr.msra.gmra.mrb[60].mxu1 %v15077_v8  ;;  %8573 = vmatpush1.bf16.msra.mxu0 %v12405_v2  ;;  %v12427_v2 = vld [vmem:[#allocation3 + $0x714] ss:$144 sps:$4 sm:$0xff]  }
 0x5f8   :  { %8614 = vmatpush1.bf16.msra.mxu1 %v12406_v3  ;;  %8574 = vmatprep.subr.bf16.mxu0 %v12407_v7  ;;  %v12428_v3 = vld [vmem:[#allocation3 + $0x71c] ss:$144 sps:$4 sm:$0xff]   ;;  %v12429_v7 = vld [vmem:[#allocation3 + $0x710] ss:$144 sps:$4 sm:$0xff]  }
 0x5f9   :  { %v15141_v57 = vpop.f32.mrb[44].mxu0  ;;  %8615 = vmatprep.subr.bf16.mxu1 %v12408_v58  ;;  %11209 = vmatprep.mubr.msk.bf16.mxu0 %vm3472_vm0, %v15063_v50  ;;  %v12430_v58 = vld [vmem:[#allocation3 + $0x718] ss:$144 sps:$4 sm:$0xff]  }
 0x5fa   :  { %v15145_v19 = vpop.f32.mrb[45].mxu0  ;;  %11211 = vmatprep.mubr.msk.bf16.mxu1 %vm3472_vm0, %v15063_v50  ;;  %v15149_v21 = vpop.f32.mrb[44].mxu1 }
 0x5fb   :  { %v8200_v30 = vpop.f32.mrb[46].mxu0  ;;  %8575 = vmatpush1.bf16.msra.mxu0 %v12409_v54  ;;  %v15151_v34 = vpop.f32.mrb[45].mxu1  ;;  %v12432_v54 = vld [vmem:[#allocation3 + $0x83c] ss:$144 sps:$4 sm:$0xff]  }
 0x5fc   :  { %8616 = vmatpush1.bf16.msra.mxu1 %v12410_v55  ;;  %v8201_v35 = vpop.f32.mrb[47].mxu0  ;;  %8576 = vmatprep.subr.bf16.mxu0 %v12411_v59  ;;  %v8241_v60 = vpop.f32.mrb[46].mxu1  ;;  %v12431_v30 = vld [vmem:[#allocation3 + $0x834] ss:$144 sps:$4 sm:$0xff]   ;;  %v12433_v55 = vld [vmem:[#allocation3 + $0x830] ss:$144 sps:$4 sm:$0xff]  }
 0x5fd   :  { %8617 = vmatprep.subr.bf16.mxu1 %v12412_v49  ;;  %v8242_v53 = vpop.f32.mrb[47].mxu1  ;;  %v12434_v35 = vld [vmem:[#allocation3 + $0x838] ss:$144 sps:$4 sm:$0xff]   ;;  %v12435_v59 = vld [vmem:[#allocation3 + $0x954] ss:$144 sps:$4 sm:$0xff]  }
 0x5fe   :  { %v12436_v60 = vld [vmem:[#allocation3 + $0x95c] ss:$144 sps:$4 sm:$0xff]   ;;  %v12437_v49 = vld [vmem:[#allocation3 + $0x950] ss:$144 sps:$4 sm:$0xff]   ;;  %v12438_v53 = vld [vmem:[#allocation3 + $0x958] ss:$144 sps:$4 sm:$0xff]  }
 0x5ff   :  { %8577 = vmatpush1.bf16.msra.mxu0 %v12413_v0  ;;  %v12439_v0 = vld [vmem:[#allocation3 + $0xa74] ss:$144 sps:$4 sm:$0xff]  }
 0x600   :  { %8618 = vmatpush1.bf16.msra.mxu1 %v12414_v43  ;;  %8578 = vmatprep.subr.bf16.mxu0 %v12415_v13  ;;  %v12440_v43 = vld [vmem:[#allocation3 + $0xa7c] ss:$144 sps:$4 sm:$0xff]   ;;  %v12441_v13 = vld [vmem:[#allocation3 + $0xa70] ss:$144 sps:$4 sm:$0xff]  }
 0x601   :  { %8619 = vmatprep.subr.bf16.mxu1 %v12416_v16  ;;  %v12442_v16 = vld [vmem:[#allocation3 + $0xa78] ss:$144 sps:$4 sm:$0xff]  }
 0x603   :  { %8579 = vmatpush1.bf16.msra.mxu0 %v12417_v5  ;;  %v12443_v5 = vld [vmem:[#allocation3 + $0xb94] ss:$144 sps:$4 sm:$0xff]  }
 0x604   :  { %8620 = vmatpush1.bf16.msra.mxu1 %v12418_v31  ;;  %8580 = vmatprep.subr.bf16.mxu0 %v12419_v63  ;;  %v12444_v31 = vld [vmem:[#allocation3 + $0xb9c] ss:$144 sps:$4 sm:$0xff]   ;;  %v12445_v63 = vld [vmem:[#allocation3 + $0xb90] ss:$144 sps:$4 sm:$0xff]  }
 0x605   :  { %8621 = vmatprep.subr.bf16.mxu1 %v12420_v46  ;;  %v12446_v46 = vld [vmem:[#allocation3 + $0xb98] ss:$144 sps:$4 sm:$0xff]  }
 0x607   :  { %8581 = vmatpush1.bf16.msra.mxu0 %v12421_v17  ;;  %v12447_v17 = vld [vmem:[#allocation3 + $0xcb4] ss:$144 sps:$4 sm:$0xff]  }
 0x608   :  { %8622 = vmatpush1.bf16.msra.mxu1 %v12422_v28  ;;  %8582 = vmatprep.subr.bf16.mxu0 %v12423_v29  ;;  %v12448_v28 = vld [vmem:[#allocation3 + $0xcbc] ss:$144 sps:$4 sm:$0xff]   ;;  %v12449_v29 = vld [vmem:[#allocation3 + $0xcb0] ss:$144 sps:$4 sm:$0xff]  }
 0x609   :  { %8623 = vmatprep.subr.bf16.mxu1 %v12424_v52  ;;  %v12450_v52 = vld [vmem:[#allocation3 + $0xcb8] ss:$144 sps:$4 sm:$0xff]  }
 0x60b   :  { %8583 = vmatpush1.bf16.msra.mxu0 %v12425_v47  ;;  %v17278_v47 = vld [vmem:[#allocation20_spill] sm:$0xff] }
 0x60c   :  { %8624 = vmatpush1.bf16.msra.mxu1 %v12426_v61  ;;  %8584 = vmatprep.subr.bf16.mxu0 %v12427_v2  ;;  %v17279_v61 = vld [vmem:[#allocation21_spill] sm:$0xff]  ;;  %v17280_v2 = vld [vmem:[#allocation22_spill] sm:$0xff] }
 0x60d   :  { %8625 = vmatprep.subr.bf16.mxu1 %v12428_v3  ;;  %v17281_v3 = vld [vmem:[#allocation23_spill] sm:$0xff] }
 0x60f   :  { %8585 = vmatpush1.bf16.msra.mxu0 %v12429_v7  ;;  %v12451_v7 = vld [vmem:[#allocation3 + $0x64] ss:$144 sps:$4 sm:$0xff]  }
 0x610   :  { %8626 = vmatpush1.bf16.msra.mxu1 %v12430_v58  ;;  %8586 = vmatprep.subr.bf16.mxu0 %v12431_v30  ;;  %v12452_v58 = vld [vmem:[#allocation3 + $0x6c] ss:$144 sps:$4 sm:$0xff]   ;;  %v12453_v30 = vld [vmem:[#allocation3 + $0x60] ss:$144 sps:$4 sm:$0xff]  }
 0x611   :  { %8627 = vmatprep.subr.bf16.mxu1 %v12432_v54  ;;  %v12454_v54 = vld [vmem:[#allocation3 + $0x68] ss:$144 sps:$4 sm:$0xff]  }
 0x613   :  { %8587 = vmatpush1.bf16.msra.mxu0 %v12433_v55  ;;  %v12455_v55 = vld [vmem:[#allocation3 + $0x184] ss:$144 sps:$4 sm:$0xff]  }
 0x614   :  { %8628 = vmatpush1.bf16.msra.mxu1 %v12434_v35  ;;  %8588 = vmatprep.subr.bf16.mxu0 %v12435_v59  ;;  %v12456_v59 = vld [vmem:[#allocation3 + $0x18c] ss:$144 sps:$4 sm:$0xff]  }
 0x615   :  { %8629 = vmatprep.subr.bf16.mxu1 %v12436_v60 }
 0x617   :  { %8589 = vmatpush1.bf16.msra.mxu0 %v12437_v49 }
 0x618   :  { %8630 = vmatpush1.bf16.msra.mxu1 %v12438_v53  ;;  %8590 = vmatprep.subr.bf16.mxu0 %v12439_v0  ;;  %v12457_v0 = vld [vmem:[#allocation3 + $0x180] ss:$144 sps:$4 sm:$0xff]  }
 0x619   :  { %8631 = vmatprep.subr.bf16.mxu1 %v12440_v43 }
 0x61b   :  { %8591 = vmatpush1.bf16.msra.mxu0 %v12441_v13  ;;  %v12458_v13 = vld [vmem:[#allocation3 + $0x188] ss:$144 sps:$4 sm:$0xff]  }
 0x61c   :  { %8632 = vmatpush1.bf16.msra.mxu1 %v12442_v16  ;;  %8592 = vmatprep.subr.bf16.mxu0 %v12443_v5  ;;  %v12459_v5 = vld [vmem:[#allocation3 + $0x2a4] ss:$144 sps:$4 sm:$0xff]  }
 0x61d   :  { %8633 = vmatprep.subr.bf16.mxu1 %v12444_v31 }
 0x61f   :  { %8593 = vmatpush1.bf16.msra.mxu0 %v12445_v63  ;;  %v12460_v63 = vld [vmem:[#allocation3 + $0x2ac] ss:$144 sps:$4 sm:$0xff]  }
 0x620   :  { %8634 = vmatpush1.bf16.msra.mxu1 %v12446_v46  ;;  %8594 = vmatprep.subr.bf16.mxu0 %v12447_v17  ;;  %v12461_v17 = vld [vmem:[#allocation3 + $0x2a0] ss:$144 sps:$4 sm:$0xff]  }
 0x621   :  { %8635 = vmatprep.subr.bf16.mxu1 %v12448_v28  ;;  %v12462_v28 = vld [vmem:[#allocation3 + $0x2a8] ss:$144 sps:$4 sm:$0xff]  }
 0x623   :  { %8595 = vmatpush1.bf16.msra.mxu0 %v12449_v29  ;;  %v12463_v29 = vld [vmem:[#allocation3 + $0x3c4] ss:$144 sps:$4 sm:$0xff]  }
 0x624   :  { %8636 = vmatpush1.bf16.msra.mxu1 %v12450_v52  ;;  %11208 = vmatprep.subr.msk.bf16.mxu0 %vm3476_vm1, %v17278_v47  ;;  %v12464_v52 = vld [vmem:[#allocation3 + $0x3cc] ss:$144 sps:$4 sm:$0xff]   ;;  %v12465_v47 = vld [vmem:[#allocation3 + $0x3c0] ss:$144 sps:$4 sm:$0xff]  }
 0x625   :  { %11210 = vmatprep.subr.msk.bf16.mxu1 %vm3476_vm1, %v17279_v61  ;;  %v12466_v61 = vld [vmem:[#allocation3 + $0x3c8] ss:$144 sps:$4 sm:$0xff]  }
 0x627   :  { %8597 = vmatpush1.bf16.msra.mxu0 %v17280_v2  ;;  %v12467_v2 = vld [vmem:[#allocation3 + $0x4e4] ss:$144 sps:$4 sm:$0xff]  }
 0x628   :  { %8638 = vmatpush1.bf16.msra.mxu1 %v17281_v3  ;;  %8654 = vmatprep.subr.bf16.mxu0 %v12451_v7  ;;  %v12468_v3 = vld [vmem:[#allocation3 + $0x4ec] ss:$144 sps:$4 sm:$0xff]   ;;  %v12469_v7 = vld [vmem:[#allocation3 + $0x4e0] ss:$144 sps:$4 sm:$0xff]  }
 0x629   :  { %8695 = vmatprep.subr.bf16.mxu1 %v12452_v58  ;;  %v12470_v58 = vld [vmem:[#allocation3 + $0x4e8] ss:$144 sps:$4 sm:$0xff]  }
 0x62a   :  { %8605 = vmatmul.mubr.bf16.vlgmr.msra.gmra.mrb[64].mxu0 %v15077_v8 }
 0x62b   :  { %8646 = vmatmul.mubr.bf16.vlgmr.msra.gmra.mrb[64].mxu1 %v15077_v8  ;;  %8655 = vmatpush1.bf16.msra.mxu0 %v12453_v30  ;;  %v12471_v30 = vld [vmem:[#allocation3 + $0x604] ss:$144 sps:$4 sm:$0xff]  }
 0x62c   :  { %8696 = vmatpush1.bf16.msra.mxu1 %v12454_v54  ;;  %8656 = vmatprep.subr.bf16.mxu0 %v12455_v55  ;;  %v12472_v54 = vld [vmem:[#allocation3 + $0x60c] ss:$144 sps:$4 sm:$0xff]   ;;  %v12473_v55 = vld [vmem:[#allocation3 + $0x600] ss:$144 sps:$4 sm:$0xff]  }
 0x62d   :  { %v15161_v35 = vpop.f32.mrb[48].mxu0  ;;  %8697 = vmatprep.subr.bf16.mxu1 %v12456_v59  ;;  %11213 = vmatprep.mubr.msk.bf16.mxu0 %vm3472_vm0, %v15063_v50  ;;  %v12474_v59 = vld [vmem:[#allocation3 + $0x608] ss:$144 sps:$4 sm:$0xff]  }
 0x62e   :  { %v15165_v60 = vpop.f32.mrb[49].mxu0  ;;  %v15167_v49 = vpop.f32.mrb[48].mxu1  ;;  %11215 = vmatprep.mubr.msk.bf16.mxu1 %vm3472_vm0, %v15063_v50 }
 0x62f   :  { %v8282_v53 = vpop.f32.mrb[50].mxu0  ;;  %8657 = vmatpush1.bf16.msra.mxu0 %v12457_v0  ;;  %v15171_v43 = vpop.f32.mrb[49].mxu1  ;;  %v12476_v0 = vld [vmem:[#allocation3 + $0x72c] ss:$144 sps:$4 sm:$0xff]  }
 0x630   :  { %8698 = vmatpush1.bf16.msra.mxu1 %v12458_v13  ;;  %v8283_v16 = vpop.f32.mrb[51].mxu0  ;;  %8658 = vmatprep.subr.bf16.mxu0 %v12459_v5  ;;  %v8323_v31 = vpop.f32.mrb[50].mxu1  ;;  %v12475_v53 = vld [vmem:[#allocation3 + $0x724] ss:$144 sps:$4 sm:$0xff]   ;;  %v12477_v13 = vld [vmem:[#allocation3 + $0x720] ss:$144 sps:$4 sm:$0xff]  }
 0x631   :  { %8699 = vmatprep.subr.bf16.mxu1 %v12460_v63  ;;  %v8324_v46 = vpop.f32.mrb[51].mxu1  ;;  %v12478_v16 = vld [vmem:[#allocation3 + $0x728] ss:$144 sps:$4 sm:$0xff]   ;;  %v12479_v5 = vld [vmem:[#allocation3 + $0x844] ss:$144 sps:$4 sm:$0xff]  }
 0x632   :  { %v12480_v31 = vld [vmem:[#allocation3 + $0x84c] ss:$144 sps:$4 sm:$0xff]   ;;  %v12481_v63 = vld [vmem:[#allocation3 + $0x840] ss:$144 sps:$4 sm:$0xff]   ;;  %v12482_v46 = vld [vmem:[#allocation3 + $0x848] ss:$144 sps:$4 sm:$0xff]  }
 0x633   :  { %8659 = vmatpush1.bf16.msra.mxu0 %v12461_v17  ;;  %v12483_v17 = vld [vmem:[#allocation3 + $0x964] ss:$144 sps:$4 sm:$0xff]  }
 0x634   :  { %8700 = vmatpush1.bf16.msra.mxu1 %v12462_v28  ;;  %8660 = vmatprep.subr.bf16.mxu0 %v12463_v29  ;;  %v12484_v28 = vld [vmem:[#allocation3 + $0x96c] ss:$144 sps:$4 sm:$0xff]   ;;  %v12485_v29 = vld [vmem:[#allocation3 + $0x960] ss:$144 sps:$4 sm:$0xff]  }
 0x635   :  { %8701 = vmatprep.subr.bf16.mxu1 %v12464_v52  ;;  %v12486_v52 = vld [vmem:[#allocation3 + $0x968] ss:$144 sps:$4 sm:$0xff]  }
 0x637   :  { %8661 = vmatpush1.bf16.msra.mxu0 %v12465_v47  ;;  %v12487_v47 = vld [vmem:[#allocation3 + $0xa84] ss:$144 sps:$4 sm:$0xff]  }
 0x638   :  { %8702 = vmatpush1.bf16.msra.mxu1 %v12466_v61  ;;  %8662 = vmatprep.subr.bf16.mxu0 %v12467_v2  ;;  %v12488_v61 = vld [vmem:[#allocation3 + $0xa8c] ss:$144 sps:$4 sm:$0xff]   ;;  %v12489_v2 = vld [vmem:[#allocation3 + $0xa80] ss:$144 sps:$4 sm:$0xff]  }
 0x639   :  { %8703 = vmatprep.subr.bf16.mxu1 %v12468_v3  ;;  %v12490_v3 = vld [vmem:[#allocation3 + $0xa88] ss:$144 sps:$4 sm:$0xff]  }
 0x63b   :  { %8663 = vmatpush1.bf16.msra.mxu0 %v12469_v7  ;;  %v12491_v7 = vld [vmem:[#allocation3 + $0xba4] ss:$144 sps:$4 sm:$0xff]  }
 0x63c   :  { %8704 = vmatpush1.bf16.msra.mxu1 %v12470_v58  ;;  %8664 = vmatprep.subr.bf16.mxu0 %v12471_v30  ;;  %v12492_v58 = vld [vmem:[#allocation3 + $0xbac] ss:$144 sps:$4 sm:$0xff]   ;;  %v12493_v30 = vld [vmem:[#allocation3 + $0xba0] ss:$144 sps:$4 sm:$0xff]  }
 0x63d   :  { %8705 = vmatprep.subr.bf16.mxu1 %v12472_v54  ;;  %v12494_v54 = vld [vmem:[#allocation3 + $0xba8] ss:$144 sps:$4 sm:$0xff]  }
 0x63f   :  { %8665 = vmatpush1.bf16.msra.mxu0 %v12473_v55  ;;  %v12495_v55 = vld [vmem:[#allocation3 + $0xcc4] ss:$144 sps:$4 sm:$0xff]  }
 0x640   :  { %8706 = vmatpush1.bf16.msra.mxu1 %v12474_v59  ;;  %8666 = vmatprep.subr.bf16.mxu0 %v12475_v53  ;;  %v12496_v59 = vld [vmem:[#allocation3 + $0xccc] ss:$144 sps:$4 sm:$0xff]   ;;  %v12497_v53 = vld [vmem:[#allocation3 + $0xcc0] ss:$144 sps:$4 sm:$0xff]  }
 0x641   :  { %8707 = vmatprep.subr.bf16.mxu1 %v12476_v0  ;;  %v12498_v0 = vld [vmem:[#allocation3 + $0xcc8] ss:$144 sps:$4 sm:$0xff]  }
 0x643   :  { %8667 = vmatpush1.bf16.msra.mxu0 %v12477_v13  ;;  %v17282_v13 = vld [vmem:[#allocation24_spill] sm:$0xff] }
 0x644   :  { %8708 = vmatpush1.bf16.msra.mxu1 %v12478_v16  ;;  %8668 = vmatprep.subr.bf16.mxu0 %v12479_v5  ;;  %v17283_v16 = vld [vmem:[#allocation25_spill] sm:$0xff]  ;;  %v17284_v5 = vld [vmem:[#allocation26_spill] sm:$0xff] }
 0x645   :  { %8709 = vmatprep.subr.bf16.mxu1 %v12480_v31  ;;  %v17285_v31 = vld [vmem:[#allocation27_spill] sm:$0xff] }
 0x647   :  { %8669 = vmatpush1.bf16.msra.mxu0 %v12481_v63  ;;  %v12499_v63 = vld [vmem:[#allocation3 + $0x74] ss:$144 sps:$4 sm:$0xff]  }
 0x648   :  { %8710 = vmatpush1.bf16.msra.mxu1 %v12482_v46  ;;  %8670 = vmatprep.subr.bf16.mxu0 %v12483_v17  ;;  %v12500_v46 = vld [vmem:[#allocation3 + $0x7c] ss:$144 sps:$4 sm:$0xff]   ;;  %v12501_v17 = vld [vmem:[#allocation3 + $0x70] ss:$144 sps:$4 sm:$0xff]  }
 0x649   :  { %8711 = vmatprep.subr.bf16.mxu1 %v12484_v28  ;;  %v12502_v28 = vld [vmem:[#allocation3 + $0x78] ss:$144 sps:$4 sm:$0xff]  }
 0x64b   :  { %8671 = vmatpush1.bf16.msra.mxu0 %v12485_v29  ;;  %v12503_v29 = vld [vmem:[#allocation3 + $0x194] ss:$144 sps:$4 sm:$0xff]  }
 0x64c   :  { %8712 = vmatpush1.bf16.msra.mxu1 %v12486_v52  ;;  %8672 = vmatprep.subr.bf16.mxu0 %v12487_v47  ;;  %v12504_v47 = vld [vmem:[#allocation3 + $0x19c] ss:$144 sps:$4 sm:$0xff]  }
 0x64d   :  { %8713 = vmatprep.subr.bf16.mxu1 %v12488_v61 }
 0x64f   :  { %8673 = vmatpush1.bf16.msra.mxu0 %v12489_v2 }
 0x650   :  { %8714 = vmatpush1.bf16.msra.mxu1 %v12490_v3  ;;  %8674 = vmatprep.subr.bf16.mxu0 %v12491_v7  ;;  %v17305_v3 = vld [vmem:[#allocation47_spill] sm:$0xff]  ;;  %v17306_v7 = vld [vmem:[#allocation48_spill] sm:$0xff] }
 0x651   :  { %8715 = vmatprep.subr.bf16.mxu1 %v12492_v58 }
 0x653   :  { %8675 = vmatpush1.bf16.msra.mxu0 %v12493_v30 }
 0x654   :  { %8716 = vmatpush1.bf16.msra.mxu1 %v12494_v54  ;;  %8676 = vmatprep.subr.bf16.mxu0 %v12495_v55  ;;  %v12505_v54 = vld [vmem:[#allocation3 + $0x190] ss:$144 sps:$4 sm:$0xff]   ;;  %v12559_v55 = vld [vmem:[#allocation3 + $0x3e4] ss:$144 sps:$4 sm:$0xff]  }
 0x655   :  { %8717 = vmatprep.subr.bf16.mxu1 %v12496_v59  ;;  %v12506_v59 = vld [vmem:[#allocation3 + $0x198] ss:$144 sps:$4 sm:$0xff]  }
 0x657   :  { %8677 = vmatpush1.bf16.msra.mxu0 %v12497_v53 }
 0x658   :  { %8718 = vmatpush1.bf16.msra.mxu1 %v12498_v0  ;;  %11212 = vmatprep.subr.msk.bf16.mxu0 %vm3476_vm1, %v17282_v13  ;;  %v12507_v0 = vld [vmem:[#allocation3 + $0x2b4] ss:$144 sps:$4 sm:$0xff]  }
 0x659   :  { %11214 = vmatprep.subr.msk.bf16.mxu1 %vm3476_vm1, %v17283_v16  ;;  %v12508_v16 = vld [vmem:[#allocation3 + $0x2bc] ss:$144 sps:$4 sm:$0xff]  }
 0x65b   :  { %8679 = vmatpush1.bf16.msra.mxu0 %v17284_v5 }
 0x65c   :  { %8720 = vmatpush1.bf16.msra.mxu1 %v17285_v31  ;;  %8736 = vmatprep.subr.bf16.mxu0 %v12499_v63  ;;  %v12509_v31 = vld [vmem:[#allocation3 + $0x2b0] ss:$144 sps:$4 sm:$0xff]   ;;  %v12510_v63 = vld [vmem:[#allocation3 + $0x2b8] ss:$144 sps:$4 sm:$0xff]  }
 0x65d   :  { %8777 = vmatprep.subr.bf16.mxu1 %v12500_v46  ;;  %v12511_v46 = vld [vmem:[#allocation3 + $0x3d4] ss:$144 sps:$4 sm:$0xff]  }
 0x65e   :  { %8687 = vmatmul.mubr.bf16.vlgmr.msra.gmra.mrb[68].mxu0 %v15077_v8 }
 0x65f   :  { %8728 = vmatmul.mubr.bf16.vlgmr.msra.gmra.mrb[68].mxu1 %v15077_v8  ;;  %8737 = vmatpush1.bf16.msra.mxu0 %v12501_v17  ;;  %v12512_v17 = vld [vmem:[#allocation3 + $0x3dc] ss:$144 sps:$4 sm:$0xff]  }
 0x660   :  { %8778 = vmatpush1.bf16.msra.mxu1 %v12502_v28  ;;  %8738 = vmatprep.subr.bf16.mxu0 %v12503_v29  ;;  %v12513_v28 = vld [vmem:[#allocation3 + $0x3d0] ss:$144 sps:$4 sm:$0xff]   ;;  %v12514_v29 = vld [vmem:[#allocation3 + $0x3d8] ss:$144 sps:$4 sm:$0xff]  }
 0x661   :  { %v15181_v52 = vpop.f32.mrb[52].mxu0  ;;  %8779 = vmatprep.subr.bf16.mxu1 %v12504_v47  ;;  %11217 = vmatprep.mubr.msk.bf16.mxu0 %vm3472_vm0, %v15063_v50  ;;  %v12515_v47 = vld [vmem:[#allocation3 + $0x4f4] ss:$144 sps:$4 sm:$0xff]  }
 0x662   :  { %v15185_v61 = vpop.f32.mrb[52].mxu1  ;;  %v15187_v2 = vpop.f32.mrb[53].mxu0  ;;  %11219 = vmatprep.mubr.msk.bf16.mxu1 %vm3472_vm0, %v15063_v50 }
 0x663   :  { %v15195_v58 = vpop.f32.mrb[53].mxu1  ;;  %v8364_v30 = vpop.f32.mrb[54].mxu0  ;;  %8739 = vmatpush1.bf16.msra.mxu0 %v12505_v54  ;;  %v12517_v54 = vld [vmem:[#allocation3 + $0x4f0] ss:$144 sps:$4 sm:$0xff]  }
 0x664   :  { %8780 = vmatpush1.bf16.msra.mxu1 %v12506_v59  ;;  %v8365_v53 = vpop.f32.mrb[55].mxu0  ;;  %8740 = vmatprep.subr.bf16.mxu0 %v12507_v0  ;;  %v8405_v13 = vpop.f32.mrb[54].mxu1  ;;  %v12516_v30 = vld [vmem:[#allocation3 + $0x4fc] ss:$144 sps:$4 sm:$0xff]   ;;  %v12518_v59 = vld [vmem:[#allocation3 + $0x4f8] ss:$144 sps:$4 sm:$0xff]  }
 0x665   :  { %8781 = vmatprep.subr.bf16.mxu1 %v12508_v16  ;;  %v8406_v5 = vpop.f32.mrb[55].mxu1  ;;  %v12519_v53 = vld [vmem:[#allocation3 + $0x614] ss:$144 sps:$4 sm:$0xff]   ;;  %v12520_v0 = vld [vmem:[#allocation3 + $0x61c] ss:$144 sps:$4 sm:$0xff]  }
 0x666   :  { %v12521_v13 = vld [vmem:[#allocation3 + $0x610] ss:$144 sps:$4 sm:$0xff]   ;;  %v12522_v16 = vld [vmem:[#allocation3 + $0x618] ss:$144 sps:$4 sm:$0xff]   ;;  %v12523_v5 = vld [vmem:[#allocation3 + $0x734] ss:$144 sps:$4 sm:$0xff]  }
 0x667   :  { %8741 = vmatpush1.bf16.msra.mxu0 %v12509_v31  ;;  %v12524_v31 = vld [vmem:[#allocation3 + $0x73c] ss:$144 sps:$4 sm:$0xff]  }
 0x668   :  { %8782 = vmatpush1.bf16.msra.mxu1 %v12510_v63  ;;  %8742 = vmatprep.subr.bf16.mxu0 %v12511_v46  ;;  %v12525_v63 = vld [vmem:[#allocation3 + $0x730] ss:$144 sps:$4 sm:$0xff]   ;;  %v12526_v46 = vld [vmem:[#allocation3 + $0x738] ss:$144 sps:$4 sm:$0xff]  }
 0x669   :  { %8783 = vmatprep.subr.bf16.mxu1 %v12512_v17  ;;  %v12527_v17 = vld [vmem:[#allocation3 + $0x854] ss:$144 sps:$4 sm:$0xff]  }
 0x66b   :  { %8743 = vmatpush1.bf16.msra.mxu0 %v12513_v28  ;;  %v12528_v28 = vld [vmem:[#allocation3 + $0x85c] ss:$144 sps:$4 sm:$0xff]  }
 0x66c   :  { %8784 = vmatpush1.bf16.msra.mxu1 %v12514_v29  ;;  %8744 = vmatprep.subr.bf16.mxu0 %v12515_v47  ;;  %v12529_v29 = vld [vmem:[#allocation3 + $0x850] ss:$144 sps:$4 sm:$0xff]   ;;  %v12530_v47 = vld [vmem:[#allocation3 + $0x858] ss:$144 sps:$4 sm:$0xff]  }
 0x66d   :  { %8785 = vmatprep.subr.bf16.mxu1 %v12516_v30  ;;  %v12531_v30 = vld [vmem:[#allocation3 + $0x974] ss:$144 sps:$4 sm:$0xff]  }
 0x66f   :  { %8745 = vmatpush1.bf16.msra.mxu0 %v12517_v54  ;;  %v12532_v54 = vld [vmem:[#allocation3 + $0x97c] ss:$144 sps:$4 sm:$0xff]  }
 0x670   :  { %8786 = vmatpush1.bf16.msra.mxu1 %v12518_v59  ;;  %8746 = vmatprep.subr.bf16.mxu0 %v12519_v53  ;;  %v12533_v59 = vld [vmem:[#allocation3 + $0x970] ss:$144 sps:$4 sm:$0xff]   ;;  %v12534_v53 = vld [vmem:[#allocation3 + $0x978] ss:$144 sps:$4 sm:$0xff]  }
 0x671   :  { %8787 = vmatprep.subr.bf16.mxu1 %v12520_v0  ;;  %v12535_v0 = vld [vmem:[#allocation3 + $0xa94] ss:$144 sps:$4 sm:$0xff]  }
 0x673   :  { %8747 = vmatpush1.bf16.msra.mxu0 %v12521_v13  ;;  %v12536_v13 = vld [vmem:[#allocation3 + $0xa9c] ss:$144 sps:$4 sm:$0xff]  }
 0x674   :  { %8788 = vmatpush1.bf16.msra.mxu1 %v12522_v16  ;;  %8748 = vmatprep.subr.bf16.mxu0 %v12523_v5  ;;  %v12537_v16 = vld [vmem:[#allocation3 + $0xa90] ss:$144 sps:$4 sm:$0xff]   ;;  %v12538_v5 = vld [vmem:[#allocation3 + $0xa98] ss:$144 sps:$4 sm:$0xff]  }
 0x675   :  { %8789 = vmatprep.subr.bf16.mxu1 %v12524_v31  ;;  %v12539_v31 = vld [vmem:[#allocation3 + $0xbb4] ss:$144 sps:$4 sm:$0xff]  }
 0x677   :  { %8749 = vmatpush1.bf16.msra.mxu0 %v12525_v63  ;;  %v12540_v63 = vld [vmem:[#allocation3 + $0xbbc] ss:$144 sps:$4 sm:$0xff]  }
 0x678   :  { %8790 = vmatpush1.bf16.msra.mxu1 %v12526_v46  ;;  %8750 = vmatprep.subr.bf16.mxu0 %v12527_v17  ;;  %v12541_v46 = vld [vmem:[#allocation3 + $0xbb0] ss:$144 sps:$4 sm:$0xff]   ;;  %v12542_v17 = vld [vmem:[#allocation3 + $0xbb8] ss:$144 sps:$4 sm:$0xff]  }
 0x679   :  { %8791 = vmatprep.subr.bf16.mxu1 %v12528_v28  ;;  %v12543_v28 = vld [vmem:[#allocation3 + $0xcd4] ss:$144 sps:$4 sm:$0xff]  }
 0x67b   :  { %8751 = vmatpush1.bf16.msra.mxu0 %v12529_v29  ;;  %v12544_v29 = vld [vmem:[#allocation3 + $0xcdc] ss:$144 sps:$4 sm:$0xff]  }
 0x67c   :  { %8792 = vmatpush1.bf16.msra.mxu1 %v12530_v47  ;;  %8752 = vmatprep.subr.bf16.mxu0 %v12531_v30  ;;  %v12545_v47 = vld [vmem:[#allocation3 + $0xcd0] ss:$144 sps:$4 sm:$0xff]   ;;  %v12546_v30 = vld [vmem:[#allocation3 + $0xcd8] ss:$144 sps:$4 sm:$0xff]  }
 0x67d   :  { %8793 = vmatprep.subr.bf16.mxu1 %v12532_v54  ;;  %v17286_v54 = vld [vmem:[#allocation28_spill] sm:$0xff] }
 0x67f   :  { %8753 = vmatpush1.bf16.msra.mxu0 %v12533_v59  ;;  %v17287_v59 = vld [vmem:[#allocation29_spill] sm:$0xff] }
 0x680   :  { %8794 = vmatpush1.bf16.msra.mxu1 %v12534_v53  ;;  %8754 = vmatprep.subr.bf16.mxu0 %v12535_v0  ;;  %v17288_v53 = vld [vmem:[#allocation30_spill] sm:$0xff]  ;;  %v17289_v0 = vld [vmem:[#allocation31_spill] sm:$0xff] }
 0x681   :  { %8795 = vmatprep.subr.bf16.mxu1 %v12536_v13  ;;  %v12547_v13 = vld [vmem:[#allocation3 + $0x84] ss:$144 sps:$4 sm:$0xff]  }
 0x683   :  { %8755 = vmatpush1.bf16.msra.mxu0 %v12537_v16  ;;  %v12548_v16 = vld [vmem:[#allocation3 + $0x8c] ss:$144 sps:$4 sm:$0xff]  }
 0x684   :  { %8796 = vmatpush1.bf16.msra.mxu1 %v12538_v5  ;;  %8756 = vmatprep.subr.bf16.mxu0 %v12539_v31  ;;  %v12549_v5 = vld [vmem:[#allocation3 + $0x80] ss:$144 sps:$4 sm:$0xff]   ;;  %v12550_v31 = vld [vmem:[#allocation3 + $0x88] ss:$144 sps:$4 sm:$0xff]  }
 0x685   :  { %8797 = vmatprep.subr.bf16.mxu1 %v12540_v63  ;;  %v12551_v63 = vld [vmem:[#allocation3 + $0x1a4] ss:$144 sps:$4 sm:$0xff]  }
 0x687   :  { %8757 = vmatpush1.bf16.msra.mxu0 %v12541_v46 }
 0x688   :  { %8798 = vmatpush1.bf16.msra.mxu1 %v12542_v17  ;;  %8758 = vmatprep.subr.bf16.mxu0 %v12543_v28  ;;  %v12552_v17 = vld [vmem:[#allocation3 + $0x1ac] ss:$144 sps:$4 sm:$0xff]  }
 0x689   :  { %8799 = vmatprep.subr.bf16.mxu1 %v12544_v29  ;;  %v17304_v28 = vld [vmem:[#allocation46_spill] sm:$0xff] }
 0x68b   :  { %8759 = vmatpush1.bf16.msra.mxu0 %v12545_v47 }
 0x68c   :  { %8800 = vmatpush1.bf16.msra.mxu1 %v12546_v30  ;;  %11216 = vmatprep.subr.msk.bf16.mxu0 %vm3476_vm1, %v17286_v54  ;;  %v12557_v30 = vld [vmem:[#allocation3 + $0x2c0] ss:$144 sps:$4 sm:$0xff]   ;;  %v12558_v54 = vld [vmem:[#allocation3 + $0x2c8] ss:$144 sps:$4 sm:$0xff]  }
 0x68d   :  { %11218 = vmatprep.subr.msk.bf16.mxu1 %vm3476_vm1, %v17287_v59 }
 0x68f   :  { %8761 = vmatpush1.bf16.msra.mxu0 %v17288_v53 }
 0x690   :  { %8802 = vmatpush1.bf16.msra.mxu1 %v17289_v0  ;;  %8818 = vmatprep.subr.bf16.mxu0 %v12547_v13  ;;  %v12553_v0 = vld [vmem:[#allocation3 + $0x1a0] ss:$144 sps:$4 sm:$0xff]   ;;  %v12562_v13 = vld [vmem:[#allocation3 + $0x3e8] ss:$144 sps:$4 sm:$0xff]  }
 0x691   :  { %8859 = vmatprep.subr.bf16.mxu1 %v12548_v16  ;;  %v12554_v16 = vld [vmem:[#allocation3 + $0x1a8] ss:$144 sps:$4 sm:$0xff]  }
 0x692   :  { %8769 = vmatmul.mubr.bf16.vlgmr.msra.gmra.mrb[72].mxu0 %v15077_v8 }
 0x693   :  { %8810 = vmatmul.mubr.bf16.vlgmr.msra.gmra.mrb[72].mxu1 %v15077_v8  ;;  %8819 = vmatpush1.bf16.msra.mxu0 %v12549_v5 }
 0x694   :  { %8860 = vmatpush1.bf16.msra.mxu1 %v12550_v31  ;;  %8820 = vmatprep.subr.bf16.mxu0 %v12551_v63  ;;  %v12555_v31 = vld [vmem:[#allocation3 + $0x2c4] ss:$144 sps:$4 sm:$0xff]   ;;  %v12556_v63 = vld [vmem:[#allocation3 + $0x2cc] ss:$144 sps:$4 sm:$0xff]  }
 0x695   :  { %v15207_v46 = vpop.f32.mrb[56].mxu0  ;;  %8861 = vmatprep.subr.bf16.mxu1 %v12552_v17  ;;  %11221 = vmatprep.mubr.msk.bf16.mxu0 %vm3472_vm0, %v15063_v50 }
 0x696   :  { %v15213_v29 = vpop.f32.mrb[56].mxu1  ;;  %v15215_v47 = vpop.f32.mrb[57].mxu0  ;;  %11223 = vmatprep.mubr.msk.bf16.mxu1 %vm3472_vm0, %v15063_v50 }
 0x697   :  { %v15223_v59 = vpop.f32.mrb[57].mxu1  ;;  %v8446_v53 = vpop.f32.mrb[58].mxu0  ;;  %8821 = vmatpush1.bf16.msra.mxu0 %v12553_v0  ;;  %v12561_v0 = vld [vmem:[#allocation3 + $0x3e0] ss:$144 sps:$4 sm:$0xff]  }
 0x698   :  { %8862 = vmatpush1.bf16.msra.mxu1 %v12554_v16  ;;  %v8447_v5 = vpop.f32.mrb[59].mxu0  ;;  %8822 = vmatprep.subr.bf16.mxu0 %v12555_v31  ;;  %v8487_v50 = vpop.f32.mrb[58].mxu1  ;;  %v12560_v53 = vld [vmem:[#allocation3 + $0x3ec] ss:$144 sps:$4 sm:$0xff]   ;;  %v12563_v16 = vld [vmem:[#allocation3 + $0x504] ss:$144 sps:$4 sm:$0xff]  }
 0x699   :  { %8863 = vmatprep.subr.bf16.mxu1 %v12556_v63  ;;  %v8488_v17 = vpop.f32.mrb[59].mxu1  ;;  %v12564_v5 = vld [vmem:[#allocation3 + $0x50c] ss:$144 sps:$4 sm:$0xff]   ;;  %v12565_v31 = vld [vmem:[#allocation3 + $0x500] ss:$144 sps:$4 sm:$0xff]  }
 0x69a   :  { %v12566_v50 = vld [vmem:[#allocation3 + $0x508] ss:$144 sps:$4 sm:$0xff]   ;;  %v12567_v63 = vld [vmem:[#allocation3 + $0x624] ss:$144 sps:$4 sm:$0xff]  }
 0x69b   :  { %8823 = vmatpush1.bf16.msra.mxu0 %v12557_v30  ;;  %v12568_v30 = vld [vmem:[#allocation3 + $0x62c] ss:$144 sps:$4 sm:$0xff]   ;;  %v12571_v17 = vld [vmem:[#allocation3 + $0x744] ss:$144 sps:$4 sm:$0xff]  }
 0x69c   :  { %8864 = vmatpush1.bf16.msra.mxu1 %v12558_v54  ;;  %8824 = vmatprep.subr.bf16.mxu0 %v12559_v55  ;;  %v12569_v54 = vld [vmem:[#allocation3 + $0x620] ss:$144 sps:$4 sm:$0xff]   ;;  %v12570_v55 = vld [vmem:[#allocation3 + $0x628] ss:$144 sps:$4 sm:$0xff]  }
 0x69d   :  { %8865 = vmatprep.subr.bf16.mxu1 %v12560_v53  ;;  %v12572_v53 = vld [vmem:[#allocation3 + $0x74c] ss:$144 sps:$4 sm:$0xff]  }
 0x69f   :  { %8825 = vmatpush1.bf16.msra.mxu0 %v12561_v0  ;;  %v12574_v0 = vld [vmem:[#allocation3 + $0x748] ss:$144 sps:$4 sm:$0xff]  }
 0x6a0   :  { %8866 = vmatpush1.bf16.msra.mxu1 %v12562_v13  ;;  %8826 = vmatprep.subr.bf16.mxu0 %v12563_v16  ;;  %v12573_v13 = vld [vmem:[#allocation3 + $0x740] ss:$144 sps:$4 sm:$0xff]   ;;  %v12575_v16 = vld [vmem:[#allocation3 + $0x864] ss:$144 sps:$4 sm:$0xff]  }
 0x6a1   :  { %8867 = vmatprep.subr.bf16.mxu1 %v12564_v5  ;;  %v12576_v5 = vld [vmem:[#allocation3 + $0x86c] ss:$144 sps:$4 sm:$0xff]  }
 0x6a3   :  { %8827 = vmatpush1.bf16.msra.mxu0 %v12565_v31  ;;  %v12577_v31 = vld [vmem:[#allocation3 + $0x860] ss:$144 sps:$4 sm:$0xff]  }
 0x6a4   :  { %8868 = vmatpush1.bf16.msra.mxu1 %v12566_v50  ;;  %8828 = vmatprep.subr.bf16.mxu0 %v12567_v63  ;;  %v12578_v50 = vld [vmem:[#allocation3 + $0x868] ss:$144 sps:$4 sm:$0xff]   ;;  %v12579_v63 = vld [vmem:[#allocation3 + $0x984] ss:$144 sps:$4 sm:$0xff]  }
 0x6a5   :  { %8869 = vmatprep.subr.bf16.mxu1 %v12568_v30  ;;  %v12580_v30 = vld [vmem:[#allocation3 + $0x98c] ss:$144 sps:$4 sm:$0xff]  }
 0x6a7   :  { %8829 = vmatpush1.bf16.msra.mxu0 %v12569_v54  ;;  %v12581_v54 = vld [vmem:[#allocation3 + $0x980] ss:$144 sps:$4 sm:$0xff]  }
 0x6a8   :  { %8870 = vmatpush1.bf16.msra.mxu1 %v12570_v55  ;;  %8830 = vmatprep.subr.bf16.mxu0 %v12571_v17  ;;  %v12582_v55 = vld [vmem:[#allocation3 + $0x988] ss:$144 sps:$4 sm:$0xff]   ;;  %v12583_v17 = vld [vmem:[#allocation3 + $0xaa4] ss:$144 sps:$4 sm:$0xff]  }
 0x6a9   :  { %8871 = vmatprep.subr.bf16.mxu1 %v12572_v53  ;;  %v12584_v53 = vld [vmem:[#allocation3 + $0xaac] ss:$144 sps:$4 sm:$0xff]  }
 0x6ab   :  { %8831 = vmatpush1.bf16.msra.mxu0 %v12573_v13  ;;  %v12585_v13 = vld [vmem:[#allocation3 + $0xaa0] ss:$144 sps:$4 sm:$0xff]  }
 0x6ac   :  { %8872 = vmatpush1.bf16.msra.mxu1 %v12574_v0  ;;  %8832 = vmatprep.subr.bf16.mxu0 %v12575_v16  ;;  %v12586_v0 = vld [vmem:[#allocation3 + $0xaa8] ss:$144 sps:$4 sm:$0xff]   ;;  %v12587_v16 = vld [vmem:[#allocation3 + $0xbc4] ss:$144 sps:$4 sm:$0xff]  }
 0x6ad   :  { %8873 = vmatprep.subr.bf16.mxu1 %v12576_v5  ;;  %v12588_v5 = vld [vmem:[#allocation3 + $0xbcc] ss:$144 sps:$4 sm:$0xff]  }
 0x6af   :  { %8833 = vmatpush1.bf16.msra.mxu0 %v12577_v31  ;;  %v12589_v31 = vld [vmem:[#allocation3 + $0xbc0] ss:$144 sps:$4 sm:$0xff]  }
 0x6b0   :  { %8874 = vmatpush1.bf16.msra.mxu1 %v12578_v50  ;;  %8834 = vmatprep.subr.bf16.mxu0 %v12579_v63  ;;  %v12590_v50 = vld [vmem:[#allocation3 + $0xbc8] ss:$144 sps:$4 sm:$0xff]   ;;  %v12591_v63 = vld [vmem:[#allocation3 + $0xce4] ss:$144 sps:$4 sm:$0xff]  }
 0x6b1   :  { %8875 = vmatprep.subr.bf16.mxu1 %v12580_v30  ;;  %v12592_v30 = vld [vmem:[#allocation3 + $0xcec] ss:$144 sps:$4 sm:$0xff]  }
 0x6b3   :  { %8835 = vmatpush1.bf16.msra.mxu0 %v12581_v54  ;;  %v12593_v54 = vld [vmem:[#allocation3 + $0xce0] ss:$144 sps:$4 sm:$0xff]  }
 0x6b4   :  { %8876 = vmatpush1.bf16.msra.mxu1 %v12582_v55  ;;  %8836 = vmatprep.subr.bf16.mxu0 %v12583_v17  ;;  %v12594_v55 = vld [vmem:[#allocation3 + $0xce8] ss:$144 sps:$4 sm:$0xff]  }
 0x6b5   :  { %8877 = vmatprep.subr.bf16.mxu1 %v12584_v53  ;;  %v17290_v17 = vld [vmem:[#allocation32_spill] sm:$0xff]  ;;  %v17291_v53 = vld [vmem:[#allocation33_spill] sm:$0xff] }
 0x6b7   :  { %8837 = vmatpush1.bf16.msra.mxu0 %v12585_v13  ;;  %v17292_v13 = vld [vmem:[#allocation34_spill] sm:$0xff] }
 0x6b8   :  { %8878 = vmatpush1.bf16.msra.mxu1 %v12586_v0  ;;  %8838 = vmatprep.subr.bf16.mxu0 %v12587_v16  ;;  %v17293_v0 = vld [vmem:[#allocation35_spill] sm:$0xff]  ;;  %v17294_v16 = vld [vmem:[#allocation36_spill] sm:$0xff] }
 0x6b9   :  { %8879 = vmatprep.subr.bf16.mxu1 %v12588_v5  ;;  %v17295_v5 = vld [vmem:[#allocation37_spill] sm:$0xff] }
 0x6bb   :  { %8839 = vmatpush1.bf16.msra.mxu0 %v12589_v31  ;;  %v17296_v31 = vld [vmem:[#allocation38_spill] sm:$0xff] }
 0x6bc   :  { %8880 = vmatpush1.bf16.msra.mxu1 %v12590_v50  ;;  %8840 = vmatprep.subr.bf16.mxu0 %v12591_v63  ;;  %v17297_v50 = vld [vmem:[#allocation39_spill] sm:$0xff]  ;;  %v17298_v63 = vld [vmem:[#allocation40_spill] sm:$0xff] }
 0x6bd   :  { %8881 = vmatprep.subr.bf16.mxu1 %v12592_v30 }
 0x6bf   :  { %8841 = vmatpush1.bf16.msra.mxu0 %v12593_v54  ;;  %v17299_v54 = vld [vmem:[#allocation41_spill] sm:$0xff] }
 0x6c0   :  { %8882 = vmatpush1.bf16.msra.mxu1 %v12594_v55  ;;  %11220 = vmatprep.subr.msk.bf16.mxu0 %vm3476_vm1, %v17290_v17  ;;  %v17303_v55 = vld [vmem:[#allocation45_spill] sm:$0xff] }
 0x6c1   :  { %11222 = vmatprep.subr.msk.bf16.mxu1 %vm3476_vm1, %v17291_v53 }
 0x6c3   :  { %8843 = vmatpush1.bf16.msra.mxu0 %v17292_v13 }
 0x6c4   :  { %8884 = vmatpush1.bf16.msra.mxu1 %v17293_v0  ;;  %8954 = vmatprep.subr.bf16.mxu0 %v17294_v16  ;;  %v17300_v16 = vld [vmem:[#allocation42_spill] sm:$0xff] }
 0x6c5   :  { %9159 = vmatprep.subr.bf16.mxu1 %v17295_v5 }
 0x6c6   :  { %8851 = vmatmul.mubr.bf16.vlgmr.msra.gmra.mrb[76].mxu0 %v15077_v8 }
 0x6c7   :  { %8892 = vmatmul.mubr.bf16.vlgmr.msra.gmra.mrb[76].mxu1 %v15077_v8  ;;  %8955 = vmatpush1.bf16.msra.mxu0 %v17296_v31  ;;  %v17308_v8 = vld [vmem:[#allocation50_spill] sm:$0xff] }
 0x6c8   :  { %9160 = vmatpush1.bf16.msra.mxu1 %v17297_v50  ;;  %8956 = vmatprep.subr.bf16.mxu0 %v17298_v63  ;;  %v17301_v50 = vld [vmem:[#allocation43_spill] sm:$0xff]  ;;  %v17302_v63 = vld [vmem:[#allocation44_spill] sm:$0xff] }
 0x6c9   :  { %v15240_v30 = vpop.f32.mrb[60].mxu0  ;;  %9161 = vmatprep.subr.bf16.mxu1 %v17299_v54 }
 0x6ca   :  { %v15245_v17 = vpop.f32.mrb[61].mxu0  ;;  %v15247_v53 = vpop.f32.mrb[60].mxu1 }
 0x6cb   :  { %v8528_v13 = vpop.f32.mrb[62].mxu0  ;;  %v15251_v0 = vpop.f32.mrb[61].mxu1  ;;  %8957 = vmatpush1.bf16.msra.mxu0 %v17300_v16  ;;  %v17309_v16 = vld [vmem:[#allocation51_spill] sm:$0xff] }
 0x6cc   :  { %v8529_v5 = vpop.f32.mrb[63].mxu0  ;;  %v8569_v31 = vpop.f32.mrb[62].mxu1  ;;  %9162 = vmatpush1.bf16.msra.mxu1 %v17301_v50  ;;  %8958 = vmatprep.subr.bf16.mxu0 %v17302_v63  ;;  %v17307_v13 = vld [vmem:[#allocation49_spill] sm:$0xff]  ;;  %v17312_v50 = vld [vmem:[#allocation54_spill] sm:$0xff]  ;;  %v17313_v63 = vld [vmem:[#allocation55_spill] sm:$0xff] }
 0x6cd   :  { %v8570_v54 = vpop.f32.mrb[63].mxu1  ;;  %9163 = vmatprep.subr.bf16.mxu1 %v17303_v55  ;;  %v17310_v5 = vld [vmem:[#allocation52_spill] sm:$0xff]  ;;  %v17311_v31 = vld [vmem:[#allocation53_spill] sm:$0xff] }
 0x6ce   :  { %v17314_v55 = vld [vmem:[#allocation56_spill] sm:$0xff] }
 0x6cf   :  { %8959 = vmatpush1.bf16.msra.mxu0 %v17304_v28  ;;  %v17315_v28 = vld [vmem:[#allocation57_spill] sm:$0xff]  ;;  %v17318_v54 = vld [vmem:[#allocation60_spill] sm:$0xff] }
 0x6d0   :  { %9164 = vmatpush1.bf16.msra.mxu1 %v17305_v3  ;;  %8960 = vmatprep.subr.bf16.mxu0 %v17306_v7  ;;  %v17316_v3 = vld [vmem:[#allocation58_spill] sm:$0xff]  ;;  %v17317_v7 = vld [vmem:[#allocation59_spill] sm:$0xff] }
 0x6d1   :  { %9165 = vmatprep.subr.bf16.mxu1 %v17307_v13  ;;  %v17320_v13 = vld [vmem:[#allocation62_spill] sm:$0xff] }
 0x6d3   :  { %8961 = vmatpush1.bf16.msra.mxu0 %v17308_v8  ;;  %v17319_v8 = vld [vmem:[#allocation61_spill] sm:$0xff] }
 0x6d4   :  { %9166 = vmatpush1.bf16.msra.mxu1 %v17309_v16  ;;  %8962 = vmatprep.subr.bf16.mxu0 %v17310_v5  ;;  %v17321_v16 = vld [vmem:[#allocation63_spill] sm:$0xff]  ;;  %v17322_v5 = vld [vmem:[#allocation64_spill] sm:$0xff] }
 0x6d5   :  { %9167 = vmatprep.subr.bf16.mxu1 %v17311_v31  ;;  %v17323_v31 = vld [vmem:[#allocation65_spill] sm:$0xff] }
 0x6d7   :  { %8963 = vmatpush1.bf16.msra.mxu0 %v17312_v50  ;;  %v17324_v50 = vld [vmem:[#allocation66_spill] sm:$0xff] }
 0x6d8   :  { %9168 = vmatpush1.bf16.msra.mxu1 %v17313_v63  ;;  %8964 = vmatprep.subr.bf16.mxu0 %v17314_v55  ;;  %v17325_v63 = vld [vmem:[#allocation67_spill] sm:$0xff]  ;;  %v17326_v55 = vld [vmem:[#allocation68_spill] sm:$0xff] }
 0x6d9   :  { %9169 = vmatprep.subr.bf16.mxu1 %v17315_v28  ;;  %v17327_v28 = vld [vmem:[#allocation69_spill] sm:$0xff] }
 0x6db   :  { %8965 = vmatpush1.bf16.msra.mxu0 %v17316_v3  ;;  %v17328_v3 = vld [vmem:[#allocation70_spill] sm:$0xff] }
 0x6dc   :  { %9170 = vmatpush1.bf16.msra.mxu1 %v17317_v7  ;;  %8966 = vmatprep.subr.bf16.mxu0 %v17318_v54  ;;  %v17329_v7 = vld [vmem:[#allocation71_spill] sm:$0xff]  ;;  %v17330_v54 = vld [vmem:[#allocation72_spill] sm:$0xff] }
 0x6dd   :  { %9171 = vmatprep.subr.bf16.mxu1 %v17319_v8  ;;  %v17331_v8 = vld [vmem:[#allocation73_spill] sm:$0xff] }
 0x6df   :  { %8967 = vmatpush1.bf16.msra.mxu0 %v17320_v13  ;;  %v17332_v13 = vld [vmem:[#allocation74_spill] sm:$0xff] }
 0x6e0   :  { %9172 = vmatpush1.bf16.msra.mxu1 %v17321_v16  ;;  %8968 = vmatprep.subr.bf16.mxu0 %v17322_v5  ;;  %v17333_v16 = vld [vmem:[#allocation75_spill] sm:$0xff]  ;;  %v17334_v5 = vld [vmem:[#allocation76_spill] sm:$0xff] }
 0x6e1   :  { %9173 = vmatprep.subr.bf16.mxu1 %v17323_v31  ;;  %v17335_v31 = vld [vmem:[#allocation77_spill] sm:$0xff] }
 0x6e3   :  { %8969 = vmatpush1.bf16.msra.mxu0 %v17324_v50  ;;  %v17336_v50 = vld [vmem:[#allocation78_spill] sm:$0xff] }
 0x6e4   :  { %9174 = vmatpush1.bf16.msra.mxu1 %v17325_v63  ;;  %8970 = vmatprep.subr.bf16.mxu0 %v17326_v55  ;;  %v17337_v63 = vld [vmem:[#allocation79_spill] sm:$0xff]  ;;  %v17338_v55 = vld [vmem:[#allocation80_spill] sm:$0xff] }
 0x6e5   :  { %9175 = vmatprep.subr.bf16.mxu1 %v17327_v28  ;;  %v17339_v28 = vld [vmem:[#allocation81_spill] sm:$0xff] }
 0x6e7   :  { %8971 = vmatpush1.bf16.msra.mxu0 %v17328_v3  ;;  %v17340_v3 = vld [vmem:[#allocation82_spill] sm:$0xff] }
 0x6e8   :  { %9176 = vmatpush1.bf16.msra.mxu1 %v17329_v7  ;;  %8972 = vmatprep.subr.bf16.mxu0 %v17330_v54  ;;  %v17341_v7 = vld [vmem:[#allocation83_spill] sm:$0xff]  ;;  %v17342_v54 = vld [vmem:[#allocation84_spill] sm:$0xff] }
 0x6e9   :  { %9177 = vmatprep.subr.bf16.mxu1 %v17331_v8  ;;  %v17343_v8 = vld [vmem:[#allocation85_spill] sm:$0xff] }
 0x6eb   :  { %8973 = vmatpush1.bf16.msra.mxu0 %v17332_v13  ;;  %v17344_v13 = vld [vmem:[#allocation86_spill] sm:$0xff] }
 0x6ec   :  { %9178 = vmatpush1.bf16.msra.mxu1 %v17333_v16  ;;  %8974 = vmatprep.subr.bf16.mxu0 %v17334_v5  ;;  %v17345_v16 = vld [vmem:[#allocation87_spill] sm:$0xff]  ;;  %v17346_v5 = vld [vmem:[#allocation88_spill] sm:$0xff] }
 0x6ed   :  { %9179 = vmatprep.subr.bf16.mxu1 %v17335_v31  ;;  %v17347_v31 = vld [vmem:[#allocation89_spill] sm:$0xff] }
 0x6ef   :  { %8975 = vmatpush1.bf16.msra.mxu0 %v17336_v50  ;;  %v17348_v50 = vld [vmem:[#allocation90_spill] sm:$0xff] }
 0x6f0   :  { %9180 = vmatpush1.bf16.msra.mxu1 %v17337_v63  ;;  %8976 = vmatprep.subr.bf16.mxu0 %v17338_v55  ;;  %v17349_v63 = vld [vmem:[#allocation91_spill] sm:$0xff]  ;;  %v17350_v55 = vld [vmem:[#allocation92_spill] sm:$0xff] }
 0x6f1   :  { %9181 = vmatprep.subr.bf16.mxu1 %v17339_v28 }
 0x6f3   :  { %8977 = vmatpush1.bf16.msra.mxu0 %v17340_v3  ;;  %v17351_v3 = vld [vmem:[#allocation93_spill] sm:$0xff] }
 0x6f4   :  { %9182 = vmatpush1.bf16.msra.mxu1 %v17341_v7  ;;  %8978 = vmatprep.subr.bf16.mxu0 %v17342_v54 }
 0x6f5   :  { %9183 = vmatprep.subr.bf16.mxu1 %v17343_v8 }
 0x6f7   :  { %8979 = vmatpush1.bf16.msra.mxu0 %v17344_v13  ;;  %v17352_v13 = vld [vmem:[#allocation94_spill] sm:$0xff] }
 0x6f8   :  { %9184 = vmatpush1.bf16.msra.mxu1 %v17345_v16  ;;  %8980 = vmatprep.subr.bf16.mxu0 %v17346_v5 }
 0x6f9   :  { %9185 = vmatprep.subr.bf16.mxu1 %v17347_v31  ;;  %v17354_v31 = vld [vmem:[#allocation96_spill] sm:$0xff] }
 0x6fb   :  { %8981 = vmatpush1.bf16.msra.mxu0 %v17348_v50 }
 0x6fc   :  { %9186 = vmatpush1.bf16.msra.mxu1 %v17349_v63  ;;  %8982 = vmatprep.subr.bf16.mxu0 %v17350_v55  ;;  %v17355_v63 = vld [vmem:[#allocation97_spill] sm:$0xff]  ;;  %v17356_v55 = vld [vmem:[#allocation98_spill] sm:$0xff] }
 0x6fd   :  { %v8606_v28 = vpop.f32.mrb[64].mxu0  ;;  %9187 = vmatprep.subr.bf16.mxu1 %v17351_v3  ;;  %v17358_v3 = vld [vmem:[#allocation100_spill] sm:$0xff] }
 0x6fe   :  { %v8608_v7 = vpop.f32.mrb[65].mxu0  ;;  %v8647_v54 = vpop.f32.mrb[64].mxu1 }
 0x6ff   :  { %v8610_v8 = vpop.f32.mrb[66].mxu0  ;;  %v15305_v48 = vpop.f32.mrb[65].mxu1  ;;  %8983 = vmatpush1.bf16.msra.mxu0 %v17352_v13 }
 0x700   :  { %v8611_v16 = vpop.f32.mrb[67].mxu0  ;;  %v8651_v5 = vpop.f32.mrb[66].mxu1  ;;  %9188 = vmatpush1.bf16.msra.mxu1 %v17353_v25  ;;  %8984 = vmatprep.subr.bf16.mxu0 %v17354_v31  ;;  %v17359_v8 = vld [vmem:[#allocation101_spill] sm:$0xff] }
 0x701   :  { %v8652_v50 = vpop.f32.mrb[67].mxu1  ;;  %9189 = vmatprep.subr.bf16.mxu1 %v17355_v63 }
 0x703   :  { %8985 = vmatpush1.bf16.msra.mxu0 %v17356_v55 }
 0x704   :  { %9190 = vmatpush1.bf16.msra.mxu1 %v17357_v56  ;;  %8995 = vmatprep.subr.bf16.mxu0 %v17358_v3  ;;  %v17360_v56 = vmax.f32 %v15141_v57, %v15187_v2  ;;  %v17362_v57 = vmax.f32 %v15151_v34, %v15207_v46  ;;  %v17371_v46 = vld [vmem:[#allocation109_spill] sm:$0xff] }
 0x705   :  { %9200 = vmatprep.subr.bf16.mxu1 %v17359_v8 }
 0x731   :  { %v15315_v1 = vpop.f32.mrb[68].mxu0 }
 0x732   :  { %v15317_v13 = vpop.f32.mrb[68].mxu1  ;;  %v15319_v16 = vpop.f32.mrb[69].mxu0 }
 0x733   :  { %v8731_v25 = vpop.f32.mrb[69].mxu1  ;;  %v8692_v5 = vpop.f32.mrb[70].mxu0 }
 0x734   :  { %v8909_v31 = vmax.f32 %v15247_v53, %v8731_v25  ;;  %v8693_v50 = vpop.f32.mrb[71].mxu0  ;;  %v8733_v63 = vpop.f32.mrb[70].mxu1  ;;  %v17361_v53 = vmax.f32 %v15145_v19, %v15185_v61 }
 0x735   :  { %v8734_v45 = vpop.f32.mrb[71].mxu1 }
 0x736   :  { %v8918_v55 = vmax.f32 %v17360_v56, %v8909_v31  ;;  %v17376_v56 = vld [vmem:[#allocation114_spill] sm:$0xff] }
 0x738   :  { %v8927_v44 = vadd.f32 %v8918_v55, %v13381_v62  ;;  %v17377_v55 = vld [vmem:[#allocation115_spill] sm:$0xff] }
 0x765   :  { %v8770_v3 = vpop.f32.mrb[72].mxu0 }
 0x766   :  { %v8910_v8 = vmax.f32 %v15251_v0, %v8770_v3  ;;  %v8811_v12 = vpop.f32.mrb[72].mxu1  ;;  %v8772_v24 = vpop.f32.mrb[73].mxu0  ;;  %v17363_v0 = vmax.f32 %v15149_v21, %v15195_v58  ;;  %v17368_v21 = vld [vmem:[#allocation106_spill] sm:$0xff]  ;;  %v17370_v58 = vld [vmem:[#allocation108_spill] sm:$0xff] }
 0x767   :  { %v8912_v9 = vmax.f32 %v8608_v7, %v8811_v12  ;;  %v8911_v20 = vmax.f32 %v8606_v28, %v8772_v24  ;;  %v8813_v26 = vpop.f32.mrb[73].mxu1  ;;  %v8774_v5 = vpop.f32.mrb[74].mxu0  ;;  %v17364_v12 = vmax.f32 %v15161_v35, %v15215_v47  ;;  %v17369_v35 = vld [vmem:[#allocation107_spill] sm:$0xff]  ;;  %v17374_v47 = vld [vmem:[#allocation112_spill] sm:$0xff] }
 0x768   :  { %v8919_v25 = vmax.f32 %v17361_v53, %v8910_v8  ;;  %v8913_v45 = vmax.f32 %v8647_v54, %v8813_v26  ;;  %v8775_v50 = vpop.f32.mrb[75].mxu0  ;;  %v8815_v63 = vpop.f32.mrb[74].mxu1  ;;  %v8936_v26 = vmax.f32 %v8927_v44, 0.0  ;;  %v17367_v44 = vld [vmem:[#allocation105_spill] sm:$0xff]  ;;  %v17378_v3 = vld [vmem:[#allocation116_spill] sm:$0xff]  ;;  %v17380_v5 = vld [vmem:[#allocation118_spill] sm:$0xff] }
 0x769   :  { %v8921_v2 = vmax.f32 %v17362_v57, %v8912_v9  ;;  %v15336_v31 = vmax.f32 %v17363_v0, %v8911_v20  ;;  %v8816_v62 = vpop.f32.mrb[75].mxu1  ;;  %v17375_v54 = vld [vmem:[#allocation113_spill] sm:$0xff]  ;;  %v17381_v53 = vld [vmem:[#allocation119_spill] sm:$0xff]  ;;  %v17384_v50 = vld [vmem:[#allocation122_spill] sm:$0xff] }
 0x76a   :  { %v8928_v24 = vadd.f32 %v8919_v25, %v13387_v14  ;;  %v15342_v19 = vmax.f32 %v17364_v12, %v8913_v45  ;;  %v15347_v9 = vpack.c.bf16 %v8936_v26, %v8936_v26  ;;  %v17365_v14 = vld [vmem:[#allocation103_spill] sm:$0xff]  ;;  %v17379_v8 = vld [vmem:[#allocation117_spill] sm:$0xff]  ;;  %v17382_v25 = vld [vmem:[#allocation120_spill] sm:$0xff] }
 0x76b   :  { %v8930_v61 = vadd.f32 %v8921_v2, %v13390_v11  ;;  %v17366_v11 = vld [vmem:[#allocation104_spill] sm:$0xff]  ;;  %v17383_v45 = vld [vmem:[#allocation121_spill] sm:$0xff]  ;;  %v17385_v63 = vld [vmem:[#allocation123_spill] sm:$0xff] }
 0x76c   :  { %v8937_v28 = vmax.f32 %v8928_v24, 0.0  ;;  %v17386_v57 = vld [vmem:[#allocation124_spill] sm:$0xff]  ;;  %v17387_v2 = vld [vmem:[#allocation125_spill] sm:$0xff]  ;;  %v17388_v0 = vld [vmem:[#allocation126_spill] sm:$0xff] }
 0x76d   :  { %v8939_v7 = vmax.f32 %v8930_v61, 0.0  ;;  %v17389_v62 = vld [vmem:[#allocation127_spill] sm:$0xff]  ;;  %v17390_v24 = vld [vmem:[#allocation128_spill] sm:$0xff]  ;;  %v17391_v12 = vld [vmem:[#allocation129_spill] sm:$0xff] }
 0x76e   :  { %v15345_v34 = vpack.c.bf16 %v8937_v28, %v8937_v28  ;;  %v17392_v26 = vld [vmem:[#allocation130_spill] sm:$0xff]  ;;  %v17393_v61 = vld [vmem:[#allocation131_spill] sm:$0xff]  ;;  %v17394_v28 = vld [vmem:[#allocation132_spill] sm:$0xff] }
 0x76f   :  { %v15351_v20 = vpack.c.bf16 %v8939_v7, %v8939_v7  ;;  %v17395_v7 = vld [vmem:[#allocation133_spill] sm:$0xff] }
 0x770   :  { %8986 = vmatprep.mubr.bf16.mxu0 %v15345_v34  ;;  %9191 = vmatprep.mubr.bf16.mxu1 %v15345_v34 }
 0x771   :  { %8987 = vmatmul.mubr.bf16.vlgmr.msra.gmra.mrb[80].mxu0 %v15347_v9  ;;  %9192 = vmatmul.mubr.bf16.vlgmr.msra.gmra.mrb[80].mxu1 %v15347_v9 }
 0x772   :  { %8996 = vmatpush1.bf16.msra.mxu0 %v13293_v41  ;;  %9201 = vmatpush1.bf16.msra.mxu1 %v13296_v18  ;;  %v17372_v41 = vld [vmem:[#allocation110_spill] sm:$0xff]  ;;  %v17373_v18 = vld [vmem:[#allocation111_spill] sm:$0xff] }
 0x773   :  { %9027 = vmatprep.mubr.bf16.mxu0 %v15351_v20  ;;  %9232 = vmatprep.mubr.bf16.mxu1 %v15351_v20 }
 0x774   :  { %8997 = vmatprep.subr.bf16.mxu0 %v17365_v14  ;;  %9202 = vmatprep.subr.bf16.mxu1 %v17366_v11  ;;  %v17396_v14 = vld [vmem:[#allocation134_spill] sm:$0xff]  ;;  %v17397_v11 = vld [vmem:[#allocation135_spill] sm:$0xff] }
 0x776   :  { %8998 = vmatpush1.bf16.msra.mxu0 %v17367_v44  ;;  %9203 = vmatpush1.bf16.msra.mxu1 %v17368_v21  ;;  %v17398_v44 = vld [vmem:[#allocation136_spill] sm:$0xff]  ;;  %v17399_v21 = vld [vmem:[#allocation137_spill] sm:$0xff] }
 0x777   :  { %8999 = vmatprep.subr.bf16.mxu0 %v17369_v35  ;;  %9204 = vmatprep.subr.bf16.mxu1 %v17370_v58  ;;  %v17400_v35 = vld [vmem:[#allocation138_spill] sm:$0xff]  ;;  %v17401_v58 = vld [vmem:[#allocation139_spill] sm:$0xff] }
 0x77a   :  { %9000 = vmatpush1.bf16.msra.mxu0 %v17371_v46  ;;  %9205 = vmatpush1.bf16.msra.mxu1 %v17372_v41  ;;  %v17402_v46 = vld [vmem:[#allocation140_spill] sm:$0xff] }
 0x77b   :  { %9001 = vmatprep.subr.bf16.mxu0 %v17373_v18  ;;  %9206 = vmatprep.subr.bf16.mxu1 %v17374_v47 }
 0x77e   :  { %9002 = vmatpush1.bf16.msra.mxu0 %v17375_v54  ;;  %9207 = vmatpush1.bf16.msra.mxu1 %v17376_v56  ;;  %v17403_v54 = vld [vmem:[#allocation141_spill] sm:$0xff] }
 0x77f   :  { %9003 = vmatprep.subr.bf16.mxu0 %v17377_v55  ;;  %9208 = vmatprep.subr.bf16.mxu1 %v17378_v3 }
 0x782   :  { %9004 = vmatpush1.bf16.msra.mxu0 %v17379_v8  ;;  %9209 = vmatpush1.bf16.msra.mxu1 %v17380_v5  ;;  %v17404_v5 = vld [vmem:[#allocation142_spill] sm:$0xff] }
 0x783   :  { %9005 = vmatprep.subr.bf16.mxu0 %v17381_v53  ;;  %9210 = vmatprep.subr.bf16.mxu1 %v17382_v25  ;;  %v17405_v53 = vld [vmem:[#allocation143_spill] sm:$0xff] }
 0x786   :  { %9006 = vmatpush1.bf16.msra.mxu0 %v17383_v45  ;;  %9211 = vmatpush1.bf16.msra.mxu1 %v17384_v50  ;;  %v17406_v45 = vmax.f32 %v15165_v60, %v15213_v29  ;;  %v17417_v29 = vld [vmem:[#allocation151_spill] sm:$0xff] }
 0x787   :  { %9007 = vmatprep.subr.bf16.mxu0 %v17385_v63  ;;  %9212 = vmatprep.subr.bf16.mxu1 %v17386_v57  ;;  %v17407_v57 = vmax.f32 %v15171_v43, %v15240_v30  ;;  %v17411_v43 = vld [vmem:[#allocation145_spill] sm:$0xff]  ;;  %v17420_v30 = vld [vmem:[#allocation154_spill] sm:$0xff] }
 0x78a   :  { %9008 = vmatpush1.bf16.msra.mxu0 %v17387_v2  ;;  %9213 = vmatpush1.bf16.msra.mxu1 %v17388_v0 }
 0x78b   :  { %9009 = vmatprep.subr.bf16.mxu0 %v17389_v62  ;;  %9214 = vmatprep.subr.bf16.mxu1 %v17390_v24  ;;  %v17409_v62 = vmax.f32 %v15181_v52, %v15245_v17 }
 0x78e   :  { %9010 = vmatpush1.bf16.msra.mxu0 %v17391_v12  ;;  %9215 = vmatpush1.bf16.msra.mxu1 %v17392_v26  ;;  %v17423_v12 = vld [vmem:[#allocation157_spill] sm:$0xff]  ;;  %v17424_v26 = vld [vmem:[#allocation158_spill] sm:$0xff] }
 0x78f   :  { %9011 = vmatprep.subr.bf16.mxu0 %v17393_v61  ;;  %9216 = vmatprep.subr.bf16.mxu1 %v17394_v28  ;;  %v17425_v61 = vld [vmem:[#allocation159_spill] sm:$0xff]  ;;  %v17426_v28 = vld [vmem:[#allocation160_spill] sm:$0xff] }
 0x792   :  { %9012 = vmatpush1.bf16.msra.mxu0 %v17395_v7  ;;  %9217 = vmatpush1.bf16.msra.mxu1 %v17396_v14  ;;  %v17427_v7 = vld [vmem:[#allocation161_spill] sm:$0xff]  ;;  %v17428_v14 = vld [vmem:[#allocation162_spill] sm:$0xff] }
 0x793   :  { %9013 = vmatprep.subr.bf16.mxu0 %v17397_v11  ;;  %9218 = vmatprep.subr.bf16.mxu1 %v17398_v44  ;;  %v17429_v11 = vld [vmem:[#allocation163_spill] sm:$0xff]  ;;  %v17430_v44 = vld [vmem:[#allocation164_spill] sm:$0xff] }
 0x796   :  { %9014 = vmatpush1.bf16.msra.mxu0 %v17399_v21  ;;  %9219 = vmatpush1.bf16.msra.mxu1 %v17400_v35  ;;  %v17431_v21 = vld [vmem:[#allocation165_spill] sm:$0xff]  ;;  %v17432_v35 = vld [vmem:[#allocation166_spill] sm:$0xff] }
 0x797   :  { %9015 = vmatprep.subr.bf16.mxu0 %v17401_v58  ;;  %9220 = vmatprep.subr.bf16.mxu1 %v17402_v46  ;;  %v17433_v58 = vld [vmem:[#allocation167_spill] sm:$0xff]  ;;  %v17434_v46 = vld [vmem:[#allocation168_spill] sm:$0xff] }
 0x799   :  { %v8852_v41 = vpop.f32.mrb[76].mxu0 }
 0x79a   :  { %v8914_v18 = vmax.f32 %v15305_v48, %v8852_v41  ;;  %v8893_v47 = vpop.f32.mrb[76].mxu1  ;;  %9016 = vmatpush1.bf16.msra.mxu0 %v13537_v38  ;;  %9221 = vmatpush1.bf16.msra.mxu1 %v17403_v54  ;;  %v8854_v56 = vpop.f32.mrb[77].mxu0  ;;  %v17435_v41 = vld [vmem:[#allocation169_spill] sm:$0xff]  ;;  %v17438_v54 = vld [vmem:[#allocation172_spill] sm:$0xff] }
 0x79b   :  { %v8916_v55 = vmax.f32 %v15319_v16, %v8893_v47  ;;  %v8915_v3 = vmax.f32 %v15315_v1, %v8854_v56  ;;  %v8895_v8 = vpop.f32.mrb[77].mxu1  ;;  %9017 = vmatprep.subr.bf16.mxu0 %v17404_v5  ;;  %9222 = vmatprep.subr.bf16.mxu1 %v17405_v53  ;;  %v8856_v25 = vpop.f32.mrb[78].mxu0  ;;  %v17408_v1 = vmax.f32 %v15167_v49, %v15223_v59  ;;  %v17410_v49 = vld [vmem:[#allocation144_spill] sm:$0xff]  ;;  %v17419_v59 = vld [vmem:[#allocation153_spill] sm:$0xff]  ;;  %v17437_v47 = vld [vmem:[#allocation171_spill] sm:$0xff] }
 0x79c   :  { %v8923_v48 = vmax.f32 %v17406_v45, %v8914_v18  ;;  %v8917_v50 = vmax.f32 %v15317_v13, %v8895_v8  ;;  %v8857_v38 = vpop.f32.mrb[79].mxu0  ;;  %v8897_v63 = vpop.f32.mrb[78].mxu1  ;;  %v17421_v13 = vld [vmem:[#allocation155_spill] sm:$0xff]  ;;  %v17436_v18 = vld [vmem:[#allocation170_spill] sm:$0xff]  ;;  %v17439_v56 = vld [vmem:[#allocation173_spill] sm:$0xff] }
 0x79d   :  { %v15411_v16 = vmax.f32 %v17407_v57, %v8916_v55  ;;  %v15416_v2 = vmax.f32 %v17408_v1, %v8915_v3  ;;  %v8898_v0 = vpop.f32.mrb[79].mxu1  ;;  %v17440_v55 = vld [vmem:[#allocation174_spill] sm:$0xff]  ;;  %v17441_v3 = vld [vmem:[#allocation175_spill] sm:$0xff]  ;;  %v17442_v8 = vld [vmem:[#allocation176_spill] sm:$0xff] }
 0x79e   :  { %v15421_v60 = vmax.f32 %v17409_v62, %v8917_v50  ;;  %9018 = vmatpush1.bf16.msra.mxu0 %v13547_v39  ;;  %9223 = vmatpush1.bf16.msra.mxu1 %v13549_v51  ;;  %v8929_v39 = vadd.f32 %v15336_v31, %v17411_v43  ;;  %v17412_v51 = vld [vmem:[#allocation146_spill] sm:$0xff]  ;;  %v17422_v31 = vld [vmem:[#allocation156_spill] sm:$0xff]  ;;  %v17443_v5 = vld [vmem:[#allocation177_spill] sm:$0xff] }
 0x79f   :  { %9019 = vmatprep.subr.bf16.mxu0 %v13555_v32  ;;  %9224 = vmatprep.subr.bf16.mxu1 %v13561_v10  ;;  %v17413_v32 = vld [vmem:[#allocation147_spill] sm:$0xff]  ;;  %v17414_v10 = vld [vmem:[#allocation148_spill] sm:$0xff]  ;;  %v17444_v53 = vld [vmem:[#allocation178_spill] sm:$0xff] }
 0x7a0   :  { %v8932_v52 = vadd.f32 %v8923_v48, %v17414_v10  ;;  %v17445_v25 = vld [vmem:[#allocation179_spill] sm:$0xff]  ;;  %v17446_v45 = vld [vmem:[#allocation180_spill] sm:$0xff]  ;;  %v17447_v48 = vld [vmem:[#allocation181_spill] sm:$0xff] }
 0x7a1   :  { %v17448_v50 = vld [vmem:[#allocation182_spill] sm:$0xff]  ;;  %v17449_v38 = vld [vmem:[#allocation183_spill] sm:$0xff]  ;;  %v17450_v63 = vld [vmem:[#allocation184_spill] sm:$0xff] }
 0x7a2   :  { %9020 = vmatpush1.bf16.msra.mxu0 %v13583_v6  ;;  %9225 = vmatpush1.bf16.msra.mxu1 %v13585_v22  ;;  %v17415_v6 = vld [vmem:[#allocation149_spill] sm:$0xff]  ;;  %v17416_v22 = vld [vmem:[#allocation150_spill] sm:$0xff]  ;;  %v17453_v0 = vld [vmem:[#allocation187_spill] sm:$0xff] }
 0x7a3   :  { %9021 = vmatprep.subr.bf16.mxu0 %v13590_v4  ;;  %9226 = vmatprep.subr.bf16.mxu1 %v13592_v42  ;;  %v8938_v4 = vmax.f32 %v8929_v39, 0.0  ;;  %v17418_v42 = vld [vmem:[#allocation152_spill] sm:$0xff]  ;;  %v17451_v57 = vld [vmem:[#allocation185_spill] sm:$0xff]  ;;  %v17452_v1 = vld [vmem:[#allocation186_spill] sm:$0xff] }
 0x7a4   :  { %v17454_v62 = vld [vmem:[#allocation188_spill] sm:$0xff]  ;;  %v17456_v43 = vld [vmem:[#allocation190_spill] sm:$0xff]  ;;  %v17457_v39 = vld [vmem:[#allocation191_spill] sm:$0xff] }
 0x7a5   :  { %v15444_v17 = vpack.c.bf16 %v8938_v4, %v8938_v4  ;;  %v17460_v10 = vld [vmem:[#allocation194_spill] sm:$0xff] }
 0x7a6   :  { %9022 = vmatpush1.bf16.msra.mxu0 %v13597_v36  ;;  %9227 = vmatpush1.bf16.msra.mxu1 %v17410_v49  ;;  %v8941_v36 = vmax.f32 %v8932_v52, 0.0  ;;  %v17455_v49 = vld [vmem:[#allocation189_spill] sm:$0xff]  ;;  %v17461_v52 = vld [vmem:[#allocation195_spill] sm:$0xff]  ;;  %v17464_v4 = vld [vmem:[#allocation198_spill] sm:$0xff] }
 0x7a7   :  { %9023 = vmatprep.subr.bf16.mxu0 %v17412_v51  ;;  %9228 = vmatprep.subr.bf16.mxu1 %v17413_v32  ;;  %v17458_v51 = vld [vmem:[#allocation192_spill] sm:$0xff]  ;;  %v17459_v32 = vld [vmem:[#allocation193_spill] sm:$0xff] }
 0x7a8   :  { %v15448_v24 = vpack.c.bf16 %v8941_v36, %v8941_v36  ;;  %v17467_v36 = vld [vmem:[#allocation201_spill] sm:$0xff] }
 0x7aa   :  { %9024 = vmatpush1.bf16.msra.mxu0 %v17415_v6  ;;  %9229 = vmatpush1.bf16.msra.mxu1 %v17416_v22  ;;  %v17462_v6 = vld [vmem:[#allocation196_spill] sm:$0xff]  ;;  %v17463_v22 = vld [vmem:[#allocation197_spill] sm:$0xff] }
 0x7ab   :  { %9025 = vmatprep.subr.bf16.mxu0 %v17417_v29  ;;  %9230 = vmatprep.subr.bf16.mxu1 %v17418_v42  ;;  %v17465_v29 = vld [vmem:[#allocation199_spill] sm:$0xff]  ;;  %v17466_v42 = vld [vmem:[#allocation200_spill] sm:$0xff] }
 0x7ae   :  { %9026 = vmatpush1.bf16.msra.mxu0 %v17419_v59  ;;  %9231 = vmatpush1.bf16.msra.mxu1 %v17420_v30  ;;  %v17468_v59 = vld [vmem:[#allocation202_spill] sm:$0xff]  ;;  %v17469_v30 = vld [vmem:[#allocation203_spill] sm:$0xff] }
 0x7af   :  { %9036 = vmatprep.subr.bf16.mxu0 %v17421_v13  ;;  %9241 = vmatprep.subr.bf16.mxu1 %v17422_v31  ;;  %v17470_v13 = vld [vmem:[#allocation204_spill] sm:$0xff]  ;;  %v17471_v31 = vld [vmem:[#allocation205_spill] sm:$0xff] }
 0x7b1   :  { %9028 = vmatmul.mubr.bf16.vlgmr.msra.gmra.mrb[80].mxu0 %v15444_v17  ;;  %9233 = vmatmul.mubr.bf16.vlgmr.msra.gmra.mrb[80].mxu1 %v15444_v17 }
 0x7b2   :  { %9037 = vmatpush1.bf16.msra.mxu0 %v17423_v12  ;;  %9068 = vmatprep.mubr.bf16.mxu0 %v15448_v24  ;;  %v17472_v12 = vld [vmem:[#allocation206_spill] sm:$0xff] }
 0x7b3   :  { %9242 = vmatpush1.bf16.msra.mxu1 %v17424_v26  ;;  %9273 = vmatprep.mubr.bf16.mxu1 %v15448_v24  ;;  %v17473_v26 = vld [vmem:[#allocation207_spill] sm:$0xff] }
 0x7b4   :  { %9038 = vmatprep.subr.bf16.mxu0 %v17425_v61  ;;  %9243 = vmatprep.subr.bf16.mxu1 %v17426_v28  ;;  %v17474_v61 = vld [vmem:[#allocation208_spill] sm:$0xff]  ;;  %v8931_v28 = vadd.f32 %v15342_v19, %v13810_v23  ;;  %v17483_v23 = vld [vmem:[#allocation217_spill] sm:$0xff] }
 0x7b6   :  { %9039 = vmatpush1.bf16.msra.mxu0 %v17427_v7  ;;  %v17475_v7 = vld [vmem:[#allocation209_spill] sm:$0xff] }
 0x7b7   :  { %9244 = vmatpush1.bf16.msra.mxu1 %v17428_v14  ;;  %9040 = vmatprep.subr.bf16.mxu0 %v17429_v11  ;;  %v17476_v14 = vld [vmem:[#allocation210_spill] sm:$0xff]  ;;  %v17477_v11 = vld [vmem:[#allocation211_spill] sm:$0xff] }
 0x7b8   :  { %9245 = vmatprep.subr.bf16.mxu1 %v17430_v44  ;;  %v17478_v44 = vld [vmem:[#allocation212_spill] sm:$0xff] }
 0x7ba   :  { %9041 = vmatpush1.bf16.msra.mxu0 %v17431_v21  ;;  %v17479_v21 = vld [vmem:[#allocation213_spill] sm:$0xff] }
 0x7bb   :  { %9246 = vmatpush1.bf16.msra.mxu1 %v17432_v35  ;;  %9042 = vmatprep.subr.bf16.mxu0 %v17433_v58  ;;  %v8940_v35 = vmax.f32 %v8931_v28, 0.0  ;;  %v17480_v58 = vld [vmem:[#allocation214_spill] sm:$0xff]  ;;  %v17522_v28 = vld [vmem:[#allocation256_spill] sm:$0xff] }
 0x7bc   :  { %9247 = vmatprep.subr.bf16.mxu1 %v17434_v46  ;;  %v17481_v46 = vld [vmem:[#allocation215_spill] sm:$0xff] }
 0x7bd   :  { %v15519_v19 = vpack.c.bf16 %v8940_v35, %v8940_v35  ;;  %v17529_v35 = vld [vmem:[#allocation263_spill] sm:$0xff] }
 0x7be   :  { %9043 = vmatpush1.bf16.msra.mxu0 %v17435_v41  ;;  %v17482_v41 = vld [vmem:[#allocation216_spill] sm:$0xff] }
 0x7bf   :  { %9248 = vmatpush1.bf16.msra.mxu1 %v17436_v18  ;;  %9044 = vmatprep.subr.bf16.mxu0 %v17437_v47  ;;  %v17484_v47 = vld [vmem:[#allocation218_spill] sm:$0xff] }
 0x7c0   :  { %9249 = vmatprep.subr.bf16.mxu1 %v17438_v54  ;;  %v17485_v54 = vld [vmem:[#allocation219_spill] sm:$0xff] }
 0x7c2   :  { %9045 = vmatpush1.bf16.msra.mxu0 %v17439_v56  ;;  %v17486_v56 = vld [vmem:[#allocation220_spill] sm:$0xff] }
 0x7c3   :  { %9250 = vmatpush1.bf16.msra.mxu1 %v17440_v55  ;;  %9046 = vmatprep.subr.bf16.mxu0 %v17441_v3  ;;  %v17487_v55 = vld [vmem:[#allocation221_spill] sm:$0xff]  ;;  %v17488_v3 = vld [vmem:[#allocation222_spill] sm:$0xff] }
 0x7c4   :  { %9251 = vmatprep.subr.bf16.mxu1 %v17442_v8  ;;  %v17489_v8 = vld [vmem:[#allocation223_spill] sm:$0xff] }
 0x7c6   :  { %9047 = vmatpush1.bf16.msra.mxu0 %v17443_v5  ;;  %v17490_v5 = vld [vmem:[#allocation224_spill] sm:$0xff] }
 0x7c7   :  { %9252 = vmatpush1.bf16.msra.mxu1 %v17444_v53  ;;  %9048 = vmatprep.subr.bf16.mxu0 %v17445_v25  ;;  %v17491_v53 = vld [vmem:[#allocation225_spill] sm:$0xff]  ;;  %v17492_v25 = vld [vmem:[#allocation226_spill] sm:$0xff] }
 0x7c8   :  { %9253 = vmatprep.subr.bf16.mxu1 %v17446_v45  ;;  %v17493_v45 = vld [vmem:[#allocation227_spill] sm:$0xff] }
 0x7ca   :  { %9049 = vmatpush1.bf16.msra.mxu0 %v17447_v48  ;;  %v17494_v48 = vld [vmem:[#allocation228_spill] sm:$0xff] }
 0x7cb   :  { %9254 = vmatpush1.bf16.msra.mxu1 %v17448_v50  ;;  %9050 = vmatprep.subr.bf16.mxu0 %v17449_v38  ;;  %v17495_v50 = vld [vmem:[#allocation229_spill] sm:$0xff]  ;;  %v17496_v38 = vld [vmem:[#allocation230_spill] sm:$0xff] }
 0x7cc   :  { %9255 = vmatprep.subr.bf16.mxu1 %v17450_v63  ;;  %v17497_v63 = vld [vmem:[#allocation231_spill] sm:$0xff] }
 0x7ce   :  { %9051 = vmatpush1.bf16.msra.mxu0 %v17451_v57  ;;  %v17498_v57 = vld [vmem:[#allocation232_spill] sm:$0xff] }
 0x7cf   :  { %9256 = vmatpush1.bf16.msra.mxu1 %v17452_v1  ;;  %9052 = vmatprep.subr.bf16.mxu0 %v17453_v0  ;;  %v17499_v1 = vld [vmem:[#allocation233_spill] sm:$0xff]  ;;  %v17500_v0 = vld [vmem:[#allocation234_spill] sm:$0xff] }
 0x7d0   :  { %9257 = vmatprep.subr.bf16.mxu1 %v17454_v62  ;;  %v17501_v62 = vld [vmem:[#allocation235_spill] sm:$0xff] }
 0x7d2   :  { %9053 = vmatpush1.bf16.msra.mxu0 %v17455_v49  ;;  %v17502_v49 = vld [vmem:[#allocation236_spill] sm:$0xff] }
 0x7d3   :  { %9258 = vmatpush1.bf16.msra.mxu1 %v17456_v43  ;;  %9054 = vmatprep.subr.bf16.mxu0 %v17457_v39  ;;  %v17503_v43 = vld [vmem:[#allocation237_spill] sm:$0xff]  ;;  %v17504_v39 = vld [vmem:[#allocation238_spill] sm:$0xff] }
 0x7d4   :  { %9259 = vmatprep.subr.bf16.mxu1 %v17458_v51  ;;  %v17505_v51 = vld [vmem:[#allocation239_spill] sm:$0xff] }
 0x7d6   :  { %9055 = vmatpush1.bf16.msra.mxu0 %v17459_v32  ;;  %v17506_v32 = vld [vmem:[#allocation240_spill] sm:$0xff] }
 0x7d7   :  { %9260 = vmatpush1.bf16.msra.mxu1 %v17460_v10  ;;  %9056 = vmatprep.subr.bf16.mxu0 %v17461_v52  ;;  %v17507_v10 = vld [vmem:[#allocation241_spill] sm:$0xff]  ;;  %v17508_v52 = vld [vmem:[#allocation242_spill] sm:$0xff] }
 0x7d8   :  { %9261 = vmatprep.subr.bf16.mxu1 %v17462_v6  ;;  %v17509_v6 = vld [vmem:[#allocation243_spill] sm:$0xff] }
 0x7da   :  { %9057 = vmatpush1.bf16.msra.mxu0 %v17463_v22  ;;  %v17510_v22 = vld [vmem:[#allocation244_spill] sm:$0xff] }
 0x7db   :  { %9262 = vmatpush1.bf16.msra.mxu1 %v17464_v4  ;;  %9058 = vmatprep.subr.bf16.mxu0 %v17465_v29  ;;  %v17511_v4 = vld [vmem:[#allocation245_spill] sm:$0xff]  ;;  %v17512_v29 = vld [vmem:[#allocation246_spill] sm:$0xff] }
 0x7dc   :  { %9263 = vmatprep.subr.bf16.mxu1 %v17466_v42  ;;  %v17513_v42 = vld [vmem:[#allocation247_spill] sm:$0xff] }
 0x7de   :  { %9059 = vmatpush1.bf16.msra.mxu0 %v17467_v36  ;;  %v17514_v36 = vld [vmem:[#allocation248_spill] sm:$0xff] }
 0x7df   :  { %9264 = vmatpush1.bf16.msra.mxu1 %v17468_v59  ;;  %9060 = vmatprep.subr.bf16.mxu0 %v17469_v30  ;;  %v17515_v59 = vld [vmem:[#allocation249_spill] sm:$0xff]  ;;  %v17516_v30 = vld [vmem:[#allocation250_spill] sm:$0xff] }
 0x7e0   :  { %9265 = vmatprep.subr.bf16.mxu1 %v17470_v13  ;;  %v17517_v13 = vld [vmem:[#allocation251_spill] sm:$0xff] }
 0x7e2   :  { %9061 = vmatpush1.bf16.msra.mxu0 %v13793_v15  ;;  %v8934_v15 = vadd.f32 %v15411_v16, %v17478_v44  ;;  %v17526_v44 = vld [vmem:[#allocation260_spill] sm:$0xff] }
 0x7e3   :  { %9266 = vmatpush1.bf16.msra.mxu1 %v17471_v31  ;;  %9062 = vmatprep.subr.bf16.mxu0 %v17472_v12  ;;  %v17518_v31 = vld [vmem:[#allocation252_spill] sm:$0xff]  ;;  %v17519_v12 = vld [vmem:[#allocation253_spill] sm:$0xff] }
 0x7e4   :  { %9267 = vmatprep.subr.bf16.mxu1 %v17473_v26  ;;  %v8943_v18 = vmax.f32 %v8934_v15, 0.0  ;;  %v17520_v26 = vld [vmem:[#allocation254_spill] sm:$0xff]  ;;  %v17527_v15 = vld [vmem:[#allocation261_spill] sm:$0xff] }
 0x7e6   :  { %9063 = vmatpush1.bf16.msra.mxu0 %v17474_v61  ;;  %v15524_v16 = vpack.c.bf16 %v8943_v18, %v8943_v18  ;;  %v17521_v61 = vld [vmem:[#allocation255_spill] sm:$0xff] }
 0x7e7   :  { %9268 = vmatpush1.bf16.msra.mxu1 %v17475_v7  ;;  %9064 = vmatprep.subr.bf16.mxu0 %v17476_v14  ;;  %v17523_v7 = vld [vmem:[#allocation257_spill] sm:$0xff]  ;;  %v17524_v14 = vld [vmem:[#allocation258_spill] sm:$0xff]  ;;  %v17533_v18 = vld [vmem:[#allocation267_spill] sm:$0xff] }
 0x7e8   :  { %9269 = vmatprep.subr.bf16.mxu1 %v17477_v11  ;;  %v17525_v11 = vld [vmem:[#allocation259_spill] sm:$0xff] }
 0x7ea   :  { %9065 = vmatpush1.bf16.msra.mxu0 %v17479_v21  ;;  %v17528_v21 = vld [vmem:[#allocation262_spill] sm:$0xff] }
 0x7eb   :  { %9270 = vmatpush1.bf16.msra.mxu1 %v17480_v58  ;;  %9066 = vmatprep.subr.bf16.mxu0 %v17481_v46  ;;  %v17530_v58 = vld [vmem:[#allocation264_spill] sm:$0xff]  ;;  %v17531_v46 = vld [vmem:[#allocation265_spill] sm:$0xff] }
 0x7ec   :  { %9271 = vmatprep.subr.bf16.mxu1 %v17482_v41  ;;  %v17532_v41 = vld [vmem:[#allocation266_spill] sm:$0xff] }
 0x7ee   :  { %9067 = vmatpush1.bf16.msra.mxu0 %v17483_v23  ;;  %v17534_v23 = vld [vmem:[#allocation268_spill] sm:$0xff] }
 0x7ef   :  { %9272 = vmatpush1.bf16.msra.mxu1 %v17484_v47  ;;  %9077 = vmatprep.subr.bf16.mxu0 %v17485_v54  ;;  %v17535_v47 = vld [vmem:[#allocation269_spill] sm:$0xff]  ;;  %v17536_v54 = vld [vmem:[#allocation270_spill] sm:$0xff] }
 0x7f0   :  { %9282 = vmatprep.subr.bf16.mxu1 %v17486_v56  ;;  %v17537_v56 = vld [vmem:[#allocation271_spill] sm:$0xff] }
 0x7f1   :  { %9069 = vmatmul.mubr.bf16.vlgmr.msra.gmra.mrb[80].mxu0 %v15519_v19 }
 0x7f2   :  { %9274 = vmatmul.mubr.bf16.vlgmr.msra.gmra.mrb[80].mxu1 %v15519_v19  ;;  %9078 = vmatpush1.bf16.msra.mxu0 %v17487_v55  ;;  %v17538_v55 = vld [vmem:[#allocation272_spill] sm:$0xff] }
 0x7f3   :  { %9109 = vmatprep.mubr.bf16.mxu0 %v15524_v16  ;;  %9283 = vmatpush1.bf16.msra.mxu1 %v17488_v3  ;;  %v17539_v3 = vld [vmem:[#allocation273_spill] sm:$0xff] }
 0x7f4   :  { %9314 = vmatprep.mubr.bf16.mxu1 %v15524_v16  ;;  %9079 = vmatprep.subr.bf16.mxu0 %v17489_v8  ;;  %v17540_v8 = vld [vmem:[#allocation274_spill] sm:$0xff] }
 0x7f5   :  { %9284 = vmatprep.subr.bf16.mxu1 %v17490_v5  ;;  %v8933_v5 = vadd.f32 %v15416_v2, %v17540_v8  ;;  %v17549_v2 = vld [vmem:[#allocation283_spill] sm:$0xff]  ;;  %v17588_v8 = vld [vmem:[#allocation322_spill] sm:$0xff] }
 0x7f6   :  { %9080 = vmatpush1.bf16.msra.mxu0 %v17491_v53  ;;  %v17541_v53 = vld [vmem:[#allocation275_spill] sm:$0xff] }
 0x7f7   :  { %9285 = vmatpush1.bf16.msra.mxu1 %v17492_v25  ;;  %9081 = vmatprep.subr.bf16.mxu0 %v17493_v45  ;;  %v17542_v25 = vld [vmem:[#allocation276_spill] sm:$0xff]  ;;  %v17543_v45 = vld [vmem:[#allocation277_spill] sm:$0xff] }
 0x7f8   :  { %9286 = vmatprep.subr.bf16.mxu1 %v17494_v48  ;;  %v17544_v48 = vld [vmem:[#allocation278_spill] sm:$0xff] }
 0x7fa   :  { %9082 = vmatpush1.bf16.msra.mxu0 %v17495_v50  ;;  %v8942_v50 = vmax.f32 %v8933_v5, 0.0  ;;  %v17589_v5 = vld [vmem:[#allocation323_spill] sm:$0xff] }
 0x7fb   :  { %9287 = vmatpush1.bf16.msra.mxu1 %v17496_v38  ;;  %9083 = vmatprep.subr.bf16.mxu0 %v17497_v63  ;;  %v17545_v38 = vld [vmem:[#allocation279_spill] sm:$0xff]  ;;  %v17546_v63 = vld [vmem:[#allocation280_spill] sm:$0xff] }
 0x7fc   :  { %9288 = vmatprep.subr.bf16.mxu1 %v17498_v57  ;;  %v17547_v57 = vld [vmem:[#allocation281_spill] sm:$0xff] }
 0x7fe   :  { %9084 = vmatpush1.bf16.msra.mxu0 %v17499_v1  ;;  %v17548_v1 = vld [vmem:[#allocation282_spill] sm:$0xff] }
 0x7ff   :  { %9289 = vmatpush1.bf16.msra.mxu1 %v17500_v0  ;;  %9085 = vmatprep.subr.bf16.mxu0 %v17501_v62  ;;  %v15593_v0 = vpack.c.bf16 %v8942_v50, %v8942_v50  ;;  %v17550_v62 = vld [vmem:[#allocation284_spill] sm:$0xff]  ;;  %v17595_v50 = vld [vmem:[#allocation329_spill] sm:$0xff] }
 0x800   :  { %9290 = vmatprep.subr.bf16.mxu1 %v17502_v49  ;;  %v17551_v49 = vld [vmem:[#allocation285_spill] sm:$0xff] }
 0x802   :  { %9086 = vmatpush1.bf16.msra.mxu0 %v17503_v43  ;;  %v17552_v43 = vld [vmem:[#allocation286_spill] sm:$0xff] }
 0x803   :  { %9291 = vmatpush1.bf16.msra.mxu1 %v17504_v39  ;;  %9087 = vmatprep.subr.bf16.mxu0 %v17505_v51  ;;  %v17553_v39 = vld [vmem:[#allocation287_spill] sm:$0xff]  ;;  %v17554_v51 = vld [vmem:[#allocation288_spill] sm:$0xff] }
 0x804   :  { %9292 = vmatprep.subr.bf16.mxu1 %v17506_v32  ;;  %v17555_v32 = vld [vmem:[#allocation289_spill] sm:$0xff] }
 0x806   :  { %9088 = vmatpush1.bf16.msra.mxu0 %v17507_v10  ;;  %v17556_v10 = vld [vmem:[#allocation290_spill] sm:$0xff] }
 0x807   :  { %9293 = vmatpush1.bf16.msra.mxu1 %v17508_v52  ;;  %9089 = vmatprep.subr.bf16.mxu0 %v17509_v6  ;;  %v17557_v52 = vld [vmem:[#allocation291_spill] sm:$0xff]  ;;  %v17558_v6 = vld [vmem:[#allocation292_spill] sm:$0xff] }
 0x808   :  { %9294 = vmatprep.subr.bf16.mxu1 %v17510_v22  ;;  %v17559_v22 = vld [vmem:[#allocation293_spill] sm:$0xff] }
 0x80a   :  { %9090 = vmatpush1.bf16.msra.mxu0 %v17511_v4  ;;  %v17560_v4 = vld [vmem:[#allocation294_spill] sm:$0xff] }
 0x80b   :  { %9295 = vmatpush1.bf16.msra.mxu1 %v17512_v29  ;;  %9091 = vmatprep.subr.bf16.mxu0 %v17513_v42  ;;  %v17561_v29 = vld [vmem:[#allocation295_spill] sm:$0xff]  ;;  %v17562_v42 = vld [vmem:[#allocation296_spill] sm:$0xff] }
 0x80c   :  { %9296 = vmatprep.subr.bf16.mxu1 %v17514_v36  ;;  %v17563_v36 = vld [vmem:[#allocation297_spill] sm:$0xff] }
 0x80e   :  { %9092 = vmatpush1.bf16.msra.mxu0 %v17515_v59  ;;  %v17564_v59 = vld [vmem:[#allocation298_spill] sm:$0xff] }
 0x80f   :  { %9297 = vmatpush1.bf16.msra.mxu1 %v17516_v30  ;;  %9093 = vmatprep.subr.bf16.mxu0 %v17517_v13  ;;  %v17565_v30 = vld [vmem:[#allocation299_spill] sm:$0xff]  ;;  %v17566_v13 = vld [vmem:[#allocation300_spill] sm:$0xff] }
 0x810   :  { %9298 = vmatprep.subr.bf16.mxu1 %v17518_v31  ;;  %v17567_v31 = vld [vmem:[#allocation301_spill] sm:$0xff] }
 0x812   :  { %9094 = vmatpush1.bf16.msra.mxu0 %v17519_v12  ;;  %v17568_v12 = vld [vmem:[#allocation302_spill] sm:$0xff] }
 0x813   :  { %9299 = vmatpush1.bf16.msra.mxu1 %v17520_v26  ;;  %9095 = vmatprep.subr.bf16.mxu0 %v17521_v61  ;;  %v17569_v26 = vld [vmem:[#allocation303_spill] sm:$0xff]  ;;  %v17570_v61 = vld [vmem:[#allocation304_spill] sm:$0xff] }
 0x814   :  { %9300 = vmatprep.subr.bf16.mxu1 %v17522_v28  ;;  %v17571_v28 = vld [vmem:[#allocation305_spill] sm:$0xff] }
 0x816   :  { %9096 = vmatpush1.bf16.msra.mxu0 %v17523_v7  ;;  %v17572_v7 = vld [vmem:[#allocation306_spill] sm:$0xff] }
 0x817   :  { %9301 = vmatpush1.bf16.msra.mxu1 %v17524_v14  ;;  %9097 = vmatprep.subr.bf16.mxu0 %v17525_v11  ;;  %v12595_v14 = vld [vmem:[#allocation5 + $0x8] ss:$0 sm:$0xff] }
 0x818   :  { %9302 = vmatprep.subr.bf16.mxu1 %v17526_v44  ;;  %v8935_v11 = vadd.f32 %v12595_v14, %v15421_v60  ;;  %v17573_v44 = vld [vmem:[#allocation307_spill] sm:$0xff]  ;;  %v17579_v60 = vld [vmem:[#allocation313_spill] sm:$0xff]  ;;  %v17624_v14 = vld [vmem:[#allocation358_spill] sm:$0xff] }
 0x81a   :  { %9098 = vmatpush1.bf16.msra.mxu0 %v17527_v15  ;;  %v17574_v15 = vld [vmem:[#allocation308_spill] sm:$0xff] }
 0x81b   :  { %9303 = vmatpush1.bf16.msra.mxu1 %v17528_v21  ;;  %9099 = vmatprep.subr.bf16.mxu0 %v17529_v35  ;;  %v8944_v21 = vmax.f32 %v8935_v11, 0.0  ;;  %v17575_v35 = vld [vmem:[#allocation309_spill] sm:$0xff]  ;;  %v17625_v11 = vld [vmem:[#allocation359_spill] sm:$0xff] }
 0x81c   :  { %9304 = vmatprep.subr.bf16.mxu1 %v17530_v58  ;;  %v17576_v58 = vld [vmem:[#allocation310_spill] sm:$0xff] }
 0x81e   :  { %9100 = vmatpush1.bf16.msra.mxu0 %v17531_v46  ;;  %v17577_v46 = vld [vmem:[#allocation311_spill] sm:$0xff] }
 0x81f   :  { %9305 = vmatpush1.bf16.msra.mxu1 %v17532_v41  ;;  %9101 = vmatprep.subr.bf16.mxu0 %v17533_v18  ;;  %v17578_v41 = vld [vmem:[#allocation312_spill] sm:$0xff]  ;;  %v15632_v18 = vpack.c.bf16 %v8944_v21, %v8944_v21  ;;  %v17628_v21 = vld [vmem:[#allocation362_spill] sm:$0xff] }
 0x820   :  { %9306 = vmatprep.subr.bf16.mxu1 %v17534_v23  ;;  %v17582_v23 = vld [vmem:[#allocation316_spill] sm:$0xff] }
 0x822   :  { %9102 = vmatpush1.bf16.msra.mxu0 %v17535_v47  ;;  %v17583_v47 = vld [vmem:[#allocation317_spill] sm:$0xff] }
 0x823   :  { %9307 = vmatpush1.bf16.msra.mxu1 %v17536_v54  ;;  %9103 = vmatprep.subr.bf16.mxu0 %v17537_v56  ;;  %v17584_v54 = vld [vmem:[#allocation318_spill] sm:$0xff]  ;;  %v17585_v56 = vld [vmem:[#allocation319_spill] sm:$0xff] }
 0x824   :  { %9308 = vmatprep.subr.bf16.mxu1 %v17538_v55  ;;  %v17586_v55 = vld [vmem:[#allocation320_spill] sm:$0xff] }
 0x826   :  { %9104 = vmatpush1.bf16.msra.mxu0 %v17539_v3  ;;  %v17587_v3 = vld [vmem:[#allocation321_spill] sm:$0xff] }
 0x827   :  { %9309 = vmatpush1.bf16.msra.mxu1 %v17541_v53  ;;  %9105 = vmatprep.subr.bf16.mxu0 %v17542_v25  ;;  %v17590_v53 = vld [vmem:[#allocation324_spill] sm:$0xff]  ;;  %v17591_v25 = vld [vmem:[#allocation325_spill] sm:$0xff] }
 0x828   :  { %9310 = vmatprep.subr.bf16.mxu1 %v17543_v45  ;;  %v17592_v45 = vld [vmem:[#allocation326_spill] sm:$0xff] }
 0x82a   :  { %9106 = vmatpush1.bf16.msra.mxu0 %v17544_v48  ;;  %v17593_v48 = vld [vmem:[#allocation327_spill] sm:$0xff] }
 0x82b   :  { %9311 = vmatpush1.bf16.msra.mxu1 %v17545_v38  ;;  %9107 = vmatprep.subr.bf16.mxu0 %v17546_v63  ;;  %v17596_v38 = vld [vmem:[#allocation330_spill] sm:$0xff]  ;;  %v17597_v63 = vld [vmem:[#allocation331_spill] sm:$0xff] }
 0x82c   :  { %9312 = vmatprep.subr.bf16.mxu1 %v17547_v57  ;;  %v17598_v57 = vld [vmem:[#allocation332_spill] sm:$0xff] }
 0x82e   :  { %9108 = vmatpush1.bf16.msra.mxu0 %v17548_v1  ;;  %v17599_v1 = vld [vmem:[#allocation333_spill] sm:$0xff] }
 0x82f   :  { %9313 = vmatpush1.bf16.msra.mxu1 %v17549_v2  ;;  %9118 = vmatprep.subr.bf16.mxu0 %v17550_v62  ;;  %v17600_v2 = vld [vmem:[#allocation334_spill] sm:$0xff]  ;;  %v17601_v62 = vld [vmem:[#allocation335_spill] sm:$0xff] }
 0x830   :  { %9323 = vmatprep.subr.bf16.mxu1 %v17551_v49  ;;  %v17602_v49 = vld [vmem:[#allocation336_spill] sm:$0xff] }
 0x831   :  { %9110 = vmatmul.mubr.bf16.vlgmr.msra.gmra.mrb[80].mxu0 %v15593_v0 }
 0x832   :  { %9315 = vmatmul.mubr.bf16.vlgmr.msra.gmra.mrb[80].mxu1 %v15593_v0  ;;  %9119 = vmatpush1.bf16.msra.mxu0 %v17552_v43  ;;  %v17603_v43 = vld [vmem:[#allocation337_spill] sm:$0xff] }
 0x833   :  { %9324 = vmatpush1.bf16.msra.mxu1 %v17553_v39  ;;  %9120 = vmatprep.subr.bf16.mxu0 %v17554_v51  ;;  %v17604_v39 = vld [vmem:[#allocation338_spill] sm:$0xff]  ;;  %v17605_v51 = vld [vmem:[#allocation339_spill] sm:$0xff] }
 0x834   :  { %9325 = vmatprep.subr.bf16.mxu1 %v17555_v32  ;;  %9150 = vmatprep.mubr.bf16.mxu0 %v17248_v37  ;;  %v17606_v32 = vld [vmem:[#allocation340_spill] sm:$0xff] }
 0x835   :  { %9355 = vmatprep.mubr.bf16.mxu1 %v17248_v37 }
 0x836   :  { %9121 = vmatpush1.bf16.msra.mxu0 %v17556_v10  ;;  %v17607_v10 = vld [vmem:[#allocation341_spill] sm:$0xff] }
 0x837   :  { %9326 = vmatpush1.bf16.msra.mxu1 %v17557_v52  ;;  %9122 = vmatprep.subr.bf16.mxu0 %v17558_v6  ;;  %v17608_v52 = vld [vmem:[#allocation342_spill] sm:$0xff]  ;;  %v17609_v6 = vld [vmem:[#allocation343_spill] sm:$0xff] }
 0x838   :  { %9327 = vmatprep.subr.bf16.mxu1 %v17559_v22  ;;  %v17610_v22 = vld [vmem:[#allocation344_spill] sm:$0xff] }
 0x83a   :  { %9123 = vmatpush1.bf16.msra.mxu0 %v17560_v4  ;;  %v17611_v4 = vld [vmem:[#allocation345_spill] sm:$0xff] }
 0x83b   :  { %9328 = vmatpush1.bf16.msra.mxu1 %v17561_v29  ;;  %9124 = vmatprep.subr.bf16.mxu0 %v17562_v42  ;;  %v17612_v29 = vld [vmem:[#allocation346_spill] sm:$0xff]  ;;  %v17613_v42 = vld [vmem:[#allocation347_spill] sm:$0xff] }
 0x83c   :  { %9329 = vmatprep.subr.bf16.mxu1 %v17563_v36  ;;  %v17614_v36 = vld [vmem:[#allocation348_spill] sm:$0xff] }
 0x83e   :  { %9125 = vmatpush1.bf16.msra.mxu0 %v17564_v59  ;;  %v17615_v59 = vld [vmem:[#allocation349_spill] sm:$0xff] }
 0x83f   :  { %9330 = vmatpush1.bf16.msra.mxu1 %v17565_v30  ;;  %9126 = vmatprep.subr.bf16.mxu0 %v17566_v13  ;;  %v17616_v30 = vld [vmem:[#allocation350_spill] sm:$0xff]  ;;  %v17617_v13 = vld [vmem:[#allocation351_spill] sm:$0xff] }
 0x840   :  { %9331 = vmatprep.subr.bf16.mxu1 %v17567_v31  ;;  %v17618_v31 = vld [vmem:[#allocation352_spill] sm:$0xff] }
 0x842   :  { %9127 = vmatpush1.bf16.msra.mxu0 %v17568_v12  ;;  %v17619_v12 = vld [vmem:[#allocation353_spill] sm:$0xff] }
 0x843   :  { %9332 = vmatpush1.bf16.msra.mxu1 %v17569_v26  ;;  %9128 = vmatprep.subr.bf16.mxu0 %v17570_v61  ;;  %v17620_v26 = vld [vmem:[#allocation354_spill] sm:$0xff]  ;;  %v17621_v61 = vld [vmem:[#allocation355_spill] sm:$0xff] }
 0x844   :  { %9333 = vmatprep.subr.bf16.mxu1 %v17571_v28  ;;  %v17622_v28 = vld [vmem:[#allocation356_spill] sm:$0xff] }
 0x846   :  { %9129 = vmatpush1.bf16.msra.mxu0 %v17572_v7  ;;  %v17623_v7 = vld [vmem:[#allocation357_spill] sm:$0xff] }
 0x847   :  { %9334 = vmatpush1.bf16.msra.mxu1 %v14128_v27  ;;  %9130 = vmatprep.subr.bf16.mxu0 %v14130_v33  ;;  %v17580_v27 = vld [vmem:[#allocation314_spill] sm:$0xff]  ;;  %v17581_v33 = vld [vmem:[#allocation315_spill] sm:$0xff] }
 0x848   :  { %9335 = vmatprep.subr.bf16.mxu1 %v17573_v44  ;;  %v17626_v44 = vld [vmem:[#allocation360_spill] sm:$0xff] }
 0x84a   :  { %9131 = vmatpush1.bf16.msra.mxu0 %v17574_v15  ;;  %v17627_v15 = vld [vmem:[#allocation361_spill] sm:$0xff] }
 0x84b   :  { %9336 = vmatpush1.bf16.msra.mxu1 %v17575_v35  ;;  %9132 = vmatprep.subr.bf16.mxu0 %v17576_v58  ;;  %v17629_v35 = vld [vmem:[#allocation363_spill] sm:$0xff]  ;;  %v17630_v58 = vld [vmem:[#allocation364_spill] sm:$0xff] }
 0x84c   :  { %9337 = vmatprep.subr.bf16.mxu1 %v17577_v46  ;;  %v17631_v46 = vld [vmem:[#allocation365_spill] sm:$0xff] }
 0x84e   :  { %9133 = vmatpush1.bf16.msra.mxu0 %v17578_v41  ;;  %v17632_v41 = vld [vmem:[#allocation366_spill] sm:$0xff] }
 0x84f   :  { %9338 = vmatpush1.bf16.msra.mxu1 %v17579_v60  ;;  %9364 = vmatprep.subr.bf16.mxu0 %v17580_v27  ;;  %v17633_v60 = vld [vmem:[#allocation367_spill] sm:$0xff]  ;;  %v17634_v27 = vld [vmem:[#allocation368_spill] sm:$0xff] }
 0x850   :  { %9569 = vmatprep.subr.bf16.mxu1 %v17581_v33  ;;  %v17635_v33 = vld [vmem:[#allocation369_spill] sm:$0xff] }
 0x851   :  { %9151 = vmatmul.mubr.bf16.vlgmr.msra.gmra.mrb[80].mxu0 %v15632_v18 }
 0x852   :  { %9356 = vmatmul.mubr.bf16.vlgmr.msra.gmra.mrb[80].mxu1 %v15632_v18  ;;  %9365 = vmatpush1.bf16.msra.mxu0 %v17582_v23  ;;  %v17636_v23 = vld [vmem:[#allocation370_spill] sm:$0xff] }
 0x853   :  { %9396 = vmatprep.mubr.bf16.mxu0 %v15345_v34  ;;  %9570 = vmatpush1.bf16.msra.mxu1 %v17583_v47  ;;  %v17637_v47 = vld [vmem:[#allocation371_spill] sm:$0xff] }
 0x854   :  { %9601 = vmatprep.mubr.bf16.mxu1 %v15345_v34  ;;  %9366 = vmatprep.subr.bf16.mxu0 %v17584_v54  ;;  %v17594_v34 = vld [vmem:[#allocation328_spill] sm:$0xff] }
 0x855   :  { %9571 = vmatprep.subr.bf16.mxu1 %v17585_v56  ;;  %v17638_v54 = vld [vmem:[#allocation372_spill] sm:$0xff]  ;;  %v17639_v56 = vld [vmem:[#allocation373_spill] sm:$0xff] }
 0x856   :  { %9367 = vmatpush1.bf16.msra.mxu0 %v17586_v55  ;;  %v17640_v55 = vld [vmem:[#allocation374_spill] sm:$0xff] }
 0x857   :  { %9572 = vmatpush1.bf16.msra.mxu1 %v17587_v3  ;;  %9368 = vmatprep.subr.bf16.mxu0 %v17588_v8  ;;  %v17641_v3 = vld [vmem:[#allocation375_spill] sm:$0xff]  ;;  %v17642_v8 = vld [vmem:[#allocation376_spill] sm:$0xff] }
 0x858   :  { %9573 = vmatprep.subr.bf16.mxu1 %v17589_v5  ;;  %v17643_v5 = vld [vmem:[#allocation377_spill] sm:$0xff] }
 0x85a   :  { %9369 = vmatpush1.bf16.msra.mxu0 %v17590_v53  ;;  %v17645_v53 = vld [vmem:[#allocation379_spill] sm:$0xff] }
 0x85b   :  { %9574 = vmatpush1.bf16.msra.mxu1 %v17591_v25  ;;  %9370 = vmatprep.subr.bf16.mxu0 %v17592_v45  ;;  %v17646_v25 = vld [vmem:[#allocation380_spill] sm:$0xff]  ;;  %v17647_v45 = vld [vmem:[#allocation381_spill] sm:$0xff] }
 0x85c   :  { %9575 = vmatprep.subr.bf16.mxu1 %v17593_v48  ;;  %v17648_v48 = vld [vmem:[#allocation382_spill] sm:$0xff] }
 0x85e   :  { %9371 = vmatpush1.bf16.msra.mxu0 %v17594_v34  ;;  %v17649_v34 = vld [vmem:[#allocation383_spill] sm:$0xff] }
 0x85f   :  { %9576 = vmatpush1.bf16.msra.mxu1 %v17595_v50  ;;  %9372 = vmatprep.subr.bf16.mxu0 %v17596_v38  ;;  %v17650_v50 = vld [vmem:[#allocation384_spill] sm:$0xff]  ;;  %v17651_v38 = vld [vmem:[#allocation385_spill] sm:$0xff] }
 0x860   :  { %9577 = vmatprep.subr.bf16.mxu1 %v17597_v63  ;;  %v17652_v63 = vld [vmem:[#allocation386_spill] sm:$0xff] }
 0x862   :  { %9373 = vmatpush1.bf16.msra.mxu0 %v17598_v57  ;;  %v17654_v57 = vld [vmem:[#allocation388_spill] sm:$0xff] }
 0x863   :  { %9578 = vmatpush1.bf16.msra.mxu1 %v17599_v1  ;;  %9374 = vmatprep.subr.bf16.mxu0 %v17600_v2  ;;  %v17655_v1 = vld [vmem:[#allocation389_spill] sm:$0xff]  ;;  %v17656_v2 = vld [vmem:[#allocation390_spill] sm:$0xff] }
 0x864   :  { %9579 = vmatprep.subr.bf16.mxu1 %v17601_v62  ;;  %v17658_v62 = vld [vmem:[#allocation392_spill] sm:$0xff] }
 0x866   :  { %9375 = vmatpush1.bf16.msra.mxu0 %v17602_v49  ;;  %v17659_v49 = vld [vmem:[#allocation393_spill] sm:$0xff] }
 0x867   :  { %9580 = vmatpush1.bf16.msra.mxu1 %v17603_v43  ;;  %9376 = vmatprep.subr.bf16.mxu0 %v17604_v39  ;;  %v17660_v43 = vld [vmem:[#allocation394_spill] sm:$0xff]  ;;  %v17661_v39 = vld [vmem:[#allocation395_spill] sm:$0xff] }
 0x868   :  { %9581 = vmatprep.subr.bf16.mxu1 %v17605_v51  ;;  %v17662_v51 = vld [vmem:[#allocation396_spill] sm:$0xff] }
 0x86a   :  { %9377 = vmatpush1.bf16.msra.mxu0 %v17606_v32  ;;  %v17663_v32 = vld [vmem:[#allocation397_spill] sm:$0xff] }
 0x86b   :  { %9582 = vmatpush1.bf16.msra.mxu1 %v17607_v10  ;;  %9378 = vmatprep.subr.bf16.mxu0 %v17608_v52  ;;  %v17664_v10 = vld [vmem:[#allocation398_spill] sm:$0xff]  ;;  %v17665_v52 = vld [vmem:[#allocation399_spill] sm:$0xff] }
 0x86c   :  { %9583 = vmatprep.subr.bf16.mxu1 %v17609_v6  ;;  %v17666_v6 = vld [vmem:[#allocation400_spill] sm:$0xff] }
 0x86e   :  { %9379 = vmatpush1.bf16.msra.mxu0 %v17610_v22  ;;  %v17667_v22 = vld [vmem:[#allocation401_spill] sm:$0xff] }
 0x86f   :  { %9584 = vmatpush1.bf16.msra.mxu1 %v17611_v4  ;;  %9380 = vmatprep.subr.bf16.mxu0 %v17612_v29  ;;  %v17668_v4 = vld [vmem:[#allocation402_spill] sm:$0xff]  ;;  %v17669_v29 = vld [vmem:[#allocation403_spill] sm:$0xff] }
 0x870   :  { %9585 = vmatprep.subr.bf16.mxu1 %v17613_v42  ;;  %v17670_v42 = vld [vmem:[#allocation404_spill] sm:$0xff] }
 0x872   :  { %9381 = vmatpush1.bf16.msra.mxu0 %v17614_v36  ;;  %v17671_v36 = vld [vmem:[#allocation405_spill] sm:$0xff] }
 0x873   :  { %9586 = vmatpush1.bf16.msra.mxu1 %v17615_v59  ;;  %9382 = vmatprep.subr.bf16.mxu0 %v17616_v30  ;;  %v17672_v59 = vld [vmem:[#allocation406_spill] sm:$0xff]  ;;  %v17673_v30 = vld [vmem:[#allocation407_spill] sm:$0xff] }
 0x874   :  { %9587 = vmatprep.subr.bf16.mxu1 %v17617_v13  ;;  %v17674_v13 = vld [vmem:[#allocation408_spill] sm:$0xff] }
 0x876   :  { %9383 = vmatpush1.bf16.msra.mxu0 %v17618_v31  ;;  %v17675_v31 = vld [vmem:[#allocation409_spill] sm:$0xff] }
 0x877   :  { %9588 = vmatpush1.bf16.msra.mxu1 %v17619_v12  ;;  %9384 = vmatprep.subr.bf16.mxu0 %v17620_v26  ;;  %v17676_v12 = vld [vmem:[#allocation410_spill] sm:$0xff]  ;;  %v17677_v26 = vld [vmem:[#allocation411_spill] sm:$0xff] }
 0x878   :  { %9589 = vmatprep.subr.bf16.mxu1 %v17621_v61  ;;  %v17678_v61 = vld [vmem:[#allocation412_spill] sm:$0xff] }
 0x87a   :  { %9385 = vmatpush1.bf16.msra.mxu0 %v17622_v28  ;;  %v17679_v28 = vld [vmem:[#allocation413_spill] sm:$0xff] }
 0x87b   :  { %9590 = vmatpush1.bf16.msra.mxu1 %v17623_v7  ;;  %9386 = vmatprep.subr.bf16.mxu0 %v17624_v14  ;;  %v17680_v7 = vld [vmem:[#allocation414_spill] sm:$0xff]  ;;  %v17681_v14 = vld [vmem:[#allocation415_spill] sm:$0xff] }
 0x87c   :  { %9591 = vmatprep.subr.bf16.mxu1 %v17625_v11  ;;  %v17682_v11 = vld [vmem:[#allocation416_spill] sm:$0xff] }
 0x87e   :  { %9387 = vmatpush1.bf16.msra.mxu0 %v17626_v44  ;;  %v17683_v44 = vld [vmem:[#allocation417_spill] sm:$0xff] }
 0x87f   :  { %9592 = vmatpush1.bf16.msra.mxu1 %v17627_v15  ;;  %9388 = vmatprep.subr.bf16.mxu0 %v17628_v21  ;;  %v17684_v15 = vld [vmem:[#allocation418_spill] sm:$0xff]  ;;  %v17685_v21 = vld [vmem:[#allocation419_spill] sm:$0xff] }
 0x880   :  { %9593 = vmatprep.subr.bf16.mxu1 %v17629_v35  ;;  %v17686_v35 = vld [vmem:[#allocation420_spill] sm:$0xff] }
 0x882   :  { %9389 = vmatpush1.bf16.msra.mxu0 %v17630_v58  ;;  %v17687_v58 = vld [vmem:[#allocation421_spill] sm:$0xff] }
 0x883   :  { %9594 = vmatpush1.bf16.msra.mxu1 %v17631_v46  ;;  %9390 = vmatprep.subr.bf16.mxu0 %v17632_v41  ;;  %v17688_v46 = vld [vmem:[#allocation422_spill] sm:$0xff]  ;;  %v17689_v41 = vld [vmem:[#allocation423_spill] sm:$0xff] }
 0x884   :  { %9595 = vmatprep.subr.bf16.mxu1 %v17633_v60  ;;  %v17690_v60 = vld [vmem:[#allocation424_spill] sm:$0xff] }
 0x886   :  { %9391 = vmatpush1.bf16.msra.mxu0 %v14323_v40  ;;  %v17644_v40 = vld [vmem:[#allocation378_spill] sm:$0xff] }
 0x887   :  { %9596 = vmatpush1.bf16.msra.mxu1 %v17634_v27  ;;  %9392 = vmatprep.subr.bf16.mxu0 %v17635_v33  ;;  %v17691_v27 = vld [vmem:[#allocation425_spill] sm:$0xff]  ;;  %v17692_v33 = vld [vmem:[#allocation426_spill] sm:$0xff] }
 0x888   :  { %9597 = vmatprep.subr.bf16.mxu1 %v17636_v23  ;;  %v17693_v23 = vld [vmem:[#allocation427_spill] sm:$0xff] }
 0x88a   :  { %9393 = vmatpush1.bf16.msra.mxu0 %v17637_v47  ;;  %v17694_v47 = vld [vmem:[#allocation428_spill] sm:$0xff] }
 0x88b   :  { %9598 = vmatpush1.bf16.msra.mxu1 %v17638_v54  ;;  %9394 = vmatprep.subr.bf16.mxu0 %v17639_v56  ;;  %v17695_v54 = vld [vmem:[#allocation429_spill] sm:$0xff]  ;;  %v17696_v56 = vld [vmem:[#allocation430_spill] sm:$0xff] }
 0x88c   :  { %9599 = vmatprep.subr.bf16.mxu1 %v17640_v55  ;;  %v17697_v55 = vld [vmem:[#allocation431_spill] sm:$0xff] }
 0x88e   :  { %9395 = vmatpush1.bf16.msra.mxu0 %v17641_v3  ;;  %v17698_v3 = vld [vmem:[#allocation432_spill] sm:$0xff] }
 0x88f   :  { %9600 = vmatpush1.bf16.msra.mxu1 %v17642_v8  ;;  %9405 = vmatprep.subr.bf16.mxu0 %v17643_v5  ;;  %v17699_v8 = vld [vmem:[#allocation433_spill] sm:$0xff]  ;;  %v17700_v5 = vld [vmem:[#allocation434_spill] sm:$0xff] }
 0x890   :  { %9610 = vmatprep.subr.bf16.mxu1 %v17644_v40  ;;  %v17701_v40 = vld [vmem:[#allocation435_spill] sm:$0xff] }
 0x891   :  { %9397 = vmatmul.mubr.bf16.vlgmr.msra.gmra.mrb[84].mxu0 %v15347_v9 }
 0x892   :  { %9602 = vmatmul.mubr.bf16.vlgmr.msra.gmra.mrb[84].mxu1 %v15347_v9  ;;  %9406 = vmatpush1.bf16.msra.mxu0 %v17645_v53  ;;  %v17653_v9 = vld [vmem:[#allocation387_spill] sm:$0xff]  ;;  %v17702_v53 = vld [vmem:[#allocation436_spill] sm:$0xff] }
 0x893   :  { %9437 = vmatprep.mubr.bf16.mxu0 %v15351_v20  ;;  %9611 = vmatpush1.bf16.msra.mxu1 %v17646_v25  ;;  %v17703_v25 = vld [vmem:[#allocation437_spill] sm:$0xff] }
 0x894   :  { %9642 = vmatprep.mubr.bf16.mxu1 %v15351_v20  ;;  %9407 = vmatprep.subr.bf16.mxu0 %v17647_v45  ;;  %v17657_v20 = vld [vmem:[#allocation391_spill] sm:$0xff]  ;;  %v17704_v45 = vld [vmem:[#allocation438_spill] sm:$0xff] }
 0x895   :  { %9612 = vmatprep.subr.bf16.mxu1 %v17648_v48  ;;  %v17705_v48 = vld [vmem:[#allocation439_spill] sm:$0xff] }
 0x896   :  { %9408 = vmatpush1.bf16.msra.mxu0 %v17649_v34  ;;  %v17706_v34 = vld [vmem:[#allocation440_spill] sm:$0xff] }
 0x897   :  { %9613 = vmatpush1.bf16.msra.mxu1 %v17650_v50  ;;  %9409 = vmatprep.subr.bf16.mxu0 %v17651_v38  ;;  %v17707_v50 = vld [vmem:[#allocation441_spill] sm:$0xff]  ;;  %v17708_v38 = vld [vmem:[#allocation442_spill] sm:$0xff] }
 0x898   :  { %9614 = vmatprep.subr.bf16.mxu1 %v17652_v63  ;;  %v17709_v63 = vld [vmem:[#allocation443_spill] sm:$0xff] }
 0x89a   :  { %9410 = vmatpush1.bf16.msra.mxu0 %v17653_v9  ;;  %v17710_v9 = vld [vmem:[#allocation444_spill] sm:$0xff] }
 0x89b   :  { %9615 = vmatpush1.bf16.msra.mxu1 %v17654_v57  ;;  %9411 = vmatprep.subr.bf16.mxu0 %v17655_v1  ;;  %v17711_v57 = vld [vmem:[#allocation445_spill] sm:$0xff]  ;;  %v17712_v1 = vld [vmem:[#allocation446_spill] sm:$0xff] }
 0x89c   :  { %9616 = vmatprep.subr.bf16.mxu1 %v17656_v2  ;;  %v17713_v2 = vld [vmem:[#allocation447_spill] sm:$0xff] }
 0x89e   :  { %9412 = vmatpush1.bf16.msra.mxu0 %v17657_v20  ;;  %v17714_v20 = vld [vmem:[#allocation448_spill] sm:$0xff] }
 0x89f   :  { %9617 = vmatpush1.bf16.msra.mxu1 %v17658_v62  ;;  %9413 = vmatprep.subr.bf16.mxu0 %v17659_v49  ;;  %v17715_v62 = vld [vmem:[#allocation449_spill] sm:$0xff]  ;;  %v17716_v49 = vld [vmem:[#allocation450_spill] sm:$0xff] }
 0x8a0   :  { %9618 = vmatprep.subr.bf16.mxu1 %v17660_v43  ;;  %v17718_v43 = vld [vmem:[#allocation452_spill] sm:$0xff] }
 0x8a2   :  { %9414 = vmatpush1.bf16.msra.mxu0 %v17661_v39  ;;  %v17719_v39 = vld [vmem:[#allocation453_spill] sm:$0xff] }
 0x8a3   :  { %9619 = vmatpush1.bf16.msra.mxu1 %v17662_v51  ;;  %9415 = vmatprep.subr.bf16.mxu0 %v17663_v32  ;;  %v17720_v51 = vld [vmem:[#allocation454_spill] sm:$0xff]  ;;  %v17722_v32 = vld [vmem:[#allocation456_spill] sm:$0xff] }
 0x8a4   :  { %9620 = vmatprep.subr.bf16.mxu1 %v17664_v10  ;;  %v17723_v10 = vld [vmem:[#allocation457_spill] sm:$0xff] }
 0x8a6   :  { %9416 = vmatpush1.bf16.msra.mxu0 %v17665_v52  ;;  %v17724_v52 = vld [vmem:[#allocation458_spill] sm:$0xff] }
 0x8a7   :  { %9621 = vmatpush1.bf16.msra.mxu1 %v17666_v6  ;;  %9417 = vmatprep.subr.bf16.mxu0 %v17667_v22  ;;  %v17725_v6 = vld [vmem:[#allocation459_spill] sm:$0xff]  ;;  %v17726_v22 = vld [vmem:[#allocation460_spill] sm:$0xff] }
 0x8a8   :  { %9622 = vmatprep.subr.bf16.mxu1 %v17668_v4  ;;  %v17727_v4 = vld [vmem:[#allocation461_spill] sm:$0xff] }
 0x8aa   :  { %9418 = vmatpush1.bf16.msra.mxu0 %v17669_v29  ;;  %v17728_v29 = vld [vmem:[#allocation462_spill] sm:$0xff] }
 0x8ab   :  { %9623 = vmatpush1.bf16.msra.mxu1 %v17670_v42  ;;  %9419 = vmatprep.subr.bf16.mxu0 %v17671_v36  ;;  %v17729_v42 = vld [vmem:[#allocation463_spill] sm:$0xff]  ;;  %v17730_v36 = vld [vmem:[#allocation464_spill] sm:$0xff] }
 0x8ac   :  { %9624 = vmatprep.subr.bf16.mxu1 %v17672_v59  ;;  %v17731_v59 = vld [vmem:[#allocation465_spill] sm:$0xff] }
 0x8ae   :  { %9420 = vmatpush1.bf16.msra.mxu0 %v17673_v30  ;;  %v17732_v30 = vld [vmem:[#allocation466_spill] sm:$0xff] }
 0x8af   :  { %9625 = vmatpush1.bf16.msra.mxu1 %v17674_v13  ;;  %9421 = vmatprep.subr.bf16.mxu0 %v17675_v31  ;;  %v17733_v13 = vld [vmem:[#allocation467_spill] sm:$0xff]  ;;  %v17734_v31 = vld [vmem:[#allocation468_spill] sm:$0xff] }
 0x8b0   :  { %9626 = vmatprep.subr.bf16.mxu1 %v17676_v12  ;;  %v17735_v12 = vld [vmem:[#allocation469_spill] sm:$0xff] }
 0x8b2   :  { %9422 = vmatpush1.bf16.msra.mxu0 %v17677_v26  ;;  %v17736_v26 = vld [vmem:[#allocation470_spill] sm:$0xff] }
 0x8b3   :  { %9627 = vmatpush1.bf16.msra.mxu1 %v17678_v61  ;;  %9423 = vmatprep.subr.bf16.mxu0 %v17679_v28  ;;  %v17737_v61 = vld [vmem:[#allocation471_spill] sm:$0xff]  ;;  %v17738_v28 = vld [vmem:[#allocation472_spill] sm:$0xff] }
 0x8b4   :  { %9628 = vmatprep.subr.bf16.mxu1 %v17680_v7  ;;  %v17739_v7 = vld [vmem:[#allocation473_spill] sm:$0xff] }
 0x8b6   :  { %9424 = vmatpush1.bf16.msra.mxu0 %v17681_v14  ;;  %v17740_v14 = vld [vmem:[#allocation474_spill] sm:$0xff] }
 0x8b7   :  { %9629 = vmatpush1.bf16.msra.mxu1 %v17682_v11  ;;  %9425 = vmatprep.subr.bf16.mxu0 %v17683_v44  ;;  %v17741_v11 = vld [vmem:[#allocation475_spill] sm:$0xff]  ;;  %v17742_v44 = vld [vmem:[#allocation476_spill] sm:$0xff] }
 0x8b8   :  { %9630 = vmatprep.subr.bf16.mxu1 %v17684_v15  ;;  %v17743_v15 = vld [vmem:[#allocation477_spill] sm:$0xff] }
 0x8ba   :  { %9426 = vmatpush1.bf16.msra.mxu0 %v17685_v21  ;;  %v17744_v21 = vld [vmem:[#allocation478_spill] sm:$0xff] }
 0x8bb   :  { %9631 = vmatpush1.bf16.msra.mxu1 %v17686_v35  ;;  %9427 = vmatprep.subr.bf16.mxu0 %v17687_v58  ;;  %v17745_v35 = vld [vmem:[#allocation479_spill] sm:$0xff]  ;;  %v17746_v58 = vld [vmem:[#allocation480_spill] sm:$0xff] }
 0x8bc   :  { %9632 = vmatprep.subr.bf16.mxu1 %v17688_v46  ;;  %v17747_v46 = vld [vmem:[#allocation481_spill] sm:$0xff] }
 0x8be   :  { %9428 = vmatpush1.bf16.msra.mxu0 %v17689_v41  ;;  %v17748_v41 = vld [vmem:[#allocation482_spill] sm:$0xff] }
 0x8bf   :  { %9633 = vmatpush1.bf16.msra.mxu1 %v17690_v60  ;;  %9429 = vmatprep.subr.bf16.mxu0 %v17691_v27  ;;  %v17749_v60 = vld [vmem:[#allocation483_spill] sm:$0xff]  ;;  %v17750_v27 = vld [vmem:[#allocation484_spill] sm:$0xff] }
 0x8c0   :  { %9634 = vmatprep.subr.bf16.mxu1 %v17692_v33  ;;  %v17751_v33 = vld [vmem:[#allocation485_spill] sm:$0xff] }
 0x8c2   :  { %9430 = vmatpush1.bf16.msra.mxu0 %v17693_v23  ;;  %v17752_v23 = vld [vmem:[#allocation486_spill] sm:$0xff] }
 0x8c3   :  { %9635 = vmatpush1.bf16.msra.mxu1 %v17694_v47  ;;  %9431 = vmatprep.subr.bf16.mxu0 %v17695_v54  ;;  %v17753_v47 = vld [vmem:[#allocation487_spill] sm:$0xff]  ;;  %v17754_v54 = vld [vmem:[#allocation488_spill] sm:$0xff] }
 0x8c4   :  { %9636 = vmatprep.subr.bf16.mxu1 %v17696_v56  ;;  %v17755_v56 = vld [vmem:[#allocation489_spill] sm:$0xff] }
 0x8c6   :  { %9432 = vmatpush1.bf16.msra.mxu0 %v17697_v55  ;;  %v17756_v55 = vld [vmem:[#allocation490_spill] sm:$0xff] }
 0x8c7   :  { %9637 = vmatpush1.bf16.msra.mxu1 %v17698_v3  ;;  %9433 = vmatprep.subr.bf16.mxu0 %v17699_v8  ;;  %v17757_v3 = vld [vmem:[#allocation491_spill] sm:$0xff]  ;;  %v17758_v8 = vld [vmem:[#allocation492_spill] sm:$0xff] }
 0x8c8   :  { %9638 = vmatprep.subr.bf16.mxu1 %v17700_v5  ;;  %v17759_v5 = vld [vmem:[#allocation493_spill] sm:$0xff] }
 0x8ca   :  { %9434 = vmatpush1.bf16.msra.mxu0 %v17701_v40  ;;  %v17760_v40 = vld [vmem:[#allocation494_spill] sm:$0xff] }
 0x8cb   :  { %9639 = vmatpush1.bf16.msra.mxu1 %v17702_v53  ;;  %9435 = vmatprep.subr.bf16.mxu0 %v17703_v25  ;;  %v17761_v53 = vld [vmem:[#allocation495_spill] sm:$0xff]  ;;  %v17762_v25 = vld [vmem:[#allocation496_spill] sm:$0xff] }
 0x8cc   :  { %9640 = vmatprep.subr.bf16.mxu1 %v17704_v45  ;;  %v17763_v45 = vld [vmem:[#allocation497_spill] sm:$0xff] }
 0x8ce   :  { %9436 = vmatpush1.bf16.msra.mxu0 %v17705_v48  ;;  %v17764_v48 = vld [vmem:[#allocation498_spill] sm:$0xff] }
 0x8cf   :  { %9641 = vmatpush1.bf16.msra.mxu1 %v17706_v34  ;;  %9446 = vmatprep.subr.bf16.mxu0 %v17707_v50  ;;  %v17765_v34 = vld [vmem:[#allocation499_spill] sm:$0xff]  ;;  %v17766_v50 = vld [vmem:[#allocation500_spill] sm:$0xff] }
 0x8d0   :  { %9651 = vmatprep.subr.bf16.mxu1 %v17708_v38  ;;  %v17767_v38 = vld [vmem:[#allocation501_spill] sm:$0xff] }
 0x8d1   :  { %9438 = vmatmul.mubr.bf16.vlgmr.msra.gmra.mrb[84].mxu0 %v15444_v17 }
 0x8d2   :  { %9643 = vmatmul.mubr.bf16.vlgmr.msra.gmra.mrb[84].mxu1 %v15444_v17  ;;  %9447 = vmatpush1.bf16.msra.mxu0 %v17709_v63  ;;  %v17717_v17 = vld [vmem:[#allocation451_spill] sm:$0xff]  ;;  %v17768_v63 = vld [vmem:[#allocation502_spill] sm:$0xff] }
 0x8d3   :  { %9478 = vmatprep.mubr.bf16.mxu0 %v15448_v24  ;;  %9652 = vmatpush1.bf16.msra.mxu1 %v17710_v9  ;;  %v17769_v9 = vld [vmem:[#allocation503_spill] sm:$0xff] }
 0x8d4   :  { %9683 = vmatprep.mubr.bf16.mxu1 %v15448_v24  ;;  %9448 = vmatprep.subr.bf16.mxu0 %v17711_v57  ;;  %v17721_v24 = vld [vmem:[#allocation455_spill] sm:$0xff]  ;;  %v17770_v57 = vld [vmem:[#allocation504_spill] sm:$0xff] }
 0x8d5   :  { %9653 = vmatprep.subr.bf16.mxu1 %v17712_v1  ;;  %v17771_v1 = vld [vmem:[#allocation505_spill] sm:$0xff] }
 0x8d6   :  { %9449 = vmatpush1.bf16.msra.mxu0 %v17713_v2  ;;  %v17772_v2 = vld [vmem:[#allocation506_spill] sm:$0xff] }
 0x8d7   :  { %9654 = vmatpush1.bf16.msra.mxu1 %v17714_v20  ;;  %9450 = vmatprep.subr.bf16.mxu0 %v17715_v62  ;;  %v17773_v20 = vld [vmem:[#allocation507_spill] sm:$0xff]  ;;  %v17774_v62 = vld [vmem:[#allocation508_spill] sm:$0xff] }
 0x8d8   :  { %9655 = vmatprep.subr.bf16.mxu1 %v17716_v49  ;;  %v17775_v49 = vld [vmem:[#allocation509_spill] sm:$0xff] }
 0x8da   :  { %9451 = vmatpush1.bf16.msra.mxu0 %v17717_v17  ;;  %v17776_v17 = vld [vmem:[#allocation510_spill] sm:$0xff] }
 0x8db   :  { %9656 = vmatpush1.bf16.msra.mxu1 %v17718_v43  ;;  %9452 = vmatprep.subr.bf16.mxu0 %v17719_v39  ;;  %v17777_v43 = vld [vmem:[#allocation511_spill] sm:$0xff]  ;;  %v17778_v39 = vld [vmem:[#allocation512_spill] sm:$0xff] }
 0x8dc   :  { %9657 = vmatprep.subr.bf16.mxu1 %v17720_v51  ;;  %v17779_v51 = vld [vmem:[#allocation513_spill] sm:$0xff] }
 0x8de   :  { %9453 = vmatpush1.bf16.msra.mxu0 %v17721_v24  ;;  %v17780_v24 = vld [vmem:[#allocation514_spill] sm:$0xff] }
 0x8df   :  { %9658 = vmatpush1.bf16.msra.mxu1 %v17722_v32  ;;  %9454 = vmatprep.subr.bf16.mxu0 %v17723_v10  ;;  %v17782_v32 = vld [vmem:[#allocation516_spill] sm:$0xff]  ;;  %v17783_v10 = vld [vmem:[#allocation517_spill] sm:$0xff] }
 0x8e0   :  { %9659 = vmatprep.subr.bf16.mxu1 %v17724_v52  ;;  %v17784_v52 = vld [vmem:[#allocation518_spill] sm:$0xff] }
 0x8e2   :  { %9455 = vmatpush1.bf16.msra.mxu0 %v17725_v6  ;;  %v17786_v6 = vld [vmem:[#allocation520_spill] sm:$0xff] }
 0x8e3   :  { %9660 = vmatpush1.bf16.msra.mxu1 %v17726_v22  ;;  %9456 = vmatprep.subr.bf16.mxu0 %v17727_v4  ;;  %v17787_v22 = vld [vmem:[#allocation521_spill] sm:$0xff]  ;;  %v17788_v4 = vld [vmem:[#allocation522_spill] sm:$0xff] }
 0x8e4   :  { %9661 = vmatprep.subr.bf16.mxu1 %v17728_v29  ;;  %v17789_v29 = vld [vmem:[#allocation523_spill] sm:$0xff] }
 0x8e6   :  { %9457 = vmatpush1.bf16.msra.mxu0 %v17729_v42  ;;  %v17790_v42 = vld [vmem:[#allocation524_spill] sm:$0xff] }
 0x8e7   :  { %9662 = vmatpush1.bf16.msra.mxu1 %v17730_v36  ;;  %9458 = vmatprep.subr.bf16.mxu0 %v17731_v59  ;;  %v17791_v36 = vld [vmem:[#allocation525_spill] sm:$0xff] }
 0x8e8   :  { %9663 = vmatprep.subr.bf16.mxu1 %v17732_v30  ;;  %v17792_v30 = vld [vmem:[#allocation526_spill] sm:$0xff] }
 0x8ea   :  { %9459 = vmatpush1.bf16.msra.mxu0 %v17733_v13 }
 0x8eb   :  { %9664 = vmatpush1.bf16.msra.mxu1 %v17734_v31  ;;  %9460 = vmatprep.subr.bf16.mxu0 %v17735_v12 }
 0x8ec   :  { %9665 = vmatprep.subr.bf16.mxu1 %v17736_v26 }
 0x8ee   :  { %9461 = vmatpush1.bf16.msra.mxu0 %v17737_v61 }
 0x8ef   :  { %9666 = vmatpush1.bf16.msra.mxu1 %v17738_v28  ;;  %9462 = vmatprep.subr.bf16.mxu0 %v17739_v7  ;;  %v17793_v28 = vld [vmem:[#allocation527_spill] sm:$0xff] }
 0x8f0   :  { %9667 = vmatprep.subr.bf16.mxu1 %v17740_v14 }
 0x8f2   :  { %9463 = vmatpush1.bf16.msra.mxu0 %v17741_v11  ;;  %v17794_v11 = vld [vmem:[#allocation528_spill] sm:$0xff] }
 0x8f3   :  { %9668 = vmatpush1.bf16.msra.mxu1 %v17742_v44  ;;  %9464 = vmatprep.subr.bf16.mxu0 %v17743_v15  ;;  %v17795_v15 = vld [vmem:[#allocation529_spill] sm:$0xff] }
 0x8f4   :  { %9669 = vmatprep.subr.bf16.mxu1 %v17744_v21 }
 0x8f6   :  { %9465 = vmatpush1.bf16.msra.mxu0 %v17745_v35  ;;  %v17796_v35 = vld [vmem:[#allocation530_spill] sm:$0xff] }
 0x8f7   :  { %9670 = vmatpush1.bf16.msra.mxu1 %v17746_v58  ;;  %9466 = vmatprep.subr.bf16.mxu0 %v17747_v46  ;;  %v17797_v58 = vld [vmem:[#allocation531_spill] sm:$0xff]  ;;  %v17798_v46 = vld [vmem:[#allocation532_spill] sm:$0xff] }
 0x8f8   :  { %9671 = vmatprep.subr.bf16.mxu1 %v17748_v41  ;;  %v17799_v41 = vld [vmem:[#allocation533_spill] sm:$0xff] }
 0x8fa   :  { %9467 = vmatpush1.bf16.msra.mxu0 %v17749_v60  ;;  %v17800_v60 = vld [vmem:[#allocation534_spill] sm:$0xff] }
 0x8fb   :  { %9672 = vmatpush1.bf16.msra.mxu1 %v17750_v27  ;;  %9468 = vmatprep.subr.bf16.mxu0 %v17751_v33  ;;  %v17801_v27 = vld [vmem:[#allocation535_spill] sm:$0xff]  ;;  %v17802_v33 = vld [vmem:[#allocation536_spill] sm:$0xff] }
 0x8fc   :  { %9673 = vmatprep.subr.bf16.mxu1 %v17752_v23  ;;  %v17803_v23 = vld [vmem:[#allocation537_spill] sm:$0xff] }
 0x8fe   :  { %9469 = vmatpush1.bf16.msra.mxu0 %v17753_v47  ;;  %v17804_v47 = vld [vmem:[#allocation538_spill] sm:$0xff] }
 0x8ff   :  { %9674 = vmatpush1.bf16.msra.mxu1 %v17754_v54  ;;  %9470 = vmatprep.subr.bf16.mxu0 %v17755_v56  ;;  %v17805_v54 = vld [vmem:[#allocation539_spill] sm:$0xff]  ;;  %v17806_v56 = vld [vmem:[#allocation540_spill] sm:$0xff] }
 0x900   :  { %9675 = vmatprep.subr.bf16.mxu1 %v17756_v55  ;;  %v17807_v55 = vld [vmem:[#allocation541_spill] sm:$0xff] }
 0x902   :  { %9471 = vmatpush1.bf16.msra.mxu0 %v17757_v3  ;;  %v17808_v3 = vld [vmem:[#allocation542_spill] sm:$0xff] }
 0x903   :  { %9676 = vmatpush1.bf16.msra.mxu1 %v17758_v8  ;;  %9472 = vmatprep.subr.bf16.mxu0 %v17759_v5  ;;  %v17809_v8 = vld [vmem:[#allocation543_spill] sm:$0xff]  ;;  %v17810_v5 = vld [vmem:[#allocation544_spill] sm:$0xff] }
 0x904   :  { %9677 = vmatprep.subr.bf16.mxu1 %v17760_v40  ;;  %v17811_v40 = vld [vmem:[#allocation545_spill] sm:$0xff] }
 0x906   :  { %9473 = vmatpush1.bf16.msra.mxu0 %v17761_v53  ;;  %v17812_v53 = vld [vmem:[#allocation546_spill] sm:$0xff] }
 0x907   :  { %9678 = vmatpush1.bf16.msra.mxu1 %v17762_v25  ;;  %9474 = vmatprep.subr.bf16.mxu0 %v17763_v45  ;;  %v17813_v25 = vld [vmem:[#allocation547_spill] sm:$0xff]  ;;  %v17814_v45 = vld [vmem:[#allocation548_spill] sm:$0xff] }
 0x908   :  { %9679 = vmatprep.subr.bf16.mxu1 %v17764_v48  ;;  %v17815_v48 = vld [vmem:[#allocation549_spill] sm:$0xff] }
 0x90a   :  { %9475 = vmatpush1.bf16.msra.mxu0 %v17765_v34  ;;  %v17816_v34 = vld [vmem:[#allocation550_spill] sm:$0xff] }
 0x90b   :  { %9680 = vmatpush1.bf16.msra.mxu1 %v17766_v50  ;;  %9476 = vmatprep.subr.bf16.mxu0 %v17767_v38  ;;  %v17817_v50 = vld [vmem:[#allocation551_spill] sm:$0xff]  ;;  %v17818_v38 = vld [vmem:[#allocation552_spill] sm:$0xff] }
 0x90c   :  { %9681 = vmatprep.subr.bf16.mxu1 %v17768_v63  ;;  %v17819_v63 = vld [vmem:[#allocation553_spill] sm:$0xff] }
 0x90e   :  { %9477 = vmatpush1.bf16.msra.mxu0 %v17769_v9  ;;  %v17820_v9 = vld [vmem:[#allocation554_spill] sm:$0xff] }
 0x90f   :  { %9682 = vmatpush1.bf16.msra.mxu1 %v17770_v57  ;;  %9487 = vmatprep.subr.bf16.mxu0 %v17771_v1  ;;  %v17821_v57 = vld [vmem:[#allocation555_spill] sm:$0xff]  ;;  %v17822_v1 = vld [vmem:[#allocation556_spill] sm:$0xff] }
 0x910   :  { %9692 = vmatprep.subr.bf16.mxu1 %v17772_v2  ;;  %v17823_v2 = vld [vmem:[#allocation557_spill] sm:$0xff] }
 0x911   :  { %9479 = vmatmul.mubr.bf16.vlgmr.msra.gmra.mrb[84].mxu0 %v15519_v19 }
 0x912   :  { %9684 = vmatmul.mubr.bf16.vlgmr.msra.gmra.mrb[84].mxu1 %v15519_v19  ;;  %9488 = vmatpush1.bf16.msra.mxu0 %v17773_v20  ;;  %v17781_v19 = vld [vmem:[#allocation515_spill] sm:$0xff]  ;;  %v17824_v20 = vld [vmem:[#allocation558_spill] sm:$0xff] }
 0x913   :  { %9519 = vmatprep.mubr.bf16.mxu0 %v15524_v16  ;;  %9693 = vmatpush1.bf16.msra.mxu1 %v17774_v62  ;;  %v17825_v62 = vld [vmem:[#allocation559_spill] sm:$0xff] }
 0x914   :  { %9724 = vmatprep.mubr.bf16.mxu1 %v15524_v16  ;;  %9489 = vmatprep.subr.bf16.mxu0 %v17775_v49  ;;  %v17785_v16 = vld [vmem:[#allocation519_spill] sm:$0xff]  ;;  %v17826_v49 = vld [vmem:[#allocation560_spill] sm:$0xff] }
 0x915   :  { %9694 = vmatprep.subr.bf16.mxu1 %v17776_v17  ;;  %v17827_v17 = vld [vmem:[#allocation561_spill] sm:$0xff] }
 0x916   :  { %9490 = vmatpush1.bf16.msra.mxu0 %v17777_v43  ;;  %v17828_v43 = vld [vmem:[#allocation562_spill] sm:$0xff] }
 0x917   :  { %9695 = vmatpush1.bf16.msra.mxu1 %v17778_v39  ;;  %9491 = vmatprep.subr.bf16.mxu0 %v17779_v51  ;;  %v17829_v39 = vld [vmem:[#allocation563_spill] sm:$0xff]  ;;  %v17830_v51 = vld [vmem:[#allocation564_spill] sm:$0xff] }
 0x918   :  { %9696 = vmatprep.subr.bf16.mxu1 %v17780_v24  ;;  %v17831_v24 = vld [vmem:[#allocation565_spill] sm:$0xff] }
 0x91a   :  { %9492 = vmatpush1.bf16.msra.mxu0 %v17781_v19  ;;  %v17832_v19 = vld [vmem:[#allocation566_spill] sm:$0xff] }
 0x91b   :  { %9697 = vmatpush1.bf16.msra.mxu1 %v17782_v32  ;;  %9493 = vmatprep.subr.bf16.mxu0 %v17783_v10  ;;  %v17833_v32 = vld [vmem:[#allocation567_spill] sm:$0xff]  ;;  %v17834_v10 = vld [vmem:[#allocation568_spill] sm:$0xff] }
 0x91c   :  { %9698 = vmatprep.subr.bf16.mxu1 %v17784_v52  ;;  %v17835_v52 = vld [vmem:[#allocation569_spill] sm:$0xff] }
 0x91e   :  { %9494 = vmatpush1.bf16.msra.mxu0 %v17785_v16  ;;  %v17836_v16 = vld [vmem:[#allocation570_spill] sm:$0xff] }
 0x91f   :  { %9699 = vmatpush1.bf16.msra.mxu1 %v17786_v6  ;;  %9495 = vmatprep.subr.bf16.mxu0 %v17787_v22  ;;  %v17837_v6 = vld [vmem:[#allocation571_spill] sm:$0xff]  ;;  %v17838_v22 = vld [vmem:[#allocation572_spill] sm:$0xff] }
 0x920   :  { %9700 = vmatprep.subr.bf16.mxu1 %v17788_v4  ;;  %v17839_v4 = vld [vmem:[#allocation573_spill] sm:$0xff] }
 0x922   :  { %9496 = vmatpush1.bf16.msra.mxu0 %v17789_v29  ;;  %v17840_v29 = vld [vmem:[#allocation574_spill] sm:$0xff] }
 0x923   :  { %9701 = vmatpush1.bf16.msra.mxu1 %v17790_v42  ;;  %9497 = vmatprep.subr.bf16.mxu0 %v17791_v36  ;;  %v17841_v42 = vld [vmem:[#allocation575_spill] sm:$0xff]  ;;  %v17842_v36 = vld [vmem:[#allocation576_spill] sm:$0xff] }
 0x924   :  { %v15864_v59 = vpop.f32.mrb[80].mxu0  ;;  %9702 = vmatprep.subr.bf16.mxu1 %v17792_v30  ;;  %v17843_v30 = vld [vmem:[#allocation577_spill] sm:$0xff] }
 0x925   :  { %v15867_v13 = vpop.f32.mrb[80].mxu1  ;;  %v15869_v31 = vpop.f32.mrb[81].mxu0 }
 0x926   :  { %v9774_v12 = vmax.f32 %v15864_v59, %v15867_v13  ;;  %v15873_v26 = vpop.f32.mrb[81].mxu1  ;;  %v9156_v61 = vpop.f32.mrb[82].mxu0  ;;  %9498 = vmatpush1.bf16.msra.mxu0 %v17793_v28  ;;  %v17846_v28 = vld [vmem:[#allocation580_spill] sm:$0xff] }
 0x927   :  { %v9775_v7 = vmax.f32 %v15869_v31, %v15873_v26  ;;  %v9361_v14 = vpop.f32.mrb[82].mxu1  ;;  %9703 = vmatpush1.bf16.msra.mxu1 %v17794_v11  ;;  %v9157_v44 = vpop.f32.mrb[83].mxu0  ;;  %9499 = vmatprep.subr.bf16.mxu0 %v17795_v15  ;;  %v17844_v61 = vld [vmem:[#allocation578_spill] sm:$0xff]  ;;  %v17850_v15 = vld [vmem:[#allocation584_spill] sm:$0xff] }
 0x928   :  { %v9362_v21 = vpop.f32.mrb[83].mxu1  ;;  %9704 = vmatprep.subr.bf16.mxu1 %v17796_v35  ;;  %v17847_v14 = vld [vmem:[#allocation581_spill] sm:$0xff]  ;;  %v17848_v11 = vld [vmem:[#allocation582_spill] sm:$0xff]  ;;  %v17849_v44 = vld [vmem:[#allocation583_spill] sm:$0xff] }
 0x929   :  { %v17852_v21 = vld [vmem:[#allocation586_spill] sm:$0xff]  ;;  %v15941_v35 = vld [vmem:[#allocation8] sm:$0x3]  ;;  %v11256_v26 = vld [vmem:[#allocation10] ss:$0 sm:$0xff] }
 0x92a   :  { %9500 = vmatpush1.bf16.msra.mxu0 %v17797_v58  ;;  %v17853_v58 = vld [vmem:[#allocation587_spill] sm:$0xff] }
 0x92b   :  { %9705 = vmatpush1.bf16.msra.mxu1 %v17798_v46  ;;  %9501 = vmatprep.subr.bf16.mxu0 %v17799_v41  ;;  %v17854_v46 = vld [vmem:[#allocation588_spill] sm:$0xff]  ;;  %v17855_v41 = vld [vmem:[#allocation589_spill] sm:$0xff] }
 0x92c   :  { %9706 = vmatprep.subr.bf16.mxu1 %v17800_v60  ;;  %v17856_v60 = vld [vmem:[#allocation590_spill] sm:$0xff] }
 0x92e   :  { %9502 = vmatpush1.bf16.msra.mxu0 %v17801_v27  ;;  %v17857_v27 = vld [vmem:[#allocation102_spill] sm:$0xff] }
 0x92f   :  { %9707 = vmatpush1.bf16.msra.mxu1 %v17802_v33  ;;  %9503 = vmatprep.subr.bf16.mxu0 %v17803_v23  ;;  %v17858_v33 = vsub.s32 1, %v17857_v27 }
 0x930   :  { %9708 = vmatprep.subr.bf16.mxu1 %v17804_v47  ;;  %v17859_v47 = vld [vmem:[#allocation591_spill] sm:$0xff] }
 0x931   :  { %v15950_v23 = vrot.slane %v15941_v35, %v17858_v33 }
 0x932   :  { %9504 = vmatpush1.bf16.msra.mxu0 %v17805_v54  ;;  %v17860_v54 = vld [vmem:[#allocation592_spill] sm:$0xff] }
 0x933   :  { %9709 = vmatpush1.bf16.msra.mxu1 %v17806_v56  ;;  %9505 = vmatprep.subr.bf16.mxu0 %v17807_v55  ;;  %v17861_v56 = vld [vmem:[#allocation593_spill] sm:$0xff]  ;;  %v17862_v55 = vld [vmem:[#allocation594_spill] sm:$0xff] }
 0x934   :  { %9710 = vmatprep.subr.bf16.mxu1 %v17808_v3  ;;  %v17863_v3 = vld [vmem:[#allocation602_spill] sm:$0xff] }
 0x936   :  { %9506 = vmatpush1.bf16.msra.mxu0 %v17809_v8  ;;  %v8142_v8 = vadd.f32 %v15950_v23, %v17863_v3 }
 0x937   :  { %9711 = vmatpush1.bf16.msra.mxu1 %v17810_v5  ;;  %9507 = vmatprep.subr.bf16.mxu0 %v17811_v40  ;;  %v17864_v5 = vld [vmem:[#allocation595_spill] sm:$0xff]  ;;  %v17865_v40 = vld [vmem:[#allocation596_spill] sm:$0xff] }
 0x938   :  { %9712 = vmatprep.subr.bf16.mxu1 %v17812_v53  ;;  %v17866_v53 = vld [vmem:[#allocation597_spill] sm:$0xff] }
 0x93a   :  { %9508 = vmatpush1.bf16.msra.mxu0 %v17813_v25  ;;  %v12142_v25 = vld [vmem:[%s16083_s7 + $0x40] sm:$0xff]  }
 0x93b   :  { %9713 = vmatpush1.bf16.msra.mxu1 %v17814_v45  ;;  %9509 = vmatprep.subr.bf16.mxu0 %v17815_v48  ;;  %v17867_v45 = vld [vmem:[#allocation598_spill] sm:$0xff]  ;;  %v12126_v48 = vld [vmem:[%s16082_s6 + $0x40] sm:$0xff]  }
 0x93c   :  { %9714 = vmatprep.subr.bf16.mxu1 %v17816_v34  ;;  %v8144_v34 = vmax.f32 %v8142_v8, 0.0 }
 0x93e   :  { %9510 = vmatpush1.bf16.msra.mxu0 %v17817_v50  ;;  %v17868_v50 = vld [vmem:[#allocation599_spill] sm:$0xff] }
 0x93f   :  { %9715 = vmatpush1.bf16.msra.mxu1 %v17818_v38  ;;  %9511 = vmatprep.subr.bf16.mxu0 %v17819_v63  ;;  %v12143_v38 = vld [vmem:[%s16083_s7] sm:$0xff]  }
 0x940   :  { %9716 = vmatprep.subr.bf16.mxu1 %v17820_v9  ;;  %v17869_v63 = vld [vmem:[#allocation600_spill] sm:$0xff] }
 0x941   :  { %v12127_v9 = vld [vmem:[%s16082_s6] sm:$0xff]  }
 0x942   :  { %9512 = vmatpush1.bf16.msra.mxu0 %v17821_v57  ;;  %v12128_v57 = vld [vmem:[%s16082_s6 + $0x48] sm:$0xff]  }
 0x943   :  { %9717 = vmatpush1.bf16.msra.mxu1 %v17822_v1  ;;  %9513 = vmatprep.subr.bf16.mxu0 %v17823_v2  ;;  %v12144_v1 = vld [vmem:[%s16083_s7 + $0x48] sm:$0xff]   ;;  %v9785_v2 = vpack.c.bf16 %v8144_v34, %v8144_v34 }
 0x944   :  { %9718 = vmatprep.subr.bf16.mxu1 %v17824_v20  ;;  %v12145_v20 = vld [vmem:[%s16083_s7 + $0x8] sm:$0xff]  }
 0x946   :  { %9514 = vmatpush1.bf16.msra.mxu0 %v17825_v62  ;;  %v12129_v62 = vld [vmem:[%s16082_s6 + $0x8] sm:$0xff]  }
 0x947   :  { %9719 = vmatpush1.bf16.msra.mxu1 %v17826_v49  ;;  %9515 = vmatprep.subr.bf16.mxu0 %v17827_v17  ;;  %v12146_v49 = vld [vmem:[%s16083_s7 + $0x50] sm:$0xff]  }
 0x948   :  { %9720 = vmatprep.subr.bf16.mxu1 %v17828_v43  ;;  %v12147_v17 = vld [vmem:[%s16083_s7 + $0x10] sm:$0xff]  }
 0x949   :  { %v12131_v43 = vld [vmem:[%s16082_s6 + $0x10] sm:$0xff]  }
 0x94a   :  { %9516 = vmatpush1.bf16.msra.mxu0 %v17829_v39  ;;  %v12148_v39 = vld [vmem:[%s16083_s7 + $0x58] sm:$0xff]  }
 0x94b   :  { %9721 = vmatpush1.bf16.msra.mxu1 %v17830_v51  ;;  %9517 = vmatprep.subr.bf16.mxu0 %v17831_v24  ;;  %v12132_v51 = vld [vmem:[%s16082_s6 + $0x58] sm:$0xff]  }
 0x94c   :  { %9722 = vmatprep.subr.bf16.mxu1 %v17832_v19  ;;  %v12149_v24 = vld [vmem:[%s16083_s7 + $0x18] sm:$0xff]  }
 0x94d   :  { %v12133_v19 = vld [vmem:[%s16082_s6 + $0x18] sm:$0xff]  }
 0x94e   :  { %9518 = vmatpush1.bf16.msra.mxu0 %v17833_v32  ;;  %v12150_v32 = vld [vmem:[%s16083_s7 + $0x60] sm:$0xff]  }
 0x94f   :  { %9723 = vmatpush1.bf16.msra.mxu1 %v17834_v10  ;;  %9528 = vmatprep.subr.bf16.mxu0 %v17835_v52  ;;  %v12134_v10 = vld [vmem:[%s16082_s6 + $0x60] sm:$0xff]  }
 0x950   :  { %9733 = vmatprep.subr.bf16.mxu1 %v17836_v16  ;;  %v12151_v52 = vld [vmem:[%s16083_s7 + $0x20] sm:$0xff]  }
 0x951   :  { %9520 = vmatmul.mubr.bf16.vlgmr.msra.gmra.mrb[84].mxu0 %v15593_v0  ;;  %v12135_v16 = vld [vmem:[%s16082_s6 + $0x20] sm:$0xff]  }
 0x952   :  { %9725 = vmatmul.mubr.bf16.vlgmr.msra.gmra.mrb[84].mxu1 %v15593_v0  ;;  %9529 = vmatpush1.bf16.msra.mxu0 %v17837_v6  ;;  %v17845_v0 = vld [vmem:[#allocation579_spill] sm:$0xff]  ;;  %v12136_v6 = vld [vmem:[%s16082_s6 + $0x68] sm:$0xff]  }
 0x953   :  { %9734 = vmatpush1.bf16.msra.mxu1 %v17838_v22  ;;  %9530 = vmatprep.subr.bf16.mxu0 %v17839_v4  ;;  %v12137_v22 = vld [vmem:[%s16082_s6 + $0x28] sm:$0xff]   ;;  %v17870_v4 = vsub.s32 0, %v17857_v27 }
 0x954   :  { %9735 = vmatprep.subr.bf16.mxu1 %v17840_v29  ;;  %9560 = vmatprep.mubr.bf16.mxu0 %v17248_v37 }
 0x955   :  { %9765 = vmatprep.mubr.bf16.mxu1 %v17248_v37  ;;  %v17851_v37 = vld [vmem:[#allocation585_spill] sm:$0xff]  ;;  %v8134_v29 = vrot.slane %v15941_v35, %v17870_v4  ;;  %v12156_v35 = vld [vmem:[%s16083_s7 + $0x78] sm:$0xff]  }
 0x956   :  { %9531 = vmatpush1.bf16.msra.mxu0 %v17841_v42  ;;  %v12138_v42 = vld [vmem:[%s16082_s6 + $0x70] sm:$0xff]  }
 0x957   :  { %9736 = vmatpush1.bf16.msra.mxu1 %v17842_v36  ;;  %9532 = vmatprep.subr.bf16.mxu0 %v17843_v30  ;;  %v12139_v36 = vld [vmem:[%s16082_s6 + $0x30] sm:$0xff]   ;;  %v17871_v30 = vld [vmem:[#allocation601_spill] sm:$0xff] }
 0x958   :  { %9737 = vmatprep.subr.bf16.mxu1 %v17844_v61  ;;  %v8141_v61 = vadd.f32 %v8134_v29, %v17871_v30 }
 0x95a   :  { %9533 = vmatpush1.bf16.msra.mxu0 %v17845_v0  ;;  %v12140_v0 = vld [vmem:[%s16082_s6 + $0x78] sm:$0xff]  }
 0x95b   :  { %9738 = vmatpush1.bf16.msra.mxu1 %v17846_v28  ;;  %9534 = vmatprep.subr.bf16.mxu0 %v17847_v14  ;;  %v12141_v28 = vld [vmem:[%s16082_s6 + $0x38] sm:$0xff]   ;;  %v8143_v14 = vmax.f32 %v8141_v61, 0.0 }
 0x95c   :  { %9739 = vmatprep.subr.bf16.mxu1 %v17848_v11 }
 0x95d   :  { %v9784_v11 = vpack.c.bf16 %v8143_v14, %v8143_v14 }
 0x95e   :  { %9535 = vmatpush1.bf16.msra.mxu0 %v17849_v44  ;;  %v12152_v44 = vld [vmem:[%s16083_s7 + $0x68] sm:$0xff]  }
 0x95f   :  { %9740 = vmatpush1.bf16.msra.mxu1 %v17850_v15  ;;  %9536 = vmatprep.subr.bf16.mxu0 %v17851_v37  ;;  %v12153_v15 = vld [vmem:[%s16083_s7 + $0x28] sm:$0xff]   ;;  %v12154_v37 = vld [vmem:[%s16083_s7 + $0x70] sm:$0xff]  }
 0x960   :  { %9741 = vmatprep.subr.bf16.mxu1 %v17852_v21  ;;  %v12155_v21 = vld [vmem:[%s16083_s7 + $0x30] sm:$0xff]  }
 0x962   :  { %9537 = vmatpush1.bf16.msra.mxu0 %v17853_v58  ;;  %v12157_v58 = vld [vmem:[%s16083_s7 + $0x38] sm:$0xff]  }
 0x963   :  { %9742 = vmatpush1.bf16.msra.mxu1 %v17854_v46  ;;  %9538 = vmatprep.subr.bf16.mxu0 %v17855_v41 }
 0x964   :  { %9743 = vmatprep.subr.bf16.mxu1 %v17856_v60 }
 0x966   :  { %9539 = vmatpush1.bf16.msra.mxu0 %v17859_v47 }
 0x967   :  { %9744 = vmatpush1.bf16.msra.mxu1 %v17860_v54  ;;  %9540 = vmatprep.subr.bf16.mxu0 %v17861_v56 }
 0x968   :  { %9745 = vmatprep.subr.bf16.mxu1 %v17862_v55 }
 0x96a   :  { %9541 = vmatpush1.bf16.msra.mxu0 %v17864_v5 }
 0x96b   :  { %9746 = vmatpush1.bf16.msra.mxu1 %v17865_v40  ;;  %9542 = vmatprep.subr.bf16.mxu0 %v17866_v53 }
 0x96c   :  { %9747 = vmatprep.subr.bf16.mxu1 %v17867_v45 }
 0x96e   :  { %9543 = vmatpush1.bf16.msra.mxu0 %v17868_v50 }
 0x96f   :  { %9748 = vmatpush1.bf16.msra.mxu1 %v17869_v63  ;;  %11259 = vmatprep.subr.bf16.mxu0 %v12142_v25 }
 0x970   :  { %11281 = vmatprep.subr.bf16.mxu1 %v12126_v48 }
 0x971   :  { %9561 = vmatmul.mubr.bf16.vlgmr.msra.gmra.mrb[84].mxu0 %v15632_v18 }
 0x972   :  { %9766 = vmatmul.mubr.bf16.vlgmr.msra.gmra.mrb[84].mxu1 %v15632_v18  ;;  %11260 = vmatpush3.bf16.msra.mxu0 %v12143_v38  ;;  %v12130_v18 = vld [vmem:[%s16082_s6 + $0x50] sm:$0xff]  }
 0x973   :  { %11282 = vmatpush3.bf16.msra.mxu1 %v12127_v9  ;;  %10052 = vmatprep.mubr.bf16.mxu1 %v9785_v2 }
 0x974   :  { %11283 = vmatprep.subr.bf16.mxu1 %v12128_v57  ;;  %11261 = vmatprep.subr.bf16.mxu0 %v12144_v1 }
 0x976   :  { %11262 = vmatpush3.bf16.msra.mxu0 %v12145_v20 }
 0x977   :  { %11284 = vmatpush3.bf16.msra.mxu1 %v12129_v62  ;;  %11263 = vmatprep.subr.bf16.mxu0 %v12146_v49 }
 0x978   :  { %11285 = vmatprep.subr.bf16.mxu1 %v12130_v18  ;;  %v11258_v18 = vld [vmem:[#allocation2] ss:$0 sm:$0xff] }
 0x97a   :  { %11264 = vmatpush3.bf16.msra.mxu0 %v12147_v17 }
 0x97b   :  { %11286 = vmatpush3.bf16.msra.mxu1 %v12131_v43  ;;  %11265 = vmatprep.subr.bf16.mxu0 %v12148_v39 }
 0x97c   :  { %11287 = vmatprep.subr.bf16.mxu1 %v12132_v51 }
 0x97e   :  { %11266 = vmatpush3.bf16.msra.mxu0 %v12149_v24 }
 0x97f   :  { %11288 = vmatpush3.bf16.msra.mxu1 %v12133_v19  ;;  %11267 = vmatprep.subr.bf16.mxu0 %v12150_v32 }
 0x980   :  { %11289 = vmatprep.subr.bf16.mxu1 %v12134_v10 }
 0x982   :  { %11268 = vmatpush3.bf16.msra.mxu0 %v12151_v52 }
 0x983   :  { %11290 = vmatpush3.bf16.msra.mxu1 %v12135_v16  ;;  %11269 = vmatprep.subr.bf16.mxu0 %v12152_v44 }
 0x984   :  { %11291 = vmatprep.subr.bf16.mxu1 %v12136_v6 }
 0x986   :  { %11270 = vmatpush3.bf16.msra.mxu0 %v12153_v15 }
 0x987   :  { %11292 = vmatpush3.bf16.msra.mxu1 %v12137_v22  ;;  %11271 = vmatprep.subr.bf16.mxu0 %v12154_v37 }
 0x988   :  { %11293 = vmatprep.subr.bf16.mxu1 %v12138_v42 }
 0x98a   :  { %11272 = vmatpush3.bf16.msra.mxu0 %v12155_v21 }
 0x98b   :  { %11294 = vmatpush3.bf16.msra.mxu1 %v12139_v36  ;;  %11273 = vmatprep.subr.bf16.mxu0 %v12156_v35 }
 0x98c   :  { %11295 = vmatprep.subr.bf16.mxu1 %v12140_v0 }
 0x98e   :  { %11274 = vmatpush3.bf16.msra.mxu0 %v12157_v58 }
 0x98f   :  { %11296 = vmatpush3.bf16.msra.mxu1 %v12141_v28 }
 0x992   :  { %10053 = vmatmul.mubr.bf16.vlgmr.msra.gmra.mrb[88].mxu1 %v9784_v11 }
 0xa44   :  { %v9562_v46 = vpop.f32.mrb[84].mxu0 }
 0xa45   :  { %v9767_v41 = vpop.f32.mrb[84].mxu1  ;;  %v9564_v60 = vpop.f32.mrb[85].mxu0 }
 0xa46   :  { %v9776_v27 = vmax.f32 %v9562_v46, %v9767_v41  ;;  %v9769_v33 = vpop.f32.mrb[85].mxu1  ;;  %v9566_v47 = vpop.f32.mrb[86].mxu0 }
 0xa47   :  { %v9777_v54 = vmax.f32 %v9564_v60, %v9769_v33  ;;  %v9771_v56 = vpop.f32.mrb[86].mxu1  ;;  %v9567_v55 = vpop.f32.mrb[87].mxu0 }
 0xa48   :  { %v9778_v3 = vmax.f32 %v9774_v12, %v9776_v27  ;;  %v9772_v8 = vpop.f32.mrb[87].mxu1 }
 0xa49   :  { %v9779_v5 = vmax.f32 %v9775_v7, %v9777_v54 }
 0xa4a   :  { %v9780_v40 = vadd.f32 %v9778_v3, %v8134_v29 }
 0xa4b   :  { %v9781_v53 = vadd.f32 %v9779_v5, %v15950_v23  ;;  %v11257_v23 = vld [vmem:[#allocation11] ss:$0 sm:$0xff] }
 0xa4c   :  { %v9782_v25 = vmax.f32 %v9780_v40, 0.0 }
 0xa4d   :  { %v9783_v45 = vmax.f32 %v9781_v53, 0.0 }
 0xa4e   :  { %v9786_v34 = vpack.c.bf16 %v9782_v25, %v9782_v25 }
 0xa4f   :  { %v9787_v48 = vpack.c.bf16 %v9783_v45, %v9783_v45 }
 0xa51   :  { %9916 = vmatprep.mubr.bf16.mxu0 %v9787_v48 }
 0xa52   :  { %9917 = vmatmul.mubr.bf16.vlgmr.msra.gmra.mrb[88].mxu0 %v9786_v34 }
 0xa65   :  { %v11297_v50 = vpop.f32.mrb[88].mxu1 }
 0xa66   :  { %v11298_v38 = vpop.f32.mrb[89].mxu1 }
 0xa67   :  { %v11299_v63 = vadd.f32 %v11298_v38, %v11297_v50  ;;  %v11300_v9 = vpop.f32.mrb[90].mxu1 }
 0xa68   :  { %v11301_v59 = vpop.f32.mrb[91].mxu1 }
 0xb25   :  { %v11275_v13 = vpop.f32.mrb[88].mxu0 }
 0xb26   :  { %v11276_v12 = vpop.f32.mrb[89].mxu0 }
 0xb27   :  { %v11277_v57 = vadd.f32 %v11276_v12, %v11275_v13  ;;  %v11278_v1 = vpop.f32.mrb[90].mxu0 }
 0xb28   :  { %v11279_v31 = vpop.f32.mrb[91].mxu0 }
 0xb29   :  { %v10055_v7 = vadd.f32 %v11299_v63, %v11277_v57 }
 0xb2b   :  { %v10067_v2 = vadd.f32 %v11256_v26, %v10055_v7 }
 0xb2d   :  { %v10068_v20 = vmax.f32 %v10067_v2, 0.0 }
 0xb2f   :  { %v10076_v62 = vmul.f32 %v11257_v23, %v10068_v20 }
 0xb31   :  { %v10078_v49 = vsel %vm10077_vm2, %v10076_v62, 0.0 }
 0xb32   :  { %10079 = vadd.xlane.f32.xlu0 %v10078_v49 }
 0xbbf   :  { %v10080_v17 = vpop.xlane.xlu0 %10079 }
 0xbc0   :  { %v10088_v43 = vadd.f32 %v11258_v18, %v10080_v17 }
 0xbc2   :  { %v10089_v39 = vsub.f32 0.0, %v10088_v43 }
 0xbc4   :  { %v10090_v51 = vmul.f32 1.442695, %v10089_v39 }
 0xbc6   :  { %12158 = vpow2.f32 %v10090_v51 }
 0xbd0   :  { %v12159_v24 = vpop.eup %12158 }
 0xbd1   :  { %v10092_v19 = vadd.f32 1.0, %v12159_v24 }
 0xbd3   :  { %12160 = vrcp.f32 %v10092_v19 }
 0xbdd   :  { %v12161_v32 = vpop.eup %12160 }
 0xbde   :  { %10096 = vst.msk [vmem:[%s16087_s11] sm:$0x3] %vm10095_vm3, %v12161_v32 }
 0xbdf   :  { %10101 = vsyncpa [#allocation4], 1 }
 0xbe0   :  { %10102 = vsyncpa [#allocation6], 1 }
 0xbe1   :  { %10103 = vsyncpa [#allocation9], 1 }
 0xbe2   :  { %10104 = vsyncpa [#allocation12], 1 }

</bundles_post_ra>
